<compile_context>
chip_gen: v7x
topology: tpu7x:2x2x1
jax: 0.10.0
libtpu: 0.0.40
codegen_flags: <defaults>
</compile_context>

<pallas_src>
import jax
import jax.numpy as jnp
from jax.experimental import pallas as pl
from jax.experimental.pallas import tpu as pltpu


# ---------------------------------------------------------------------------
# Fused kernel: pad -> conv3x3+bias+ReLU -> pad -> conv3x3+bias+ReLU -> maxpool2x2
# ---------------------------------------------------------------------------
def _downconv_fused_kernel(x_ref, w1_ref, b1_ref, w2_ref, b2_ref, o_ref,
                           pad1_ref, pad2_ref):
    # x_ref   : (1, H, W, Cin)         NHWC input tile for one batch element
    # w1_ref  : (9*Cin, Cout)          conv1 weights, im2col-flattened (HWIO row-major)
    # b1_ref  : (1, Cout)
    # w2_ref  : (9*Cout, Cout)         conv2 weights, im2col-flattened
    # b2_ref  : (1, Cout)
    # o_ref   : (1, Ho, Wo*Cout)       lane-dense pooled output (un-flattened in wrapper)
    # pad1_ref: VMEM (H+2, W+2, Cin)   zero-padded input            (scratch)
    # pad2_ref: VMEM (H+2, W+2, Cout)  zero-padded relu(conv1(x))   (scratch)
    Hp, Wp, cin = pad1_ref.shape
    H, W = Hp - 2, Wp - 2
    cout = pad2_ref.shape[-1]
    Ho, Wo = H // 2, W // 2

    # ---- conv1: pad in VMEM -> 3x3 conv -> bias -> ReLU --------------------
    pad1_ref[...] = jnp.zeros(pad1_ref.shape, pad1_ref.dtype)
    pad1_ref[1:H + 1, 1:W + 1, :] = x_ref[0]

    if cin == 1:
        # Tiny contraction (K = 9): the MXU would be all setup/drain; use 9 VPU
        # multiply-accumulates broadcasting each tap's (Cout,) weight row over (H, W).
        acc1 = jnp.zeros((H, W, cout), jnp.float32)
        for dy in range(3):
            for dx in range(3):
                tap = pad1_ref[dy:dy + H, dx:dx + W, :]        # (H, W, 1)
                acc1 = acc1 + tap * w1_ref[dy * 3 + dx, :]     # -> (H, W, Cout)
        a1 = acc1.reshape(H * W, cout)
    else:
        # General case: one im2col matmul with K = 9*Cin.
        patches1 = jnp.concatenate(
            [pad1_ref[dy:dy + H, dx:dx + W, :].reshape(H * W, cin)
             for dy in range(3) for dx in range(3)], axis=-1)   # (H*W, 9*Cin)
        a1 = jnp.dot(patches1, w1_ref[...], preferred_element_type=jnp.float32)
    a1 = jnp.maximum(a1 + b1_ref[...], 0.0)                     # (H*W, Cout)

    # ---- conv2 on the VMEM-resident activation (single K=9*Cout matmul) ----
    pad2_ref[...] = jnp.zeros(pad2_ref.shape, pad2_ref.dtype)
    pad2_ref[1:H + 1, 1:W + 1, :] = a1.reshape(H, W, cout)

    patches2 = jnp.concatenate(
        [pad2_ref[dy:dy + H, dx:dx + W, :].reshape(H * W, cout)
         for dy in range(3) for dx in range(3)], axis=-1)       # (H*W, 9*Cout)
    a2 = jnp.dot(patches2, w2_ref[...], preferred_element_type=jnp.float32)
    a2 = jnp.maximum(a2 + b2_ref[...], 0.0)                     # (H*W, Cout)

    # ---- 2x2 / stride-2 max pool on the VMEM-resident conv2 result ---------
    a2 = a2.reshape(Ho, 2, Wo, 2, cout)
    pooled = jnp.maximum(jnp.maximum(a2[:, 0, :, 0, :], a2[:, 0, :, 1, :]),
                         jnp.maximum(a2[:, 1, :, 0, :], a2[:, 1, :, 1, :]))
    # Lane-dense store: last dim Wo*Cout (= 256) >= 128 -> unmasked full-width vst.
    o_ref[0] = pooled.reshape(Ho, Wo * cout).astype(o_ref.dtype)


# ---------------------------------------------------------------------------
# Wrapper
# ---------------------------------------------------------------------------
def downconv_forward(x_nchw, params):
    """Pallas forward: maxpool2x2(relu(conv2(relu(conv1(x))))). NCHW in / NCHW out."""
    w1, b1, w2, b2 = params                         # w*: HWIO, b*: (1, Cout)
    N, Cin, H, W = x_nchw.shape
    Cout = w1.shape[-1]
    assert H % 2 == 0 and W % 2 == 0, "maxpool2x2 requires even H and W"
    Ho, Wo = H // 2, W // 2

    x_nhwc = jnp.transpose(x_nchw, (0, 2, 3, 1))    # NCHW -> NHWC (cheap for Cin=1)
    w1f = w1.reshape(9 * Cin, Cout)                 # im2col weight layout
    w2f = w2.reshape(9 * Cout, Cout)

    # Per-batch working set is tiny (< 1 MiB), so the whole image is one block; for
    # larger H/W add a second (parallel) grid axis over row tiles with a 2-row halo and
    # set pltpu.CompilerParams(vmem_limit_bytes=...) (v7x has 64 MiB VMEM vs 128 MiB).
    out_flat = pl.pallas_call(
        _downconv_fused_kernel,
        out_shape=jax.ShapeDtypeStruct((N, Ho, Wo * Cout), jnp.float32),
        grid=(N,),
        in_specs=[
            pl.BlockSpec((1, H, W, Cin), lambda n: (n, 0, 0, 0)),
            pl.BlockSpec((9 * Cin, Cout), lambda n: (0, 0)),
            pl.BlockSpec((1, Cout), lambda n: (0, 0)),
            pl.BlockSpec((9 * Cout, Cout), lambda n: (0, 0)),
            pl.BlockSpec((1, Cout), lambda n: (0, 0)),
        ],
        out_specs=pl.BlockSpec((1, Ho, Wo * Cout), lambda n: (n, 0, 0)),
        scratch_shapes=[
            pltpu.VMEM((H + 2, W + 2, Cin), jnp.float32),
            pltpu.VMEM((H + 2, W + 2, Cout), jnp.float32),
        ],
        compiler_params=pltpu.CompilerParams(dimension_semantics=("parallel",)),
    )(x_nhwc, w1f, b1, w2f, b2)

    out = out_flat.reshape(N, Ho, Wo, Cout)         # free metadata reshape
    return jnp.transpose(out, (0, 3, 1, 2))         # NHWC -> NCHW (module boundary)


# ---------------------------------------------------------------------------
# Params (PyTorch-like uniform init) and pure-JAX reference
# ---------------------------------------------------------------------------
def init_downconv_params(key, in_channels=1, out_channels=32, kernel_size=3):
    k1, k2, k3, k4 = jax.random.split(key, 4)

    def conv_init(kw, kb, cin, cout):
        fan_in = cin * kernel_size * kernel_size
        bound = 1.0 / (fan_in ** 0.5)
        w = jax.random.uniform(kw, (kernel_size, kernel_size, cin, cout),
                               jnp.float32, -bound, bound)      # HWIO
        b = jax.random.uniform(kb, (1, cout), jnp.float32, -bound, bound)
        return w, b

    w1, b1 = conv_init(k1, k2, in_channels, out_channels)
    w2, b2 = conv_init(k3, k4, out_channels, out_channels)
    # TODO(synk): n_filters_per_depth == 3 (a third conv) is not implemented; the module
    # default (2 convs + pool) is what this kernel covers.
    return (w1, b1, w2, b2)


def downconv_reference(x_nchw, params):
    """Pure-JAX reference matching the PyTorch forward semantics."""
    w1, b1, w2, b2 = params

    def conv(x, w, b):
        y = jax.lax.conv_general_dilated(
            x, w, window_strides=(1, 1), padding=((1, 1), (1, 1)),
            dimension_numbers=("NCHW", "HWIO", "NCHW"),
            precision=jax.lax.Precision.HIGHEST)
        return jax.nn.relu(y + b.reshape(1, -1, 1, 1))

    y = conv(x_nchw, w1, b1)
    y = conv(y, w2, b2)
    y = jax.lax.reduce_window(y, jnp.array(-jnp.inf, jnp.float32), jax.lax.max,
                              (1, 1, 2, 2), (1, 1, 2, 2), "VALID")
    return y


if __name__ == "__main__":
    key = jax.random.PRNGKey(0)
    kp, kx = jax.random.split(key)

    in_channels, out_channels = 1, 32                 # PyTorch module defaults
    params = init_downconv_params(kp, in_channels=in_channels,
                                  out_channels=out_channels)
    x = jax.random.normal(kx, (2, in_channels, 16, 16), jnp.float32)   # NCHW

    out = jax.block_until_ready(downconv_forward(x, params))
    assert out.shape == (2, out_channels, 8, 8), out.shape

    ref = downconv_reference(x, params)
    max_err = float(jnp.max(jnp.abs(out - ref)))
    assert jnp.allclose(out, ref, atol=1e-3, rtol=1e-3), f"max abs err {max_err}"

    print("KERNEL_OK")
</pallas_src>

<mosaic_0001>
module attributes {stable_mosaic.version = 11 : i64} {
  func.func @_downconv_fused_kernel(%arg0: i32, %arg1: memref<1x16x16x1xf32, #tpu.memory_space<vmem>>, %arg2: memref<9x32xf32, #tpu.memory_space<vmem>>, %arg3: memref<1x32xf32, #tpu.memory_space<vmem>>, %arg4: memref<288x32xf32, #tpu.memory_space<vmem>>, %arg5: memref<1x32xf32, #tpu.memory_space<vmem>>, %arg6: memref<1x8x256xf32, #tpu.memory_space<vmem>>, %arg7: memref<18x18x1xf32, #tpu.memory_space<vmem>>, %arg8: memref<18x18x32xf32, #tpu.memory_space<vmem>>) attributes {dimension_semantics = [#tpu.dimension_semantics<parallel>], iteration_bounds = array<i64: 2>, scalar_prefetch = 0 : i64, scratch_operands = 2 : i64, tpu.core_type = #tpu.core_type<tc>, window_params = [{transform_indices = @transform_0, window_bounds = array<i64: 1, 16, 16, 1>}, {pipeline_mode = #tpu.pipeline_mode<synchronous>, transform_indices = @transform_1, window_bounds = array<i64: 9, 32>}, {pipeline_mode = #tpu.pipeline_mode<synchronous>, transform_indices = @transform_2, window_bounds = array<i64: 1, 32>}, {pipeline_mode = #tpu.pipeline_mode<synchronous>, transform_indices = @transform_3, window_bounds = array<i64: 288, 32>}, {pipeline_mode = #tpu.pipeline_mode<synchronous>, transform_indices = @transform_4, window_bounds = array<i64: 1, 32>}, {transform_indices = @transform_5, window_bounds = array<i64: 1, 8, 256>}]} {
    %cst = arith.constant 0.000000e+00 : f32
    %0 = vector.broadcast %cst : f32 to vector<18x18x1xf32>
    %c0 = arith.constant 0 : index
    %c0_0 = arith.constant 0 : index
    %c0_1 = arith.constant 0 : index
    %1 = vector.load %arg7[%c0, %c0_0, %c0_1] : memref<18x18x1xf32, #tpu.memory_space<vmem>>, vector<18x18x1xf32>
    tpu.vector_store %arg7[%c0, %c0_0, %c0_1], %0 {strides = array<i32>} : memref<18x18x1xf32, #tpu.memory_space<vmem>>, vector<18x18x1xf32>,
    %c0_2 = arith.constant 0 : index
    %c0_3 = arith.constant 0 : index
    %c0_4 = arith.constant 0 : index
    %c0_5 = arith.constant 0 : index
    %2 = vector.load %arg1[%c0_2, %c0_3, %c0_4, %c0_5] : memref<1x16x16x1xf32, #tpu.memory_space<vmem>>, vector<1x16x16x1xf32>
    %3 = vector.shape_cast %2 : vector<1x16x16x1xf32> to vector<16x16x1xf32>
    %c1 = arith.constant 1 : index
    %c1_6 = arith.constant 1 : index
    %c0_7 = arith.constant 0 : index
    %4 = vector.load %arg7[%c1, %c1_6, %c0_7] : memref<18x18x1xf32, #tpu.memory_space<vmem>>, vector<16x16x1xf32>
    tpu.vector_store %arg7[%c1, %c1_6, %c0_7], %3 {strides = array<i32>} : memref<18x18x1xf32, #tpu.memory_space<vmem>>, vector<16x16x1xf32>,
    %cst_8 = arith.constant 0.000000e+00 : f32
    %5 = vector.broadcast %cst_8 : f32 to vector<16x16x32xf32>
    %c0_9 = arith.constant 0 : index
    %c0_10 = arith.constant 0 : index
    %c0_11 = arith.constant 0 : index
    %6 = vector.load %arg7[%c0_9, %c0_10, %c0_11] : memref<18x18x1xf32, #tpu.memory_space<vmem>>, vector<16x16x1xf32>
    %c0_12 = arith.constant 0 : index
    %c0_13 = arith.constant 0 : index
    %7 = vector.load %arg2[%c0_12, %c0_13] : memref<9x32xf32, #tpu.memory_space<vmem>>, vector<1x32xf32>
    %8 = vector.shape_cast %7 : vector<1x32xf32> to vector<32xf32>
    %9 = vector.shape_cast %8 : vector<32xf32> to vector<1x1x32xf32>
    %10 = vector.broadcast %6 : vector<16x16x1xf32> to vector<16x16x32xf32>
    %11 = vector.broadcast %9 : vector<1x1x32xf32> to vector<16x16x32xf32>
    %12 = arith.mulf %10, %11 : vector<16x16x32xf32>
    %13 = arith.addf %5, %12 : vector<16x16x32xf32>
    %c0_14 = arith.constant 0 : index
    %c1_15 = arith.constant 1 : index
    %c0_16 = arith.constant 0 : index
    %14 = vector.load %arg7[%c0_14, %c1_15, %c0_16] : memref<18x18x1xf32, #tpu.memory_space<vmem>>, vector<16x16x1xf32>
    %c1_17 = arith.constant 1 : index
    %c0_18 = arith.constant 0 : index
    %15 = vector.load %arg2[%c1_17, %c0_18] : memref<9x32xf32, #tpu.memory_space<vmem>>, vector<1x32xf32>
    %16 = vector.shape_cast %15 : vector<1x32xf32> to vector<32xf32>
    %17 = vector.shape_cast %16 : vector<32xf32> to vector<1x1x32xf32>
    %18 = vector.broadcast %14 : vector<16x16x1xf32> to vector<16x16x32xf32>
    %19 = vector.broadcast %17 : vector<1x1x32xf32> to vector<16x16x32xf32>
    %20 = arith.mulf %18, %19 : vector<16x16x32xf32>
    %21 = arith.addf %13, %20 : vector<16x16x32xf32>
    %c0_19 = arith.constant 0 : index
    %c2 = arith.constant 2 : index
    %c0_20 = arith.constant 0 : index
    %22 = vector.load %arg7[%c0_19, %c2, %c0_20] : memref<18x18x1xf32, #tpu.memory_space<vmem>>, vector<16x16x1xf32>
    %c2_21 = arith.constant 2 : index
    %c0_22 = arith.constant 0 : index
    %23 = vector.load %arg2[%c2_21, %c0_22] : memref<9x32xf32, #tpu.memory_space<vmem>>, vector<1x32xf32>
    %24 = vector.shape_cast %23 : vector<1x32xf32> to vector<32xf32>
    %25 = vector.shape_cast %24 : vector<32xf32> to vector<1x1x32xf32>
    %26 = vector.broadcast %22 : vector<16x16x1xf32> to vector<16x16x32xf32>
    %27 = vector.broadcast %25 : vector<1x1x32xf32> to vector<16x16x32xf32>
    %28 = arith.mulf %26, %27 : vector<16x16x32xf32>
    %29 = arith.addf %21, %28 : vector<16x16x32xf32>
    %c1_23 = arith.constant 1 : index
    %c0_24 = arith.constant 0 : index
    %c0_25 = arith.constant 0 : index
    %30 = vector.load %arg7[%c1_23, %c0_24, %c0_25] : memref<18x18x1xf32, #tpu.memory_space<vmem>>, vector<16x16x1xf32>
    %c3 = arith.constant 3 : index
    %c0_26 = arith.constant 0 : index
    %31 = vector.load %arg2[%c3, %c0_26] : memref<9x32xf32, #tpu.memory_space<vmem>>, vector<1x32xf32>
    %32 = vector.shape_cast %31 : vector<1x32xf32> to vector<32xf32>
    %33 = vector.shape_cast %32 : vector<32xf32> to vector<1x1x32xf32>
    %34 = vector.broadcast %30 : vector<16x16x1xf32> to vector<16x16x32xf32>
    %35 = vector.broadcast %33 : vector<1x1x32xf32> to vector<16x16x32xf32>
    %36 = arith.mulf %34, %35 : vector<16x16x32xf32>
    %37 = arith.addf %29, %36 : vector<16x16x32xf32>
    %c1_27 = arith.constant 1 : index
    %c1_28 = arith.constant 1 : index
    %c0_29 = arith.constant 0 : index
    %38 = vector.load %arg7[%c1_27, %c1_28, %c0_29] : memref<18x18x1xf32, #tpu.memory_space<vmem>>, vector<16x16x1xf32>
    %c4 = arith.constant 4 : index
    %c0_30 = arith.constant 0 : index
    %39 = vector.load %arg2[%c4, %c0_30] : memref<9x32xf32, #tpu.memory_space<vmem>>, vector<1x32xf32>
    %40 = vector.shape_cast %39 : vector<1x32xf32> to vector<32xf32>
    %41 = vector.shape_cast %40 : vector<32xf32> to vector<1x1x32xf32>
    %42 = vector.broadcast %38 : vector<16x16x1xf32> to vector<16x16x32xf32>
    %43 = vector.broadcast %41 : vector<1x1x32xf32> to vector<16x16x32xf32>
    %44 = arith.mulf %42, %43 : vector<16x16x32xf32>
    %45 = arith.addf %37, %44 : vector<16x16x32xf32>
    %c1_31 = arith.constant 1 : index
    %c2_32 = arith.constant 2 : index
    %c0_33 = arith.constant 0 : index
    %46 = vector.load %arg7[%c1_31, %c2_32, %c0_33] : memref<18x18x1xf32, #tpu.memory_space<vmem>>, vector<16x16x1xf32>
    %c5 = arith.constant 5 : index
    %c0_34 = arith.constant 0 : index
    %47 = vector.load %arg2[%c5, %c0_34] : memref<9x32xf32, #tpu.memory_space<vmem>>, vector<1x32xf32>
    %48 = vector.shape_cast %47 : vector<1x32xf32> to vector<32xf32>
    %49 = vector.shape_cast %48 : vector<32xf32> to vector<1x1x32xf32>
    %50 = vector.broadcast %46 : vector<16x16x1xf32> to vector<16x16x32xf32>
    %51 = vector.broadcast %49 : vector<1x1x32xf32> to vector<16x16x32xf32>
    %52 = arith.mulf %50, %51 : vector<16x16x32xf32>
    %53 = arith.addf %45, %52 : vector<16x16x32xf32>
    %c2_35 = arith.constant 2 : index
    %c0_36 = arith.constant 0 : index
    %c0_37 = arith.constant 0 : index
    %54 = vector.load %arg7[%c2_35, %c0_36, %c0_37] : memref<18x18x1xf32, #tpu.memory_space<vmem>>, vector<16x16x1xf32>
    %c6 = arith.constant 6 : index
    %c0_38 = arith.constant 0 : index
    %55 = vector.load %arg2[%c6, %c0_38] : memref<9x32xf32, #tpu.memory_space<vmem>>, vector<1x32xf32>
    %56 = vector.shape_cast %55 : vector<1x32xf32> to vector<32xf32>
    %57 = vector.shape_cast %56 : vector<32xf32> to vector<1x1x32xf32>
    %58 = vector.broadcast %54 : vector<16x16x1xf32> to vector<16x16x32xf32>
    %59 = vector.broadcast %57 : vector<1x1x32xf32> to vector<16x16x32xf32>
    %60 = arith.mulf %58, %59 : vector<16x16x32xf32>
    %61 = arith.addf %53, %60 : vector<16x16x32xf32>
    %c2_39 = arith.constant 2 : index
    %c1_40 = arith.constant 1 : index
    %c0_41 = arith.constant 0 : index
    %62 = vector.load %arg7[%c2_39, %c1_40, %c0_41] : memref<18x18x1xf32, #tpu.memory_space<vmem>>, vector<16x16x1xf32>
    %c7 = arith.constant 7 : index
    %c0_42 = arith.constant 0 : index
    %63 = vector.load %arg2[%c7, %c0_42] : memref<9x32xf32, #tpu.memory_space<vmem>>, vector<1x32xf32>
    %64 = vector.shape_cast %63 : vector<1x32xf32> to vector<32xf32>
    %65 = vector.shape_cast %64 : vector<32xf32> to vector<1x1x32xf32>
    %66 = vector.broadcast %62 : vector<16x16x1xf32> to vector<16x16x32xf32>
    %67 = vector.broadcast %65 : vector<1x1x32xf32> to vector<16x16x32xf32>
    %68 = arith.mulf %66, %67 : vector<16x16x32xf32>
    %69 = arith.addf %61, %68 : vector<16x16x32xf32>
    %c2_43 = arith.constant 2 : index
    %c2_44 = arith.constant 2 : index
    %c0_45 = arith.constant 0 : index
    %70 = vector.load %arg7[%c2_43, %c2_44, %c0_45] : memref<18x18x1xf32, #tpu.memory_space<vmem>>, vector<16x16x1xf32>
    %c8 = arith.constant 8 : index
    %c0_46 = arith.constant 0 : index
    %71 = vector.load %arg2[%c8, %c0_46] : memref<9x32xf32, #tpu.memory_space<vmem>>, vector<1x32xf32>
    %72 = vector.shape_cast %71 : vector<1x32xf32> to vector<32xf32>
    %73 = vector.shape_cast %72 : vector<32xf32> to vector<1x1x32xf32>
    %74 = vector.broadcast %70 : vector<16x16x1xf32> to vector<16x16x32xf32>
    %75 = vector.broadcast %73 : vector<1x1x32xf32> to vector<16x16x32xf32>
    %76 = arith.mulf %74, %75 : vector<16x16x32xf32>
    %77 = arith.addf %69, %76 : vector<16x16x32xf32>
    %78 = vector.shape_cast %77 : vector<16x16x32xf32> to vector<256x32xf32>
    %c0_47 = arith.constant 0 : index
    %c0_48 = arith.constant 0 : index
    %79 = vector.load %arg3[%c0_47, %c0_48] : memref<1x32xf32, #tpu.memory_space<vmem>>, vector<1x32xf32>
    %80 = vector.broadcast %79 : vector<1x32xf32> to vector<256x32xf32>
    %81 = arith.addf %78, %80 : vector<256x32xf32>
    %cst_49 = arith.constant 0.000000e+00 : f32
    %82 = vector.broadcast %cst_49 : f32 to vector<256x32xf32>
    %83 = arith.maximumf %81, %82 : vector<256x32xf32>
    %cst_50 = arith.constant 0.000000e+00 : f32
    %84 = vector.broadcast %cst_50 : f32 to vector<18x18x32xf32>
    %c0_51 = arith.constant 0 : index
    %c0_52 = arith.constant 0 : index
    %c0_53 = arith.constant 0 : index
    %85 = vector.load %arg8[%c0_51, %c0_52, %c0_53] : memref<18x18x32xf32, #tpu.memory_space<vmem>>, vector<18x18x32xf32>
    tpu.vector_store %arg8[%c0_51, %c0_52, %c0_53], %84 {strides = array<i32>} : memref<18x18x32xf32, #tpu.memory_space<vmem>>, vector<18x18x32xf32>,
    %86 = vector.shape_cast %83 : vector<256x32xf32> to vector<16x16x32xf32>
    %c1_54 = arith.constant 1 : index
    %c1_55 = arith.constant 1 : index
    %c0_56 = arith.constant 0 : index
    %87 = vector.load %arg8[%c1_54, %c1_55, %c0_56] : memref<18x18x32xf32, #tpu.memory_space<vmem>>, vector<16x16x32xf32>
    tpu.vector_store %arg8[%c1_54, %c1_55, %c0_56], %86 {strides = array<i32>} : memref<18x18x32xf32, #tpu.memory_space<vmem>>, vector<16x16x32xf32>,
    %c0_57 = arith.constant 0 : index
    %c0_58 = arith.constant 0 : index
    %c0_59 = arith.constant 0 : index
    %88 = vector.load %arg8[%c0_57, %c0_58, %c0_59] : memref<18x18x32xf32, #tpu.memory_space<vmem>>, vector<16x16x32xf32>
    %89 = vector.shape_cast %88 : vector<16x16x32xf32> to vector<256x32xf32>
    %c0_60 = arith.constant 0 : index
    %c1_61 = arith.constant 1 : index
    %c0_62 = arith.constant 0 : index
    %90 = vector.load %arg8[%c0_60, %c1_61, %c0_62] : memref<18x18x32xf32, #tpu.memory_space<vmem>>, vector<16x16x32xf32>
    %91 = vector.shape_cast %90 : vector<16x16x32xf32> to vector<256x32xf32>
    %c0_63 = arith.constant 0 : index
    %c2_64 = arith.constant 2 : index
    %c0_65 = arith.constant 0 : index
    %92 = vector.load %arg8[%c0_63, %c2_64, %c0_65] : memref<18x18x32xf32, #tpu.memory_space<vmem>>, vector<16x16x32xf32>
    %93 = vector.shape_cast %92 : vector<16x16x32xf32> to vector<256x32xf32>
    %c1_66 = arith.constant 1 : index
    %c0_67 = arith.constant 0 : index
    %c0_68 = arith.constant 0 : index
    %94 = vector.load %arg8[%c1_66, %c0_67, %c0_68] : memref<18x18x32xf32, #tpu.memory_space<vmem>>, vector<16x16x32xf32>
    %95 = vector.shape_cast %94 : vector<16x16x32xf32> to vector<256x32xf32>
    %c1_69 = arith.constant 1 : index
    %c1_70 = arith.constant 1 : index
    %c0_71 = arith.constant 0 : index
    %96 = vector.load %arg8[%c1_69, %c1_70, %c0_71] : memref<18x18x32xf32, #tpu.memory_space<vmem>>, vector<16x16x32xf32>
    %97 = vector.shape_cast %96 : vector<16x16x32xf32> to vector<256x32xf32>
    %c1_72 = arith.constant 1 : index
    %c2_73 = arith.constant 2 : index
    %c0_74 = arith.constant 0 : index
    %98 = vector.load %arg8[%c1_72, %c2_73, %c0_74] : memref<18x18x32xf32, #tpu.memory_space<vmem>>, vector<16x16x32xf32>
    %99 = vector.shape_cast %98 : vector<16x16x32xf32> to vector<256x32xf32>
    %c2_75 = arith.constant 2 : index
    %c0_76 = arith.constant 0 : index
    %c0_77 = arith.constant 0 : index
    %100 = vector.load %arg8[%c2_75, %c0_76, %c0_77] : memref<18x18x32xf32, #tpu.memory_space<vmem>>, vector<16x16x32xf32>
    %101 = vector.shape_cast %100 : vector<16x16x32xf32> to vector<256x32xf32>
    %c2_78 = arith.constant 2 : index
    %c1_79 = arith.constant 1 : index
    %c0_80 = arith.constant 0 : index
    %102 = vector.load %arg8[%c2_78, %c1_79, %c0_80] : memref<18x18x32xf32, #tpu.memory_space<vmem>>, vector<16x16x32xf32>
    %103 = vector.shape_cast %102 : vector<16x16x32xf32> to vector<256x32xf32>
    %c2_81 = arith.constant 2 : index
    %c2_82 = arith.constant 2 : index
    %c0_83 = arith.constant 0 : index
    %104 = vector.load %arg8[%c2_81, %c2_82, %c0_83] : memref<18x18x32xf32, #tpu.memory_space<vmem>>, vector<16x16x32xf32>
    %105 = vector.shape_cast %104 : vector<16x16x32xf32> to vector<256x32xf32>
    %106 = tpu.concatenate %89, %91, %93, %95, %97, %99, %101, %103, %105 in 1 : vector<256x32xf32>, vector<256x32xf32>, vector<256x32xf32>, vector<256x32xf32>, vector<256x32xf32>, vector<256x32xf32>, vector<256x32xf32>, vector<256x32xf32>, vector<256x32xf32> -> vector<256x288xf32>
    %c0_84 = arith.constant 0 : index
    %c0_85 = arith.constant 0 : index
    %107 = vector.load %arg4[%c0_84, %c0_85] : memref<288x32xf32, #tpu.memory_space<vmem>>, vector<288x32xf32>
    %cst_86 = arith.constant dense<0.000000e+00> : vector<256x32xf32>
    %108 = tpu.matmul %106, %107, %cst_86 {dimension_numbers = #tpu.dot_dimension_numbers<[1], [0], [0], [1], [0, 0, 1, 1], [], []>} : vector<256x288xf32>, vector<288x32xf32>, vector<256x32xf32> -> vector<256x32xf32>
    %c0_87 = arith.constant 0 : index
    %c0_88 = arith.constant 0 : index
    %109 = vector.load %arg5[%c0_87, %c0_88] : memref<1x32xf32, #tpu.memory_space<vmem>>, vector<1x32xf32>
    %110 = vector.broadcast %109 : vector<1x32xf32> to vector<256x32xf32>
    %111 = arith.addf %108, %110 : vector<256x32xf32>
    %cst_89 = arith.constant 0.000000e+00 : f32
    %112 = vector.broadcast %cst_89 : f32 to vector<256x32xf32>
    %113 = arith.maximumf %111, %112 : vector<256x32xf32>
    %114 = vector.shape_cast %113 : vector<256x32xf32> to vector<8x2x8x2x32xf32>
    %115 = vector.extract_strided_slice %114 {offsets = [0, 0, 0, 0, 0], sizes = [8, 1, 8, 1, 32], strides = [1, 1, 1, 1, 1]} : vector<8x2x8x2x32xf32> to vector<8x1x8x1x32xf32>
    %116 = vector.shape_cast %115 : vector<8x1x8x1x32xf32> to vector<8x8x32xf32>
    %117 = vector.extract_strided_slice %114 {offsets = [0, 0, 0, 1, 0], sizes = [8, 1, 8, 1, 32], strides = [1, 1, 1, 1, 1]} : vector<8x2x8x2x32xf32> to vector<8x1x8x1x32xf32>
    %118 = vector.shape_cast %117 : vector<8x1x8x1x32xf32> to vector<8x8x32xf32>
    %119 = arith.maximumf %116, %118 : vector<8x8x32xf32>
    %120 = vector.extract_strided_slice %114 {offsets = [0, 1, 0, 0, 0], sizes = [8, 1, 8, 1, 32], strides = [1, 1, 1, 1, 1]} : vector<8x2x8x2x32xf32> to vector<8x1x8x1x32xf32>
    %121 = vector.shape_cast %120 : vector<8x1x8x1x32xf32> to vector<8x8x32xf32>
    %122 = vector.extract_strided_slice %114 {offsets = [0, 1, 0, 1, 0], sizes = [8, 1, 8, 1, 32], strides = [1, 1, 1, 1, 1]} : vector<8x2x8x2x32xf32> to vector<8x1x8x1x32xf32>
    %123 = vector.shape_cast %122 : vector<8x1x8x1x32xf32> to vector<8x8x32xf32>
    %124 = arith.maximumf %121, %123 : vector<8x8x32xf32>
    %125 = arith.maximumf %119, %124 : vector<8x8x32xf32>
    %126 = vector.shape_cast %125 : vector<8x8x32xf32> to vector<8x256xf32>
    %c0_90 = arith.constant 0 : index
    %c0_91 = arith.constant 0 : index
    %c0_92 = arith.constant 0 : index
    %127 = vector.load %arg6[%c0_90, %c0_91, %c0_92] : memref<1x8x256xf32, #tpu.memory_space<vmem>>, vector<1x8x256xf32>
    %128 = vector.shape_cast %127 : vector<1x8x256xf32> to vector<8x256xf32>
    %129 = vector.shape_cast %126 : vector<8x256xf32> to vector<1x8x256xf32>
    tpu.vector_store %arg6[%c0_90, %c0_91, %c0_92], %129 {strides = array<i32>} : memref<1x8x256xf32, #tpu.memory_space<vmem>>, vector<1x8x256xf32>,
    return
  }
  func.func @transform_0(%arg0: i32) -> (i32, i32, i32, i32) {
    %c0_i32 = arith.constant 0 : i32
    %c0_i32_0 = arith.constant 0 : i32
    %c0_i32_1 = arith.constant 0 : i32
    %c0_i32_2 = arith.constant 0 : i32
    return %arg0, %c0_i32, %c0_i32_0, %c0_i32_1 : i32, i32, i32, i32
  }
  func.func @transform_1(%arg0: i32) -> (i32, i32) {
    %c0_i32 = arith.constant 0 : i32
    %c0_i32_0 = arith.constant 0 : i32
    %c0_i32_1 = arith.constant 0 : i32
    return %c0_i32, %c0_i32_0 : i32, i32
  }
  func.func @transform_2(%arg0: i32) -> (i32, i32) {
    %c0_i32 = arith.constant 0 : i32
    %c0_i32_0 = arith.constant 0 : i32
    %c0_i32_1 = arith.constant 0 : i32
    return %c0_i32, %c0_i32_0 : i32, i32
  }
  func.func @transform_3(%arg0: i32) -> (i32, i32) {
    %c0_i32 = arith.constant 0 : i32
    %c0_i32_0 = arith.constant 0 : i32
    %c0_i32_1 = arith.constant 0 : i32
    return %c0_i32, %c0_i32_0 : i32, i32
  }
  func.func @transform_4(%arg0: i32) -> (i32, i32) {
    %c0_i32 = arith.constant 0 : i32
    %c0_i32_0 = arith.constant 0 : i32
    %c0_i32_1 = arith.constant 0 : i32
    return %c0_i32, %c0_i32_0 : i32, i32
  }
  func.func @transform_5(%arg0: i32) -> (i32, i32, i32) {
    %c0_i32 = arith.constant 0 : i32
    %c0_i32_0 = arith.constant 0 : i32
    %c0_i32_1 = arith.constant 0 : i32
    return %arg0, %c0_i32, %c0_i32_0 : i32, i32, i32
  }
}

</mosaic_0001>

<bundles_post_ra>
// kernel: tpu_custom_call.1
= control target key start
LH: loop header
LB: loop body
LE: loop exit
PB: predicated region body
PF: predicated region fallthrough
CT: control target
= control target key end

     0   :  { %10 = vsyncpa [#allocation5], 0  ;;  %s11845_s0 = inlined_call_operand.vmem [shape: f32[2,16,16,1], index: 0, kind: input, shape index: {}]   ;;  %s11846_s1 = inlined_call_operand.vmem [shape: f32[9,32], index: 1, kind: input, shape index: {}]   ;;  %s11847_s2 = inlined_call_operand.vmem [shape: f32[1,32], index: 2, kind: input, shape index: {}]   ;;  %s11848_s3 = inlined_call_operand.vmem [shape: f32[288,32], index: 3, kind: input, shape index: {}]   ;;  %s11849_s4 = inlined_call_operand.vmem [shape: f32[1,32], index: 4, kind: input, shape index: {}]   ;;  %s11850_s5 = inlined_call_operand.hbm [shape: f32[2,8,256], index: 5, kind: output, shape index: {}]  }
   0x1   :  { %12 = vsyncpa [#allocation5 + $0x1], 0  ;;  %s7752_s18 = smov 0   ;;  %s7754_s19 = smov 0  }
   0x2   :  { %s7756_s20 = smov 0   ;;  %s7758_s21 = smov 0  }
   0x3 LB: > { %s7773_s22 = sadd.s32 4294967295, %s7711_s21   ;;  %s6746_s23 = sadd.s32 4294967294, %s7711_s21   ;;  %s7711_s21 = sphi %s7758_s21, %s12489_s21   ;;  %s7707_s20 = sphi %s7756_s20, %s12488_s20   ;;  %s7703_s19 = sphi %s7754_s19, %s12487_s19   ;;  %s7699_s18 = sphi %s7752_s18, %s12486_s18  }
   0x4   : > { %s7777_s24 = sadd.s32 1, %s7711_s21   ;;  %s135_s25 = sadd.s32 1, %s7707_s20 }
   0x5   : > { %s132_s26 = ssub.s32 %s7711_s21, %s7777_s24  ;;  %p145_p0 = scmp.ne.s32.totalorder %s7707_s20, %s7703_s19 }
   0x6   : > { %p133_p1 = scmp.eq.s32.totalorder %s132_s26, 0  ;;  %p146_p2 = scmp.eq.s32.totalorder %s7773_s22, 1 }
   0x7   : > { %p151_p3 = scmp.ne.s32.totalorder %s7703_s19, %s7699_s18  ;;  %p152_p4 = scmp.eq.s32.totalorder %s6746_s23, 1 }
   0x8   : > { %s7788_s27 = scalar_select %p133_p1, %s7707_s20, %s135_s25  }
   0x9   : > { %p7790_p5 = por %p146_p2, %p145_p0  ;;  %p7794_p6 = por %p152_p4, %p151_p3 }
   0xa   : > { %p6749_p7 = scmp.ge.s32.totalorder %s7711_s21, 1  ;;  %p190_p8 = scmp.lt.s32.totalorder %s7711_s21, 3 }
   0xc   : > { %p191_p9 = pnand %p6749_p7, %p190_p8 }
   0xe   : > { %194 = sbr.rel (%p191_p9) target bundleno = 1483 (0x5cb), region = 40 }
  0x15   : > { %vm223_vm0 = vcmask 7168   ;;  %p218_p10 = scmp.lt.s32.totalorder %s7773_s22, 1  ;;  %vm226_vm1 = vcmask 1024   ;;  %v7713_v0 = vmov 0   ;;  %v11851_v1 = vmov 0.0   ;;  %s7716_s14 = smov 32  }
  0x16   : > { %7166 = vset.pattern.permute.xlu0 %v7713_v0  ;;  %224 = vst.msk [vmem:[#allocation2] sm:$0xff] %vm223_vm0, %v11851_v1  ;;  %225 = vst.msk [vmem:[#allocation2 + $0x8] sm:$0xff] %vm223_vm0, %v11851_v1  ;;  %7167 = vset.pattern.permute.xlu1 %v7713_v0  ;;  %vm2765_vm2 = vcmask 261120   ;;  %vm2768_vm3 = vcmask 254976   ;;  %s7717_s15 = smov 64   ;;  %s7718_s16 = smov 96  }
  0x17   : > { %228 = vst.msk [vmem:[#allocation2 + $0x18] sm:$0xff] %vm223_vm0, %v11851_v1  ;;  %229 = vst.msk [vmem:[#allocation2 + $0x20] sm:$0xff] %vm223_vm0, %v11851_v1  ;;  %s219_s30 = scalar_select %p218_p10, %s7773_s22, 1  ;;  %vm3943_vm4 = vcmask 523264   ;;  %vm3976_vm5 = vcmask 785408   ;;  %vm6075_vm6 = vcmask 1041409  }
  0x18   : > { %231 = vst.msk [vmem:[#allocation2 + $0x30] sm:$0xff] %vm223_vm0, %v11851_v1  ;;  %232 = vst.msk [vmem:[#allocation2 + $0x38] sm:$0xff] %vm223_vm0, %v11851_v1  ;;  %vm6077_vm7 = vcmask 1043459   ;;  %vm6079_vm8 = vcmask 1045509   ;;  %vm6081_vm9 = vcmask 1047559   ;;  %s215_s13 = sand.u32 1, %s7703_s19  }
  0x19   : > { %234 = vst.msk [vmem:[#allocation2 + $0x48] sm:$0xff] %vm223_vm0, %v11851_v1  ;;  %235 = vst.msk [vmem:[#allocation2 + $0x50] sm:$0xff] %vm223_vm0, %v11851_v1  ;;  %s6937_s6 = sshll.u32 %s219_s30, 8  ;;  %s6938_s23 = sshll.u32 %s7773_s22, 8 }
  0x1a   : > { %237 = vst.msk [vmem:[#allocation2 + $0x60] sm:$0xff] %vm223_vm0, %v11851_v1  ;;  %238 = vst.msk [vmem:[#allocation2 + $0x68] sm:$0xff] %vm223_vm0, %v11851_v1  ;;  %s7915_s9 = scalar_lea.vmem %s11845_s0, %s6937_s6  ;;  %s11802_s26 = scalar_lea.hbm %s11850_s5, %s6938_s23 }
  0x1b   : > { %240 = vst.msk [vmem:[#allocation2 + $0x78] sm:$0xff] %vm223_vm0, %v11851_v1  ;;  %241 = vst.msk [vmem:[#allocation2 + $0x80] sm:$0xff] %vm223_vm0, %v11851_v1  ;;  %v279_v2 = vld [vmem:[%s7915_s9] sm:$0xff]  ;;  %v281_v3 = vld [vmem:[%s7915_s9 + $0x10] sm:$0xff]  ;;  %s6673_s22 = scalar_lea.sflag [#allocation5], %s215_s13  ;;  %s7721_s6 = smov [#allocation4]  }
  0x1c   : > { %243 = vst.msk [vmem:[#allocation2 + $0x90] sm:$0xff] %vm223_vm0, %v11851_v1  ;;  %244 = vst.msk [vmem:[#allocation2 + $0x98] sm:$0xff] %vm223_vm0, %v11851_v1  ;;  %v280_v4 = vld [vmem:[%s7915_s9 + $0x8] sm:$0xff]  ;;  %v283_v5 = vld [vmem:[%s7915_s9 + $0x20] sm:$0xff]  ;;  %s7653_s7 = sshll.u32 %s7721_s6, 4  ;;  %s7654_s7 = int_to_ptr.vmem [resolvable:$false] %s7653_s7 }
  0x1d   : > { %246 = vst.msk [vmem:[#allocation2 + $0xa8] sm:$0xff] %vm223_vm0, %v11851_v1  ;;  %247 = vst.msk [vmem:[#allocation2 + $0xb0] sm:$0xff] %vm223_vm0, %v11851_v1  ;;  %v282_v6 = vld [vmem:[%s7915_s9 + $0x18] sm:$0xff]  ;;  %v285_v7 = vld [vmem:[%s7915_s9 + $0x30] sm:$0xff]  ;;  %s7655_s8 = scalar_lea.vmem %s7654_s7, 512 }
  0x1e   : > { %249 = vst.msk [vmem:[#allocation2 + $0xc0] sm:$0xff] %vm223_vm0, %v11851_v1  ;;  %250 = vst.msk [vmem:[#allocation2 + $0xc8] sm:$0xff] %vm223_vm0, %v11851_v1  ;;  %v344_v8 = vld [vmem:[#allocation2] sm:$0xff]  ;;  %v345_v9 = vld [vmem:[#allocation2 + $0x8] sm:$0xff] }
  0x1f   : > { %252 = vst.msk [vmem:[#allocation2 + $0xd8] sm:$0xff] %vm223_vm0, %v11851_v1  ;;  %253 = vst.msk [vmem:[#allocation2 + $0xe0] sm:$0xff] %vm223_vm0, %v11851_v1  ;;  %v284_v10 = vld [vmem:[%s7915_s9 + $0x28] sm:$0xff]  ;;  %379 = vperm.xlu0 %7166, %v344_v8   ;;  %v287_v11 = vld [vmem:[%s7915_s9 + $0x40] sm:$0xff] }
  0x20   : > { %255 = vst.msk [vmem:[#allocation2 + $0xf0] sm:$0xff] %vm223_vm0, %v11851_v1  ;;  %256 = vst.msk [vmem:[#allocation2 + $0xf8] sm:$0xff] %vm223_vm0, %v11851_v1  ;;  %v286_v12 = vld [vmem:[%s7915_s9 + $0x38] sm:$0xff]  ;;  %v289_v13 = vld [vmem:[%s7915_s9 + $0x50] sm:$0xff] }
  0x21   : > { %258 = vst.msk [vmem:[#allocation2 + $0x108] sm:$0xff] %vm223_vm0, %v11851_v1  ;;  %259 = vst.msk [vmem:[#allocation2 + $0x110] sm:$0xff] %vm223_vm0, %v11851_v1  ;;  %v288_v14 = vld [vmem:[%s7915_s9 + $0x48] sm:$0xff]  ;;  %v291_v15 = vld [vmem:[%s7915_s9 + $0x60] sm:$0xff] }
  0x22   : > { %261 = vst.msk [vmem:[#allocation2 + $0x120] sm:$0xff] %vm223_vm0, %v11851_v1  ;;  %262 = vst.msk [vmem:[#allocation2 + $0x128] sm:$0xff] %vm223_vm0, %v11851_v1  ;;  %v290_v16 = vld [vmem:[%s7915_s9 + $0x58] sm:$0xff]  ;;  %v293_v17 = vld [vmem:[%s7915_s9 + $0x70] sm:$0xff] }
  0x23   : > { %264 = vst.msk [vmem:[#allocation2 + $0x138] sm:$0xff] %vm223_vm0, %v11851_v1  ;;  %265 = vst.msk [vmem:[#allocation2 + $0x140] sm:$0xff] %vm223_vm0, %v11851_v1  ;;  %v292_v18 = vld [vmem:[%s7915_s9 + $0x68] sm:$0xff]  ;;  %v295_v19 = vld [vmem:[%s7915_s9 + $0x80] sm:$0xff]  ;;  %384 = vperm.xlu0 %7166, %v345_v9  }
  0x24   : > { %267 = vst.msk [vmem:[#allocation2 + $0x150] sm:$0xff] %vm223_vm0, %v11851_v1  ;;  %268 = vst.msk [vmem:[#allocation2 + $0x158] sm:$0xff] %vm223_vm0, %v11851_v1  ;;  %v294_v20 = vld [vmem:[%s7915_s9 + $0x78] sm:$0xff]  ;;  %v297_v21 = vld [vmem:[%s7915_s9 + $0x90] sm:$0xff] }
  0x25   : > { %270 = vst.msk [vmem:[#allocation2 + $0x168] sm:$0xff] %vm223_vm0, %v11851_v1  ;;  %271 = vst.msk [vmem:[#allocation2 + $0x170] sm:$0xff] %vm223_vm0, %v11851_v1  ;;  %v296_v22 = vld [vmem:[%s7915_s9 + $0x88] sm:$0xff]  ;;  %v299_v23 = vld [vmem:[%s7915_s9 + $0xa0] sm:$0xff] }
  0x26   : > { %273 = vst.msk [vmem:[#allocation2 + $0x180] sm:$0xff] %vm223_vm0, %v11851_v1  ;;  %274 = vst.msk [vmem:[#allocation2 + $0x188] sm:$0xff] %vm223_vm0, %v11851_v1  ;;  %v298_v24 = vld [vmem:[%s7915_s9 + $0x98] sm:$0xff]  ;;  %v301_v25 = vld [vmem:[%s7915_s9 + $0xb0] sm:$0xff] }
  0x27   : > { %276 = vst.msk [vmem:[#allocation2 + $0x198] sm:$0xff] %vm223_vm0, %v11851_v1  ;;  %277 = vst.msk [vmem:[#allocation2 + $0x1a0] sm:$0xff] %vm223_vm0, %v11851_v1  ;;  %v300_v29 = vld [vmem:[%s7915_s9 + $0xa8] sm:$0xff]  ;;  %v303_v30 = vld [vmem:[%s7915_s9 + $0xc0] sm:$0xff] }
  0x28   : > { %230 = vst.msk [vmem:[#allocation2 + $0x28] sm:$0x3] %vm226_vm1, %v11851_v1  ;;  %227 = vst.msk [vmem:[#allocation2 + $0x10] sm:$0x3] %vm226_vm1, %v11851_v1  ;;  %v302_v34 = vld [vmem:[%s7915_s9 + $0xb8] sm:$0xff]  ;;  %v305_v35 = vld [vmem:[%s7915_s9 + $0xd0] sm:$0xff] }
  0x29   : > { %233 = vst.msk [vmem:[#allocation2 + $0x40] sm:$0x3] %vm226_vm1, %v11851_v1  ;;  %236 = vst.msk [vmem:[#allocation2 + $0x58] sm:$0x3] %vm226_vm1, %v11851_v1  ;;  %v304_v36 = vld [vmem:[%s7915_s9 + $0xc8] sm:$0xff]  ;;  %v307_v37 = vld [vmem:[%s7915_s9 + $0xe0] sm:$0xff] }
  0x2a   : > { %239 = vst.msk [vmem:[#allocation2 + $0x70] sm:$0x3] %vm226_vm1, %v11851_v1  ;;  %242 = vst.msk [vmem:[#allocation2 + $0x88] sm:$0x3] %vm226_vm1, %v11851_v1  ;;  %v306_v38 = vld [vmem:[%s7915_s9 + $0xd8] sm:$0xff]  ;;  %v308_v40 = vld [vmem:[%s7915_s9 + $0xe8] sm:$0xff] }
  0x2b   : > { %245 = vst.msk [vmem:[#allocation2 + $0xa0] sm:$0x3] %vm226_vm1, %v11851_v1  ;;  %248 = vst.msk [vmem:[#allocation2 + $0xb8] sm:$0x3] %vm226_vm1, %v11851_v1  ;;  %v605_v63 = vld [vmem:[#allocation2 + $0x1] sm:$0xff] }
  0x2c   : > { %251 = vst.msk [vmem:[#allocation2 + $0xd0] sm:$0x3] %vm226_vm1, %v11851_v1  ;;  %254 = vst.msk [vmem:[#allocation2 + $0xe8] sm:$0x3] %vm226_vm1, %v11851_v1 }
  0x2d   : > { %257 = vst.msk [vmem:[#allocation2 + $0x100] sm:$0x3] %vm226_vm1, %v11851_v1  ;;  %260 = vst.msk [vmem:[#allocation2 + $0x118] sm:$0x3] %vm226_vm1, %v11851_v1 }
  0x2e   : > { %263 = vst.msk [vmem:[#allocation2 + $0x130] sm:$0x3] %vm226_vm1, %v11851_v1  ;;  %266 = vst.msk [vmem:[#allocation2 + $0x148] sm:$0x3] %vm226_vm1, %v11851_v1 }
  0x2f   : > { %269 = vst.msk [vmem:[#allocation2 + $0x160] sm:$0x3] %vm226_vm1, %v11851_v1  ;;  %272 = vst.msk [vmem:[#allocation2 + $0x178] sm:$0x3] %vm226_vm1, %v11851_v1 }
  0x30   : > { %275 = vst.msk [vmem:[#allocation2 + $0x190] sm:$0x3] %vm226_vm1, %v11851_v1  ;;  %278 = vst.msk [vmem:[#allocation2 + $0x1a8] sm:$0x3] %vm226_vm1, %v11851_v1 }
  0x31   : > { %312 = vst.msk [vmem:[#allocation2 + $0x19] sm:$0xff] %vm223_vm0, %v279_v2  ;;  %314 = vst.msk [vmem:[#allocation2 + $0x31] sm:$0xff] %vm223_vm0, %v281_v3  ;;  %v606_v3 = vld [vmem:[#allocation2 + $0x9] sm:$0xff] }
  0x32   : > { %313 = vst.msk [vmem:[#allocation2 + $0x21] sm:$0xff] %vm223_vm0, %v280_v4  ;;  %316 = vst.msk [vmem:[#allocation2 + $0x49] sm:$0xff] %vm223_vm0, %v283_v5 }
  0x33   : > { %315 = vst.msk [vmem:[#allocation2 + $0x39] sm:$0xff] %vm223_vm0, %v282_v6  ;;  %318 = vst.msk [vmem:[#allocation2 + $0x61] sm:$0xff] %vm223_vm0, %v285_v7 }
  0x34   : > { %317 = vst.msk [vmem:[#allocation2 + $0x51] sm:$0xff] %vm223_vm0, %v284_v10  ;;  %320 = vst.msk [vmem:[#allocation2 + $0x79] sm:$0xff] %vm223_vm0, %v287_v11 }
  0x35   : > { %319 = vst.msk [vmem:[#allocation2 + $0x69] sm:$0xff] %vm223_vm0, %v286_v12  ;;  %322 = vst.msk [vmem:[#allocation2 + $0x91] sm:$0xff] %vm223_vm0, %v289_v13 }
  0x36   : > { %321 = vst.msk [vmem:[#allocation2 + $0x81] sm:$0xff] %vm223_vm0, %v288_v14  ;;  %324 = vst.msk [vmem:[#allocation2 + $0xa9] sm:$0xff] %vm223_vm0, %v291_v15 }
  0x37   : > { %323 = vst.msk [vmem:[#allocation2 + $0x99] sm:$0xff] %vm223_vm0, %v290_v16  ;;  %326 = vst.msk [vmem:[#allocation2 + $0xc1] sm:$0xff] %vm223_vm0, %v293_v17 }
  0x38   : > { %325 = vst.msk [vmem:[#allocation2 + $0xb1] sm:$0xff] %vm223_vm0, %v292_v18  ;;  %328 = vst.msk [vmem:[#allocation2 + $0xd9] sm:$0xff] %vm223_vm0, %v295_v19  ;;  %v7958_v26 = vld [vmem:[#allocation2 + $0x18] sm:$0xff]  ;;  %v7960_v27 = vld [vmem:[#allocation2 + $0x30] sm:$0xff] }
  0x39   : > { %327 = vst.msk [vmem:[#allocation2 + $0xc9] sm:$0xff] %vm223_vm0, %v294_v20  ;;  %330 = vst.msk [vmem:[#allocation2 + $0xf1] sm:$0xff] %vm223_vm0, %v297_v21  ;;  %389 = vperm.xlu1 %7167, %v7958_v26   ;;  %v7966_v28 = vld [vmem:[#allocation2 + $0x20] sm:$0xff]  ;;  %399 = vperm.xlu0 %7166, %v7960_v27   ;;  %v7973_v31 = vld [vmem:[#allocation2 + $0x48] sm:$0xff] }
  0x3a   : > { %329 = vst.msk [vmem:[#allocation2 + $0xe1] sm:$0xff] %vm223_vm0, %v296_v22  ;;  %332 = vst.msk [vmem:[#allocation2 + $0x109] sm:$0xff] %vm223_vm0, %v299_v23  ;;  %v7976_v32 = vld [vmem:[#allocation2 + $0x38] sm:$0xff]  ;;  %v7979_v33 = vld [vmem:[#allocation2 + $0x60] sm:$0xff] }
  0x3b   : > { %331 = vst.msk [vmem:[#allocation2 + $0xf9] sm:$0xff] %vm223_vm0, %v298_v24  ;;  %334 = vst.msk [vmem:[#allocation2 + $0x121] sm:$0xff] %vm223_vm0, %v301_v25  ;;  %v7990_v39 = vld [vmem:[#allocation2 + $0x50] sm:$0xff]  ;;  %v7997_v41 = vld [vmem:[#allocation2 + $0x78] sm:$0xff] }
  0x3c   : > { %333 = vst.msk [vmem:[#allocation2 + $0x111] sm:$0xff] %vm223_vm0, %v300_v29  ;;  %336 = vst.msk [vmem:[#allocation2 + $0x139] sm:$0xff] %vm223_vm0, %v303_v30  ;;  %v8000_v42 = vld [vmem:[#allocation2 + $0x68] sm:$0xff]  ;;  %v8003_v43 = vld [vmem:[#allocation2 + $0x90] sm:$0xff] }
  0x3d   : > { %394 = vperm.xlu1 %7167, %v7966_v28   ;;  %409 = vperm.xlu0 %7166, %v7973_v31   ;;  %335 = vst.msk [vmem:[#allocation2 + $0x129] sm:$0xff] %vm223_vm0, %v302_v34  ;;  %338 = vst.msk [vmem:[#allocation2 + $0x151] sm:$0xff] %vm223_vm0, %v305_v35  ;;  %v8006_v44 = vld [vmem:[#allocation2 + $0x80] sm:$0xff]  ;;  %v8009_v45 = vld [vmem:[#allocation2 + $0xa8] sm:$0xff] }
  0x3e   : > { %337 = vst.msk [vmem:[#allocation2 + $0x141] sm:$0xff] %vm223_vm0, %v304_v36  ;;  %340 = vst.msk [vmem:[#allocation2 + $0x169] sm:$0xff] %vm223_vm0, %v307_v37  ;;  %v8012_v46 = vld [vmem:[#allocation2 + $0x98] sm:$0xff]  ;;  %v8015_v47 = vld [vmem:[#allocation2 + $0xc0] sm:$0xff] }
  0x3f   : > { %339 = vst.msk [vmem:[#allocation2 + $0x159] sm:$0xff] %vm223_vm0, %v306_v38  ;;  %341 = vst.msk [vmem:[#allocation2 + $0x171] sm:$0xff] %vm223_vm0, %v308_v40  ;;  %v8018_v48 = vld [vmem:[#allocation2 + $0xb0] sm:$0xff]  ;;  %v8021_v49 = vld [vmem:[#allocation2 + $0xd8] sm:$0xff] }
  0x40   : > { %v8024_v50 = vld [vmem:[#allocation2 + $0xc8] sm:$0xff]  ;;  %v8027_v51 = vld [vmem:[#allocation2 + $0xf0] sm:$0xff]  ;;  %v8066_v2 = vld [vmem:[#allocation2 + $0x19] sm:$0xff] }
  0x41   : > { %404 = vperm.xlu1 %7167, %v7976_v32   ;;  %419 = vperm.xlu0 %7166, %v7979_v33   ;;  %v8030_v52 = vld [vmem:[#allocation2 + $0xe0] sm:$0xff]  ;;  %v8033_v53 = vld [vmem:[#allocation2 + $0x108] sm:$0xff]  ;;  %v8070_v4 = vld [vmem:[#allocation2 + $0x31] sm:$0xff] }
  0x42   : > { %v8036_v54 = vld [vmem:[#allocation2 + $0xf8] sm:$0xff]  ;;  %v8039_v55 = vld [vmem:[#allocation2 + $0x120] sm:$0xff]  ;;  %v8075_v6 = vld [vmem:[#allocation2 + $0x49] sm:$0xff] }
  0x43   : > { %v8042_v56 = vld [vmem:[#allocation2 + $0x110] sm:$0xff]  ;;  %v8045_v57 = vld [vmem:[#allocation2 + $0x138] sm:$0xff]  ;;  %v8072_v5 = vld [vmem:[#allocation2 + $0x21] sm:$0xff] }
  0x44   : > { %v8048_v58 = vld [vmem:[#allocation2 + $0x128] sm:$0xff]  ;;  %v8051_v59 = vld [vmem:[#allocation2 + $0x150] sm:$0xff]  ;;  %v8078_v7 = vld [vmem:[#allocation2 + $0x39] sm:$0xff] }
  0x45   : > { %414 = vperm.xlu1 %7167, %v7990_v39   ;;  %429 = vperm.xlu0 %7166, %v7997_v41   ;;  %v8054_v60 = vld [vmem:[#allocation2 + $0x140] sm:$0xff]  ;;  %v8057_v61 = vld [vmem:[#allocation2 + $0x168] sm:$0xff]  ;;  %v8084_v9 = vld [vmem:[#allocation2 + $0x51] sm:$0xff] }
  0x46   : > { %v8060_v62 = vld [vmem:[#allocation2 + $0x158] sm:$0xff]  ;;  %v8064_v0 = vld [vmem:[#allocation2 + $0x170] sm:$0xff]  ;;  %v8081_v8 = vld [vmem:[#allocation2 + $0x61] sm:$0xff] }
  0x47   : > { %v8087_v10 = vld [vmem:[#allocation2 + $0x79] sm:$0xff]  ;;  %v8090_v11 = vld [vmem:[#allocation2 + $0x69] sm:$0xff]  ;;  %v8093_v12 = vld [vmem:[#allocation2 + $0x91] sm:$0xff] }
  0x48   : > { %v8096_v13 = vld [vmem:[#allocation2 + $0x81] sm:$0xff]  ;;  %v8099_v14 = vld [vmem:[#allocation2 + $0xa9] sm:$0xff]  ;;  %v8102_v15 = vld [vmem:[#allocation2 + $0x99] sm:$0xff] }
  0x49   : > { %424 = vperm.xlu1 %7167, %v8000_v42   ;;  %439 = vperm.xlu0 %7166, %v8003_v43   ;;  %v8105_v16 = vld [vmem:[#allocation2 + $0xc1] sm:$0xff]  ;;  %v8108_v17 = vld [vmem:[#allocation2 + $0xb1] sm:$0xff]  ;;  %v8111_v18 = vld [vmem:[#allocation2 + $0xd9] sm:$0xff] }
  0x4a   : > { %v8114_v19 = vld [vmem:[#allocation2 + $0xc9] sm:$0xff]  ;;  %v8117_v20 = vld [vmem:[#allocation2 + $0xf1] sm:$0xff]  ;;  %v8120_v21 = vld [vmem:[#allocation2 + $0xe1] sm:$0xff] }
  0x4b   : > { %v8123_v22 = vld [vmem:[#allocation2 + $0x109] sm:$0xff]  ;;  %v8126_v23 = vld [vmem:[#allocation2 + $0xf9] sm:$0xff]  ;;  %v8129_v24 = vld [vmem:[#allocation2 + $0x121] sm:$0xff] }
  0x4c   : > { %v8132_v25 = vld [vmem:[#allocation2 + $0x111] sm:$0xff]  ;;  %v8135_v29 = vld [vmem:[#allocation2 + $0x139] sm:$0xff]  ;;  %v8138_v30 = vld [vmem:[#allocation2 + $0x129] sm:$0xff] }
  0x4d   : > { %434 = vperm.xlu1 %7167, %v8006_v44   ;;  %449 = vperm.xlu0 %7166, %v8009_v45   ;;  %11910 = vst [vmem:[#allocation7_spill] sm:$0xff] %v8138_v30  ;;  %v309_v34 = vld [vmem:[%s7915_s9 + $0xf0] sm:$0xff]  ;;  %v8146_v36 = vld [vmem:[#allocation2 + $0x141] sm:$0xff]  ;;  %v310_v38 = vld [vmem:[%s7915_s9 + $0xf8] sm:$0xff] }
  0x4e   : > { %342 = vst.msk [vmem:[#allocation2 + $0x181] sm:$0xff] %vm223_vm0, %v309_v34  ;;  %v8143_v35 = vld [vmem:[#allocation2 + $0x151] sm:$0xff]  ;;  %11912 = vst [vmem:[#allocation9_spill] sm:$0xff] %v8146_v36  ;;  %v8149_v37 = vld [vmem:[#allocation2 + $0x169] sm:$0xff] }
  0x4f   : > { %11911 = vst [vmem:[#allocation8_spill] sm:$0xff] %v8143_v35  ;;  %11913 = vst [vmem:[#allocation10_spill] sm:$0xff] %v8149_v37  ;;  %v8154_v40 = vld [vmem:[#allocation2 + $0x159] sm:$0xff]  ;;  %v8160_v34 = vld [vmem:[#allocation2 + $0x171] sm:$0xff] }
  0x50   : > { %343 = vst.msk [vmem:[#allocation2 + $0x189] sm:$0xff] %vm223_vm0, %v310_v38  ;;  %11914 = vst [vmem:[#allocation11_spill] sm:$0xff] %v8154_v40  ;;  %v8162_v1 = vld [vmem:[#allocation2 + $0x1a] sm:$0xff] }
  0x51   : > { %444 = vperm.xlu1 %7167, %v8012_v46   ;;  %459 = vperm.xlu0 %7166, %v8015_v47   ;;  %11916 = vst [vmem:[#allocation13_spill] sm:$0xff] %v8162_v1 }
  0x55   : > { %454 = vperm.xlu1 %7167, %v8018_v48   ;;  %469 = vperm.xlu0 %7166, %v8021_v49  }
  0x59   : > { %464 = vperm.xlu1 %7167, %v8024_v50   ;;  %479 = vperm.xlu0 %7166, %v8027_v51  }
  0x5d   : > { %474 = vperm.xlu1 %7167, %v8030_v52   ;;  %489 = vperm.xlu0 %7166, %v8033_v53  }
  0x61   : > { %484 = vperm.xlu1 %7167, %v8036_v54   ;;  %499 = vperm.xlu0 %7166, %v8039_v55  }
  0x65   : > { %494 = vperm.xlu1 %7167, %v8042_v56   ;;  %509 = vperm.xlu0 %7166, %v8045_v57  }
  0x69   : > { %504 = vperm.xlu1 %7167, %v8048_v58   ;;  %519 = vperm.xlu0 %7166, %v8051_v59  }
  0x6d   : > { %514 = vperm.xlu1 %7167, %v8054_v60   ;;  %529 = vperm.xlu0 %7166, %v8057_v61  }
  0x71   : > { %524 = vperm.xlu1 %7167, %v8060_v62   ;;  %640 = vperm.xlu0 %7166, %v605_v63   ;;  %v866_v63 = vld [vmem:[#allocation2 + $0x2] sm:$0xff] }
  0x75   : > { %534 = vperm.xlu1 %7167, %v8064_v0   ;;  %650 = vperm.xlu0 %7166, %v8066_v2  }
  0x79   : > { %645 = vperm.xlu1 %7167, %v606_v3   ;;  %660 = vperm.xlu0 %7166, %v8070_v4  }
  0x7d   : > { %655 = vperm.xlu1 %7167, %v8072_v5   ;;  %670 = vperm.xlu0 %7166, %v8075_v6  }
  0x81   : > { %665 = vperm.xlu1 %7167, %v8078_v7   ;;  %680 = vperm.xlu0 %7166, %v8081_v8  }
  0x85   : > { %675 = vperm.xlu1 %7167, %v8084_v9   ;;  %690 = vperm.xlu0 %7166, %v8087_v10  }
  0x89   : > { %685 = vperm.xlu1 %7167, %v8090_v11   ;;  %700 = vperm.xlu0 %7166, %v8093_v12  }
  0x8d   : > { %695 = vperm.xlu1 %7167, %v8096_v13   ;;  %710 = vperm.xlu0 %7166, %v8099_v14  }
  0x91   : > { %705 = vperm.xlu1 %7167, %v8102_v15   ;;  %720 = vperm.xlu0 %7166, %v8105_v16  }
  0x95   : > { %715 = vperm.xlu1 %7167, %v8108_v17   ;;  %730 = vperm.xlu0 %7166, %v8111_v18  }
  0x99   : > { %725 = vperm.xlu1 %7167, %v8114_v19   ;;  %740 = vperm.xlu0 %7166, %v8117_v20  }
  0x9d   : > { %735 = vperm.xlu1 %7167, %v8120_v21   ;;  %750 = vperm.xlu0 %7166, %v8123_v22  }
  0x9e   : > { %v8158_v3 = vpop.permute.xlu0 %379 }
  0x9f   : > { %11915 = vst [vmem:[#allocation12_spill] sm:$0xff] %v8158_v3  ;;  %v8174_v3 = vld [vmem:[#allocation2 + $0x22] sm:$0xff] }
  0xa0   : > { %11921 = vst [vmem:[#allocation18_spill] sm:$0xff] %v8174_v3 }
  0xa1   : > { %745 = vperm.xlu1 %7167, %v8126_v23   ;;  %760 = vperm.xlu0 %7166, %v8129_v24  }
  0xa5   : > { %755 = vperm.xlu1 %7167, %v8132_v25   ;;  %770 = vperm.xlu0 %7166, %v8135_v29  }
  0xa9   : > { %765 = vperm.xlu1 %7167, %v8138_v30   ;;  %780 = vperm.xlu0 %7166, %v8143_v35   ;;  %v8165_v35 = vpop.permute.xlu0 %384  ;;  %v8179_v30 = vld [vmem:[#allocation2 + $0x4a] sm:$0xff] }
  0xaa   : > { %11917 = vst [vmem:[#allocation14_spill] sm:$0xff] %v8165_v35  ;;  %11923 = vst [vmem:[#allocation20_spill] sm:$0xff] %v8179_v30 }
  0xad   : > { %775 = vperm.xlu1 %7167, %v8146_v36   ;;  %790 = vperm.xlu0 %7166, %v8149_v37   ;;  %v867_v36 = vld [vmem:[#allocation2 + $0xa] sm:$0xff]  ;;  %v8170_v37 = vld [vmem:[#allocation2 + $0x32] sm:$0xff] }
  0xae   : > { %11919 = vst [vmem:[#allocation16_spill] sm:$0xff] %v8170_v37 }
  0xb1   : > { %785 = vperm.xlu1 %7167, %v8154_v40   ;;  %901 = vperm.xlu0 %7166, %v866_v63  }
  0xb5   : > { %795 = vperm.xlu1 %7167, %v8160_v34   ;;  %911 = vperm.xlu0 %7166, %v8162_v1   ;;  %v8184_v1 = vld [vmem:[#allocation2 + $0x3a] sm:$0xff] }
  0xb6   : > { %11925 = vst [vmem:[#allocation22_spill] sm:$0xff] %v8184_v1 }
  0xb8   : > { %v8168_v38 = vpop.permute.xlu1 %389  ;;  %v8172_v40 = vpop.permute.xlu0 %399 }
  0xb9   : > { %11918 = vst [vmem:[#allocation15_spill] sm:$0xff] %v8168_v38  ;;  %906 = vperm.xlu1 %7167, %v867_v36   ;;  %11920 = vst [vmem:[#allocation17_spill] sm:$0xff] %v8172_v40  ;;  %921 = vperm.xlu0 %7166, %v8170_v37   ;;  %v8189_v36 = vld [vmem:[#allocation2 + $0x62] sm:$0xff]  ;;  %v8194_v37 = vld [vmem:[#allocation2 + $0x52] sm:$0xff] }
  0xba   : > { %11927 = vst [vmem:[#allocation24_spill] sm:$0xff] %v8189_v36  ;;  %11929 = vst [vmem:[#allocation26_spill] sm:$0xff] %v8194_v37 }
  0xbc   : > { %v8177_v63 = vpop.permute.xlu1 %394  ;;  %v8182_v35 = vpop.permute.xlu0 %409 }
  0xbd   : > { %11922 = vst [vmem:[#allocation19_spill] sm:$0xff] %v8177_v63  ;;  %916 = vperm.xlu1 %7167, %v8174_v3   ;;  %11924 = vst [vmem:[#allocation21_spill] sm:$0xff] %v8182_v35  ;;  %931 = vperm.xlu0 %7166, %v8179_v30   ;;  %v8199_v3 = vld [vmem:[#allocation2 + $0x7a] sm:$0xff]  ;;  %v8204_v30 = vld [vmem:[#allocation2 + $0x6a] sm:$0xff] }
  0xbe   : > { %11931 = vst [vmem:[#allocation28_spill] sm:$0xff] %v8199_v3  ;;  %11933 = vst [vmem:[#allocation30_spill] sm:$0xff] %v8204_v30 }
  0xc0   : > { %v8187_v38 = vpop.permute.xlu1 %404  ;;  %v8192_v40 = vpop.permute.xlu0 %419 }
  0xc1   : > { %11926 = vst [vmem:[#allocation23_spill] sm:$0xff] %v8187_v38  ;;  %926 = vperm.xlu1 %7167, %v8184_v1   ;;  %11928 = vst [vmem:[#allocation25_spill] sm:$0xff] %v8192_v40  ;;  %941 = vperm.xlu0 %7166, %v8189_v36   ;;  %v8209_v1 = vld [vmem:[#allocation2 + $0x92] sm:$0xff]  ;;  %v8214_v36 = vld [vmem:[#allocation2 + $0x82] sm:$0xff] }
  0xc2   : > { %11935 = vst [vmem:[#allocation32_spill] sm:$0xff] %v8209_v1  ;;  %11937 = vst [vmem:[#allocation34_spill] sm:$0xff] %v8214_v36 }
  0xc4   : > { %v8197_v63 = vpop.permute.xlu1 %414  ;;  %v8202_v35 = vpop.permute.xlu0 %429 }
  0xc5   : > { %11930 = vst [vmem:[#allocation27_spill] sm:$0xff] %v8197_v63  ;;  %936 = vperm.xlu1 %7167, %v8194_v37   ;;  %11932 = vst [vmem:[#allocation29_spill] sm:$0xff] %v8202_v35  ;;  %951 = vperm.xlu0 %7166, %v8199_v3   ;;  %v8219_v37 = vld [vmem:[#allocation2 + $0xaa] sm:$0xff]  ;;  %v8224_v3 = vld [vmem:[#allocation2 + $0x9a] sm:$0xff] }
  0xc6   : > { %11939 = vst [vmem:[#allocation36_spill] sm:$0xff] %v8219_v37  ;;  %11941 = vst [vmem:[#allocation38_spill] sm:$0xff] %v8224_v3 }
  0xc8   : > { %v8207_v38 = vpop.permute.xlu1 %424  ;;  %v8212_v40 = vpop.permute.xlu0 %439 }
  0xc9   : > { %11934 = vst [vmem:[#allocation31_spill] sm:$0xff] %v8207_v38  ;;  %946 = vperm.xlu1 %7167, %v8204_v30   ;;  %11936 = vst [vmem:[#allocation33_spill] sm:$0xff] %v8212_v40  ;;  %961 = vperm.xlu0 %7166, %v8209_v1   ;;  %v8229_v30 = vld [vmem:[#allocation2 + $0xc2] sm:$0xff]  ;;  %v8234_v1 = vld [vmem:[#allocation2 + $0xb2] sm:$0xff] }
  0xca   : > { %11943 = vst [vmem:[#allocation40_spill] sm:$0xff] %v8229_v30  ;;  %11945 = vst [vmem:[#allocation42_spill] sm:$0xff] %v8234_v1 }
  0xcc   : > { %v8217_v63 = vpop.permute.xlu1 %434  ;;  %v8222_v35 = vpop.permute.xlu0 %449 }
  0xcd   : > { %11938 = vst [vmem:[#allocation35_spill] sm:$0xff] %v8217_v63  ;;  %956 = vperm.xlu1 %7167, %v8214_v36   ;;  %11940 = vst [vmem:[#allocation37_spill] sm:$0xff] %v8222_v35  ;;  %971 = vperm.xlu0 %7166, %v8219_v37   ;;  %v8239_v36 = vld [vmem:[#allocation2 + $0xda] sm:$0xff]  ;;  %v8244_v37 = vld [vmem:[#allocation2 + $0xca] sm:$0xff] }
  0xce   : > { %11947 = vst [vmem:[#allocation44_spill] sm:$0xff] %v8239_v36  ;;  %11949 = vst [vmem:[#allocation46_spill] sm:$0xff] %v8244_v37 }
  0xd0   : > { %v8227_v38 = vpop.permute.xlu1 %444  ;;  %v8232_v40 = vpop.permute.xlu0 %459 }
  0xd1   : > { %11942 = vst [vmem:[#allocation39_spill] sm:$0xff] %v8227_v38  ;;  %966 = vperm.xlu1 %7167, %v8224_v3   ;;  %11944 = vst [vmem:[#allocation41_spill] sm:$0xff] %v8232_v40  ;;  %981 = vperm.xlu0 %7166, %v8229_v30   ;;  %v8249_v3 = vld [vmem:[#allocation2 + $0xf2] sm:$0xff]  ;;  %v8254_v30 = vld [vmem:[#allocation2 + $0xe2] sm:$0xff] }
  0xd2   : > { %11951 = vst [vmem:[#allocation48_spill] sm:$0xff] %v8249_v3  ;;  %11953 = vst [vmem:[#allocation50_spill] sm:$0xff] %v8254_v30 }
  0xd4   : > { %v8237_v63 = vpop.permute.xlu1 %454  ;;  %v8242_v35 = vpop.permute.xlu0 %469 }
  0xd5   : > { %11946 = vst [vmem:[#allocation43_spill] sm:$0xff] %v8237_v63  ;;  %976 = vperm.xlu1 %7167, %v8234_v1   ;;  %11948 = vst [vmem:[#allocation45_spill] sm:$0xff] %v8242_v35  ;;  %991 = vperm.xlu0 %7166, %v8239_v36   ;;  %v8259_v1 = vld [vmem:[#allocation2 + $0x10a] sm:$0xff]  ;;  %v8264_v36 = vld [vmem:[#allocation2 + $0xfa] sm:$0xff] }
  0xd6   : > { %11955 = vst [vmem:[#allocation52_spill] sm:$0xff] %v8259_v1  ;;  %11957 = vst [vmem:[#allocation54_spill] sm:$0xff] %v8264_v36 }
  0xd8   : > { %v8247_v38 = vpop.permute.xlu1 %464  ;;  %v8252_v40 = vpop.permute.xlu0 %479 }
  0xd9   : > { %11950 = vst [vmem:[#allocation47_spill] sm:$0xff] %v8247_v38  ;;  %986 = vperm.xlu1 %7167, %v8244_v37   ;;  %11952 = vst [vmem:[#allocation49_spill] sm:$0xff] %v8252_v40  ;;  %1001 = vperm.xlu0 %7166, %v8249_v3   ;;  %v8269_v37 = vld [vmem:[#allocation2 + $0x122] sm:$0xff]  ;;  %v8274_v3 = vld [vmem:[#allocation2 + $0x112] sm:$0xff] }
  0xda   : > { %11959 = vst [vmem:[#allocation56_spill] sm:$0xff] %v8269_v37  ;;  %11961 = vst [vmem:[#allocation58_spill] sm:$0xff] %v8274_v3 }
  0xdc   : > { %v8257_v63 = vpop.permute.xlu1 %474  ;;  %v8262_v35 = vpop.permute.xlu0 %489 }
  0xdd   : > { %11954 = vst [vmem:[#allocation51_spill] sm:$0xff] %v8257_v63  ;;  %996 = vperm.xlu1 %7167, %v8254_v30   ;;  %11956 = vst [vmem:[#allocation53_spill] sm:$0xff] %v8262_v35  ;;  %1011 = vperm.xlu0 %7166, %v8259_v1   ;;  %v8279_v30 = vld [vmem:[#allocation2 + $0x13a] sm:$0xff]  ;;  %v8284_v1 = vld [vmem:[#allocation2 + $0x12a] sm:$0xff] }
  0xde   : > { %11963 = vst [vmem:[#allocation60_spill] sm:$0xff] %v8279_v30  ;;  %11965 = vst [vmem:[#allocation62_spill] sm:$0xff] %v8284_v1 }
  0xe0   : > { %v8267_v38 = vpop.permute.xlu1 %484  ;;  %v8272_v40 = vpop.permute.xlu0 %499 }
  0xe1   : > { %11958 = vst [vmem:[#allocation55_spill] sm:$0xff] %v8267_v38  ;;  %1006 = vperm.xlu1 %7167, %v8264_v36   ;;  %11960 = vst [vmem:[#allocation57_spill] sm:$0xff] %v8272_v40  ;;  %1021 = vperm.xlu0 %7166, %v8269_v37   ;;  %v8289_v36 = vld [vmem:[#allocation2 + $0x152] sm:$0xff]  ;;  %v8294_v37 = vld [vmem:[#allocation2 + $0x142] sm:$0xff] }
  0xe2   : > { %11968 = vst [vmem:[#allocation65_spill] sm:$0xff] %v8294_v37 }
  0xe4   : > { %v8277_v63 = vpop.permute.xlu1 %494  ;;  %v8282_v35 = vpop.permute.xlu0 %509 }
  0xe5   : > { %11962 = vst [vmem:[#allocation59_spill] sm:$0xff] %v8277_v63  ;;  %1016 = vperm.xlu1 %7167, %v8274_v3   ;;  %11964 = vst [vmem:[#allocation61_spill] sm:$0xff] %v8282_v35  ;;  %1031 = vperm.xlu0 %7166, %v8279_v30   ;;  %v8299_v3 = vld [vmem:[#allocation2 + $0x16a] sm:$0xff]  ;;  %v8304_v30 = vld [vmem:[#allocation2 + $0x15a] sm:$0xff] }
  0xe8   : > { %v8287_v38 = vpop.permute.xlu1 %504  ;;  %v8292_v40 = vpop.permute.xlu0 %519 }
  0xe9   : > { %11966 = vst [vmem:[#allocation63_spill] sm:$0xff] %v8287_v38  ;;  %1026 = vperm.xlu1 %7167, %v8284_v1   ;;  %11967 = vst [vmem:[#allocation64_spill] sm:$0xff] %v8292_v40  ;;  %1041 = vperm.xlu0 %7166, %v8289_v36   ;;  %v8312_v1 = vld [vmem:[#allocation2 + $0x172] sm:$0xff] }
  0xec   : > { %v8297_v63 = vpop.permute.xlu1 %514  ;;  %v8302_v35 = vpop.permute.xlu0 %529 }
  0xed   : > { %11969 = vst [vmem:[#allocation66_spill] sm:$0xff] %v8297_v63  ;;  %1036 = vperm.xlu1 %7167, %v8294_v37   ;;  %11970 = vst [vmem:[#allocation67_spill] sm:$0xff] %v8302_v35  ;;  %1051 = vperm.xlu0 %7166, %v8299_v3  }
  0xf0   : > { %v8307_v38 = vpop.permute.xlu1 %524  ;;  %v8310_v40 = vpop.permute.xlu0 %640 }
  0xf1   : > { %11971 = vst [vmem:[#allocation68_spill] sm:$0xff] %v8307_v38  ;;  %1046 = vperm.xlu1 %7167, %v8304_v30   ;;  %11972 = vst [vmem:[#allocation69_spill] sm:$0xff] %v8310_v40  ;;  %1162 = vperm.xlu0 %7166, %v7958_v26  }
  0xf4   : > { %v8315_v63 = vpop.permute.xlu1 %534  ;;  %v8318_v37 = vpop.permute.xlu0 %650 }
  0xf5   : > { %11973 = vst [vmem:[#allocation70_spill] sm:$0xff] %v8315_v63  ;;  %1056 = vperm.xlu1 %7167, %v8312_v1   ;;  %1172 = vperm.xlu0 %7166, %v7960_v27  }
  0xf8   : > { %v8321_v35 = vpop.permute.xlu1 %645  ;;  %v8324_v38 = vpop.permute.xlu0 %660 }
  0xf9   : > { %1167 = vperm.xlu1 %7167, %v7966_v28   ;;  %1182 = vperm.xlu0 %7166, %v7973_v31  }
  0xfc   : > { %v8327_v40 = vpop.permute.xlu1 %655  ;;  %v8330_v26 = vpop.permute.xlu0 %670 }
  0xfd   : > { %1177 = vperm.xlu1 %7167, %v7976_v32   ;;  %1192 = vperm.xlu0 %7166, %v7979_v33  }
 0x100   : > { %v8333_v63 = vpop.permute.xlu1 %665  ;;  %v8336_v27 = vpop.permute.xlu0 %680 }
 0x101   : > { %1187 = vperm.xlu1 %7167, %v7990_v39   ;;  %1202 = vperm.xlu0 %7166, %v7997_v41  }
 0x104   : > { %v8339_v28 = vpop.permute.xlu1 %675  ;;  %v8342_v31 = vpop.permute.xlu0 %690 }
 0x105   : > { %1197 = vperm.xlu1 %7167, %v8000_v42   ;;  %1212 = vperm.xlu0 %7166, %v8003_v43  }
 0x108   : > { %v8345_v32 = vpop.permute.xlu1 %685  ;;  %v8348_v33 = vpop.permute.xlu0 %700 }
 0x109   : > { %1207 = vperm.xlu1 %7167, %v8006_v44   ;;  %1222 = vperm.xlu0 %7166, %v8009_v45  }
 0x10c   : > { %v8351_v39 = vpop.permute.xlu1 %695  ;;  %v8354_v41 = vpop.permute.xlu0 %710 }
 0x10d   : > { %1217 = vperm.xlu1 %7167, %v8012_v46   ;;  %1232 = vperm.xlu0 %7166, %v8015_v47  }
 0x110   : > { %v8357_v42 = vpop.permute.xlu1 %705  ;;  %v8360_v43 = vpop.permute.xlu0 %720 }
 0x111   : > { %1227 = vperm.xlu1 %7167, %v8018_v48   ;;  %1242 = vperm.xlu0 %7166, %v8021_v49  }
 0x114   : > { %v8363_v44 = vpop.permute.xlu1 %715  ;;  %v8366_v45 = vpop.permute.xlu0 %730 }
 0x115   : > { %1237 = vperm.xlu1 %7167, %v8024_v50   ;;  %1252 = vperm.xlu0 %7166, %v8027_v51  }
 0x118   : > { %v8369_v46 = vpop.permute.xlu1 %725  ;;  %v8372_v47 = vpop.permute.xlu0 %740 }
 0x119   : > { %1247 = vperm.xlu1 %7167, %v8030_v52   ;;  %1262 = vperm.xlu0 %7166, %v8033_v53  }
 0x11c   : > { %v8375_v48 = vpop.permute.xlu1 %735  ;;  %v8378_v49 = vpop.permute.xlu0 %750 }
 0x11d   : > { %1257 = vperm.xlu1 %7167, %v8036_v54   ;;  %1272 = vperm.xlu0 %7166, %v8039_v55  }
 0x120   : > { %v8381_v50 = vpop.permute.xlu1 %745  ;;  %v8384_v51 = vpop.permute.xlu0 %760 }
 0x121   : > { %1267 = vperm.xlu1 %7167, %v8042_v56   ;;  %11974 = vst [vmem:[#allocation71_spill] sm:$0xff] %v8384_v51  ;;  %1282 = vperm.xlu0 %7166, %v8045_v57   ;;  %v8401_v51 = vld [vmem:[#allocation2 + $0x180] sm:$0xff] }
 0x124   : > { %v8387_v52 = vpop.permute.xlu1 %755  ;;  %v8390_v53 = vpop.permute.xlu0 %770 }
 0x125   : > { %1277 = vperm.xlu1 %7167, %v8048_v58   ;;  %1292 = vperm.xlu0 %7166, %v8051_v59  }
 0x128   : > { %v8393_v54 = vpop.permute.xlu1 %765  ;;  %v8396_v55 = vpop.permute.xlu0 %780 }
 0x129   : > { %1287 = vperm.xlu1 %7167, %v8054_v60   ;;  %1302 = vperm.xlu0 %7166, %v8057_v61   ;;  %v8412_v60 = vld [vmem:[#allocation2 + $0x188] sm:$0xff] }
 0x12c   : > { %v8399_v56 = vpop.permute.xlu1 %775  ;;  %v8404_v57 = vpop.permute.xlu0 %790 }
 0x12d   : > { %11975 = vst [vmem:[#allocation72_spill] sm:$0xff] %v8399_v56  ;;  %1297 = vperm.xlu1 %7167, %v8060_v62   ;;  %11976 = vst [vmem:[#allocation73_spill] sm:$0xff] %v8404_v57  ;;  %1312 = vperm.xlu0 %7166, %v8401_v51  }
 0x130   : > { %v8407_v58 = vpop.permute.xlu1 %785  ;;  %v8410_v59 = vpop.permute.xlu0 %901 }
 0x131   : > { %11977 = vst [vmem:[#allocation74_spill] sm:$0xff] %v8407_v58  ;;  %1307 = vperm.xlu1 %7167, %v8064_v0   ;;  %11978 = vst [vmem:[#allocation75_spill] sm:$0xff] %v8410_v59  ;;  %1423 = vperm.xlu0 %7166, %v8066_v2  }
 0x134   : > { %v8415_v61 = vpop.permute.xlu1 %795  ;;  %v8418_v56 = vpop.permute.xlu0 %911 }
 0x135   : > { %11979 = vst [vmem:[#allocation76_spill] sm:$0xff] %v8415_v61  ;;  %1317 = vperm.xlu1 %7167, %v8412_v60   ;;  %11980 = vst [vmem:[#allocation77_spill] sm:$0xff] %v8418_v56  ;;  %1433 = vperm.xlu0 %7166, %v8070_v4   ;;  %v12179_v56 = vld [vmem:[#allocation57_spill] sm:$0xff] }
 0x138   : > { %v8421_v62 = vpop.permute.xlu1 %906  ;;  %v8424_v58 = vpop.permute.xlu0 %921 }
 0x139   : > { %11981 = vst [vmem:[#allocation78_spill] sm:$0xff] %v8421_v62  ;;  %1428 = vperm.xlu1 %7167, %v8072_v5   ;;  %11982 = vst [vmem:[#allocation79_spill] sm:$0xff] %v8424_v58  ;;  %1443 = vperm.xlu0 %7166, %v8075_v6   ;;  %v12178_v62 = vld [vmem:[#allocation55_spill] sm:$0xff] }
 0x13c   : > { %v8427_v0 = vpop.permute.xlu1 %916  ;;  %v8430_v2 = vpop.permute.xlu0 %931 }
 0x13d   : > { %11983 = vst [vmem:[#allocation80_spill] sm:$0xff] %v8427_v0  ;;  %1438 = vperm.xlu1 %7167, %v8078_v7   ;;  %11984 = vst [vmem:[#allocation81_spill] sm:$0xff] %v8430_v2  ;;  %1453 = vperm.xlu0 %7166, %v8081_v8   ;;  %v12174_v2 = vld [vmem:[#allocation53_spill] sm:$0xff] }
 0x13e   : > { %v12176_v0 = vld [vmem:[#allocation69_spill] sm:$0xff] }
 0x140   : > { %v8433_v61 = vpop.permute.xlu1 %926  ;;  %v8436_v4 = vpop.permute.xlu0 %941 }
 0x141   : > { %11985 = vst [vmem:[#allocation82_spill] sm:$0xff] %v8433_v61  ;;  %1448 = vperm.xlu1 %7167, %v8084_v9   ;;  %11986 = vst [vmem:[#allocation83_spill] sm:$0xff] %v8436_v4  ;;  %1463 = vperm.xlu0 %7166, %v8087_v10   ;;  %v12172_v61 = vld [vmem:[#allocation51_spill] sm:$0xff] }
 0x144   : > { %v8439_v5 = vpop.permute.xlu1 %936  ;;  %v8442_v6 = vpop.permute.xlu0 %951 }
 0x145   : > { %11987 = vst [vmem:[#allocation84_spill] sm:$0xff] %v8439_v5  ;;  %1458 = vperm.xlu1 %7167, %v8090_v11   ;;  %11988 = vst [vmem:[#allocation85_spill] sm:$0xff] %v8442_v6  ;;  %1473 = vperm.xlu0 %7166, %v8093_v12   ;;  %v12168_v6 = vld [vmem:[#allocation43_spill] sm:$0xff] }
 0x148   : > { %v8445_v7 = vpop.permute.xlu1 %946  ;;  %v8448_v8 = vpop.permute.xlu0 %961 }
 0x149   : > { %11989 = vst [vmem:[#allocation86_spill] sm:$0xff] %v8445_v7  ;;  %1468 = vperm.xlu1 %7167, %v8096_v13   ;;  %11990 = vst [vmem:[#allocation87_spill] sm:$0xff] %v8448_v8  ;;  %1483 = vperm.xlu0 %7166, %v8099_v14   ;;  %v12167_v8 = vld [vmem:[#allocation41_spill] sm:$0xff] }
 0x14c   : > { %v8451_v9 = vpop.permute.xlu1 %956  ;;  %v8454_v10 = vpop.permute.xlu0 %971 }
 0x14d   : > { %11991 = vst [vmem:[#allocation88_spill] sm:$0xff] %v8451_v9  ;;  %1478 = vperm.xlu1 %7167, %v8102_v15   ;;  %11992 = vst [vmem:[#allocation89_spill] sm:$0xff] %v8454_v10  ;;  %1493 = vperm.xlu0 %7166, %v8105_v16   ;;  %v2463_v9 = vld [vmem:[#allocation2 + $0x19a] sm:$0xff] }
 0x150   : > { %v8457_v11 = vpop.permute.xlu1 %966  ;;  %v8460_v12 = vpop.permute.xlu0 %981 }
 0x151   : > { %11993 = vst [vmem:[#allocation90_spill] sm:$0xff] %v8457_v11  ;;  %1488 = vperm.xlu1 %7167, %v8108_v17   ;;  %11994 = vst [vmem:[#allocation91_spill] sm:$0xff] %v8460_v12  ;;  %1503 = vperm.xlu0 %7166, %v8111_v18  }
 0x154   : > { %v8463_v13 = vpop.permute.xlu1 %976  ;;  %v8466_v14 = vpop.permute.xlu0 %991 }
 0x155   : > { %11995 = vst [vmem:[#allocation92_spill] sm:$0xff] %v8463_v13  ;;  %1498 = vperm.xlu1 %7167, %v8114_v19   ;;  %11996 = vst [vmem:[#allocation93_spill] sm:$0xff] %v8466_v14  ;;  %1513 = vperm.xlu0 %7166, %v8117_v20   ;;  %v12156_v14 = vld [vmem:[#allocation23_spill] sm:$0xff] }
 0x158   : > { %v8469_v15 = vpop.permute.xlu1 %986  ;;  %v8472_v16 = vpop.permute.xlu0 %1001 }
 0x159   : > { %11997 = vst [vmem:[#allocation94_spill] sm:$0xff] %v8469_v15  ;;  %1508 = vperm.xlu1 %7167, %v8120_v21   ;;  %11998 = vst [vmem:[#allocation95_spill] sm:$0xff] %v8472_v16  ;;  %1523 = vperm.xlu0 %7166, %v8123_v22   ;;  %v12004_v16 = vld [vmem:[#allocation7_spill] sm:$0xff] }
 0x15c   : > { %v8475_v17 = vpop.permute.xlu1 %996  ;;  %v8478_v18 = vpop.permute.xlu0 %1011 }
 0x15d   : > { %11999 = vst [vmem:[#allocation96_spill] sm:$0xff] %v8475_v17  ;;  %1518 = vperm.xlu1 %7167, %v8126_v23   ;;  %12000 = vst [vmem:[#allocation97_spill] sm:$0xff] %v8478_v18  ;;  %1533 = vperm.xlu0 %7166, %v8129_v24   ;;  %v12006_v17 = vld [vmem:[#allocation8_spill] sm:$0xff]  ;;  %v12008_v18 = vld [vmem:[#allocation9_spill] sm:$0xff] }
 0x160   : > { %v8481_v19 = vpop.permute.xlu1 %1006  ;;  %v8484_v20 = vpop.permute.xlu0 %1021 }
 0x161   : > { %12001 = vst [vmem:[#allocation98_spill] sm:$0xff] %v8481_v19  ;;  %1528 = vperm.xlu1 %7167, %v8132_v25   ;;  %12002 = vst [vmem:[#allocation99_spill] sm:$0xff] %v8484_v20  ;;  %1543 = vperm.xlu0 %7166, %v8135_v29   ;;  %v12010_v19 = vld [vmem:[#allocation10_spill] sm:$0xff]  ;;  %v1418_v20 = vld [vmem:[#allocation2 + $0x181] sm:$0xff] }
 0x162   : > { %v12012_v29 = vld [vmem:[#allocation11_spill] sm:$0xff] }
 0x164   : > { %v8487_v21 = vpop.permute.xlu1 %1016  ;;  %v8490_v22 = vpop.permute.xlu0 %1031 }
 0x165   : > { %12003 = vst [vmem:[#allocation100_spill] sm:$0xff] %v8487_v21  ;;  %1538 = vperm.xlu1 %7167, %v12004_v16   ;;  %12005 = vst [vmem:[#allocation7_spill] sm:$0xff] %v8490_v22  ;;  %1553 = vperm.xlu0 %7166, %v12006_v17   ;;  %v12155_v22 = vld [vmem:[#allocation21_spill] sm:$0xff] }
 0x168   : > { %v8493_v23 = vpop.permute.xlu1 %1026  ;;  %v8496_v24 = vpop.permute.xlu0 %1041 }
 0x169   : > { %12007 = vst [vmem:[#allocation8_spill] sm:$0xff] %v8493_v23  ;;  %1548 = vperm.xlu1 %7167, %v12008_v18   ;;  %12009 = vst [vmem:[#allocation9_spill] sm:$0xff] %v8496_v24  ;;  %1563 = vperm.xlu0 %7166, %v12010_v19   ;;  %v1419_v23 = vld [vmem:[#allocation2 + $0x189] sm:$0xff] }
 0x16a   : > { %v12016_v18 = vld [vmem:[#allocation13_spill] sm:$0xff] }
 0x16c   : > { %v8499_v25 = vpop.permute.xlu1 %1036  ;;  %v8502_v21 = vpop.permute.xlu0 %1051 }
 0x16d   : > { %12011 = vst [vmem:[#allocation10_spill] sm:$0xff] %v8499_v25  ;;  %1558 = vperm.xlu1 %7167, %v12012_v29   ;;  %12013 = vst [vmem:[#allocation11_spill] sm:$0xff] %v8502_v21  ;;  %1573 = vperm.xlu0 %7166, %v1418_v20   ;;  %v12019_v25 = vld [vmem:[#allocation16_spill] sm:$0xff]  ;;  %v12021_v21 = vld [vmem:[#allocation18_spill] sm:$0xff] }
 0x170   : > { %v8504_v16 = vpop.permute.xlu1 %1046  ;;  %v8507_v17 = vpop.permute.xlu0 %1162 }
 0x171   : > { %12014 = vst [vmem:[#allocation101_spill] sm:$0xff] %v8504_v16  ;;  %1568 = vperm.xlu1 %7167, %v8160_v34   ;;  %12015 = vst [vmem:[#allocation102_spill] sm:$0xff] %v8507_v17  ;;  %1684 = vperm.xlu0 %7166, %v12016_v18   ;;  %v12023_v16 = vld [vmem:[#allocation20_spill] sm:$0xff]  ;;  %v12025_v17 = vld [vmem:[#allocation22_spill] sm:$0xff] }
 0x174   : > { %v8510_v24 = vpop.permute.xlu1 %1056  ;;  %v8512_v19 = vpop.permute.xlu0 %1172 }
 0x175   : > { %12017 = vst [vmem:[#allocation13_spill] sm:$0xff] %v8510_v24  ;;  %1578 = vperm.xlu1 %7167, %v1419_v23   ;;  %12018 = vst [vmem:[#allocation103_spill] sm:$0xff] %v8512_v19  ;;  %1694 = vperm.xlu0 %7166, %v12019_v25   ;;  %v12027_v24 = vld [vmem:[#allocation24_spill] sm:$0xff]  ;;  %v12029_v19 = vld [vmem:[#allocation26_spill] sm:$0xff] }
 0x178   : > { %v8515_v29 = vpop.permute.xlu1 %1167  ;;  %v8518_v20 = vpop.permute.xlu0 %1182 }
 0x179   : > { %12020 = vst [vmem:[#allocation16_spill] sm:$0xff] %v8515_v29  ;;  %1689 = vperm.xlu1 %7167, %v12021_v21   ;;  %12022 = vst [vmem:[#allocation18_spill] sm:$0xff] %v8518_v20  ;;  %1704 = vperm.xlu0 %7166, %v12023_v16   ;;  %v12031_v29 = vld [vmem:[#allocation28_spill] sm:$0xff]  ;;  %v12033_v20 = vld [vmem:[#allocation30_spill] sm:$0xff] }
 0x17c   : > { %v8521_v34 = vpop.permute.xlu1 %1177  ;;  %v8524_v18 = vpop.permute.xlu0 %1192 }
 0x17d   : > { %12024 = vst [vmem:[#allocation20_spill] sm:$0xff] %v8521_v34  ;;  %1699 = vperm.xlu1 %7167, %v12025_v17   ;;  %12026 = vst [vmem:[#allocation22_spill] sm:$0xff] %v8524_v18  ;;  %1714 = vperm.xlu0 %7166, %v12027_v24   ;;  %v12035_v34 = vld [vmem:[#allocation32_spill] sm:$0xff]  ;;  %v12037_v18 = vld [vmem:[#allocation34_spill] sm:$0xff] }
 0x180   : > { %v8527_v23 = vpop.permute.xlu1 %1187  ;;  %v8530_v25 = vpop.permute.xlu0 %1202 }
 0x181   : > { %12028 = vst [vmem:[#allocation24_spill] sm:$0xff] %v8527_v23  ;;  %1709 = vperm.xlu1 %7167, %v12029_v19   ;;  %12030 = vst [vmem:[#allocation26_spill] sm:$0xff] %v8530_v25  ;;  %1724 = vperm.xlu0 %7166, %v12031_v29   ;;  %v12039_v23 = vld [vmem:[#allocation36_spill] sm:$0xff]  ;;  %v12041_v25 = vld [vmem:[#allocation38_spill] sm:$0xff] }
 0x184   : > { %v8533_v21 = vpop.permute.xlu1 %1197  ;;  %v8536_v16 = vpop.permute.xlu0 %1212 }
 0x185   : > { %12032 = vst [vmem:[#allocation28_spill] sm:$0xff] %v8533_v21  ;;  %1719 = vperm.xlu1 %7167, %v12033_v20   ;;  %12034 = vst [vmem:[#allocation30_spill] sm:$0xff] %v8536_v16  ;;  %1734 = vperm.xlu0 %7166, %v12035_v34   ;;  %v12043_v21 = vld [vmem:[#allocation40_spill] sm:$0xff]  ;;  %v12045_v16 = vld [vmem:[#allocation42_spill] sm:$0xff] }
 0x188   : > { %v8539_v17 = vpop.permute.xlu1 %1207  ;;  %v8542_v24 = vpop.permute.xlu0 %1222 }
 0x189   : > { %12036 = vst [vmem:[#allocation32_spill] sm:$0xff] %v8539_v17  ;;  %1729 = vperm.xlu1 %7167, %v12037_v18   ;;  %12038 = vst [vmem:[#allocation34_spill] sm:$0xff] %v8542_v24  ;;  %1744 = vperm.xlu0 %7166, %v12039_v23   ;;  %v12047_v17 = vld [vmem:[#allocation44_spill] sm:$0xff]  ;;  %v12049_v24 = vld [vmem:[#allocation46_spill] sm:$0xff] }
 0x18c   : > { %v8545_v19 = vpop.permute.xlu1 %1217  ;;  %v8548_v29 = vpop.permute.xlu0 %1232 }
 0x18d   : > { %12040 = vst [vmem:[#allocation36_spill] sm:$0xff] %v8545_v19  ;;  %1739 = vperm.xlu1 %7167, %v12041_v25   ;;  %12042 = vst [vmem:[#allocation38_spill] sm:$0xff] %v8548_v29  ;;  %1754 = vperm.xlu0 %7166, %v12043_v21   ;;  %v12051_v19 = vld [vmem:[#allocation48_spill] sm:$0xff]  ;;  %v12053_v29 = vld [vmem:[#allocation50_spill] sm:$0xff] }
 0x190   : > { %v8551_v20 = vpop.permute.xlu1 %1227  ;;  %v8554_v34 = vpop.permute.xlu0 %1242 }
 0x191   : > { %12044 = vst [vmem:[#allocation40_spill] sm:$0xff] %v8551_v20  ;;  %1749 = vperm.xlu1 %7167, %v12045_v16   ;;  %12046 = vst [vmem:[#allocation42_spill] sm:$0xff] %v8554_v34  ;;  %1764 = vperm.xlu0 %7166, %v12047_v17   ;;  %v12055_v20 = vld [vmem:[#allocation52_spill] sm:$0xff]  ;;  %v12057_v34 = vld [vmem:[#allocation54_spill] sm:$0xff] }
 0x194   : > { %v8557_v18 = vpop.permute.xlu1 %1237  ;;  %v8560_v23 = vpop.permute.xlu0 %1252 }
 0x195   : > { %12048 = vst [vmem:[#allocation44_spill] sm:$0xff] %v8557_v18  ;;  %1759 = vperm.xlu1 %7167, %v12049_v24   ;;  %12050 = vst [vmem:[#allocation46_spill] sm:$0xff] %v8560_v23  ;;  %1774 = vperm.xlu0 %7166, %v12051_v19   ;;  %v12059_v18 = vld [vmem:[#allocation56_spill] sm:$0xff]  ;;  %v12061_v23 = vld [vmem:[#allocation58_spill] sm:$0xff] }
 0x198   : > { %v8563_v25 = vpop.permute.xlu1 %1247  ;;  %v8566_v21 = vpop.permute.xlu0 %1262 }
 0x199   : > { %12052 = vst [vmem:[#allocation48_spill] sm:$0xff] %v8563_v25  ;;  %1769 = vperm.xlu1 %7167, %v12053_v29   ;;  %12054 = vst [vmem:[#allocation50_spill] sm:$0xff] %v8566_v21  ;;  %1784 = vperm.xlu0 %7166, %v12055_v20   ;;  %v12063_v25 = vld [vmem:[#allocation60_spill] sm:$0xff]  ;;  %v12065_v21 = vld [vmem:[#allocation62_spill] sm:$0xff] }
 0x19c   : > { %v8569_v16 = vpop.permute.xlu1 %1257  ;;  %v8572_v17 = vpop.permute.xlu0 %1272 }
 0x19d   : > { %12056 = vst [vmem:[#allocation52_spill] sm:$0xff] %v8569_v16  ;;  %1779 = vperm.xlu1 %7167, %v12057_v34   ;;  %12058 = vst [vmem:[#allocation54_spill] sm:$0xff] %v8572_v17  ;;  %1794 = vperm.xlu0 %7166, %v12059_v18   ;;  %v12068_v17 = vld [vmem:[#allocation65_spill] sm:$0xff] }
 0x1a0   : > { %v8575_v24 = vpop.permute.xlu1 %1267  ;;  %v8578_v19 = vpop.permute.xlu0 %1282 }
 0x1a1   : > { %12060 = vst [vmem:[#allocation56_spill] sm:$0xff] %v8575_v24  ;;  %1789 = vperm.xlu1 %7167, %v12061_v23   ;;  %12062 = vst [vmem:[#allocation58_spill] sm:$0xff] %v8578_v19  ;;  %1804 = vperm.xlu0 %7166, %v12063_v25   ;;  %v8595_v19 = vld [vmem:[#allocation2 + $0x182] sm:$0xff] }
 0x1a4   : > { %v8581_v29 = vpop.permute.xlu1 %1277  ;;  %v8584_v20 = vpop.permute.xlu0 %1292 }
 0x1a5   : > { %12064 = vst [vmem:[#allocation60_spill] sm:$0xff] %v8581_v29  ;;  %1799 = vperm.xlu1 %7167, %v12065_v21   ;;  %12066 = vst [vmem:[#allocation62_spill] sm:$0xff] %v8584_v20  ;;  %1814 = vperm.xlu0 %7166, %v8289_v36   ;;  %v1911_v36 = vld [vmem:[#allocation2 + $0x30] sm:$0xff]  ;;  %v1916_v29 = vld [vmem:[#allocation2 + $0x68] sm:$0xff] }
 0x1a8   : > { %v8587_v34 = vpop.permute.xlu1 %1287  ;;  %v8590_v18 = vpop.permute.xlu0 %1302 }
 0x1a9   : > { %12067 = vst [vmem:[#allocation104_spill] sm:$0xff] %v8587_v34  ;;  %1809 = vperm.xlu1 %7167, %v12068_v17   ;;  %12069 = vst [vmem:[#allocation65_spill] sm:$0xff] %v8590_v18  ;;  %1824 = vperm.xlu0 %7166, %v8299_v3   ;;  %v8606_v18 = vld [vmem:[#allocation2 + $0x18a] sm:$0xff] }
 0x1ac   : > { %v8593_v23 = vpop.permute.xlu1 %1297  ;;  %v8598_v25 = vpop.permute.xlu0 %1312 }
 0x1ad   : > { %12070 = vst [vmem:[#allocation105_spill] sm:$0xff] %v8593_v23  ;;  %1819 = vperm.xlu1 %7167, %v8304_v30   ;;  %12071 = vst [vmem:[#allocation106_spill] sm:$0xff] %v8598_v25  ;;  %1834 = vperm.xlu0 %7166, %v8595_v19   ;;  %v1913_v23 = vld [vmem:[#allocation2 + $0x48] sm:$0xff]  ;;  %v1912_v25 = vld [vmem:[#allocation2 + $0x38] sm:$0xff] }
 0x1b0   : > { %v8601_v21 = vpop.permute.xlu1 %1307  ;;  %v8604_v17 = vpop.permute.xlu0 %1423 }
 0x1b1   : > { %12072 = vst [vmem:[#allocation107_spill] sm:$0xff] %v8601_v21  ;;  %1829 = vperm.xlu1 %7167, %v8312_v1   ;;  %12073 = vst [vmem:[#allocation108_spill] sm:$0xff] %v8604_v17  ;;  %1946 = vperm.xlu0 %7166, %v1911_v36   ;;  %v1915_v21 = vld [vmem:[#allocation2 + $0x60] sm:$0xff]  ;;  %v1914_v1 = vld [vmem:[#allocation2 + $0x50] sm:$0xff] }
 0x1b2   : > { %v1917_v36 = vld [vmem:[#allocation2 + $0x78] sm:$0xff] }
 0x1b4   : > { %v8608_v3 = vpop.permute.xlu1 %1317  ;;  %v8611_v30 = vpop.permute.xlu0 %1433 }
 0x1b5   : > { %12074 = vst [vmem:[#allocation109_spill] sm:$0xff] %v8608_v3  ;;  %1839 = vperm.xlu1 %7167, %v8606_v18   ;;  %12075 = vst [vmem:[#allocation110_spill] sm:$0xff] %v8611_v30  ;;  %1956 = vperm.xlu0 %7166, %v1913_v23   ;;  %v1919_v30 = vld [vmem:[#allocation2 + $0x90] sm:$0xff] }
 0x1b8   : > { %v8613_v34 = vpop.permute.xlu1 %1428  ;;  %v8615_v20 = vpop.permute.xlu0 %1443 }
 0x1b9   : > { %12076 = vst [vmem:[#allocation111_spill] sm:$0xff] %v8613_v34  ;;  %1951 = vperm.xlu1 %7167, %v1912_v25   ;;  %12077 = vst [vmem:[#allocation112_spill] sm:$0xff] %v8615_v20  ;;  %1966 = vperm.xlu0 %7166, %v1915_v21   ;;  %v1918_v34 = vld [vmem:[#allocation2 + $0x80] sm:$0xff]  ;;  %v1921_v20 = vld [vmem:[#allocation2 + $0xa8] sm:$0xff] }
 0x1bc   : > { %v8617_v17 = vpop.permute.xlu1 %1438  ;;  %v8619_v3 = vpop.permute.xlu0 %1453 }
 0x1bd   : > { %12078 = vst [vmem:[#allocation113_spill] sm:$0xff] %v8617_v17  ;;  %1961 = vperm.xlu1 %7167, %v1914_v1   ;;  %12079 = vst [vmem:[#allocation114_spill] sm:$0xff] %v8619_v3  ;;  %1976 = vperm.xlu0 %7166, %v1917_v36   ;;  %v1920_v17 = vld [vmem:[#allocation2 + $0x98] sm:$0xff]  ;;  %v1923_v3 = vld [vmem:[#allocation2 + $0xc0] sm:$0xff] }
 0x1c0   : > { %v8621_v24 = vpop.permute.xlu1 %1448  ;;  %v8623_v23 = vpop.permute.xlu0 %1463 }
 0x1c1   : > { %12080 = vst [vmem:[#allocation115_spill] sm:$0xff] %v8621_v24  ;;  %1971 = vperm.xlu1 %7167, %v1916_v29   ;;  %12081 = vst [vmem:[#allocation116_spill] sm:$0xff] %v8623_v23  ;;  %1986 = vperm.xlu0 %7166, %v1919_v30   ;;  %v1922_v24 = vld [vmem:[#allocation2 + $0xb0] sm:$0xff]  ;;  %v1925_v23 = vld [vmem:[#allocation2 + $0xd8] sm:$0xff] }
 0x1c4   : > { %v8625_v25 = vpop.permute.xlu1 %1458  ;;  %v8627_v21 = vpop.permute.xlu0 %1473 }
 0x1c5   : > { %12082 = vst [vmem:[#allocation117_spill] sm:$0xff] %v8625_v25  ;;  %1981 = vperm.xlu1 %7167, %v1918_v34   ;;  %12083 = vst [vmem:[#allocation118_spill] sm:$0xff] %v8627_v21  ;;  %1996 = vperm.xlu0 %7166, %v1921_v20   ;;  %v1924_v25 = vld [vmem:[#allocation2 + $0xc8] sm:$0xff]  ;;  %v1927_v21 = vld [vmem:[#allocation2 + $0xf0] sm:$0xff] }
 0x1c8   : > { %v8629_v1 = vpop.permute.xlu1 %1468  ;;  %v8631_v36 = vpop.permute.xlu0 %1483 }
 0x1c9   : > { %12084 = vst [vmem:[#allocation119_spill] sm:$0xff] %v8629_v1  ;;  %1991 = vperm.xlu1 %7167, %v1920_v17   ;;  %12085 = vst [vmem:[#allocation120_spill] sm:$0xff] %v8631_v36  ;;  %2006 = vperm.xlu0 %7166, %v1923_v3   ;;  %v1926_v1 = vld [vmem:[#allocation2 + $0xe0] sm:$0xff]  ;;  %v1929_v36 = vld [vmem:[#allocation2 + $0x108] sm:$0xff] }
 0x1cc   : > { %v8633_v29 = vpop.permute.xlu1 %1478  ;;  %v8635_v30 = vpop.permute.xlu0 %1493 }
 0x1cd   : > { %12086 = vst [vmem:[#allocation121_spill] sm:$0xff] %v8633_v29  ;;  %2001 = vperm.xlu1 %7167, %v1922_v24   ;;  %12087 = vst [vmem:[#allocation122_spill] sm:$0xff] %v8635_v30  ;;  %2016 = vperm.xlu0 %7166, %v1925_v23   ;;  %v1928_v29 = vld [vmem:[#allocation2 + $0xf8] sm:$0xff]  ;;  %v1931_v30 = vld [vmem:[#allocation2 + $0x120] sm:$0xff] }
 0x1d0   : > { %v8637_v34 = vpop.permute.xlu1 %1488  ;;  %v8639_v20 = vpop.permute.xlu0 %1503 }
 0x1d1   : > { %12088 = vst [vmem:[#allocation123_spill] sm:$0xff] %v8637_v34  ;;  %2011 = vperm.xlu1 %7167, %v1924_v25   ;;  %12089 = vst [vmem:[#allocation124_spill] sm:$0xff] %v8639_v20  ;;  %2026 = vperm.xlu0 %7166, %v1927_v21   ;;  %v1930_v34 = vld [vmem:[#allocation2 + $0x110] sm:$0xff]  ;;  %v1933_v20 = vld [vmem:[#allocation2 + $0x138] sm:$0xff] }
 0x1d4   : > { %v8641_v17 = vpop.permute.xlu1 %1498  ;;  %v8643_v3 = vpop.permute.xlu0 %1513 }
 0x1d5   : > { %12090 = vst [vmem:[#allocation125_spill] sm:$0xff] %v8641_v17  ;;  %2021 = vperm.xlu1 %7167, %v1926_v1   ;;  %12091 = vst [vmem:[#allocation126_spill] sm:$0xff] %v8643_v3  ;;  %2036 = vperm.xlu0 %7166, %v1929_v36   ;;  %v1932_v17 = vld [vmem:[#allocation2 + $0x128] sm:$0xff]  ;;  %v1935_v3 = vld [vmem:[#allocation2 + $0x150] sm:$0xff] }
 0x1d8   : > { %v8645_v24 = vpop.permute.xlu1 %1508  ;;  %v8647_v23 = vpop.permute.xlu0 %1523 }
 0x1d9   : > { %12092 = vst [vmem:[#allocation127_spill] sm:$0xff] %v8645_v24  ;;  %2031 = vperm.xlu1 %7167, %v1928_v29   ;;  %12093 = vst [vmem:[#allocation128_spill] sm:$0xff] %v8647_v23  ;;  %2046 = vperm.xlu0 %7166, %v1931_v30   ;;  %v1934_v24 = vld [vmem:[#allocation2 + $0x140] sm:$0xff]  ;;  %v1937_v23 = vld [vmem:[#allocation2 + $0x168] sm:$0xff] }
 0x1dc   : > { %v8649_v25 = vpop.permute.xlu1 %1518  ;;  %v8651_v21 = vpop.permute.xlu0 %1533 }
 0x1dd   : > { %12094 = vst [vmem:[#allocation129_spill] sm:$0xff] %v8649_v25  ;;  %2041 = vperm.xlu1 %7167, %v1930_v34   ;;  %12095 = vst [vmem:[#allocation130_spill] sm:$0xff] %v8651_v21  ;;  %2056 = vperm.xlu0 %7166, %v1933_v20   ;;  %v1936_v25 = vld [vmem:[#allocation2 + $0x158] sm:$0xff]  ;;  %v12154_v21 = vld [vmem:[#allocation19_spill] sm:$0xff] }
 0x1e0   : > { %v8653_v1 = vpop.permute.xlu1 %1528  ;;  %v8655_v36 = vpop.permute.xlu0 %1543 }
 0x1e1   : > { %12096 = vst [vmem:[#allocation131_spill] sm:$0xff] %v8653_v1  ;;  %2051 = vperm.xlu1 %7167, %v1932_v17   ;;  %12097 = vst [vmem:[#allocation132_spill] sm:$0xff] %v8655_v36  ;;  %2066 = vperm.xlu0 %7166, %v1935_v3   ;;  %v1938_v1 = vld [vmem:[#allocation2 + $0x170] sm:$0xff]  ;;  %v1941_v36 = vld [vmem:[#allocation2 + $0x198] sm:$0xff] }
 0x1e4   : > { %v8657_v29 = vpop.permute.xlu1 %1538  ;;  %v8659_v30 = vpop.permute.xlu0 %1553 }
 0x1e5   : > { %12098 = vst [vmem:[#allocation133_spill] sm:$0xff] %v8657_v29  ;;  %2061 = vperm.xlu1 %7167, %v1934_v24   ;;  %12099 = vst [vmem:[#allocation134_spill] sm:$0xff] %v8659_v30  ;;  %2076 = vperm.xlu0 %7166, %v1937_v23   ;;  %v2172_v30 = vld [vmem:[#allocation2 + $0x31] sm:$0xff]  ;;  %v2455_v29 = vld [vmem:[#allocation2 + $0x13a] sm:$0xff] }
 0x1e8   : > { %v8661_v34 = vpop.permute.xlu1 %1548  ;;  %v8663_v20 = vpop.permute.xlu0 %1563 }
 0x1e9   : > { %12100 = vst [vmem:[#allocation135_spill] sm:$0xff] %v8661_v34  ;;  %2071 = vperm.xlu1 %7167, %v1936_v25   ;;  %12101 = vst [vmem:[#allocation136_spill] sm:$0xff] %v8663_v20  ;;  %2086 = vperm.xlu0 %7166, %v8401_v51   ;;  %v1942_v25 = vld [vmem:[#allocation2 + $0x1a0] sm:$0xff]  ;;  %v2174_v34 = vld [vmem:[#allocation2 + $0x49] sm:$0xff] }
 0x1ec   : > { %v8666_v17 = vpop.permute.xlu1 %1558  ;;  %v8668_v3 = vpop.permute.xlu0 %1573 }
 0x1ed   : > { %12102 = vst [vmem:[#allocation137_spill] sm:$0xff] %v8666_v17  ;;  %2081 = vperm.xlu1 %7167, %v1938_v1   ;;  %12103 = vst [vmem:[#allocation138_spill] sm:$0xff] %v8668_v3  ;;  %2096 = vperm.xlu0 %7166, %v1941_v36   ;;  %v2173_v17 = vld [vmem:[#allocation2 + $0x39] sm:$0xff]  ;;  %v2176_v36 = vld [vmem:[#allocation2 + $0x61] sm:$0xff] }
 0x1ee   : > { %v2175_v3 = vld [vmem:[#allocation2 + $0x51] sm:$0xff] }
 0x1f0   : > { %v8670_v24 = vpop.permute.xlu1 %1568  ;;  %v8673_v23 = vpop.permute.xlu0 %1684 }
 0x1f1   : > { %12104 = vst [vmem:[#allocation139_spill] sm:$0xff] %v8670_v24  ;;  %2091 = vperm.xlu1 %7167, %v8412_v60   ;;  %12105 = vst [vmem:[#allocation140_spill] sm:$0xff] %v8673_v23  ;;  %2207 = vperm.xlu0 %7166, %v2172_v30   ;;  %v2178_v23 = vld [vmem:[#allocation2 + $0x79] sm:$0xff] }
 0x1f4   : > { %v8675_v20 = vpop.permute.xlu1 %1578  ;;  %v8677_v51 = vpop.permute.xlu0 %1694 }
 0x1f5   : > { %12106 = vst [vmem:[#allocation141_spill] sm:$0xff] %v8675_v20  ;;  %2101 = vperm.xlu1 %7167, %v1942_v25   ;;  %12107 = vst [vmem:[#allocation142_spill] sm:$0xff] %v8677_v51  ;;  %2217 = vperm.xlu0 %7166, %v2174_v34   ;;  %v2177_v20 = vld [vmem:[#allocation2 + $0x69] sm:$0xff]  ;;  %v2180_v51 = vld [vmem:[#allocation2 + $0x91] sm:$0xff] }
 0x1f8   : > { %v8679_v1 = vpop.permute.xlu1 %1689  ;;  %v8681_v24 = vpop.permute.xlu0 %1704 }
 0x1f9   : > { %12108 = vst [vmem:[#allocation143_spill] sm:$0xff] %v8679_v1  ;;  %2212 = vperm.xlu1 %7167, %v2173_v17   ;;  %12109 = vst [vmem:[#allocation144_spill] sm:$0xff] %v8681_v24  ;;  %2227 = vperm.xlu0 %7166, %v2176_v36   ;;  %v2179_v1 = vld [vmem:[#allocation2 + $0x81] sm:$0xff]  ;;  %v2182_v24 = vld [vmem:[#allocation2 + $0xa9] sm:$0xff] }
 0x1fc   : > { %v8683_v60 = vpop.permute.xlu1 %1699  ;;  %v8685_v30 = vpop.permute.xlu0 %1714 }
 0x1fd   : > { %12110 = vst [vmem:[#allocation145_spill] sm:$0xff] %v8683_v60  ;;  %2222 = vperm.xlu1 %7167, %v2175_v3   ;;  %12111 = vst [vmem:[#allocation146_spill] sm:$0xff] %v8685_v30  ;;  %2237 = vperm.xlu0 %7166, %v2178_v23   ;;  %v2181_v60 = vld [vmem:[#allocation2 + $0x99] sm:$0xff]  ;;  %v2184_v30 = vld [vmem:[#allocation2 + $0xc1] sm:$0xff] }
 0x200   : > { %v8687_v25 = vpop.permute.xlu1 %1709  ;;  %v8689_v34 = vpop.permute.xlu0 %1724 }
 0x201   : > { %12112 = vst [vmem:[#allocation147_spill] sm:$0xff] %v8687_v25  ;;  %2232 = vperm.xlu1 %7167, %v2177_v20   ;;  %12113 = vst [vmem:[#allocation148_spill] sm:$0xff] %v8689_v34  ;;  %2247 = vperm.xlu0 %7166, %v2180_v51   ;;  %v2183_v25 = vld [vmem:[#allocation2 + $0xb1] sm:$0xff]  ;;  %v2186_v34 = vld [vmem:[#allocation2 + $0xd9] sm:$0xff] }
 0x204   : > { %v8691_v17 = vpop.permute.xlu1 %1719  ;;  %v8693_v36 = vpop.permute.xlu0 %1734 }
 0x205   : > { %12114 = vst [vmem:[#allocation149_spill] sm:$0xff] %v8691_v17  ;;  %2242 = vperm.xlu1 %7167, %v2179_v1   ;;  %12115 = vst [vmem:[#allocation150_spill] sm:$0xff] %v8693_v36  ;;  %2257 = vperm.xlu0 %7166, %v2182_v24   ;;  %v2185_v17 = vld [vmem:[#allocation2 + $0xc9] sm:$0xff]  ;;  %v2188_v36 = vld [vmem:[#allocation2 + $0xf1] sm:$0xff] }
 0x208   : > { %v8695_v3 = vpop.permute.xlu1 %1729  ;;  %v8697_v23 = vpop.permute.xlu0 %1744 }
 0x209   : > { %12116 = vst [vmem:[#allocation151_spill] sm:$0xff] %v8695_v3  ;;  %2252 = vperm.xlu1 %7167, %v2181_v60   ;;  %12117 = vst [vmem:[#allocation152_spill] sm:$0xff] %v8697_v23  ;;  %2267 = vperm.xlu0 %7166, %v2184_v30   ;;  %v2187_v3 = vld [vmem:[#allocation2 + $0xe1] sm:$0xff]  ;;  %v2190_v23 = vld [vmem:[#allocation2 + $0x109] sm:$0xff] }
 0x20c   : > { %v8699_v20 = vpop.permute.xlu1 %1739  ;;  %v8701_v51 = vpop.permute.xlu0 %1754 }
 0x20d   : > { %12118 = vst [vmem:[#allocation153_spill] sm:$0xff] %v8699_v20  ;;  %2262 = vperm.xlu1 %7167, %v2183_v25   ;;  %12119 = vst [vmem:[#allocation154_spill] sm:$0xff] %v8701_v51  ;;  %2277 = vperm.xlu0 %7166, %v2186_v34   ;;  %v2189_v20 = vld [vmem:[#allocation2 + $0xf9] sm:$0xff]  ;;  %v2192_v51 = vld [vmem:[#allocation2 + $0x121] sm:$0xff] }
 0x210   : > { %v8703_v1 = vpop.permute.xlu1 %1749  ;;  %v8705_v24 = vpop.permute.xlu0 %1764 }
 0x211   : > { %12120 = vst [vmem:[#allocation155_spill] sm:$0xff] %v8703_v1  ;;  %2272 = vperm.xlu1 %7167, %v2185_v17   ;;  %12121 = vst [vmem:[#allocation156_spill] sm:$0xff] %v8705_v24  ;;  %2287 = vperm.xlu0 %7166, %v2188_v36   ;;  %v2191_v1 = vld [vmem:[#allocation2 + $0x111] sm:$0xff]  ;;  %v2194_v24 = vld [vmem:[#allocation2 + $0x139] sm:$0xff] }
 0x214   : > { %v8707_v60 = vpop.permute.xlu1 %1759  ;;  %v8709_v30 = vpop.permute.xlu0 %1774 }
 0x215   : > { %12122 = vst [vmem:[#allocation157_spill] sm:$0xff] %v8707_v60  ;;  %2282 = vperm.xlu1 %7167, %v2187_v3   ;;  %12123 = vst [vmem:[#allocation158_spill] sm:$0xff] %v8709_v30  ;;  %2297 = vperm.xlu0 %7166, %v2190_v23   ;;  %v2193_v60 = vld [vmem:[#allocation2 + $0x129] sm:$0xff]  ;;  %v2196_v30 = vld [vmem:[#allocation2 + $0x151] sm:$0xff] }
 0x218   : > { %v8711_v25 = vpop.permute.xlu1 %1769  ;;  %v8713_v34 = vpop.permute.xlu0 %1784 }
 0x219   : > { %12124 = vst [vmem:[#allocation159_spill] sm:$0xff] %v8711_v25  ;;  %2292 = vperm.xlu1 %7167, %v2189_v20   ;;  %12125 = vst [vmem:[#allocation160_spill] sm:$0xff] %v8713_v34  ;;  %2307 = vperm.xlu0 %7166, %v2192_v51   ;;  %v2195_v25 = vld [vmem:[#allocation2 + $0x141] sm:$0xff]  ;;  %v2198_v34 = vld [vmem:[#allocation2 + $0x169] sm:$0xff] }
 0x21c   : > { %v8715_v17 = vpop.permute.xlu1 %1779  ;;  %v8717_v36 = vpop.permute.xlu0 %1794 }
 0x21d   : > { %12126 = vst [vmem:[#allocation161_spill] sm:$0xff] %v8715_v17  ;;  %2302 = vperm.xlu1 %7167, %v2191_v1   ;;  %12127 = vst [vmem:[#allocation162_spill] sm:$0xff] %v8717_v36  ;;  %2317 = vperm.xlu0 %7166, %v2194_v24   ;;  %v2197_v17 = vld [vmem:[#allocation2 + $0x159] sm:$0xff] }
 0x21e   : > { %v2433_v36 = vld [vmem:[#allocation2 + $0x32] sm:$0xff] }
 0x220   : > { %v8719_v3 = vpop.permute.xlu1 %1789  ;;  %v8721_v23 = vpop.permute.xlu0 %1804 }
 0x221   : > { %12128 = vst [vmem:[#allocation163_spill] sm:$0xff] %v8719_v3  ;;  %2312 = vperm.xlu1 %7167, %v2193_v60   ;;  %12129 = vst [vmem:[#allocation164_spill] sm:$0xff] %v8721_v23  ;;  %2327 = vperm.xlu0 %7166, %v2196_v30   ;;  %v2199_v3 = vld [vmem:[#allocation2 + $0x171] sm:$0xff]  ;;  %v12135_v23 = vmov 0.0  }
 0x222   : > { %v2435_v30 = vld [vmem:[#allocation2 + $0x4a] sm:$0xff]  ;;  %2770 = vst.msk [vmem:[#allocation3 + $0x18] sm:$0xff] %vm2765_vm2, %v12135_v23  ;;  %2771 = vst.msk [vmem:[#allocation3 + $0x20] sm:$0xff] %vm2765_vm2, %v12135_v23 }
 0x223   : > { %2766 = vst.msk [vmem:[#allocation3] sm:$0xff] %vm2765_vm2, %v12135_v23  ;;  %2767 = vst.msk [vmem:[#allocation3 + $0x8] sm:$0xff] %vm2765_vm2, %v12135_v23 }
 0x224   : > { %v8723_v20 = vpop.permute.xlu1 %1799  ;;  %v8725_v51 = vpop.permute.xlu0 %1814  ;;  %2773 = vst.msk [vmem:[#allocation3 + $0x30] sm:$0xff] %vm2765_vm2, %v12135_v23  ;;  %2774 = vst.msk [vmem:[#allocation3 + $0x38] sm:$0xff] %vm2765_vm2, %v12135_v23 }
 0x225   : > { %12130 = vst [vmem:[#allocation165_spill] sm:$0xff] %v8723_v20  ;;  %2322 = vperm.xlu1 %7167, %v2195_v25   ;;  %12131 = vst [vmem:[#allocation166_spill] sm:$0xff] %v8725_v51  ;;  %2337 = vperm.xlu0 %7166, %v2198_v34   ;;  %v2434_v34 = vld [vmem:[#allocation2 + $0x3a] sm:$0xff]  ;;  %v2459_v51 = vld [vmem:[#allocation2 + $0x16a] sm:$0xff] }
 0x226   : > { %2776 = vst.msk [vmem:[#allocation3 + $0x48] sm:$0xff] %vm2765_vm2, %v12135_v23  ;;  %2777 = vst.msk [vmem:[#allocation3 + $0x50] sm:$0xff] %vm2765_vm2, %v12135_v23 }
 0x227   : > { %2779 = vst.msk [vmem:[#allocation3 + $0x60] sm:$0xff] %vm2765_vm2, %v12135_v23  ;;  %2780 = vst.msk [vmem:[#allocation3 + $0x68] sm:$0xff] %vm2765_vm2, %v12135_v23 }
 0x228   : > { %v8727_v1 = vpop.permute.xlu1 %1809  ;;  %v8729_v24 = vpop.permute.xlu0 %1824  ;;  %2782 = vst.msk [vmem:[#allocation3 + $0x78] sm:$0xff] %vm2765_vm2, %v12135_v23  ;;  %2783 = vst.msk [vmem:[#allocation3 + $0x80] sm:$0xff] %vm2765_vm2, %v12135_v23 }
 0x229   : > { %12132 = vst [vmem:[#allocation167_spill] sm:$0xff] %v8727_v1  ;;  %2332 = vperm.xlu1 %7167, %v2197_v17   ;;  %12133 = vst [vmem:[#allocation168_spill] sm:$0xff] %v8729_v24  ;;  %2468 = vperm.xlu0 %7166, %v2433_v36   ;;  %v2458_v36 = vld [vmem:[#allocation2 + $0x15a] sm:$0xff]  ;;  %v2457_v24 = vld [vmem:[#allocation2 + $0x152] sm:$0xff] }
 0x22a   : > { %2785 = vst.msk [vmem:[#allocation3 + $0x90] sm:$0xff] %vm2765_vm2, %v12135_v23  ;;  %2786 = vst.msk [vmem:[#allocation3 + $0x98] sm:$0xff] %vm2765_vm2, %v12135_v23 }
 0x22b   : > { %2788 = vst.msk [vmem:[#allocation3 + $0xa8] sm:$0xff] %vm2765_vm2, %v12135_v23  ;;  %2789 = vst.msk [vmem:[#allocation3 + $0xb0] sm:$0xff] %vm2765_vm2, %v12135_v23 }
 0x22c   : > { %v8731_v60 = vpop.permute.xlu1 %1819  ;;  %2791 = vst.msk [vmem:[#allocation3 + $0xc0] sm:$0xff] %vm2765_vm2, %v12135_v23  ;;  %2792 = vst.msk [vmem:[#allocation3 + $0xc8] sm:$0xff] %vm2765_vm2, %v12135_v23  ;;  %v8805_v25 = vpop.permute.xlu0 %1834 }
 0x22d   : > { %12134 = vst [vmem:[#allocation169_spill] sm:$0xff] %v8731_v60  ;;  %2794 = vst.msk [vmem:[#allocation3 + $0xd8] sm:$0xff] %vm2765_vm2, %v12135_v23  ;;  %2342 = vperm.xlu1 %7167, %v2199_v3   ;;  %2478 = vperm.xlu0 %7166, %v2435_v30   ;;  %v2436_v30 = vld [vmem:[#allocation2 + $0x52] sm:$0xff] }
 0x22e   : > { %2795 = vst.msk [vmem:[#allocation3 + $0xe0] sm:$0xff] %vm2765_vm2, %v12135_v23  ;;  %2797 = vst.msk [vmem:[#allocation3 + $0xf0] sm:$0xff] %vm2765_vm2, %v12135_v23 }
 0x22f   : > { %2798 = vst.msk [vmem:[#allocation3 + $0xf8] sm:$0xff] %vm2765_vm2, %v12135_v23  ;;  %2800 = vst.msk [vmem:[#allocation3 + $0x108] sm:$0xff] %vm2765_vm2, %v12135_v23 }
 0x230   : > { %2801 = vst.msk [vmem:[#allocation3 + $0x110] sm:$0xff] %vm2765_vm2, %v12135_v23  ;;  %2803 = vst.msk [vmem:[#allocation3 + $0x120] sm:$0xff] %vm2765_vm2, %v12135_v23  ;;  %v8807_v17 = vpop.permute.xlu1 %1829  ;;  %v8809_v60 = vpop.permute.xlu0 %1946 }
 0x231   : > { %2804 = vst.msk [vmem:[#allocation3 + $0x128] sm:$0xff] %vm2765_vm2, %v12135_v23  ;;  %2806 = vst.msk [vmem:[#allocation3 + $0x138] sm:$0xff] %vm2765_vm2, %v12135_v23  ;;  %2473 = vperm.xlu1 %7167, %v2434_v34   ;;  %2593 = vperm.xlu0 %7166, %v2458_v36   ;;  %v2200_v36 = vld [vmem:[#allocation2 + $0x181] sm:$0xff] }
 0x232   : > { %2807 = vst.msk [vmem:[#allocation3 + $0x140] sm:$0xff] %vm2765_vm2, %v12135_v23  ;;  %2809 = vst.msk [vmem:[#allocation3 + $0x150] sm:$0xff] %vm2765_vm2, %v12135_v23 }
 0x233   : > { %2810 = vst.msk [vmem:[#allocation3 + $0x158] sm:$0xff] %vm2765_vm2, %v12135_v23  ;;  %2812 = vst.msk [vmem:[#allocation3 + $0x168] sm:$0xff] %vm2765_vm2, %v12135_v23 }
 0x234   : > { %2813 = vst.msk [vmem:[#allocation3 + $0x170] sm:$0xff] %vm2765_vm2, %v12135_v23  ;;  %2815 = vst.msk [vmem:[#allocation3 + $0x180] sm:$0xff] %vm2765_vm2, %v12135_v23  ;;  %v8811_v1 = vpop.permute.xlu1 %1839  ;;  %v8813_v20 = vpop.permute.xlu0 %1956 }
 0x235   : > { %2816 = vst.msk [vmem:[#allocation3 + $0x188] sm:$0xff] %vm2765_vm2, %v12135_v23  ;;  %2818 = vst.msk [vmem:[#allocation3 + $0x198] sm:$0xff] %vm2765_vm2, %v12135_v23  ;;  %2588 = vperm.xlu1 %7167, %v2457_v24   ;;  %2598 = vperm.xlu0 %7166, %v2459_v51   ;;  %v2456_v24 = vld [vmem:[#allocation2 + $0x142] sm:$0xff] }
 0x236   : > { %2819 = vst.msk [vmem:[#allocation3 + $0x1a0] sm:$0xff] %vm2765_vm2, %v12135_v23  ;;  %12136 = vst [vmem:[#allocation170_spill] sm:$0xff] %v8805_v25  ;;  %v2437_v25 = vld [vmem:[#allocation2 + $0x62] sm:$0xff] }
 0x237   : > { %12137 = vst [vmem:[#allocation171_spill] sm:$0xff] %v8807_v17  ;;  %12138 = vst [vmem:[#allocation172_spill] sm:$0xff] %v8809_v60 }
 0x238   : > { %12139 = vst [vmem:[#allocation173_spill] sm:$0xff] %v8811_v1  ;;  %12140 = vst [vmem:[#allocation174_spill] sm:$0xff] %v8813_v20  ;;  %v8815_v3 = vpop.permute.xlu1 %1951  ;;  %v8853_v51 = vpop.permute.xlu0 %1966  ;;  %v2460_v20 = vld [vmem:[#allocation2 + $0x172] sm:$0xff] }
 0x239   : > { %12141 = vst [vmem:[#allocation175_spill] sm:$0xff] %v8815_v3  ;;  %2772 = vst.msk [vmem:[#allocation3 + $0x28] sm:$0x3] %vm2768_vm3, %v12135_v23  ;;  %2578 = vperm.xlu1 %7167, %v2455_v29   ;;  %2483 = vperm.xlu0 %7166, %v2436_v30   ;;  %v6753_v30 = vld [vmem:[%s11846_s1] ss:$0 sm:$0xff] }
 0x23a   : > { %2769 = vst.msk [vmem:[#allocation3 + $0x10] sm:$0x3] %vm2768_vm3, %v12135_v23  ;;  %2775 = vst.msk [vmem:[#allocation3 + $0x40] sm:$0x3] %vm2768_vm3, %v12135_v23  ;;  %v544_v16 = vmul.f32 %v6753_v30, %v12154_v21  ;;  %v547_v15 = vmul.f32 %v6753_v30, %v12155_v22  ;;  %v8899_v22 = vld [vmem:[%s11846_s1 + $0x1] ss:$0 sm:$0xff]  ;;  %v8916_v7 = vmul.f32 %v6753_v30, %v12167_v8 }
 0x23b   : > { %2778 = vst.msk [vmem:[#allocation3 + $0x58] sm:$0x3] %vm2768_vm3, %v12135_v23  ;;  %2781 = vst.msk [vmem:[#allocation3 + $0x70] sm:$0x3] %vm2768_vm3, %v12135_v23  ;;  %v8935_v8 = vmul.f32 %v6753_v30, %v12174_v2  ;;  %v12184_v2 = vld [vmem:[#allocation63_spill] sm:$0xff] }
 0x23c   : > { %2784 = vst.msk [vmem:[#allocation3 + $0x88] sm:$0x3] %vm2768_vm3, %v12135_v23  ;;  %2787 = vst.msk [vmem:[#allocation3 + $0xa0] sm:$0x3] %vm2768_vm3, %v12135_v23  ;;  %v8855_v34 = vpop.permute.xlu1 %1961  ;;  %v8857_v3 = vpop.permute.xlu0 %1976 }
 0x23d   : > { %2790 = vst.msk [vmem:[#allocation3 + $0xb8] sm:$0x3] %vm2768_vm3, %v12135_v23  ;;  %2793 = vst.msk [vmem:[#allocation3 + $0xd0] sm:$0x3] %vm2768_vm3, %v12135_v23  ;;  %2583 = vperm.xlu1 %7167, %v2456_v24   ;;  %2347 = vperm.xlu0 %7166, %v2200_v36  }
 0x23e   : > { %2796 = vst.msk [vmem:[#allocation3 + $0xe8] sm:$0x3] %vm2768_vm3, %v12135_v23  ;;  %2799 = vst.msk [vmem:[#allocation3 + $0x100] sm:$0x3] %vm2768_vm3, %v12135_v23 }
 0x23f   : > { %2802 = vst.msk [vmem:[#allocation3 + $0x118] sm:$0x3] %vm2768_vm3, %v12135_v23  ;;  %2805 = vst.msk [vmem:[#allocation3 + $0x130] sm:$0x3] %vm2768_vm3, %v12135_v23 }
 0x240   : > { %2808 = vst.msk [vmem:[#allocation3 + $0x148] sm:$0x3] %vm2768_vm3, %v12135_v23  ;;  %2811 = vst.msk [vmem:[#allocation3 + $0x160] sm:$0x3] %vm2768_vm3, %v12135_v23  ;;  %v8859_v1 = vpop.permute.xlu1 %1971  ;;  %v8861_v17 = vpop.permute.xlu0 %1986 }
 0x241   : > { %2814 = vst.msk [vmem:[#allocation3 + $0x178] sm:$0x3] %vm2768_vm3, %v12135_v23  ;;  %2817 = vst.msk [vmem:[#allocation3 + $0x190] sm:$0x3] %vm2768_vm3, %v12135_v23  ;;  %2603 = vperm.xlu1 %7167, %v2460_v20   ;;  %2608 = vperm.xlu0 %7166, %v8595_v19   ;;  %v2202_v20 = vld [vmem:[#allocation2 + $0x199] sm:$0xff] }
 0x242   : > { %2820 = vst.msk [vmem:[#allocation3 + $0x1a8] sm:$0x3] %vm2768_vm3, %v12135_v23  ;;  %12142 = vst [vmem:[#allocation176_spill] sm:$0xff] %v8853_v51  ;;  %v2438_v23 = vld [vmem:[#allocation2 + $0x6a] sm:$0xff]  ;;  %v12152_v19 = vld [vmem:[#allocation15_spill] sm:$0xff] }
 0x243   : > { %12143 = vst [vmem:[#allocation177_spill] sm:$0xff] %v8855_v34  ;;  %12144 = vst [vmem:[#allocation178_spill] sm:$0xff] %v8857_v3  ;;  %v2201_v3 = vld [vmem:[#allocation2 + $0x189] sm:$0xff]  ;;  %v12151_v34 = vld [vmem:[#allocation14_spill] sm:$0xff]  ;;  %v543_v60 = vmul.f32 %v6753_v30, %v12152_v19 }
 0x244   : > { %12145 = vst [vmem:[#allocation179_spill] sm:$0xff] %v8859_v1  ;;  %12146 = vst [vmem:[#allocation180_spill] sm:$0xff] %v8861_v17  ;;  %v8864_v29 = vpop.permute.xlu1 %1981  ;;  %v8869_v24 = vpop.permute.xlu0 %1996  ;;  %v12150_v1 = vld [vmem:[#allocation12_spill] sm:$0xff]  ;;  %v542_v51 = vmul.f32 %v6753_v30, %v12151_v34  ;;  %v12160_v34 = vld [vmem:[#allocation29_spill] sm:$0xff] }
 0x245   : > { %12147 = vst [vmem:[#allocation181_spill] sm:$0xff] %v8864_v29  ;;  %2488 = vperm.xlu1 %7167, %v2437_v25   ;;  %12148 = vst [vmem:[#allocation182_spill] sm:$0xff] %v8869_v24  ;;  %2493 = vperm.xlu0 %7166, %v2438_v23   ;;  %v541_v17 = vmul.f32 %v6753_v30, %v12150_v1  ;;  %v12153_v29 = vld [vmem:[#allocation17_spill] sm:$0xff]  ;;  %v8880_v24 = vmul.f32 %v6753_v30, %v12156_v14  ;;  %v12159_v1 = vld [vmem:[#allocation27_spill] sm:$0xff] }
 0x246   : > { %v545_v25 = vmul.f32 %v6753_v30, %v12153_v29  ;;  %v8888_v12 = vmul.f32 %v6753_v30, %v12159_v1  ;;  %v8891_v19 = vmul.f32 %v6753_v30, %v12160_v34  ;;  %v12162_v14 = vld [vmem:[#allocation33_spill] sm:$0xff]  ;;  %v12165_v34 = vld [vmem:[#allocation39_spill] sm:$0xff]  ;;  %12175 = vst [vmem:[#allocation17_spill] sm:$0xff] %v8935_v8  ;;  %v8954_v8 = vmul.f32 %v6753_v30, %v12184_v2 }
 0x247   : > { %v8902_v21 = vmul.f32 %v6753_v30, %v12162_v14  ;;  %v12164_v1 = vld [vmem:[#allocation37_spill] sm:$0xff]  ;;  %v8911_v10 = vmul.f32 %v6753_v30, %v12165_v34  ;;  %v808_v2 = vmul.f32 %v8899_v22, %v8330_v26  ;;  %v810_v26 = vmul.f32 %v8899_v22, %v8336_v27 }
 0x248   : > { %v8871_v36 = vpop.permute.xlu1 %1991  ;;  %v8882_v23 = vpop.permute.xlu0 %2006  ;;  %v8908_v11 = vmul.f32 %v6753_v30, %v12164_v1  ;;  %v12169_v14 = vld [vmem:[#allocation45_spill] sm:$0xff] }
 0x249   : > { %12149 = vst [vmem:[#allocation183_spill] sm:$0xff] %v8871_v36  ;;  %2352 = vperm.xlu1 %7167, %v2201_v3   ;;  %12157 = vst [vmem:[#allocation12_spill] sm:$0xff] %v8882_v23  ;;  %v12158_v36 = vld [vmem:[#allocation25_spill] sm:$0xff]  ;;  %v12161_v3 = vld [vmem:[#allocation31_spill] sm:$0xff]  ;;  %2357 = vperm.xlu0 %7166, %v2202_v20   ;;  %v8919_v20 = vmul.f32 %v6753_v30, %v12168_v6  ;;  %v8922_v5 = vmul.f32 %v6753_v30, %v12169_v14 }
 0x24a   : > { %v8885_v13 = vmul.f32 %v6753_v30, %v12158_v36  ;;  %v8894_v29 = vmul.f32 %v6753_v30, %v12161_v3  ;;  %v12163_v36 = vld [vmem:[#allocation35_spill] sm:$0xff]  ;;  %v12171_v1 = vld [vmem:[#allocation49_spill] sm:$0xff]  ;;  %v802_v6 = vmul.f32 %v8899_v22, %v12176_v0  ;;  %12185 = vst [vmem:[#allocation25_spill] sm:$0xff] %v8954_v8  ;;  %v12186_v0 = vld [vmem:[#allocation64_spill] sm:$0xff] }
 0x24b   : > { %v8905_v23 = vmul.f32 %v6753_v30, %v12163_v36  ;;  %v12170_v36 = vld [vmem:[#allocation47_spill] sm:$0xff]  ;;  %v8929_v34 = vmul.f32 %v6753_v30, %v12171_v1  ;;  %v12194_v8 = vld [vmem:[#allocation70_spill] sm:$0xff] }
 0x24c   : > { %v8913_v3 = vpop.permute.xlu1 %2001  ;;  %v8925_v4 = vmul.f32 %v6753_v30, %v12170_v36  ;;  %v8939_v58 = vpop.permute.xlu0 %2016  ;;  %v2439_v14 = vld [vmem:[#allocation2 + $0x7a] sm:$0xff]  ;;  %v8942_v36 = vmul.f32 %v6753_v30, %v12178_v62  ;;  %v804_v62 = vmul.f32 %v8899_v22, %v8318_v37  ;;  %v2441_v27 = vld [vmem:[#allocation2 + $0x92] sm:$0xff] }
 0x24d   : > { %12166 = vst [vmem:[#allocation14_spill] sm:$0xff] %v8913_v3  ;;  %2613 = vperm.xlu1 %7167, %v8606_v18   ;;  %v8932_v3 = vmul.f32 %v6753_v30, %v12172_v61  ;;  %12177 = vst [vmem:[#allocation19_spill] sm:$0xff] %v8939_v58  ;;  %v8945_v18 = vmul.f32 %v6753_v30, %v12179_v56  ;;  %v12181_v1 = vld [vmem:[#allocation59_spill] sm:$0xff]  ;;  %v12183_v61 = vld [vmem:[#allocation61_spill] sm:$0xff]  ;;  %2618 = vperm.xlu0 %7166, %v2463_v9  }
 0x24e   : > { %v8948_v59 = vmul.f32 %v6753_v30, %v12181_v1  ;;  %v8951_v57 = vmul.f32 %v6753_v30, %v12183_v61  ;;  %v803_v56 = vmul.f32 %v8899_v22, %v8321_v35  ;;  %v2440_v1 = vld [vmem:[#allocation2 + $0x82] sm:$0xff]  ;;  %v806_v9 = vmul.f32 %v8899_v22, %v8324_v38 }
 0x24f   : > { %12173 = vst [vmem:[#allocation15_spill] sm:$0xff] %v8932_v3  ;;  %12180 = vst [vmem:[#allocation21_spill] sm:$0xff] %v8945_v18  ;;  %v8957_v3 = vmul.f32 %v6753_v30, %v12186_v0  ;;  %v805_v61 = vmul.f32 %v8899_v22, %v8327_v40  ;;  %v12191_v37 = vld [vmem:[#allocation67_spill] sm:$0xff]  ;;  %v12192_v35 = vld [vmem:[#allocation68_spill] sm:$0xff]  ;;  %v8987_v40 = vmul.f32 %v6753_v30, %v12194_v8 }
 0x250   : > { %12182 = vst [vmem:[#allocation23_spill] sm:$0xff] %v8948_v59  ;;  %v8963_v58 = vpop.permute.xlu1 %2011  ;;  %v12189_v59 = vld [vmem:[#allocation66_spill] sm:$0xff]  ;;  %v8975_v0 = vmul.f32 %v6753_v30, %v12191_v37  ;;  %v2203_v38 = vld [vmem:[#allocation2 + $0x1a1] sm:$0xff]  ;;  %v812_v37 = vmul.f32 %v8899_v22, %v8342_v31  ;;  %v813_v31 = vmul.f32 %v8899_v22, %v8351_v39 }
 0x251   : > { %12187 = vst [vmem:[#allocation27_spill] sm:$0xff] %v8957_v3  ;;  %12188 = vst [vmem:[#allocation29_spill] sm:$0xff] %v8963_v58  ;;  %v8966_v18 = vmul.f32 %v6753_v30, %v12189_v59  ;;  %2498 = vperm.xlu1 %7167, %v2439_v14   ;;  %v8978_v3 = vmul.f32 %v6753_v30, %v12192_v35  ;;  %v8980_v58 = vadd.f32 %v802_v6, %v541_v17 }
 0x252   : > { %v807_v59 = vmul.f32 %v8899_v22, %v8333_v63  ;;  %v809_v14 = vmul.f32 %v8899_v22, %v8339_v28  ;;  %2503 = vperm.xlu0 %7166, %v2440_v1   ;;  %v8995_v17 = vadd.f32 %v804_v62, %v543_v60  ;;  %v8997_v6 = vadd.f32 %v803_v56, %v542_v51 }
 0x253   : > { %12190 = vst [vmem:[#allocation31_spill] sm:$0xff] %v8966_v18  ;;  %v8984_v18 = vpop.permute.xlu0 %2026  ;;  %v811_v63 = vmul.f32 %v8899_v22, %v8345_v32  ;;  %v814_v30 = vmul.f32 %v8899_v22, %v8348_v33  ;;  %v9005_v35 = vadd.f32 %v806_v9, %v545_v25  ;;  %v9007_v28 = vadd.f32 %v805_v61, %v544_v16  ;;  %v2442_v9 = vld [vmem:[#allocation2 + $0x9a] sm:$0xff] }
 0x254   : > { %12193 = vst [vmem:[#allocation33_spill] sm:$0xff] %v8984_v18  ;;  %v9003_v8 = vpop.permute.xlu1 %2021  ;;  %v9009_v18 = vadd.f32 %v808_v2, %v547_v15  ;;  %v9014_v60 = vadd.f32 %v807_v59, %v8880_v24  ;;  %v816_v32 = vmul.f32 %v8899_v22, %v8354_v41  ;;  %v815_v33 = vmul.f32 %v8899_v22, %v8357_v42  ;;  %v2464_v15 = vld [vmem:[#allocation2 + $0x1a2] sm:$0xff] }
 0x255   : > { %12195 = vst [vmem:[#allocation35_spill] sm:$0xff] %v9003_v8  ;;  %2362 = vperm.xlu1 %7167, %v2203_v38   ;;  %v818_v51 = vmul.f32 %v8899_v22, %v8360_v43  ;;  %v9025_v25 = vadd.f32 %v810_v26, %v8885_v13  ;;  %v9028_v39 = vadd.f32 %v809_v14, %v8888_v12 }
 0x256   : > { %v9031_v24 = vadd.f32 %v812_v37, %v8891_v19  ;;  %v817_v41 = vmul.f32 %v8899_v22, %v8363_v44  ;;  %2508 = vperm.xlu0 %7166, %v2441_v27   ;;  %v9036_v42 = vadd.f32 %v811_v63, %v8894_v29  ;;  %v9039_v43 = vadd.f32 %v814_v30, %v8902_v21  ;;  %v2443_v19 = vld [vmem:[#allocation2 + $0xaa] sm:$0xff]  ;;  %v12201_v26 = vld [vmem:[#allocation15_spill] sm:$0xff]  ;;  %v12205_v27 = vld [vmem:[#allocation74_spill] sm:$0xff] }
 0x257   : > { %v9022_v16 = vpop.permute.xlu0 %2036  ;;  %v820_v13 = vmul.f32 %v8899_v22, %v8366_v45  ;;  %v819_v12 = vmul.f32 %v8899_v22, %v8369_v46  ;;  %v9048_v56 = vadd.f32 %v813_v31, %v8905_v23  ;;  %v822_v44 = vmul.f32 %v8899_v22, %v8372_v47  ;;  %v12206_v31 = vld [vmem:[#allocation75_spill] sm:$0xff] }
 0x258   : > { %12196 = vst [vmem:[#allocation37_spill] sm:$0xff] %v9022_v16  ;;  %v9045_v62 = vpop.permute.xlu1 %2031  ;;  %v821_v29 = vmul.f32 %v8899_v22, %v8375_v48  ;;  %v824_v21 = vmul.f32 %v8899_v22, %v8378_v49  ;;  %v9057_v45 = vadd.f32 %v816_v32, %v8908_v11  ;;  %v9060_v46 = vadd.f32 %v815_v33, %v8911_v10  ;;  %v12199_v49 = vld [vmem:[#allocation71_spill] sm:$0xff] }
 0x259   : > { %12197 = vst [vmem:[#allocation39_spill] sm:$0xff] %v9045_v62  ;;  %2623 = vperm.xlu1 %7167, %v2464_v15   ;;  %v9063_v1 = vadd.f32 %v818_v51, %v8916_v7  ;;  %v823_v23 = vmul.f32 %v8899_v22, %v8381_v50  ;;  %v9070_v48 = vadd.f32 %v817_v41, %v8919_v20  ;;  %v9081_v7 = vld [vmem:[%s11846_s1 + $0x2] ss:$0 sm:$0xff]  ;;  %v2444_v51 = vld [vmem:[#allocation2 + $0xb2] sm:$0xff] }
 0x25a   : > { %v826_v61 = vmul.f32 %v8899_v22, %v12199_v49  ;;  %v825_v11 = vmul.f32 %v8899_v22, %v8387_v52  ;;  %v828_v10 = vmul.f32 %v8899_v22, %v8390_v53  ;;  %2518 = vperm.xlu0 %7166, %v2443_v19   ;;  %v9084_v50 = vadd.f32 %v820_v13, %v8922_v5  ;;  %v2445_v53 = vld [vmem:[#allocation2 + $0xc2] sm:$0xff]  ;;  %v12202_v5 = vld [vmem:[#allocation17_spill] sm:$0xff] }
 0x25b   : > { %v9067_v47 = vpop.permute.xlu0 %2046  ;;  %v9087_v20 = vadd.f32 %v819_v12, %v8925_v4  ;;  %v827_v2 = vmul.f32 %v8899_v22, %v8393_v54  ;;  %v830_v52 = vmul.f32 %v8899_v22, %v8396_v55  ;;  %v9096_v38 = vadd.f32 %v822_v44, %v8929_v34  ;;  %v12203_v4 = vld [vmem:[#allocation72_spill] sm:$0xff]  ;;  %v12204_v55 = vld [vmem:[#allocation73_spill] sm:$0xff]  ;;  %v12208_v13 = vld [vmem:[#allocation23_spill] sm:$0xff] }
 0x25c   : > { %12198 = vst [vmem:[#allocation41_spill] sm:$0xff] %v9067_v47  ;;  %v9093_v59 = vpop.permute.xlu1 %2041  ;;  %v9099_v14 = vadd.f32 %v821_v29, %v12201_v26  ;;  %v9102_v37 = vadd.f32 %v824_v21, %v12202_v5  ;;  %v829_v63 = vmul.f32 %v8899_v22, %v12203_v4  ;;  %v9107_v54 = vadd.f32 %v823_v23, %v8942_v36  ;;  %v12207_v15 = vld [vmem:[#allocation21_spill] sm:$0xff]  ;;  %v12209_v19 = vld [vmem:[#allocation76_spill] sm:$0xff]  ;;  %v12211_v23 = vld [vmem:[#allocation27_spill] sm:$0xff] }
 0x25d   : > { %12200 = vst [vmem:[#allocation43_spill] sm:$0xff] %v9093_v59  ;;  %2513 = vperm.xlu1 %7167, %v2442_v9   ;;  %v832_v30 = vmul.f32 %v8899_v22, %v12204_v55  ;;  %v831_v34 = vmul.f32 %v8899_v22, %v12205_v27  ;;  %v1063_v32 = vmul.f32 %v9081_v7, %v12206_v31  ;;  %v12210_v29 = vld [vmem:[#allocation25_spill] sm:$0xff]  ;;  %v12213_v26 = vld [vmem:[#allocation78_spill] sm:$0xff] }
 0x25e   : > { %v9118_v41 = vadd.f32 %v826_v61, %v12207_v15  ;;  %v9121_v12 = vadd.f32 %v825_v11, %v12208_v13  ;;  %v9124_v36 = vadd.f32 %v828_v10, %v8951_v57  ;;  %v833_v44 = vmul.f32 %v8899_v22, %v12209_v19  ;;  %2528 = vperm.xlu0 %7166, %v2445_v53   ;;  %v12212_v49 = vld [vmem:[#allocation77_spill] sm:$0xff]  ;;  %v2447_v57 = vld [vmem:[#allocation2 + $0xda] sm:$0xff] }
 0x25f   : > { %v9115_v33 = vpop.permute.xlu0 %2056  ;;  %v9129_v21 = vadd.f32 %v827_v2, %v12210_v29  ;;  %v9132_v9 = vadd.f32 %v830_v52, %v12211_v23  ;;  %v1065_v61 = vmul.f32 %v9081_v7, %v12212_v49  ;;  %v1064_v11 = vmul.f32 %v9081_v7, %v12213_v26  ;;  %v12215_v10 = vld [vmem:[#allocation31_spill] sm:$0xff]  ;;  %v12217_v2 = vld [vmem:[#allocation80_spill] sm:$0xff]  ;;  %v12218_v52 = vld [vmem:[#allocation81_spill] sm:$0xff] }
 0x260   : > { %v9138_v5 = vpop.permute.xlu1 %2051  ;;  %v9141_v4 = vadd.f32 %v829_v63, %v12215_v10  ;;  %v12216_v22 = vld [vmem:[#allocation79_spill] sm:$0xff]  ;;  %v1066_v55 = vmul.f32 %v9081_v7, %v12217_v2  ;;  %v1069_v27 = vmul.f32 %v9081_v7, %v12218_v52  ;;  %v9150_v31 = vadd.f32 %v832_v30, %v8975_v0  ;;  %v12219_v63 = vld [vmem:[#allocation82_spill] sm:$0xff]  ;;  %v2446_v23 = vld [vmem:[#allocation2 + $0xca] sm:$0xff] }
 0x261   : > { %12214 = vst [vmem:[#allocation45_spill] sm:$0xff] %v9138_v5  ;;  %v1067_v53 = vmul.f32 %v9081_v7, %v12216_v22  ;;  %2523 = vperm.xlu1 %7167, %v2444_v51   ;;  %v9153_v15 = vadd.f32 %v831_v34, %v8978_v3  ;;  %v9156_v13 = vadd.f32 %v1063_v32, %v8980_v58  ;;  %v12220_v26 = vld [vmem:[#allocation83_spill] sm:$0xff]  ;;  %v12221_v0 = vld [vmem:[#allocation84_spill] sm:$0xff]  ;;  %v12222_v3 = vld [vmem:[#allocation85_spill] sm:$0xff] }
 0x262   : > { %v1068_v19 = vmul.f32 %v9081_v7, %v12219_v63  ;;  %v9163_v49 = vadd.f32 %v833_v44, %v8987_v40  ;;  %v1071_v51 = vmul.f32 %v9081_v7, %v12220_v26  ;;  %v1070_v30 = vmul.f32 %v9081_v7, %v12221_v0  ;;  %2538 = vperm.xlu0 %7166, %v2447_v57   ;;  %v12223_v10 = vld [vmem:[#allocation86_spill] sm:$0xff]  ;;  %v12224_v44 = vld [vmem:[#allocation87_spill] sm:$0xff]  ;;  %v12226_v26 = vld [vmem:[#allocation89_spill] sm:$0xff] }
 0x263   : > { %v9160_v29 = vpop.permute.xlu0 %2066  ;;  %v1073_v34 = vmul.f32 %v9081_v7, %v12222_v3  ;;  %v9172_v58 = vadd.f32 %v1065_v61, %v8995_v17  ;;  %v9175_v32 = vadd.f32 %v1064_v11, %v8997_v6  ;;  %v1072_v40 = vmul.f32 %v9081_v7, %v12223_v10  ;;  %v2449_v52 = vld [vmem:[#allocation2 + $0xf2] sm:$0xff]  ;;  %v12225_v6 = vld [vmem:[#allocation88_spill] sm:$0xff] }
 0x264   : > { %v1075_v22 = vmul.f32 %v9081_v7, %v12224_v44  ;;  %v9181_v2 = vpop.permute.xlu1 %2061  ;;  %v9184_v63 = vadd.f32 %v1067_v53, %v9005_v35  ;;  %v9187_v57 = vadd.f32 %v1066_v55, %v9007_v28  ;;  %v9190_v17 = vadd.f32 %v1069_v27, %v9009_v18  ;;  %v12227_v3 = vld [vmem:[#allocation90_spill] sm:$0xff]  ;;  %v12228_v53 = vld [vmem:[#allocation91_spill] sm:$0xff]  ;;  %v12244_v47 = vld [vmem:[#allocation101_spill] sm:$0xff] }
 0x265   : > { %v1074_v61 = vmul.f32 %v9081_v7, %v12225_v6  ;;  %2533 = vperm.xlu1 %7167, %v2446_v23   ;;  %v9195_v11 = vadd.f32 %v1068_v19, %v9014_v60  ;;  %v1077_v0 = vmul.f32 %v9081_v7, %v12226_v26  ;;  %v1076_v35 = vmul.f32 %v9081_v7, %v12227_v3  ;;  %v2448_v18 = vld [vmem:[#allocation2 + $0xe2] sm:$0xff]  ;;  %v12230_v26 = vld [vmem:[#allocation93_spill] sm:$0xff] }
 0x266   : > { %v1079_v28 = vmul.f32 %v9081_v7, %v12228_v53  ;;  %v9206_v27 = vadd.f32 %v1071_v51, %v9025_v25  ;;  %v9209_v23 = vadd.f32 %v1070_v30, %v9028_v39  ;;  %v9212_v60 = vadd.f32 %v1073_v34, %v9031_v24  ;;  %v12229_v19 = vld [vmem:[#allocation92_spill] sm:$0xff]  ;;  %2548 = vperm.xlu0 %7166, %v2449_v52   ;;  %v12231_v51 = vld [vmem:[#allocation94_spill] sm:$0xff]  ;;  %v12232_v3 = vld [vmem:[#allocation95_spill] sm:$0xff] }
 0x267   : > { %v9203_v55 = vpop.permute.xlu0 %2076  ;;  %v1078_v10 = vmul.f32 %v9081_v7, %v12229_v19  ;;  %v9217_v44 = vadd.f32 %v1072_v40, %v9036_v42  ;;  %v9220_v6 = vadd.f32 %v1075_v22, %v9039_v43  ;;  %v1081_v25 = vmul.f32 %v9081_v7, %v12230_v26  ;;  %v2451_v24 = vld [vmem:[#allocation2 + $0x10a] sm:$0xff] }
 0x268   : > { %v1080_v39 = vmul.f32 %v9081_v7, %v12231_v51  ;;  %v9226_v30 = vpop.permute.xlu1 %2071  ;;  %v9229_v34 = vadd.f32 %v1074_v61, %v9048_v56  ;;  %v1083_v52 = vmul.f32 %v9081_v7, %v12232_v3  ;;  %v12233_v42 = vld [vmem:[#allocation96_spill] sm:$0xff]  ;;  %v12234_v43 = vld [vmem:[#allocation97_spill] sm:$0xff]  ;;  %v9238_v53 = vadd.f32 %v1077_v0, %v9057_v45  ;;  %v12235_v56 = vld [vmem:[#allocation98_spill] sm:$0xff] }
 0x269   : > { %v1082_v40 = vmul.f32 %v9081_v7, %v12233_v42  ;;  %v1085_v22 = vmul.f32 %v9081_v7, %v12234_v43  ;;  %2543 = vperm.xlu1 %7167, %v2448_v18   ;;  %v9241_v19 = vadd.f32 %v1076_v35, %v9060_v46  ;;  %v9244_v26 = vadd.f32 %v1079_v28, %v9063_v1  ;;  %v2450_v3 = vld [vmem:[#allocation2 + $0xfa] sm:$0xff]  ;;  %v12238_v45 = vld [vmem:[#allocation100_spill] sm:$0xff]  ;;  %v9262_v1 = vld [vmem:[%s11846_s1 + $0x3] ss:$0 sm:$0xff] }
 0x26a   : > { %v1084_v61 = vmul.f32 %v9081_v7, %v12235_v56  ;;  %v9251_v42 = vadd.f32 %v1078_v10, %v9070_v48  ;;  %v12237_v43 = vld [vmem:[#allocation99_spill] sm:$0xff]  ;;  %v1086_v0 = vmul.f32 %v9081_v7, %v12238_v45  ;;  %2558 = vperm.xlu0 %7166, %v2451_v24   ;;  %v9265_v28 = vadd.f32 %v1081_v25, %v9084_v50  ;;  %v12240_v10 = vld [vmem:[#allocation8_spill] sm:$0xff] }
 0x26b   : > { %v9248_v51 = vpop.permute.xlu0 %2086  ;;  %v1087_v18 = vmul.f32 %v9081_v7, %v12237_v43  ;;  %v12239_v46 = vld [vmem:[#allocation7_spill] sm:$0xff]  ;;  %v9268_v48 = vadd.f32 %v1080_v39, %v9087_v20  ;;  %v1088_v56 = vmul.f32 %v9081_v7, %v12240_v10  ;;  %v12241_v43 = vld [vmem:[#allocation9_spill] sm:$0xff]  ;;  %v9277_v59 = vadd.f32 %v1083_v52, %v9096_v38  ;;  %v12242_v20 = vld [vmem:[#allocation10_spill] sm:$0xff] }
 0x26c   : > { %12236 = vst [vmem:[#allocation47_spill] sm:$0xff] %v9248_v51  ;;  %v1089_v35 = vmul.f32 %v9081_v7, %v12239_v46  ;;  %v1091_v45 = vmul.f32 %v9081_v7, %v12241_v43  ;;  %v9274_v5 = vpop.permute.xlu1 %2081  ;;  %v2453_v46 = vld [vmem:[#allocation2 + $0x122] sm:$0xff]  ;;  %v9280_v24 = vadd.f32 %v1082_v40, %v9099_v14  ;;  %v9283_v50 = vadd.f32 %v1085_v22, %v9102_v37  ;;  %v12245_v52 = vld [vmem:[#allocation102_spill] sm:$0xff] }
 0x26d   : > { %v1090_v25 = vmul.f32 %v9081_v7, %v12242_v20  ;;  %2553 = vperm.xlu1 %7167, %v2450_v3   ;;  %v9288_v39 = vadd.f32 %v1084_v61, %v9107_v54  ;;  %v12243_v10 = vld [vmem:[#allocation11_spill] sm:$0xff]  ;;  %v1092_v38 = vmul.f32 %v9081_v7, %v12244_v47  ;;  %v1324_v14 = vmul.f32 %v9262_v1, %v12245_v52  ;;  %v2452_v37 = vld [vmem:[#allocation2 + $0x112] sm:$0xff] }
 0x26e   : > { %v1093_v43 = vmul.f32 %v9081_v7, %v12243_v10  ;;  %v9299_v22 = vadd.f32 %v1087_v18, %v9118_v41  ;;  %v9302_v3 = vadd.f32 %v1086_v0, %v9121_v12  ;;  %v9305_v54 = vadd.f32 %v1089_v35, %v9124_v36  ;;  %v12247_v61 = vld [vmem:[#allocation13_spill] sm:$0xff]  ;;  %2568 = vperm.xlu0 %7166, %v2453_v46   ;;  %v12248_v52 = vld [vmem:[#allocation103_spill] sm:$0xff]  ;;  %v12249_v18 = vld [vmem:[#allocation16_spill] sm:$0xff] }
 0x26f   : > { %v9296_v40 = vpop.permute.xlu0 %2096  ;;  %v1094_v20 = vmul.f32 %v9081_v7, %v12247_v61  ;;  %v9310_v47 = vadd.f32 %v1088_v56, %v9129_v21  ;;  %v9313_v10 = vadd.f32 %v1091_v45, %v9132_v9  ;;  %v1326_v41 = vmul.f32 %v9262_v1, %v12248_v52  ;;  %v12251_v35 = vld [vmem:[#allocation18_spill] sm:$0xff]  ;;  %v12252_v46 = vld [vmem:[#allocation20_spill] sm:$0xff] }
 0x270   : > { %12246 = vst [vmem:[#allocation49_spill] sm:$0xff] %v9296_v40  ;;  %v1325_v12 = vmul.f32 %v9262_v1, %v12249_v18  ;;  %v9319_v0 = vpop.permute.xlu1 %2091  ;;  %v9322_v36 = vadd.f32 %v1090_v25, %v9141_v4  ;;  %v1328_v7 = vmul.f32 %v9262_v1, %v12251_v35  ;;  %v1327_v21 = vmul.f32 %v9262_v1, %v12252_v46  ;;  %v12253_v56 = vld [vmem:[#allocation22_spill] sm:$0xff]  ;;  %v12254_v4 = vld [vmem:[#allocation24_spill] sm:$0xff] }
 0x271   : > { %12250 = vst [vmem:[#allocation51_spill] sm:$0xff] %v9319_v0  ;;  %v1330_v9 = vmul.f32 %v9262_v1, %v12253_v56  ;;  %2563 = vperm.xlu1 %7167, %v2452_v37   ;;  %v9331_v45 = vadd.f32 %v1093_v43, %v9150_v31  ;;  %v9334_v61 = vadd.f32 %v1092_v38, %v9153_v15  ;;  %v2454_v35 = vld [vmem:[#allocation2 + $0x12a] sm:$0xff]  ;;  %v12255_v56 = vld [vmem:[#allocation26_spill] sm:$0xff]  ;;  %v12280_v0 = vld [vmem:[#allocation107_spill] sm:$0xff] }
 0x272   : > { %v9337_v52 = vadd.f32 %v1324_v14, %v9156_v13  ;;  %v1329_v25 = vmul.f32 %v9262_v1, %v12254_v4  ;;  %v9344_v46 = vadd.f32 %v1094_v20, %v9163_v49  ;;  %v1332_v37 = vmul.f32 %v9262_v1, %v12255_v56  ;;  %v12256_v31 = vld [vmem:[#allocation28_spill] sm:$0xff]  ;;  %v12257_v15 = vld [vmem:[#allocation30_spill] sm:$0xff] }
 0x273   : > { %v9341_v18 = vpop.permute.xlu0 %2207  ;;  %v1331_v43 = vmul.f32 %v9262_v1, %v12256_v31  ;;  %v1334_v38 = vmul.f32 %v9262_v1, %v12257_v15  ;;  %v9353_v13 = vadd.f32 %v1326_v41, %v9172_v58  ;;  %v9356_v14 = vadd.f32 %v1325_v12, %v9175_v32  ;;  %v12258_v4 = vld [vmem:[#allocation32_spill] sm:$0xff]  ;;  %v12259_v49 = vld [vmem:[#allocation34_spill] sm:$0xff] }
 0x274   : > { %v1333_v62 = vmul.f32 %v9262_v1, %v12258_v4  ;;  %v1336_v20 = vmul.f32 %v9262_v1, %v12259_v49  ;;  %v9362_v16 = vpop.permute.xlu1 %2101  ;;  %v9365_v56 = vadd.f32 %v1328_v7, %v9184_v63  ;;  %v9368_v31 = vadd.f32 %v1327_v21, %v9187_v57  ;;  %v12261_v41 = vld [vmem:[#allocation36_spill] sm:$0xff]  ;;  %v12262_v15 = vld [vmem:[#allocation38_spill] sm:$0xff] }
 0x275   : > { %12260 = vst [vmem:[#allocation53_spill] sm:$0xff] %v9362_v16  ;;  %v9371_v58 = vadd.f32 %v1330_v9, %v9190_v17  ;;  %v1335_v32 = vmul.f32 %v9262_v1, %v12261_v41  ;;  %2573 = vperm.xlu1 %7167, %v2454_v35   ;;  %v9376_v12 = vadd.f32 %v1329_v25, %v9195_v11  ;;  %v12263_v49 = vld [vmem:[#allocation40_spill] sm:$0xff]  ;;  %v12264_v7 = vld [vmem:[#allocation42_spill] sm:$0xff] }
 0x276   : > { %v1338_v4 = vmul.f32 %v9262_v1, %v12262_v15  ;;  %v1337_v63 = vmul.f32 %v9262_v1, %v12263_v49  ;;  %v1340_v57 = vmul.f32 %v9262_v1, %v12264_v7  ;;  %v9387_v17 = vadd.f32 %v1332_v37, %v9206_v27  ;;  %v12265_v25 = vld [vmem:[#allocation44_spill] sm:$0xff]  ;;  %v12266_v49 = vld [vmem:[#allocation46_spill] sm:$0xff] }
 0x277   : > { %v9384_v21 = vpop.permute.xlu0 %2217  ;;  %v9390_v9 = vadd.f32 %v1331_v43, %v9209_v23  ;;  %v9393_v11 = vadd.f32 %v1334_v38, %v9212_v60  ;;  %v1339_v35 = vmul.f32 %v9262_v1, %v12265_v25  ;;  %v9398_v41 = vadd.f32 %v1333_v62, %v9217_v44  ;;  %v12267_v27 = vld [vmem:[#allocation48_spill] sm:$0xff]  ;;  %v12268_v43 = vld [vmem:[#allocation50_spill] sm:$0xff] }
 0x278   : > { %v9401_v15 = vadd.f32 %v1336_v20, %v9220_v6  ;;  %v1342_v7 = vmul.f32 %v9262_v1, %v12266_v49  ;;  %v1341_v37 = vmul.f32 %v9262_v1, %v12267_v27  ;;  %v9407_v23 = vpop.permute.xlu1 %2212  ;;  %v9410_v60 = vadd.f32 %v1335_v32, %v9229_v34  ;;  %v12269_v25 = vld [vmem:[#allocation52_spill] sm:$0xff]  ;;  %v12270_v44 = vld [vmem:[#allocation54_spill] sm:$0xff] }
 0x279   : > { %v1344_v38 = vmul.f32 %v9262_v1, %v12268_v43  ;;  %v1343_v62 = vmul.f32 %v9262_v1, %v12269_v25  ;;  %v1346_v6 = vmul.f32 %v9262_v1, %v12270_v44  ;;  %v9419_v20 = vadd.f32 %v1338_v4, %v9238_v53  ;;  %v12271_v34 = vld [vmem:[#allocation56_spill] sm:$0xff]  ;;  %v12273_v25 = vld [vmem:[#allocation58_spill] sm:$0xff] }
 0x27a   : > { %v9422_v49 = vadd.f32 %v1337_v63, %v9241_v19  ;;  %v9425_v27 = vadd.f32 %v1340_v57, %v9244_v26  ;;  %v1345_v32 = vmul.f32 %v9262_v1, %v12271_v34  ;;  %v9432_v43 = vadd.f32 %v1339_v35, %v9251_v42  ;;  %v12274_v16 = vld [vmem:[#allocation60_spill] sm:$0xff]  ;;  %v12275_v4 = vld [vmem:[#allocation62_spill] sm:$0xff]  ;;  %v9443_v26 = vld [vmem:[%s11846_s1 + $0x4] ss:$0 sm:$0xff] }
 0x27b   : > { %v9429_v8 = vpop.permute.xlu0 %2227  ;;  %v1348_v44 = vmul.f32 %v9262_v1, %v12273_v25  ;;  %v1347_v53 = vmul.f32 %v9262_v1, %v12274_v16  ;;  %v1350_v19 = vmul.f32 %v9262_v1, %v12275_v4  ;;  %v9446_v63 = vadd.f32 %v1342_v7, %v9265_v28  ;;  %v12276_v57 = vld [vmem:[#allocation104_spill] sm:$0xff]  ;;  %v12277_v34 = vld [vmem:[#allocation65_spill] sm:$0xff]  ;;  %v12316_v51 = vld [vmem:[#allocation134_spill] sm:$0xff] }
 0x27c   : > { %12272 = vst [vmem:[#allocation69_spill] sm:$0xff] %v9429_v8  ;;  %v9449_v42 = vadd.f32 %v1341_v37, %v9268_v48  ;;  %v1349_v35 = vmul.f32 %v9262_v1, %v12276_v57  ;;  %v1352_v16 = vmul.f32 %v9262_v1, %v12277_v34  ;;  %v9455_v25 = vpop.permute.xlu1 %2222  ;;  %v9458_v4 = vadd.f32 %v1344_v38, %v9277_v59  ;;  %v12278_v7 = vld [vmem:[#allocation105_spill] sm:$0xff]  ;;  %v12279_v57 = vld [vmem:[#allocation106_spill] sm:$0xff]  ;;  %v12281_v59 = vld [vmem:[#allocation108_spill] sm:$0xff] }
 0x27d   : > { %v9461_v40 = vadd.f32 %v1343_v62, %v9280_v24  ;;  %v9464_v28 = vadd.f32 %v1346_v6, %v9283_v50  ;;  %v1351_v48 = vmul.f32 %v9262_v1, %v12278_v7  ;;  %v9469_v37 = vadd.f32 %v1345_v32, %v9288_v39  ;;  %v12283_v6 = vld [vmem:[#allocation109_spill] sm:$0xff] }
 0x27e   : > { %v1354_v34 = vmul.f32 %v9262_v1, %v12279_v57  ;;  %v1353_v8 = vmul.f32 %v9262_v1, %v12280_v0  ;;  %v1585_v38 = vmul.f32 %v9443_v26, %v12281_v59  ;;  %v9480_v50 = vadd.f32 %v1348_v44, %v9299_v22  ;;  %v12284_v57 = vld [vmem:[#allocation110_spill] sm:$0xff] }
 0x27f   : > { %v9477_v24 = vpop.permute.xlu0 %2237  ;;  %v9483_v62 = vadd.f32 %v1347_v53, %v9302_v3  ;;  %v9486_v39 = vadd.f32 %v1350_v19, %v9305_v54  ;;  %v1355_v32 = vmul.f32 %v9262_v1, %v12283_v6  ;;  %v9491_v7 = vadd.f32 %v1349_v35, %v9310_v47  ;;  %v4105_v3 = vld [vmem:[%s11848_s3] sm:$0xff]  ;;  %v4106_v54 = vld [vmem:[%s11848_s3 + $0x8] sm:$0xff] }
 0x280   : > { %12282 = vst [vmem:[#allocation55_spill] sm:$0xff] %v9477_v24  ;;  %v9494_v0 = vadd.f32 %v1352_v16, %v9313_v10  ;;  %v1587_v59 = vmul.f32 %v9443_v26, %v12284_v57  ;;  %v9498_v22 = vpop.permute.xlu1 %2232  ;;  %v9507_v1 = vadd.f32 %v1351_v48, %v9322_v36  ;;  %v12286_v47 = vld [vmem:[#allocation111_spill] sm:$0xff]  ;;  %v11884_v44 = vmov 0.0|0.0   ;;  %v12287_v36 = vld [vmem:[#allocation112_spill] sm:$0xff] }
 0x281   : > { %12285 = vst [vmem:[#allocation57_spill] sm:$0xff] %v9498_v22  ;;  %v1586_v10 = vmul.f32 %v9443_v26, %v12286_v47  ;;  %7031 = vmatprep.subr.bf16.mxu0 %v11884_v44  ;;  %v7032_v53 = vpack.c.bf16 %v4106_v54, %v4105_v3  ;;  %7087 = vmatprep.subr.bf16.mxu1 %v11884_v44  ;;  %v12289_v3 = vld [vmem:[#allocation113_spill] sm:$0xff]  ;;  %v12290_v47 = vld [vmem:[#allocation114_spill] sm:$0xff]  ;;  %v12297_v24 = vld [vmem:[#allocation120_spill] sm:$0xff] }
 0x282   : > { %v9514_v19 = vadd.f32 %v1354_v34, %v9331_v45  ;;  %v9517_v35 = vadd.f32 %v1353_v8, %v9334_v61  ;;  %v9520_v16 = vadd.f32 %v1585_v38, %v9337_v52  ;;  %v1589_v48 = vmul.f32 %v9443_v26, %v12287_v36  ;;  %v12291_v61 = vld [vmem:[#allocation115_spill] sm:$0xff]  ;;  %v12292_v34 = vld [vmem:[#allocation116_spill] sm:$0xff] }
 0x283   : > { %v9524_v6 = vpop.permute.xlu0 %2247  ;;  %v9527_v57 = vadd.f32 %v1355_v32, %v9344_v46  ;;  %v1588_v54 = vmul.f32 %v9443_v26, %v12289_v3  ;;  %v1591_v45 = vmul.f32 %v9443_v26, %v12290_v47  ;;  %7033 = vmatpush1.bf16.msra.mxu0 %v7032_v53  ;;  %7103 = vmatpush1.bf16.msra.mxu1 %v7032_v53  ;;  %v4107_v46 = vld [vmem:[%s11848_s3 + $0x10] sm:$0xff]  ;;  %v4108_v32 = vld [vmem:[%s11848_s3 + $0x18] sm:$0xff] }
 0x284   : > { %12288 = vst [vmem:[#allocation59_spill] sm:$0xff] %v9524_v6  ;;  %v9534_v8 = vadd.f32 %v1587_v59, %v9353_v13  ;;  %v1590_v52 = vmul.f32 %v9443_v26, %v12291_v61  ;;  %v1593_v38 = vmul.f32 %v9443_v26, %v12292_v34  ;;  %v9540_v36 = vpop.permute.xlu1 %2242  ;;  %7034 = vmatprep.subr.bf16.mxu0 %v11884_v44  ;;  %v12294_v59 = vld [vmem:[#allocation117_spill] sm:$0xff]  ;;  %v12295_v3 = vld [vmem:[#allocation118_spill] sm:$0xff]  ;;  %v12296_v6 = vld [vmem:[#allocation119_spill] sm:$0xff] }
 0x285   : > { %12293 = vst [vmem:[#allocation61_spill] sm:$0xff] %v9540_v36  ;;  %7088 = vmatprep.subr.bf16.mxu1 %v11884_v44  ;;  %v9551_v13 = vadd.f32 %v1586_v10, %v9356_v14  ;;  %v1592_v53 = vmul.f32 %v9443_v26, %v12294_v59  ;;  %v1595_v47 = vmul.f32 %v9443_v26, %v12295_v3  ;;  %v12298_v44 = vld [vmem:[#allocation121_spill] sm:$0xff] }
 0x286   : > { %v7035_v61 = vpack.c.bf16 %v4108_v32, %v4107_v46  ;;  %v9558_v34 = vadd.f32 %v1589_v48, %v9365_v56  ;;  %v1594_v36 = vmul.f32 %v9443_v26, %v12296_v6  ;;  %v1597_v22 = vmul.f32 %v9443_v26, %v12297_v24  ;;  %v12300_v46 = vld [vmem:[#allocation122_spill] sm:$0xff] }
 0x287   : > { %v1596_v14 = vmul.f32 %v9443_v26, %v12298_v44  ;;  %v9566_v10 = vpop.permute.xlu0 %2257  ;;  %v9569_v59 = vadd.f32 %v1588_v54, %v9368_v31  ;;  %v9572_v3 = vadd.f32 %v1591_v45, %v9371_v58  ;;  %v1599_v56 = vmul.f32 %v9443_v26, %v12300_v46  ;;  %v12301_v44 = vld [vmem:[#allocation123_spill] sm:$0xff]  ;;  %v4110_v54 = vld [vmem:[%s11848_s3 + $0x28] sm:$0xff] }
 0x288   : > { %12299 = vst [vmem:[#allocation63_spill] sm:$0xff] %v9566_v10  ;;  %7036 = vmatpush1.bf16.msra.mxu0 %v7035_v61  ;;  %7104 = vmatpush1.bf16.msra.mxu1 %v7035_v61  ;;  %v9577_v48 = vadd.f32 %v1590_v52, %v9376_v12  ;;  %v9580_v24 = vadd.f32 %v1593_v38, %v9387_v17  ;;  %v9584_v32 = vpop.permute.xlu1 %2252  ;;  %v12303_v31 = vmov 0.0|0.0   ;;  %v4109_v58 = vld [vmem:[%s11848_s3 + $0x20] sm:$0xff]  ;;  %v12304_v45 = vld [vmem:[#allocation124_spill] sm:$0xff] }
 0x289   : > { %v1598_v6 = vmul.f32 %v9443_v26, %v12301_v44  ;;  %12302 = vst [vmem:[#allocation64_spill] sm:$0xff] %v9584_v32  ;;  %7037 = vmatprep.subr.bf16.mxu0 %v12303_v31  ;;  %7089 = vmatprep.subr.bf16.mxu1 %v12303_v31  ;;  %v9595_v12 = vadd.f32 %v1592_v53, %v9390_v9  ;;  %v12305_v32 = vld [vmem:[#allocation125_spill] sm:$0xff] }
 0x28a   : > { %v9598_v17 = vadd.f32 %v1595_v47, %v9393_v11  ;;  %v1601_v52 = vmul.f32 %v9443_v26, %v12304_v45  ;;  %v7038_v38 = vpack.c.bf16 %v4110_v54, %v4109_v58  ;;  %v9603_v61 = vadd.f32 %v1594_v36, %v9398_v41  ;;  %v12307_v47 = vld [vmem:[#allocation126_spill] sm:$0xff]  ;;  %v12308_v54 = vld [vmem:[#allocation127_spill] sm:$0xff]  ;;  %v12310_v36 = vld [vmem:[#allocation129_spill] sm:$0xff] }
 0x28b   : > { %v9606_v46 = vadd.f32 %v1597_v22, %v9401_v15  ;;  %v9609_v44 = vadd.f32 %v1596_v14, %v9410_v60  ;;  %v1600_v9 = vmul.f32 %v9443_v26, %v12305_v32  ;;  %v9613_v53 = vpop.permute.xlu0 %2267  ;;  %v9616_v11 = vadd.f32 %v1599_v56, %v9419_v20  ;;  %v12309_v60 = vld [vmem:[#allocation128_spill] sm:$0xff]  ;;  %v4111_v20 = vld [vmem:[%s11848_s3 + $0x30] sm:$0xff]  ;;  %v4112_v56 = vld [vmem:[%s11848_s3 + $0x38] sm:$0xff] }
 0x28c   : > { %12306 = vst [vmem:[#allocation66_spill] sm:$0xff] %v9613_v53  ;;  %v1603_v58 = vmul.f32 %v9443_v26, %v12307_v47  ;;  %v1602_v41 = vmul.f32 %v9443_v26, %v12308_v54  ;;  %7039 = vmatpush1.bf16.msra.mxu0 %v7038_v38  ;;  %7105 = vmatpush1.bf16.msra.mxu1 %v7038_v38  ;;  %v9629_v32 = vpop.permute.xlu1 %2262  ;;  %v12313_v38 = vld [vmem:[#allocation131_spill] sm:$0xff]  ;;  %v12315_v53 = vld [vmem:[#allocation133_spill] sm:$0xff] }
 0x28d   : > { %v9623_v15 = vadd.f32 %v1598_v6, %v9422_v49  ;;  %v1605_v22 = vmul.f32 %v9443_v26, %v12309_v60  ;;  %v1604_v14 = vmul.f32 %v9443_v26, %v12310_v36  ;;  %12311 = vst [vmem:[#allocation67_spill] sm:$0xff] %v9629_v32  ;;  %7040 = vmatprep.subr.bf16.mxu0 %v12303_v31  ;;  %v12312_v6 = vld [vmem:[#allocation130_spill] sm:$0xff]  ;;  %v12314_v36 = vld [vmem:[#allocation132_spill] sm:$0xff] }
 0x28e   : > { %7090 = vmatprep.subr.bf16.mxu1 %v12303_v31  ;;  %v9640_v49 = vadd.f32 %v1601_v52, %v9425_v27  ;;  %v1607_v45 = vmul.f32 %v9443_v26, %v12312_v6  ;;  %v1606_v47 = vmul.f32 %v9443_v26, %v12313_v38  ;;  %v7041_v54 = vpack.c.bf16 %v4112_v56, %v4111_v20  ;;  %v12318_v20 = vld [vmem:[#allocation135_spill] sm:$0xff] }
 0x28f   : > { %v9647_v60 = vadd.f32 %v1600_v9, %v9432_v43  ;;  %v1609_v32 = vmul.f32 %v9443_v26, %v12314_v36  ;;  %v1608_v10 = vmul.f32 %v9443_v26, %v12315_v53  ;;  %v1611_v27 = vmul.f32 %v9443_v26, %v12316_v51  ;;  %v9655_v52 = vpop.permute.xlu0 %2277  ;;  %v12319_v51 = vld [vmem:[#allocation136_spill] sm:$0xff] }
 0x290   : > { %12317 = vst [vmem:[#allocation68_spill] sm:$0xff] %v9655_v52  ;;  %v9658_v6 = vadd.f32 %v1603_v58, %v9446_v63  ;;  %v9661_v38 = vadd.f32 %v1602_v41, %v9449_v42  ;;  %v1610_v43 = vmul.f32 %v9443_v26, %v12318_v20  ;;  %7042 = vmatpush1.bf16.msra.mxu0 %v7041_v54  ;;  %v9676_v63 = vld [vmem:[%s11846_s1 + $0x5] ss:$0 sm:$0xff]  ;;  %v9678_v42 = vpop.permute.xlu1 %2272 }
 0x291   : > { %7106 = vmatpush1.bf16.msra.mxu1 %v7041_v54  ;;  %v9666_v9 = vadd.f32 %v1605_v22, %v9458_v4  ;;  %v9669_v53 = vadd.f32 %v1604_v14, %v9461_v40  ;;  %v1613_v56 = vmul.f32 %v9443_v26, %v12319_v51  ;;  %12320 = vst [vmem:[#allocation70_spill] sm:$0xff] %v9678_v42  ;;  %v4113_v4 = vld [vmem:[%s11848_s3 + $0x40] sm:$0xff]  ;;  %v4114_v40 = vld [vmem:[%s11848_s3 + $0x48] sm:$0xff]  ;;  %v12322_v22 = vld [vmem:[#allocation137_spill] sm:$0xff] }
 0x292   : > { %7043 = vmatprep.subr.bf16.mxu0 %v12303_v31  ;;  %7091 = vmatprep.subr.bf16.mxu1 %v12303_v31  ;;  %v9689_v58 = vadd.f32 %v1607_v45, %v9464_v28  ;;  %v9692_v41 = vadd.f32 %v1606_v47, %v9469_v37  ;;  %v1612_v14 = vmul.f32 %v9443_v26, %v12322_v22  ;;  %v12323_v42 = vld [vmem:[#allocation138_spill] sm:$0xff]  ;;  %v12325_v47 = vld [vmem:[#allocation139_spill] sm:$0xff]  ;;  %v12331_v22 = vld [vmem:[#allocation144_spill] sm:$0xff] }
 0x293   : > { %v7044_v54 = vpack.c.bf16 %v4114_v40, %v4113_v4  ;;  %v9697_v36 = vadd.f32 %v1609_v32, %v9480_v50  ;;  %v9700_v20 = vadd.f32 %v1608_v10, %v9483_v62  ;;  %v9703_v51 = vadd.f32 %v1611_v27, %v9486_v39  ;;  %v9707_v45 = vpop.permute.xlu0 %2287  ;;  %v12326_v40 = vld [vmem:[#allocation140_spill] sm:$0xff]  ;;  %v12327_v39 = vld [vmem:[#allocation141_spill] sm:$0xff]  ;;  %v12328_v32 = vld [vmem:[#allocation142_spill] sm:$0xff] }
 0x294   : > { %12321 = vst [vmem:[#allocation71_spill] sm:$0xff] %v9692_v41  ;;  %v1615_v28 = vmul.f32 %v9443_v26, %v12323_v42  ;;  %12324 = vst [vmem:[#allocation15_spill] sm:$0xff] %v9707_v45  ;;  %v9710_v37 = vadd.f32 %v1610_v43, %v9491_v7  ;;  %v1614_v4 = vmul.f32 %v9443_v26, %v12325_v47  ;;  %v9723_v42 = vpop.permute.xlu1 %2282  ;;  %v4115_v7 = vld [vmem:[%s11848_s3 + $0x50] sm:$0xff]  ;;  %v4116_v43 = vld [vmem:[%s11848_s3 + $0x58] sm:$0xff] }
 0x295   : > { %v1846_v50 = vmul.f32 %v9676_v63, %v12326_v40  ;;  %7045 = vmatpush1.bf16.msra.mxu0 %v7044_v54  ;;  %7107 = vmatpush1.bf16.msra.mxu1 %v7044_v54  ;;  %v9717_v62 = vadd.f32 %v1613_v56, %v9494_v0  ;;  %v1616_v10 = vmul.f32 %v9443_v26, %v12327_v39  ;;  %v12330_v26 = vld [vmem:[#allocation143_spill] sm:$0xff]  ;;  %v12332_v39 = vld [vmem:[#allocation145_spill] sm:$0xff]  ;;  %v12333_v41 = vld [vmem:[#allocation146_spill] sm:$0xff] }
 0x296   : > { %v1848_v27 = vmul.f32 %v9676_v63, %v12328_v32  ;;  %12329 = vst [vmem:[#allocation17_spill] sm:$0xff] %v9723_v42  ;;  %7046 = vmatprep.subr.bf16.mxu0 %v12303_v31  ;;  %7092 = vmatprep.subr.bf16.mxu1 %v12303_v31  ;;  %v9734_v0 = vadd.f32 %v1612_v14, %v9507_v1  ;;  %v12334_v45 = vld [vmem:[#allocation147_spill] sm:$0xff] }
 0x297   : > { %v1847_v56 = vmul.f32 %v9676_v63, %v12330_v26  ;;  %v1850_v54 = vmul.f32 %v9676_v63, %v12331_v22  ;;  %v7047_v47 = vpack.c.bf16 %v4116_v43, %v4115_v7  ;;  %v9741_v40 = vadd.f32 %v1615_v28, %v9514_v19  ;;  %v9749_v14 = vpop.permute.xlu0 %2297  ;;  %v12336_v7 = vld [vmem:[#allocation148_spill] sm:$0xff]  ;;  %v12369_v52 = vld [vmem:[#allocation171_spill] sm:$0xff] }
 0x298   : > { %v1849_v32 = vmul.f32 %v9676_v63, %v12332_v39  ;;  %v1852_v42 = vmul.f32 %v9676_v63, %v12333_v41  ;;  %v1851_v1 = vmul.f32 %v9676_v63, %v12334_v45  ;;  %12335 = vst [vmem:[#allocation72_spill] sm:$0xff] %v9749_v14  ;;  %v9752_v26 = vadd.f32 %v1614_v4, %v9517_v35  ;;  %v12337_v45 = vld [vmem:[#allocation149_spill] sm:$0xff]  ;;  %v9767_v39 = vpop.permute.xlu1 %2292  ;;  %v4117_v35 = vld [vmem:[%s11848_s3 + $0x60] sm:$0xff]  ;;  %v12339_v4 = vld [vmem:[#allocation150_spill] sm:$0xff] }
 0x299   : > { %v9755_v22 = vadd.f32 %v1846_v50, %v9520_v16  ;;  %v1854_v19 = vmul.f32 %v9676_v63, %v12336_v7  ;;  %7048 = vmatpush1.bf16.msra.mxu0 %v7047_v47  ;;  %7108 = vmatpush1.bf16.msra.mxu1 %v7047_v47  ;;  %v9760_v28 = vadd.f32 %v1616_v10, %v9527_v57  ;;  %v4118_v16 = vld [vmem:[%s11848_s3 + $0x68] sm:$0xff] }
 0x29a   : > { %v9763_v41 = vadd.f32 %v1848_v27, %v9534_v8  ;;  %v1853_v43 = vmul.f32 %v9676_v63, %v12337_v45  ;;  %12338 = vst [vmem:[#allocation73_spill] sm:$0xff] %v9767_v39  ;;  %7049 = vmatprep.subr.bf16.mxu0 %v12303_v31  ;;  %7093 = vmatprep.subr.bf16.mxu1 %v12303_v31  ;;  %v12340_v45 = vld [vmem:[#allocation151_spill] sm:$0xff]  ;;  %v12351_v14 = vld [vmem:[#allocation160_spill] sm:$0xff] }
 0x29b   : > { %v9778_v57 = vadd.f32 %v1847_v56, %v9551_v13  ;;  %v9781_v8 = vadd.f32 %v1850_v54, %v9558_v34  ;;  %v1856_v50 = vmul.f32 %v9676_v63, %v12339_v4  ;;  %v7050_v10 = vpack.c.bf16 %v4118_v16, %v4117_v35  ;;  %v9796_v56 = vpop.permute.xlu0 %2307  ;;  %v12342_v54 = vld [vmem:[#allocation152_spill] sm:$0xff]  ;;  %v12343_v16 = vld [vmem:[#allocation153_spill] sm:$0xff] }
 0x29c   : > { %v9786_v27 = vadd.f32 %v1849_v32, %v9569_v59  ;;  %v9789_v47 = vadd.f32 %v1852_v42, %v9572_v3  ;;  %v9792_v7 = vadd.f32 %v1851_v1, %v9577_v48  ;;  %v1855_v13 = vmul.f32 %v9676_v63, %v12340_v45  ;;  %12341 = vst [vmem:[#allocation74_spill] sm:$0xff] %v9796_v56  ;;  %v12344_v48 = vld [vmem:[#allocation154_spill] sm:$0xff]  ;;  %v12345_v32 = vld [vmem:[#allocation155_spill] sm:$0xff]  ;;  %v9812_v4 = vpop.permute.xlu1 %2302  ;;  %v12348_v45 = vld [vmem:[#allocation157_spill] sm:$0xff] }
 0x29d   : > { %v9799_v34 = vadd.f32 %v1854_v19, %v9580_v24  ;;  %v1858_v35 = vmul.f32 %v9676_v63, %v12342_v54  ;;  %v1857_v59 = vmul.f32 %v9676_v63, %v12343_v16  ;;  %7051 = vmatpush1.bf16.msra.mxu0 %v7050_v10  ;;  %7109 = vmatpush1.bf16.msra.mxu1 %v7050_v10  ;;  %v4119_v24 = vld [vmem:[%s11848_s3 + $0x70] sm:$0xff]  ;;  %v4120_v19 = vld [vmem:[%s11848_s3 + $0x78] sm:$0xff]  ;;  %v12350_v56 = vld [vmem:[#allocation159_spill] sm:$0xff] }
 0x29e   : > { %v9806_v3 = vadd.f32 %v1853_v43, %v9595_v12  ;;  %v1860_v42 = vmul.f32 %v9676_v63, %v12344_v48  ;;  %v1859_v1 = vmul.f32 %v9676_v63, %v12345_v32  ;;  %12346 = vst [vmem:[#allocation75_spill] sm:$0xff] %v9812_v4  ;;  %7052 = vmatprep.subr.bf16.mxu0 %v12303_v31  ;;  %v12347_v43 = vld [vmem:[#allocation156_spill] sm:$0xff]  ;;  %v12349_v32 = vld [vmem:[#allocation158_spill] sm:$0xff] }
 0x29f   : > { %7094 = vmatprep.subr.bf16.mxu1 %v12303_v31  ;;  %v9823_v12 = vadd.f32 %v1856_v50, %v9598_v17  ;;  %v1862_v10 = vmul.f32 %v9676_v63, %v12347_v43  ;;  %v1861_v54 = vmul.f32 %v9676_v63, %v12348_v45  ;;  %v7053_v16 = vpack.c.bf16 %v4120_v19, %v4119_v24  ;;  %v9838_v50 = vpop.permute.xlu0 %2317  ;;  %v12352_v24 = vld [vmem:[#allocation161_spill] sm:$0xff] }
 0x2a0   : > { %v9830_v48 = vadd.f32 %v1855_v13, %v9603_v61  ;;  %v1864_v4 = vmul.f32 %v9676_v63, %v12349_v32  ;;  %v1863_v39 = vmul.f32 %v9676_v63, %v12350_v56  ;;  %v1866_v17 = vmul.f32 %v9676_v63, %v12351_v14  ;;  %v12353_v14 = vld [vmem:[#allocation162_spill] sm:$0xff]  ;;  %v9856_v32 = vpop.permute.xlu1 %2312 }
 0x2a1   : > { %v9841_v43 = vadd.f32 %v1858_v35, %v9606_v46  ;;  %v9844_v45 = vadd.f32 %v1857_v59, %v9609_v44  ;;  %v1865_v61 = vmul.f32 %v9676_v63, %v12352_v24  ;;  %7054 = vmatpush1.bf16.msra.mxu0 %v7053_v16  ;;  %7110 = vmatpush1.bf16.msra.mxu1 %v7053_v16  ;;  %v4121_v46 = vld [vmem:[%s11848_s3 + $0x80] sm:$0xff]  ;;  %v4122_v44 = vld [vmem:[%s11848_s3 + $0x88] sm:$0xff] }
 0x2a2   : > { %v9849_v13 = vadd.f32 %v1860_v42, %v9616_v11  ;;  %v9852_v56 = vadd.f32 %v1859_v1, %v9623_v15  ;;  %v1868_v19 = vmul.f32 %v9676_v63, %v12353_v14  ;;  %12354 = vst [vmem:[#allocation21_spill] sm:$0xff] %v9856_v32  ;;  %7055 = vmatprep.subr.bf16.mxu0 %v12303_v31  ;;  %v12355_v35 = vld [vmem:[#allocation164_spill] sm:$0xff]  ;;  %v12359_v14 = vld [vmem:[#allocation165_spill] sm:$0xff] }
 0x2a3   : > { %7095 = vmatprep.subr.bf16.mxu1 %v12303_v31  ;;  %v9867_v11 = vadd.f32 %v1862_v10, %v9640_v49  ;;  %v9870_v15 = vadd.f32 %v1861_v54, %v9647_v60  ;;  %v1870_v59 = vmul.f32 %v9676_v63, %v12355_v35  ;;  %v7056_v42 = vpack.c.bf16 %v4122_v44, %v4121_v46  ;;  %v9888_v60 = vld [vmem:[%s11846_s1 + $0x6] ss:$0 sm:$0xff]  ;;  %v9890_v10 = vpop.permute.xlu0 %2327  ;;  %v12364_v44 = vld [vmem:[#allocation169_spill] sm:$0xff] }
 0x2a4   : > { %v9875_v1 = vadd.f32 %v1864_v4, %v9658_v6  ;;  %v9878_v16 = vadd.f32 %v1863_v39, %v9661_v38  ;;  %v9881_v24 = vadd.f32 %v1866_v17, %v9666_v9  ;;  %v1869_v49 = vmul.f32 %v9676_v63, %v12359_v14  ;;  %v12361_v6 = vld [vmem:[#allocation166_spill] sm:$0xff]  ;;  %v12362_v39 = vld [vmem:[#allocation167_spill] sm:$0xff]  ;;  %v12363_v17 = vld [vmem:[#allocation168_spill] sm:$0xff] }
 0x2a5   : > { %v9893_v54 = vadd.f32 %v1865_v61, %v9669_v53  ;;  %v1872_v38 = vmul.f32 %v9676_v63, %v12361_v6  ;;  %v1871_v9 = vmul.f32 %v9676_v63, %v12362_v39  ;;  %7057 = vmatpush1.bf16.msra.mxu0 %v7056_v42  ;;  %7111 = vmatpush1.bf16.msra.mxu1 %v7056_v42  ;;  %v9909_v53 = vld [vmem:[%s11846_s1 + $0x7] ss:$0 sm:$0xff]  ;;  %v9911_v61 = vpop.permute.xlu1 %2322  ;;  %v12367_v39 = vld [vmem:[#allocation172_spill] sm:$0xff] }
 0x2a6   : > { %12356 = vst [vmem:[#allocation23_spill] sm:$0xff] %v9875_v1  ;;  %12357 = vst [vmem:[#allocation76_spill] sm:$0xff] %v9878_v16  ;;  %v9900_v4 = vadd.f32 %v1868_v19, %v9689_v58  ;;  %v1874_v46 = vmul.f32 %v9676_v63, %v12363_v17  ;;  %v1873_v35 = vmul.f32 %v9676_v63, %v12364_v44  ;;  %7058 = vmatprep.subr.bf16.mxu0 %v12303_v31  ;;  %v4123_v58 = vld [vmem:[%s11848_s3 + $0x90] sm:$0xff]  ;;  %v4124_v19 = vld [vmem:[%s11848_s3 + $0x98] sm:$0xff] }
 0x2a7   : > { %12358 = vst [vmem:[#allocation25_spill] sm:$0xff] %v9881_v24  ;;  %12360 = vst [vmem:[#allocation27_spill] sm:$0xff] %v9893_v54  ;;  %7096 = vmatprep.subr.bf16.mxu1 %v12303_v31  ;;  %v12365_v42 = vld [vmem:[#allocation163_spill] sm:$0xff]  ;;  %v9926_v6 = vadd.f32 %v1870_v59, %v9697_v36  ;;  %v2108_v17 = vmul.f32 %v9888_v60, %v12367_v39  ;;  %v7059_v44 = vpack.c.bf16 %v4124_v19, %v4123_v58  ;;  %v12368_v54 = vld [vmem:[#allocation170_spill] sm:$0xff] }
 0x2a8   : > { %v9923_v14 = vmul.f32 %v9676_v63, %v12365_v42  ;;  %v9931_v32 = vadd.f32 %v1869_v49, %v9700_v20  ;;  %v1876_v24 = vmul.f32 %v9676_v63, %v12368_v54  ;;  %v1875_v16 = vmul.f32 %v9676_v63, %v12369_v52  ;;  %v12370_v1 = vld [vmem:[#allocation173_spill] sm:$0xff]  ;;  %v12371_v54 = vld [vmem:[#allocation174_spill] sm:$0xff] }
 0x2a9   : > { %v1877_v42 = vmul.f32 %v9676_v63, %v12370_v1  ;;  %v9942_v36 = vadd.f32 %v1872_v38, %v9703_v51  ;;  %v1903_v59 = vadd.f32 %v1871_v9, %v9710_v37  ;;  %v2369_v20 = vmul.f32 %v9909_v53, %v9341_v18  ;;  %7060 = vmatpush1.bf16.msra.mxu0 %v7059_v44  ;;  %v2333_v1 = vpop.permute.xlu1 %2332  ;;  %v9958_v51 = vld [vmem:[%s11846_s1 + $0x8] ss:$0 sm:$0xff]  ;;  %v4125_v18 = vld [vmem:[%s11848_s3 + $0xa0] sm:$0xff] }
 0x2aa   : > { %12366 = vst [vmem:[#allocation77_spill] sm:$0xff] %v9923_v14  ;;  %v9939_v14 = vpop.permute.xlu0 %2337  ;;  %7112 = vmatpush1.bf16.msra.mxu1 %v7059_v44  ;;  %v9948_v49 = vadd.f32 %v1874_v46, %v9717_v62  ;;  %v9951_v52 = vadd.f32 %v1873_v35, %v9734_v0  ;;  %v2110_v63 = vmul.f32 %v9888_v60, %v12371_v54  ;;  %v4126_v37 = vld [vmem:[%s11848_s3 + $0xa8] sm:$0xff]  ;;  %v12372_v0 = vld [vmem:[#allocation175_spill] sm:$0xff]  ;;  %v12374_v44 = vld [vmem:[#allocation177_spill] sm:$0xff] }
 0x2ab   : > { %7061 = vmatprep.subr.bf16.mxu0 %v12303_v31  ;;  %7097 = vmatprep.subr.bf16.mxu1 %v12303_v31  ;;  %v2140_v62 = vadd.f32 %v2108_v17, %v9755_v22  ;;  %v2109_v38 = vmul.f32 %v9888_v60, %v12372_v0  ;;  %v12373_v9 = vld [vmem:[#allocation176_spill] sm:$0xff]  ;;  %v7062_v35 = vpack.c.bf16 %v4126_v37, %v4125_v18 }
 0x2ac   : > { %v2112_v46 = vmul.f32 %v9888_v60, %v12373_v9  ;;  %v9974_v58 = vadd.f32 %v1876_v24, %v9741_v40  ;;  %v9977_v19 = vadd.f32 %v1875_v16, %v9752_v26  ;;  %v9980_v39 = vadd.f32 %v1877_v42, %v9760_v28  ;;  %v9995_v16 = vld [vmem:[%s11847_s2] ss:$0 sm:$0xff] }
 0x2ad   : > { %v2111_v54 = vmul.f32 %v9888_v60, %v12374_v44  ;;  %v2401_v17 = vadd.f32 %v2369_v20, %v2140_v62  ;;  %v2371_v0 = vmul.f32 %v9909_v53, %v9384_v21  ;;  %7063 = vmatpush1.bf16.msra.mxu0 %v7062_v35  ;;  %v2142_v40 = vadd.f32 %v2110_v63, %v9763_v41  ;;  %v9997_v24 = vpop.permute.xlu1 %2342  ;;  %v4127_v21 = vld [vmem:[%s11848_s3 + $0xb0] sm:$0xff] }
 0x2ae   : > { %v2469_v22 = vpop.permute.xlu0 %2468  ;;  %7113 = vmatpush1.bf16.msra.mxu1 %v7062_v35  ;;  %v2133_v26 = vmul.f32 %v9888_v60, %v9226_v30  ;;  %v2370_v28 = vmul.f32 %v9909_v53, %v9407_v23  ;;  %7064 = vmatprep.subr.bf16.mxu0 %v12303_v31  ;;  %v4128_v30 = vld [vmem:[%s11848_s3 + $0xb8] sm:$0xff]  ;;  %v2141_v23 = vadd.f32 %v2109_v38, %v9778_v57 }
 0x2af   : > { %v2630_v9 = vmul.f32 %v9958_v51, %v2469_v22  ;;  %7098 = vmatprep.subr.bf16.mxu1 %v12303_v31  ;;  %v10009_v41 = vadd.f32 %v2112_v46, %v9781_v8  ;;  %v7065_v20 = vpack.c.bf16 %v4128_v30, %v4127_v21  ;;  %v10012_v63 = vadd.f32 %v2111_v54, %v9786_v27 }
 0x2b0   : > { %v2132_v18 = vmul.f32 %v9888_v60, %v9160_v29  ;;  %v2134_v37 = vmul.f32 %v9888_v60, %v9203_v55  ;;  %v2394_v62 = vmul.f32 %v9909_v53, %v2333_v1  ;;  %v2403_v44 = vadd.f32 %v2371_v0, %v2142_v40  ;;  %v4129_v29 = vld [vmem:[%s11848_s3 + $0xc0] sm:$0xff]  ;;  %v4130_v55 = vld [vmem:[%s11848_s3 + $0xc8] sm:$0xff] }
 0x2b1   : > { %v2662_v42 = vadd.f32 %v2630_v9, %v2401_v17  ;;  %7066 = vmatpush1.bf16.msra.mxu0 %v7065_v20  ;;  %v2165_v38 = vadd.f32 %v2133_v26, %v1903_v59  ;;  %v2402_v46 = vadd.f32 %v2370_v28, %v2141_v23  ;;  %v2393_v27 = vmul.f32 %v9909_v53, %v9890_v10  ;;  %v2474_v54 = vpop.permute.xlu1 %2473 }
 0x2b2   : > { %v2479_v35 = vpop.permute.xlu0 %2478  ;;  %7114 = vmatpush1.bf16.msra.mxu1 %v7065_v20  ;;  %7067 = vmatprep.subr.bf16.mxu0 %v12303_v31  ;;  %v2631_v59 = vmul.f32 %v9958_v51, %v2474_v54  ;;  %v7068_v17 = vpack.c.bf16 %v4130_v55, %v4129_v29  ;;  %v2130_v10 = vmul.f32 %v9888_v60, %v9115_v33 }
 0x2b3   : > { %v2701_v57 = vadd.f32 %v9995_v16, %v2662_v42  ;;  %v2632_v8 = vmul.f32 %v9958_v51, %v2479_v35  ;;  %7099 = vmatprep.subr.bf16.mxu1 %v12303_v31  ;;  %v2164_v0 = vadd.f32 %v2132_v18, %v9926_v6  ;;  %v2395_v9 = vmul.f32 %v9909_v53, %v9939_v14 }
 0x2b4   : > { %v2426_v40 = vadd.f32 %v2394_v62, %v2165_v38  ;;  %v2663_v21 = vadd.f32 %v2631_v59, %v2402_v46  ;;  %v2166_v23 = vadd.f32 %v2134_v37, %v9942_v36  ;;  %v2391_v33 = vmul.f32 %v9909_v53, %v9838_v50 }
 0x2b5   : > { %v2733_v1 = vmax.f32 %v2701_v57, 0.0  ;;  %v2664_v22 = vadd.f32 %v2632_v8, %v2403_v44  ;;  %7069 = vmatpush1.bf16.msra.mxu0 %v7068_v17  ;;  %v2425_v6 = vadd.f32 %v2393_v27, %v2164_v0  ;;  %v2589_v42 = vpop.permute.xlu1 %2588  ;;  %v2162_v35 = vadd.f32 %v2130_v10, %v9900_v4  ;;  %v4131_v4 = vld [vmem:[%s11848_s3 + $0xd0] sm:$0xff]  ;;  %v12375_v27 = vld [vmem:[#allocation178_spill] sm:$0xff] }
 0x2b6   : > { %v2594_v26 = vpop.permute.xlu0 %2593  ;;  %7115 = vmatpush1.bf16.msra.mxu1 %v7068_v17  ;;  %7070 = vmatprep.subr.bf16.mxu0 %v12303_v31  ;;  %v2702_v20 = vadd.f32 %v9995_v16, %v2663_v21  ;;  %v2654_v62 = vmul.f32 %v9958_v51, %v2589_v42  ;;  %v2131_v36 = vmul.f32 %v9888_v60, %v9181_v2  ;;  %v4132_v2 = vld [vmem:[%s11848_s3 + $0xd8] sm:$0xff] }
 0x2b7   : > { %2822 = vst.msk [vmem:[#allocation3 + $0x19] sm:$0xff] %vm2765_vm2, %v2733_v1  ;;  %v2703_v28 = vadd.f32 %v9995_v16, %v2664_v22  ;;  %v2655_v30 = vmul.f32 %v9958_v51, %v2594_v26  ;;  %7100 = vmatprep.subr.bf16.mxu1 %v12303_v31  ;;  %v2372_v50 = vmul.f32 %v9909_v53, %v9455_v25 }
 0x2b8   : > { %v2427_v37 = vadd.f32 %v2395_v9, %v2166_v23  ;;  %v2734_v57 = vmax.f32 %v2702_v20, 0.0  ;;  %v2686_v38 = vadd.f32 %v2654_v62, %v2425_v6  ;;  %v2114_v25 = vmul.f32 %v9888_v60, %v12375_v27 }
 0x2b9   : > { %v2735_v14 = vmax.f32 %v2703_v28, 0.0  ;;  %v2687_v18 = vadd.f32 %v2655_v30, %v2426_v40  ;;  %v2423_v54 = vadd.f32 %v2391_v33, %v2162_v35  ;;  %v2392_v29 = vmul.f32 %v9909_v53, %v9911_v61  ;;  %v2579_v55 = vpop.permute.xlu1 %2578 }
 0x2ba   : > { %v2599_v44 = vpop.permute.xlu0 %2598  ;;  %v7071_v1 = vpack.c.bf16 %v4132_v2, %v4131_v4  ;;  %2823 = vst.msk [vmem:[#allocation3 + $0x21] sm:$0xff] %vm2765_vm2, %v2734_v57  ;;  %v2725_v59 = vadd.f32 %v9995_v16, %v2686_v38  ;;  %v2652_v10 = vmul.f32 %v9958_v51, %v2579_v55  ;;  %v2163_v0 = vadd.f32 %v2131_v36, %v9931_v32  ;;  %v4133_v32 = vld [vmem:[%s11848_s3 + $0xe0] sm:$0xff]  ;;  %v2886_v4 = vld [vmem:[#allocation3 + $0x1] sm:$0xff]  ;;  %v12378_v2 = vld [vmem:[#allocation180_spill] sm:$0xff] }
 0x2bb   : > { %2824 = vst.msk [vmem:[#allocation3 + $0x31] sm:$0xff] %vm2765_vm2, %v2735_v14  ;;  %v2726_v8 = vadd.f32 %v9995_v16, %v2687_v18  ;;  %v2656_v46 = vmul.f32 %v9958_v51, %v2599_v44  ;;  %v2135_v9 = vmul.f32 %v9888_v60, %v9274_v5  ;;  %v2404_v40 = vadd.f32 %v2372_v50, %v10012_v63  ;;  %v4134_v5 = vld [vmem:[%s11848_s3 + $0xe8] sm:$0xff]  ;;  %v12376_v63 = vld [vmem:[#allocation47_spill] sm:$0xff] }
 0x2bc   : > { %7072 = vmatpush1.bf16.msra.mxu0 %v7071_v1  ;;  %7116 = vmatpush1.bf16.msra.mxu1 %v7071_v1  ;;  %v2757_v61 = vmax.f32 %v2725_v59, 0.0  ;;  %v2684_v21 = vadd.f32 %v2652_v10, %v2423_v54  ;;  %v2136_v23 = vmul.f32 %v9888_v60, %v12376_v63  ;;  %v2424_v33 = vadd.f32 %v2392_v29, %v2163_v0  ;;  %v12377_v50 = vld [vmem:[#allocation179_spill] sm:$0xff]  ;;  %v12379_v54 = vld [vmem:[#allocation69_spill] sm:$0xff] }
 0x2bd   : > { %v2758_v22 = vmax.f32 %v2726_v8, 0.0  ;;  %v2688_v17 = vadd.f32 %v2656_v46, %v2427_v37  ;;  %7073 = vmatprep.subr.bf16.mxu0 %v12303_v31  ;;  %7101 = vmatprep.subr.bf16.mxu1 %v12303_v31  ;;  %v2396_v6 = vmul.f32 %v9909_v53, %v9997_v24  ;;  %v2584_v42 = vpop.permute.xlu1 %2583  ;;  %v7074_v14 = vpack.c.bf16 %v4134_v5, %v4133_v32  ;;  %v12380_v0 = vld [vmem:[#allocation181_spill] sm:$0xff] }
 0x2be   : > { %v2484_v26 = vpop.permute.xlu0 %2483  ;;  %2846 = vst.msk [vmem:[#allocation3 + $0x139] sm:$0xff] %vm2765_vm2, %v2757_v61  ;;  %v2723_v18 = vadd.f32 %v9995_v16, %v2684_v21  ;;  %v2653_v35 = vmul.f32 %v9958_v51, %v2584_v42  ;;  %v10091_v36 = vadd.f32 %v2114_v25, %v9789_v47  ;;  %v2113_v37 = vmul.f32 %v9888_v60, %v12377_v50  ;;  %v4135_v47 = vld [vmem:[%s11848_s3 + $0xf0] sm:$0xff] }
 0x2bf   : > { %2847 = vst.msk [vmem:[#allocation3 + $0x141] sm:$0xff] %vm2765_vm2, %v2758_v22  ;;  %v2727_v28 = vadd.f32 %v9995_v16, %v2688_v17  ;;  %v2633_v30 = vmul.f32 %v9958_v51, %v2484_v26  ;;  %v2167_v44 = vadd.f32 %v2135_v9, %v9951_v52  ;;  %v4136_v52 = vld [vmem:[%s11848_s3 + $0xf8] sm:$0xff]  ;;  %v2116_v27 = vmul.f32 %v9888_v60, %v12378_v2  ;;  %v12385_v2 = vld [vmem:[#allocation12_spill] sm:$0xff] }
 0x2c0   : > { %7075 = vmatpush1.bf16.msra.mxu0 %v7074_v14  ;;  %7117 = vmatpush1.bf16.msra.mxu1 %v7074_v14  ;;  %v2755_v24 = vmax.f32 %v2723_v18, 0.0  ;;  %v2685_v38 = vadd.f32 %v2653_v35, %v2424_v33  ;;  %v2168_v25 = vadd.f32 %v2136_v23, %v9948_v49  ;;  %v2373_v29 = vmul.f32 %v9909_v53, %v12379_v54  ;;  %v2918_v5 = vld [vmem:[#allocation3 + $0x2] sm:$0xff]  ;;  %v12383_v14 = vld [vmem:[#allocation183_spill] sm:$0xff] }
 0x2c1   : > { %v2759_v20 = vmax.f32 %v2727_v28, 0.0  ;;  %v2665_v62 = vadd.f32 %v2633_v30, %v2404_v40  ;;  %7076 = vmatprep.subr.bf16.mxu0 %v12303_v31  ;;  %7102 = vmatprep.subr.bf16.mxu1 %v12303_v31  ;;  %v2604_v55 = vpop.permute.xlu1 %2603  ;;  %v10112_v1 = vld [vmem:[#allocation3 + $0x1a] sm:$0xff]  ;;  %v7077_v22 = vpack.c.bf16 %v4136_v52, %v4135_v47  ;;  %v2428_v59 = vadd.f32 %v2396_v6, %v2167_v44  ;;  %v12382_v6 = vld [vmem:[#allocation182_spill] sm:$0xff] }
 0x2c2   : > { %v2348_v57 = vpop.permute.xlu0 %2347  ;;  %2844 = vst.msk [vmem:[#allocation3 + $0x121] sm:$0xff] %vm2765_vm2, %v2755_v24  ;;  %v2724_v10 = vadd.f32 %v9995_v16, %v2685_v38  ;;  %v2657_v31 = vmul.f32 %v9958_v51, %v2604_v55  ;;  %v2115_v9 = vmul.f32 %v9888_v60, %v12380_v0  ;;  %v12381_v40 = vld [vmem:[#allocation57_spill] sm:$0xff]  ;;  %v7168_v61 = vpack.i.bf16 %v2886_v4, %v10112_v1  ;;  %v10124_v63 = vld [vmem:[#allocation3 + $0x30] sm:$0xff] }
 0x2c3   : > { %2848 = vst.msk [vmem:[#allocation3 + $0x151] sm:$0xff] %vm2765_vm2, %v2759_v20  ;;  %v2704_v8 = vadd.f32 %v9995_v16, %v2665_v62  ;;  %v2397_v46 = vmul.f32 %v9909_v53, %v2348_v57  ;;  %v2374_v49 = vmul.f32 %v9909_v53, %v12381_v40  ;;  %v2145_v23 = vadd.f32 %v2113_v37, %v9792_v7  ;;  %v12384_v37 = vld [vmem:[#allocation51_spill] sm:$0xff] }
 0x2c4   : > { %7078 = vmatpush1.bf16.msra.mxu0 %v7077_v22  ;;  %7118 = vmatpush1.bf16.msra.mxu1 %v7077_v22  ;;  %v2756_v28 = vmax.f32 %v2724_v10, 0.0  ;;  %v2689_v30 = vadd.f32 %v2657_v31, %v2428_v59  ;;  %v10128_v33 = vadd.f32 %v2116_v27, %v9799_v34  ;;  %v2118_v42 = vmul.f32 %v9888_v60, %v12382_v6  ;;  %v10147_v47 = vld [vmem:[#allocation3 + $0x31] sm:$0xff]  ;;  %v12387_v31 = vld [vmem:[#allocation14_spill] sm:$0xff]  ;;  %v12389_v6 = vld [vmem:[#allocation29_spill] sm:$0xff] }
 0x2c5   : > { %v2736_v17 = vmax.f32 %v2704_v8, 0.0  ;;  %v2429_v21 = vadd.f32 %v2397_v46, %v2168_v25  ;;  %v2117_v20 = vmul.f32 %v9888_v60, %v12383_v14  ;;  %7169 = vrot.lane.b32.xlu0 %v7168_v61, %s7716_s14  ;;  %v2489_v18 = vpop.permute.xlu1 %2488  ;;  %v2405_v62 = vadd.f32 %v2373_v29, %v10009_v41  ;;  %v12386_v25 = vld [vmem:[#allocation49_spill] sm:$0xff] }
 0x2c6   : > { %v2609_v26 = vpop.permute.xlu0 %2608  ;;  %2845 = vst.msk [vmem:[#allocation3 + $0x129] sm:$0xff] %vm2765_vm2, %v2756_v28  ;;  %v2728_v35 = vadd.f32 %v9995_v16, %v2689_v30  ;;  %v2634_v34 = vmul.f32 %v9958_v51, %v2489_v18  ;;  %v10140_v50 = vadd.f32 %v2115_v9, %v9806_v3  ;;  %v2137_v44 = vmul.f32 %v9888_v60, %v12384_v37  ;;  %v10163_v10 = vld [vmem:[#allocation3 + $0x13a] sm:$0xff]  ;;  %v12388_v9 = vld [vmem:[#allocation19_spill] sm:$0xff] }
 0x2c7   : > { %2825 = vst.msk [vmem:[#allocation3 + $0x39] sm:$0xff] %vm2765_vm2, %v2736_v17  ;;  %v2658_v32 = vmul.f32 %v9958_v51, %v2609_v26  ;;  %v2406_v57 = vadd.f32 %v2374_v49, %v2145_v23  ;;  %v7178_v8 = vpack.i.bf16 %v2918_v5, %v10124_v63  ;;  %v10150_v52 = vadd.f32 %v2118_v42, %v9823_v12  ;;  %v2950_v17 = vld [vmem:[#allocation3 + $0x18] sm:$0xff]  ;;  %v2887_v5 = vld [vmem:[#allocation3 + $0x9] sm:$0xff] }
 0x2c8   : > { %v2760_v38 = vmax.f32 %v2728_v35, 0.0  ;;  %v2666_v46 = vadd.f32 %v2634_v34, %v2405_v62  ;;  %v10153_v3 = vadd.f32 %v2117_v20, %v9830_v48  ;;  %v2120_v27 = vmul.f32 %v9888_v60, %v12385_v2  ;;  %v10175_v23 = vld [vmem:[#allocation3 + $0x22] sm:$0xff]  ;;  %v12390_v20 = vld [vmem:[#allocation55_spill] sm:$0xff] }
 0x2c9   : > { %v2690_v7 = vadd.f32 %v2658_v32, %v2429_v21  ;;  %v2138_v54 = vmul.f32 %v9888_v60, %v12386_v25  ;;  %7179 = vrot.lane.b32.xlu0 %v7178_v8, %s7717_s15  ;;  %v2353_v29 = vpop.permute.xlu1 %2352  ;;  %v2910_v55 = vld [vmem:[#allocation3 + $0x121] sm:$0xff]  ;;  %v2119_v0 = vmul.f32 %v9888_v60, %v12387_v31  ;;  %v2122_v40 = vmul.f32 %v9888_v60, %v12388_v9 }
 0x2ca   : > { %v2494_v24 = vpop.permute.xlu0 %2493  ;;  %2849 = vst.msk [vmem:[#allocation3 + $0x159] sm:$0xff] %vm2765_vm2, %v2760_v38  ;;  %v2705_v12 = vadd.f32 %v9995_v16, %v2666_v46  ;;  %v2398_v48 = vmul.f32 %v9909_v53, %v2353_v29  ;;  %v7188_v26 = vpack.i.bf16 %v2950_v17, %v10147_v47  ;;  %v7173_v61 = vpack.i.bf16 %v2910_v55, %v10163_v10  ;;  %v10184_v35 = vld [vmem:[#allocation3 + $0x150] sm:$0xff]  ;;  %v12392_v29 = vld [vmem:[#allocation33_spill] sm:$0xff] }
 0x2cb   : > { %v2729_v41 = vadd.f32 %v9995_v16, %v2690_v7  ;;  %v2635_v4 = vmul.f32 %v9958_v51, %v2494_v24  ;;  %v2169_v28 = vadd.f32 %v2137_v44, %v9977_v19  ;;  %v2121_v42 = vmul.f32 %v9888_v60, %v12389_v6  ;;  %v12391_v24 = vld [vmem:[#allocation61_spill] sm:$0xff] }
 0x2cc   : > { %v2737_v21 = vmax.f32 %v2705_v12, 0.0  ;;  %v2170_v14 = vadd.f32 %v2138_v54, %v9974_v58  ;;  %v2375_v18 = vmul.f32 %v9909_v53, %v12390_v20  ;;  %7174 = vrot.lane.b32.xlu1 %v7173_v61, %s7716_s14  ;;  %v10190_v44 = vadd.f32 %v2120_v27, %v9841_v43  ;;  %v2919_v43 = vld [vmem:[#allocation3 + $0xa] sm:$0xff] }
 0x2cd   : > { %v2761_v22 = vmax.f32 %v2729_v41, 0.0  ;;  %v2667_v59 = vadd.f32 %v2635_v4, %v2406_v57  ;;  %7189 = vrot.lane.b32.xlu0 %v7188_v26, %s7718_s16  ;;  %v2614_v19 = vpop.permute.xlu1 %2613  ;;  %v2942_v62 = vld [vmem:[#allocation3 + $0x122] sm:$0xff]  ;;  %v2430_v34 = vadd.f32 %v2398_v48, %v2169_v28  ;;  %v10193_v57 = vadd.f32 %v2119_v0, %v9844_v45  ;;  %v10205_v45 = vld [vmem:[#allocation3 + $0x151] sm:$0xff] }
 0x2ce   : > { %v2358_v49 = vpop.permute.xlu0 %2357  ;;  %2826 = vst.msk [vmem:[#allocation3 + $0x49] sm:$0xff] %vm2765_vm2, %v2737_v21  ;;  %v2659_v37 = vmul.f32 %v9958_v51, %v2614_v19  ;;  %v7183_v58 = vpack.i.bf16 %v2942_v62, %v10184_v35  ;;  %v2376_v8 = vmul.f32 %v9909_v53, %v12391_v24  ;;  %v7198_v41 = vpack.i.bf16 %v2887_v5, %v10175_v23  ;;  %v10203_v27 = vld [vmem:[#allocation3 + $0x38] sm:$0xff]  ;;  %v12394_v0 = vld [vmem:[#allocation59_spill] sm:$0xff] }
 0x2cf   : > { %2850 = vst.msk [vmem:[#allocation3 + $0x169] sm:$0xff] %vm2765_vm2, %v2761_v22  ;;  %v2706_v30 = vadd.f32 %v9995_v16, %v2667_v59  ;;  %v2399_v32 = vmul.f32 %v9909_v53, %v2358_v49  ;;  %v10199_v46 = vadd.f32 %v2122_v40, %v9849_v13  ;;  %v10208_v54 = vadd.f32 %v2121_v42, %v9852_v56  ;;  %v12393_v22 = vld [vmem:[#allocation53_spill] sm:$0xff]  ;;  %v2974_v56 = vld [vmem:[#allocation3 + $0x138] sm:$0xff]  ;;  %v2911_v5 = vld [vmem:[#allocation3 + $0x129] sm:$0xff] }
 0x2d0   : > { %v2691_v2 = vadd.f32 %v2659_v37, %v2430_v34  ;;  %v2124_v55 = vmul.f32 %v9888_v60, %v12392_v29  ;;  %v2139_v13 = vmul.f32 %v9888_v60, %v12393_v22  ;;  %7184 = vrot.lane.b32.xlu1 %v7183_v58, %s7717_s15  ;;  %v2407_v59 = vadd.f32 %v2375_v18, %v10091_v36  ;;  %v12395_v42 = vld [vmem:[#allocation35_spill] sm:$0xff]  ;;  %v2951_v34 = vld [vmem:[#allocation3 + $0x20] sm:$0xff] }
 0x2d1   : > { %v2738_v7 = vmax.f32 %v2706_v30, 0.0  ;;  %v2431_v4 = vadd.f32 %v2399_v32, %v2170_v14  ;;  %7199 = vrot.lane.b32.xlu0 %v7198_v41, %s7716_s14  ;;  %v2499_v12 = vpop.permute.xlu1 %2498  ;;  %v2377_v9 = vmul.f32 %v9909_v53, %v12394_v0  ;;  %v2408_v40 = vadd.f32 %v2376_v8, %v10140_v50  ;;  %v10226_v32 = vld [vmem:[#allocation3 + $0x39] sm:$0xff]  ;;  %v10240_v37 = vld [vmem:[#allocation3 + $0x142] sm:$0xff]  ;;  %v12398_v22 = vld [vmem:[#allocation39_spill] sm:$0xff] }
 0x2d2   : > { %v2619_v38 = vpop.permute.xlu0 %2618  ;;  %v2730_v48 = vadd.f32 %v9995_v16, %v2691_v2  ;;  %v2636_v31 = vmul.f32 %v9958_v51, %v2499_v12  ;;  %v7208_v26 = vpack.i.bf16 %v2919_v43, %v10203_v27  ;;  %v7193_v61 = vpack.i.bf16 %v2974_v56, %v10205_v45  ;;  %v12396_v14 = vld [vmem:[#allocation37_spill] sm:$0xff]  ;;  %v12399_v12 = vld [vmem:[#allocation64_spill] sm:$0xff] }
 0x2d3   : > { %2827 = vst.msk [vmem:[#allocation3 + $0x51] sm:$0xff] %vm2765_vm2, %v2738_v7  ;;  %v2660_v25 = vmul.f32 %v9958_v51, %v2619_v38  ;;  %v10229_v6 = vadd.f32 %v2124_v55, %v9867_v11  ;;  %v2123_v50 = vmul.f32 %v9888_v60, %v12395_v42  ;;  %v2126_v20 = vmul.f32 %v9888_v60, %v12396_v14  ;;  %v10251_v55 = vld [vmem:[#allocation3 + $0x32] sm:$0xff] }
 0x2d4   : > { %v2762_v28 = vmax.f32 %v2730_v48, 0.0  ;;  %v2668_v36 = vadd.f32 %v2636_v31, %v2407_v59  ;;  %7194 = vrot.lane.b32.xlu1 %v7193_v61, %s7718_s16  ;;  %v2171_v58 = vadd.f32 %v2139_v13, %v9980_v39  ;;  %v2409_v24 = vadd.f32 %v2377_v9, %v10128_v33  ;;  %v10253_v39 = vld [vmem:[#allocation3 + $0x158] sm:$0xff]  ;;  %v2943_v9 = vld [vmem:[#allocation3 + $0x12a] sm:$0xff] }
 0x2d5   : > { %v2692_v17 = vadd.f32 %v2660_v25, %v2431_v4  ;;  %7209 = vrot.lane.b32.xlu0 %v7208_v26, %s7717_s15  ;;  %v2363_v18 = vpop.permute.xlu1 %2362  ;;  %v7218_v38 = vpack.i.bf16 %v2951_v34, %v10226_v32  ;;  %v7203_v41 = vpack.i.bf16 %v2911_v5, %v10240_v37  ;;  %v12397_v4 = vld [vmem:[#allocation63_spill] sm:$0xff]  ;;  %v10256_v33 = vadd.f32 %v2123_v50, %v9870_v15  ;;  %v10266_v15 = vld [vmem:[#allocation3 + $0x19] sm:$0xff]  ;;  %v12401_v26 = vld [vmem:[#allocation66_spill] sm:$0xff] }
 0x2d6   : > { %v2504_v49 = vpop.permute.xlu0 %2503  ;;  %2851 = vst.msk [vmem:[#allocation3 + $0x171] sm:$0xff] %vm2765_vm2, %v2762_v28  ;;  %v2707_v62 = vadd.f32 %v9995_v16, %v2668_v36  ;;  %v2400_v11 = vmul.f32 %v9909_v53, %v2363_v18  ;;  %v2379_v2 = vmul.f32 %v9909_v53, %v12397_v4  ;;  %v2125_v13 = vmul.f32 %v9888_v60, %v12398_v22  ;;  %v10280_v14 = vld [vmem:[#allocation3 + $0x159] sm:$0xff] }
 0x2d7   : > { %v2731_v21 = vadd.f32 %v9995_v16, %v2692_v17  ;;  %v2637_v30 = vmul.f32 %v9958_v51, %v2504_v49  ;;  %v2378_v59 = vmul.f32 %v9909_v53, %v12399_v12  ;;  %v2381_v61 = vmul.f32 %v9909_v53, %v12401_v26  ;;  %v12402_v18 = vld [vmem:[#allocation76_spill] sm:$0xff] }
 0x2d8   : > { %v2739_v25 = vmax.f32 %v2707_v62, 0.0  ;;  %7204 = vrot.lane.b32.xlu1 %v7203_v41, %s7716_s14  ;;  %v2432_v31 = vadd.f32 %v2400_v11, %v2171_v58  ;;  %v7213_v36 = vpack.i.bf16 %v2943_v9, %v10253_v39  ;;  %v12404_v4 = vld [vmem:[#allocation68_spill] sm:$0xff] }
 0x2d9   : > { %v2763_v19 = vmax.f32 %v2731_v21, 0.0  ;;  %v2669_v7 = vadd.f32 %v2637_v30, %v2408_v40  ;;  %7219 = vrot.lane.b32.xlu0 %v7218_v38, %s7718_s16  ;;  %v2624_v48 = vpop.permute.xlu1 %2623  ;;  %v12400_v40 = vld [vmem:[#allocation23_spill] sm:$0xff]  ;;  %v7228_v21 = vpack.i.bf16 %v10266_v15, %v10251_v55  ;;  %v2411_v30 = vadd.f32 %v2379_v2, %v10150_v52  ;;  %v2975_v38 = vld [vmem:[#allocation3 + $0x140] sm:$0xff] }
 0x2da   : > { %v2509_v8 = vpop.permute.xlu0 %2508  ;;  %2828 = vst.msk [vmem:[#allocation3 + $0x61] sm:$0xff] %vm2765_vm2, %v2739_v25  ;;  %v2661_v0 = vmul.f32 %v9958_v51, %v2624_v48  ;;  %v10269_v49 = vadd.f32 %v2126_v20, %v12400_v40  ;;  %v10282_v20 = vld [vmem:[#allocation3 + $0x48] sm:$0xff]  ;;  %v2410_v62 = vadd.f32 %v2378_v59, %v10153_v3  ;;  %v2413_v41 = vadd.f32 %v2381_v61, %v10190_v44  ;;  %v10303_v59 = vld [vmem:[#allocation3 + $0x152] sm:$0xff]  ;;  %v12405_v48 = vld [vmem:[#allocation41_spill] sm:$0xff] }
 0x2db   : > { %2852 = vst.msk [vmem:[#allocation3 + $0x181] sm:$0xff] %vm2765_vm2, %v2763_v19  ;;  %v2708_v43 = vadd.f32 %v9995_v16, %v2669_v7  ;;  %v2638_v29 = vmul.f32 %v9958_v51, %v2509_v8  ;;  %v10285_v19 = vadd.f32 %v2125_v13, %v12402_v18  ;;  %v12403_v7 = vld [vmem:[#allocation67_spill] sm:$0xff]  ;;  %v2383_v3 = vmul.f32 %v9909_v53, %v12404_v4 }
 0x2dc   : > { %v2693_v42 = vadd.f32 %v2661_v0, %v2432_v31  ;;  %v2380_v11 = vmul.f32 %v9909_v53, %v12403_v7  ;;  %7214 = vrot.lane.b32.xlu1 %v7213_v36, %s7717_s15  ;;  %v7223_v25 = vpack.i.bf16 %v2975_v38, %v10280_v14  ;;  %v10305_v44 = vld [vmem:[#allocation3 + $0x49] sm:$0xff] }
 0x2dd   : > { %v2740_v17 = vmax.f32 %v2708_v43, 0.0  ;;  %v2670_v56 = vadd.f32 %v2638_v29, %v2409_v24  ;;  %7229 = vrot.lane.b32.xlu0 %v7228_v21, %s7716_s14  ;;  %v2514_v52 = vpop.permute.xlu1 %2513  ;;  %v7238_v43 = vpack.i.bf16 %v10112_v1, %v10282_v20  ;;  %v12407_v21 = vld [vmem:[#allocation15_spill] sm:$0xff] }
 0x2de   : > { %v2519_v28 = vpop.permute.xlu0 %2518  ;;  %v2732_v58 = vadd.f32 %v9995_v16, %v2693_v42  ;;  %v2639_v8 = vmul.f32 %v9958_v51, %v2514_v52  ;;  %v2412_v31 = vadd.f32 %v2380_v11, %v10193_v57  ;;  %v2415_v57 = vadd.f32 %v2383_v3, %v10199_v46  ;;  %v10329_v11 = vld [vmem:[#allocation3 + $0x168] sm:$0xff]  ;;  %v10331_v46 = vld [vmem:[#allocation3 + $0x3a] sm:$0xff] }
 0x2df   : > { %2829 = vst.msk [vmem:[#allocation3 + $0x69] sm:$0xff] %vm2765_vm2, %v2740_v17  ;;  %v2709_v5 = vadd.f32 %v9995_v16, %v2670_v56  ;;  %v2640_v50 = vmul.f32 %v9958_v51, %v2519_v28  ;;  %v2128_v17 = vmul.f32 %v9888_v60, %v12405_v48  ;;  %v12406_v56 = vld [vmem:[#allocation70_spill] sm:$0xff]  ;;  %v10317_v28 = vld [vmem:[#allocation3 + $0x139] sm:$0xff]  ;;  %v2385_v36 = vmul.f32 %v9909_v53, %v12407_v21 }
 0x2e0   : > { %v2764_v29 = vmax.f32 %v2732_v58, 0.0  ;;  %v2671_v13 = vadd.f32 %v2639_v8, %v2410_v62  ;;  %v2382_v1 = vmul.f32 %v9909_v53, %v12406_v56  ;;  %7224 = vrot.lane.b32.xlu1 %v7223_v25, %s7718_s16  ;;  %v7248_v42 = vpack.i.bf16 %v10124_v63, %v10305_v44  ;;  %v12408_v52 = vld [vmem:[#allocation25_spill] sm:$0xff]  ;;  %v12410_v25 = vld [vmem:[#allocation72_spill] sm:$0xff]  ;;  %v10354_v56 = vld [vmem:[#allocation3 + $0x169] sm:$0xff] }
 0x2e1   : > { %v2741_v34 = vmax.f32 %v2709_v5, 0.0  ;;  %v2672_v24 = vadd.f32 %v2640_v50, %v2411_v30  ;;  %7239 = vrot.lane.b32.xlu0 %v7238_v43, %s7717_s15  ;;  %v2524_v0 = vpop.permute.xlu1 %2523  ;;  %v7233_v5 = vpack.i.bf16 %v10317_v28, %v10303_v59  ;;  %v2387_v43 = vmul.f32 %v9909_v53, %v12410_v25 }
 0x2e2   : > { %v2529_v2 = vpop.permute.xlu0 %2528  ;;  %2853 = vst.msk [vmem:[#allocation3 + $0x189] sm:$0xff] %vm2765_vm2, %v2764_v29  ;;  %v2710_v40 = vadd.f32 %v9995_v16, %v2671_v13  ;;  %v2641_v61 = vmul.f32 %v9958_v51, %v2524_v0  ;;  %v2414_v58 = vadd.f32 %v2382_v1, %v10208_v54  ;;  %v2417_v54 = vadd.f32 %v2385_v36, %v10229_v6  ;;  %v10356_v6 = vld [vmem:[#allocation3 + $0x50] sm:$0xff] }
 0x2e3   : > { %2830 = vst.msk [vmem:[#allocation3 + $0x79] sm:$0xff] %vm2765_vm2, %v2741_v34  ;;  %v2711_v22 = vadd.f32 %v9995_v16, %v2672_v24  ;;  %v2642_v12 = vmul.f32 %v9958_v51, %v2529_v2  ;;  %v2160_v34 = vadd.f32 %v2128_v17, %v12408_v52  ;;  %v12409_v24 = vld [vmem:[#allocation17_spill] sm:$0xff]  ;;  %v12411_v1 = vld [vmem:[#allocation43_spill] sm:$0xff] }
 0x2e4   : > { %v2742_v50 = vmax.f32 %v2710_v40, 0.0  ;;  %v2673_v62 = vadd.f32 %v2641_v61, %v2412_v31  ;;  %v2384_v8 = vmul.f32 %v9909_v53, %v12409_v24  ;;  %7234 = vrot.lane.b32.xlu1 %v7233_v5, %s7716_s14  ;;  %v10342_v2 = vld [vmem:[#allocation3 + $0x21] sm:$0xff]  ;;  %v2127_v0 = vmul.f32 %v9888_v60, %v12411_v1 }
 0x2e5   : > { %v2743_v9 = vmax.f32 %v2711_v22, 0.0  ;;  %v2674_v26 = vadd.f32 %v2642_v12, %v2413_v41  ;;  %7249 = vrot.lane.b32.xlu0 %v7248_v42, %s7718_s16  ;;  %v2534_v63 = vpop.permute.xlu1 %2533  ;;  %v7243_v22 = vpack.i.bf16 %v10163_v10, %v10329_v11  ;;  %v7258_v13 = vpack.i.bf16 %v10342_v2, %v10331_v46  ;;  %v12413_v5 = vld [vmem:[#allocation74_spill] sm:$0xff]  ;;  %v10378_v24 = vld [vmem:[#allocation3 + $0x15a] sm:$0xff] }
 0x2e6   : > { %v2539_v30 = vpop.permute.xlu0 %2538  ;;  %2831 = vst.msk [vmem:[#allocation3 + $0x81] sm:$0xff] %vm2765_vm2, %v2742_v50  ;;  %v2712_v41 = vadd.f32 %v9995_v16, %v2673_v62  ;;  %v2643_v3 = vmul.f32 %v9958_v51, %v2534_v63  ;;  %v2416_v10 = vadd.f32 %v2384_v8, %v10256_v33  ;;  %v2389_v33 = vmul.f32 %v9909_v53, %v12413_v5  ;;  %v12414_v8 = vld [vmem:[#allocation27_spill] sm:$0xff] }
 0x2e7   : > { %2832 = vst.msk [vmem:[#allocation3 + $0x91] sm:$0xff] %vm2765_vm2, %v2743_v9  ;;  %v2713_v18 = vadd.f32 %v9995_v16, %v2674_v26  ;;  %v2644_v7 = vmul.f32 %v9958_v51, %v2539_v30  ;;  %v12412_v9 = vld [vmem:[#allocation73_spill] sm:$0xff]  ;;  %v2419_v30 = vadd.f32 %v2387_v43, %v10269_v49  ;;  %v7253_v50 = vpack.i.bf16 %v10184_v35, %v10354_v56  ;;  %v10380_v49 = vld [vmem:[#allocation3 + $0x51] sm:$0xff] }
 0x2e8   : > { %v2744_v12 = vmax.f32 %v2712_v41, 0.0  ;;  %v2675_v17 = vadd.f32 %v2643_v3, %v2414_v58  ;;  %v2386_v40 = vmul.f32 %v9909_v53, %v12412_v9  ;;  %7244 = vrot.lane.b32.xlu1 %v7243_v22, %s7717_s15  ;;  %v2159_v63 = vadd.f32 %v2127_v0, %v12414_v8  ;;  %v12415_v35 = vld [vmem:[#allocation75_spill] sm:$0xff]  ;;  %v10391_v43 = vld [vmem:[#allocation3 + $0x141] sm:$0xff] }
 0x2e9   : > { %v2745_v38 = vmax.f32 %v2713_v18, 0.0  ;;  %v2676_v4 = vadd.f32 %v2644_v7, %v2415_v57  ;;  %7259 = vrot.lane.b32.xlu0 %v7258_v13, %s7716_s14  ;;  %v2544_v26 = vpop.permute.xlu1 %2543  ;;  %v7268_v18 = vpack.i.bf16 %v10175_v23, %v10356_v6  ;;  %v2388_v41 = vmul.f32 %v9909_v53, %v12415_v35  ;;  %v10404_v9 = vld [vmem:[#allocation3 + $0x170] sm:$0xff] }
 0x2ea   : > { %v2549_v29 = vpop.permute.xlu0 %2548  ;;  %2833 = vst.msk [vmem:[#allocation3 + $0x99] sm:$0xff] %vm2765_vm2, %v2744_v12  ;;  %v2714_v57 = vadd.f32 %v9995_v16, %v2675_v17  ;;  %v2645_v36 = vmul.f32 %v9958_v51, %v2544_v26  ;;  %v2421_v22 = vadd.f32 %v2389_v33, %v2160_v34  ;;  %v7263_v12 = vpack.i.bf16 %v10391_v43, %v10378_v24  ;;  %v12418_v34 = vld [vmem:[#allocation77_spill] sm:$0xff] }
 0x2eb   : > { %2834 = vst.msk [vmem:[#allocation3 + $0xa9] sm:$0xff] %vm2765_vm2, %v2745_v38  ;;  %v2715_v48 = vadd.f32 %v9995_v16, %v2676_v4  ;;  %v2646_v31 = vmul.f32 %v9958_v51, %v2549_v29  ;;  %v2418_v38 = vadd.f32 %v2386_v40, %v10285_v19  ;;  %v12416_v29 = vld [vmem:[#allocation45_spill] sm:$0xff]  ;;  %v2420_v26 = vadd.f32 %v2388_v41, %v2159_v63 }
 0x2ec   : > { %v2746_v62 = vmax.f32 %v2714_v57, 0.0  ;;  %v2677_v52 = vadd.f32 %v2645_v36, %v2416_v10  ;;  %7254 = vrot.lane.b32.xlu1 %v7253_v50, %s7718_s16  ;;  %v2129_v19 = vmul.f32 %v9888_v60, %v12416_v29  ;;  %v10402_v10 = vld [vmem:[#allocation3 + $0x4a] sm:$0xff]  ;;  %v3019_v29 = vld [vmem:[#allocation3 + $0x52] sm:$0xff] }
 0x2ed   : > { %v2747_v61 = vmax.f32 %v2715_v48, 0.0  ;;  %v2678_v21 = vadd.f32 %v2646_v31, %v2417_v54  ;;  %7269 = vrot.lane.b32.xlu0 %v7268_v18, %s7717_s15  ;;  %v2554_v23 = vpop.permute.xlu1 %2553  ;;  %v7278_v48 = vpack.i.bf16 %v10203_v27, %v10380_v49  ;;  %v12417_v60 = vld [vmem:[#allocation71_spill] sm:$0xff]  ;;  %v7288_v33 = vpack.i.bf16 %v10147_v47, %v10402_v10 }
 0x2ee   : > { %v2559_v42 = vpop.permute.xlu0 %2558  ;;  %2835 = vst.msk [vmem:[#allocation3 + $0xb1] sm:$0xff] %vm2765_vm2, %v2746_v62  ;;  %v2716_v3 = vadd.f32 %v9995_v16, %v2677_v52  ;;  %v2647_v25 = vmul.f32 %v9958_v51, %v2554_v23  ;;  %v1899_v40 = vadd.f32 %v12418_v34, %v12417_v60  ;;  %v3051_v52 = vld [vmem:[#allocation3 + $0x60] sm:$0xff] }
 0x2ef   : > { %2836 = vst.msk [vmem:[#allocation3 + $0xc1] sm:$0xff] %vm2765_vm2, %v2747_v61  ;;  %v2717_v7 = vadd.f32 %v9995_v16, %v2678_v21  ;;  %v2648_v58 = vmul.f32 %v9958_v51, %v2559_v42  ;;  %v12419_v61 = vld [vmem:[#allocation21_spill] sm:$0xff]  ;;  %v7273_v42 = vpack.i.bf16 %v10240_v37, %v10404_v9  ;;  %v7298_v35 = vpack.i.bf16 %v10251_v55, %v3051_v52 }
 0x2f0   : > { %v2748_v17 = vmax.f32 %v2716_v3, 0.0  ;;  %v2679_v1 = vadd.f32 %v2647_v25, %v2418_v38  ;;  %v2390_v57 = vmul.f32 %v9909_v53, %v12419_v61  ;;  %7264 = vrot.lane.b32.xlu1 %v7263_v12, %s7716_s14  ;;  %v2161_v53 = vadd.f32 %v2129_v19, %v1899_v40  ;;  %v10432_v3 = vld [vmem:[#allocation3 + $0x61] sm:$0xff]  ;;  %v3043_v12 = vld [vmem:[#allocation3 + $0x172] sm:$0xff] }
 0x2f1   : > { %v2749_v4 = vmax.f32 %v2717_v7, 0.0  ;;  %v2680_v54 = vadd.f32 %v2648_v58, %v2419_v30  ;;  %7279 = vrot.lane.b32.xlu0 %v7278_v48, %s7718_s16  ;;  %v2564_v27 = vpop.permute.xlu1 %2563  ;;  %v10421_v7 = vld [vmem:[#allocation3 + $0x171] sm:$0xff]  ;;  %v7308_v55 = vpack.i.bf16 %v10282_v20, %v10432_v3  ;;  %v3075_v25 = vld [vmem:[#allocation3 + $0x180] sm:$0xff]  ;;  %v10450_v48 = vld [vmem:[#allocation3 + $0x69] sm:$0xff] }
 0x2f2   : > { %v2569_v13 = vpop.permute.xlu0 %2568  ;;  %2837 = vst.msk [vmem:[#allocation3 + $0xc9] sm:$0xff] %vm2765_vm2, %v2748_v17  ;;  %v2718_v36 = vadd.f32 %v9995_v16, %v2679_v1  ;;  %v2649_v5 = vmul.f32 %v9958_v51, %v2564_v27  ;;  %v2422_v8 = vadd.f32 %v2390_v57, %v2161_v53  ;;  %v7283_v38 = vpack.i.bf16 %v10253_v39, %v10421_v7  ;;  %v3020_v17 = vld [vmem:[#allocation3 + $0x62] sm:$0xff]  ;;  %v3053_v1 = vld [vmem:[#allocation3 + $0x78] sm:$0xff] }
 0x2f3   : > { %2838 = vst.msk [vmem:[#allocation3 + $0xd9] sm:$0xff] %vm2765_vm2, %v2749_v4  ;;  %v2719_v31 = vadd.f32 %v9995_v16, %v2680_v54  ;;  %v2650_v0 = vmul.f32 %v9958_v51, %v2569_v13  ;;  %v3042_v4 = vld [vmem:[#allocation3 + $0x16a] sm:$0xff]  ;;  %v7303_v19 = vpack.i.bf16 %v10303_v59, %v3075_v25  ;;  %v3107_v13 = vld [vmem:[#allocation3 + $0x181] sm:$0xff]  ;;  %v7323_v59 = vpack.i.bf16 %v10280_v14, %v3043_v12  ;;  %v3085_v60 = vld [vmem:[#allocation3 + $0x79] sm:$0xff] }
 0x2f4   : > { %v2750_v50 = vmax.f32 %v2718_v36, 0.0  ;;  %v2681_v62 = vadd.f32 %v2649_v5, %v2420_v26  ;;  %7274 = vrot.lane.b32.xlu1 %v7273_v42, %s7717_s15  ;;  %v7293_v54 = vpack.i.bf16 %v10205_v45, %v3042_v4  ;;  %v7313_v45 = vpack.i.bf16 %v10329_v11, %v3107_v13  ;;  %v3044_v34 = vld [vmem:[#allocation3 + $0x182] sm:$0xff]  ;;  %v3077_v26 = vld [vmem:[#allocation3 + $0x198] sm:$0xff]  ;;  %v3045_v36 = vld [vmem:[#allocation3 + $0x18a] sm:$0xff] }
 0x2f5   : > { %v2751_v21 = vmax.f32 %v2719_v31, 0.0  ;;  %v2682_v30 = vadd.f32 %v2650_v0, %v2421_v22  ;;  %7289 = vrot.lane.b32.xlu0 %v7288_v33, %s7716_s14  ;;  %v2574_v58 = vpop.permute.xlu1 %2573  ;;  %v7318_v22 = vpack.i.bf16 %v10226_v32, %v3019_v29  ;;  %v7338_v32 = vpack.i.bf16 %v10356_v6, %v10450_v48  ;;  %v3076_v31 = vld [vmem:[#allocation3 + $0x188] sm:$0xff]  ;;  %v3109_v57 = vld [vmem:[#allocation3 + $0x199] sm:$0xff] }
 0x2f6   : > { %2839 = vst.msk [vmem:[#allocation3 + $0xe1] sm:$0xff] %vm2765_vm2, %v2750_v50  ;;  %v2720_v37 = vadd.f32 %v9995_v16, %v2681_v62  ;;  %v2651_v63 = vmul.f32 %v9958_v51, %v2574_v58  ;;  %v7348_v11 = vpack.i.bf16 %v10305_v44, %v3020_v17  ;;  %v3108_v0 = vld [vmem:[#allocation3 + $0x189] sm:$0xff]  ;;  %v7358_v14 = vpack.i.bf16 %v10402_v10, %v3053_v1  ;;  %v4138_v5 = vld [vmem:[%s11848_s3 + $0x108] sm:$0xff]  ;;  %v3078_v53 = vld [vmem:[#allocation3 + $0x1a0] sm:$0xff] }
 0x2f7   : > { %2840 = vst.msk [vmem:[#allocation3 + $0xf1] sm:$0xff] %vm2765_vm2, %v2751_v21  ;;  %v2721_v18 = vadd.f32 %v9995_v16, %v2682_v30  ;;  %v7343_v6 = vpack.i.bf16 %v10404_v9, %v3108_v0  ;;  %v7368_v40 = vpack.i.bf16 %v3051_v52, %v3085_v60  ;;  %v7353_v44 = vpack.i.bf16 %v10354_v56, %v3044_v34  ;;  %v3054_v9 = vld [vmem:[#allocation3 + $0x80] sm:$0xff]  ;;  %v4137_v56 = vld [vmem:[%s11848_s3 + $0x100] sm:$0xff] }
 0x2f8   : > { %v2752_v41 = vmax.f32 %v2720_v37, 0.0  ;;  %v2683_v23 = vadd.f32 %v2651_v63, %v2422_v8  ;;  %7284 = vrot.lane.b32.xlu1 %v7283_v38, %s7718_s16  ;;  %v7363_v10 = vpack.i.bf16 %v3042_v4, %v3077_v26  ;;  %v7373_v27 = vpack.i.bf16 %v3075_v25, %v3109_v57  ;;  %v3086_v30 = vld [vmem:[#allocation3 + $0x81] sm:$0xff]  ;;  %v3087_v58 = vld [vmem:[#allocation3 + $0x91] sm:$0xff] }
 0x2f9   : > { %v2753_v47 = vmax.f32 %v2721_v18, 0.0  ;;  %7299 = vrot.lane.b32.xlu0 %v7298_v35, %s7717_s15  ;;  %v7388_v21 = vpack.i.bf16 %v3019_v29, %v3054_v9  ;;  %v7383_v33 = vpack.i.bf16 %v10421_v7, %v3045_v36  ;;  %v3022_v50 = vld [vmem:[#allocation3 + $0x7a] sm:$0xff]  ;;  %v7393_v18 = vpack.i.bf16 %v3043_v12, %v3078_v53  ;;  %v3023_v35 = vld [vmem:[#allocation3 + $0x82] sm:$0xff]  ;;  %v10506_v25 = vld [vmem:[#allocation3 + $0xb0] sm:$0xff] }
 0x2fa   : > { %2841 = vst.msk [vmem:[#allocation3 + $0xf9] sm:$0xff] %vm2765_vm2, %v2752_v41  ;;  %v2722_v51 = vadd.f32 %v9995_v16, %v2683_v23  ;;  %v3052_v16 = vld [vmem:[#allocation3 + $0x68] sm:$0xff]  ;;  %v7408_v62 = vpack.i.bf16 %v10432_v3, %v3022_v50  ;;  %v7418_v7 = vpack.i.bf16 %v3053_v1, %v3087_v58  ;;  %v3056_v37 = vld [vmem:[#allocation3 + $0x98] sm:$0xff]  ;;  %v7423_v23 = vpack.i.bf16 %v10450_v48, %v3023_v35 }
 0x2fb   : > { %2842 = vst.msk [vmem:[#allocation3 + $0x109] sm:$0xff] %vm2765_vm2, %v2753_v47  ;;  %v7328_v20 = vpack.i.bf16 %v10331_v46, %v3052_v16  ;;  %v7333_v46 = vpack.i.bf16 %v10378_v24, %v3076_v31  ;;  %v3021_v24 = vld [vmem:[#allocation3 + $0x6a] sm:$0xff]  ;;  %v7398_v42 = vpack.i.bf16 %v3052_v16, %v3086_v30  ;;  %v3110_v52 = vld [vmem:[#allocation3 + $0x1a1] sm:$0xff]  ;;  %v10492_v41 = vld [vmem:[#allocation3 + $0x92] sm:$0xff] }
 0x2fc   : > { %v2754_v39 = vmax.f32 %v2722_v51, 0.0  ;;  %7294 = vrot.lane.b32.xlu1 %v7293_v54, %s7716_s14  ;;  %v7378_v61 = vpack.i.bf16 %v10380_v49, %v3021_v24  ;;  %v10481_v49 = vpack.c.bf16 %v4138_v5, %v4137_v56  ;;  %v7403_v8 = vpack.i.bf16 %v3076_v31, %v3110_v52  ;;  %v3055_v47 = vld [vmem:[#allocation3 + $0x90] sm:$0xff]  ;;  %v10498_v3 = vld [vmem:[#allocation3 + $0x99] sm:$0xff]  ;;  %v10527_v26 = vld [vmem:[#allocation3 + $0xc8] sm:$0xff] }
 0x2fd   : > { %7309 = vrot.lane.b32.xlu0 %v7308_v55, %s7718_s16  ;;  %v7413_v63 = vpack.i.bf16 %v3020_v17, %v3055_v47  ;;  %v7428_v38 = vpack.i.bf16 %v3021_v24, %v3056_v37  ;;  %v7438_v4 = vpack.i.bf16 %v3085_v60, %v10492_v41  ;;  %v10500_v51 = vld [vmem:[#allocation3 + $0xa9] sm:$0xff]  ;;  %v7433_v54 = vpack.i.bf16 %v3054_v9, %v10498_v3  ;;  %v3025_v13 = vld [vmem:[#allocation3 + $0x9a] sm:$0xff]  ;;  %v10537_v5 = vld [vmem:[#allocation3 + $0xb2] sm:$0xff] }
 0x2fe   : > { %2843 = vst.msk [vmem:[#allocation3 + $0x111] sm:$0xff] %vm2765_vm2, %v2754_v39  ;;  %7080 = vmatprep.subr.bf16.mxu1 %v10481_v49  ;;  %v7448_v55 = vpack.i.bf16 %v3055_v47, %v10500_v51  ;;  %v3057_v39 = vld [vmem:[#allocation3 + $0xa8] sm:$0xff]  ;;  %v3059_v24 = vld [vmem:[#allocation3 + $0xc0] sm:$0xff]  ;;  %v7488_v56 = vpack.i.bf16 %v3025_v13, %v10527_v26  ;;  %v7483_v52 = vpack.i.bf16 %v10498_v3, %v10537_v5 }
 0x2ff   : > { %v10511_v16 = vld [vmem:[#allocation3 + $0xaa] sm:$0xff]  ;;  %v10518_v17 = vld [vmem:[#allocation3 + $0xc1] sm:$0xff]  ;;  %v10553_v47 = vld [vmem:[#allocation3 + $0xd9] sm:$0xff] }
 0x300   : > { %7304 = vrot.lane.b32.xlu1 %v7303_v19, %s7717_s15  ;;  %v7443_v19 = vpack.i.bf16 %v3022_v50, %v3057_v39  ;;  %v7468_v12 = vpack.i.bf16 %v3087_v58, %v10511_v16  ;;  %v10543_v50 = vld [vmem:[#allocation3 + $0x120] sm:$0xff] }
 0x301   : > { %7319 = vrot.lane.b32.xlu0 %v7318_v22, %s7716_s14  ;;  %v7458_v22 = vpack.i.bf16 %v3023_v35, %v10506_v25 }
 0x304   : > { %7314 = vrot.lane.b32.xlu1 %v7313_v45, %s7718_s16 }
 0x305   : > { %7329 = vrot.lane.b32.xlu0 %v7328_v20, %s7717_s15  ;;  %v7453_v20 = vpack.i.bf16 %v3086_v30, %v3025_v13  ;;  %v7473_v30 = vpack.i.bf16 %v10492_v41, %v3059_v24  ;;  %v10555_v41 = vld [vmem:[#allocation3 + $0xc9] sm:$0xff] }
 0x306   : > { %v7493_v13 = vpack.i.bf16 %v10506_v25, %v10555_v41 }
 0x308   : > { %7324 = vrot.lane.b32.xlu1 %v7323_v59, %s7716_s14 }
 0x309   : > { %7339 = vrot.lane.b32.xlu0 %v7338_v32, %s7718_s16  ;;  %v10516_v32 = vld [vmem:[#allocation3 + $0xb1] sm:$0xff] }
 0x30c   : > { %7334 = vrot.lane.b32.xlu1 %v7333_v46, %s7717_s15  ;;  %v2854_v46 = vld [vmem:[#allocation3] sm:$0xff] }
 0x30d   : > { %7349 = vrot.lane.b32.xlu0 %v7348_v11, %s7716_s14 }
 0x310   : > { %7344 = vrot.lane.b32.xlu1 %v7343_v6, %s7718_s16  ;;  %v7478_v6 = vpack.i.bf16 %v3057_v39, %v10518_v17 }
 0x311   : > { %7359 = vrot.lane.b32.xlu0 %v7358_v14, %s7717_s15  ;;  %v7463_v14 = vpack.i.bf16 %v3056_v37, %v10516_v32 }
 0x314   : > { %7354 = vrot.lane.b32.xlu1 %v7353_v44, %s7716_s14 }
 0x315   : > { %7369 = vrot.lane.b32.xlu0 %v7368_v40, %s7718_s16 }
 0x318   : > { %7364 = vrot.lane.b32.xlu1 %v7363_v10, %s7717_s15 }
 0x319   : > { %7379 = vrot.lane.b32.xlu0 %v7378_v61, %s7716_s14 }
 0x31c   : > { %7374 = vrot.lane.b32.xlu1 %v7373_v27, %s7718_s16 }
 0x31d   : > { %7389 = vrot.lane.b32.xlu0 %v7388_v21, %s7717_s15 }
 0x320   : > { %7384 = vrot.lane.b32.xlu1 %v7383_v33, %s7716_s14  ;;  %v10539_v33 = vld [vmem:[#allocation3 + $0xc2] sm:$0xff] }
 0x321   : > { %7399 = vrot.lane.b32.xlu0 %v7398_v42, %s7718_s16  ;;  %v7498_v58 = vpack.i.bf16 %v10500_v51, %v10539_v33 }
 0x324   : > { %7394 = vrot.lane.b32.xlu1 %v7393_v18, %s7717_s15 }
 0x325   : > { %7409 = vrot.lane.b32.xlu0 %v7408_v62, %s7716_s14 }
 0x328   : > { %7404 = vrot.lane.b32.xlu1 %v7403_v8, %s7718_s16 }
 0x329   : > { %7419 = vrot.lane.b32.xlu0 %v7418_v7, %s7718_s16 }
 0x32c   : > { %7414 = vrot.lane.b32.xlu1 %v7413_v63, %s7717_s15 }
 0x32d   : > { %7429 = vrot.lane.b32.xlu0 %v7428_v38, %s7717_s15 }
 0x330   : > { %7424 = vrot.lane.b32.xlu1 %v7423_v23, %s7716_s14  ;;  %v4139_v23 = vld [vmem:[%s11848_s3 + $0x110] sm:$0xff] }
 0x331   : > { %7439 = vrot.lane.b32.xlu0 %v7438_v4, %s7716_s14  ;;  %v4140_v4 = vld [vmem:[%s11848_s3 + $0x118] sm:$0xff] }
 0x334   : > { %7434 = vrot.lane.b32.xlu1 %v7433_v54, %s7718_s16 }
 0x335   : > { %7449 = vrot.lane.b32.xlu0 %v7448_v55, %s7718_s16  ;;  %v2855_v55 = vld [vmem:[#allocation3 + $0x8] sm:$0xff] }
 0x337   : > { %v7170_v29 = vpop.permute.xlu0 %7169 }
 0x338   : > { %7444 = vrot.lane.b32.xlu1 %v7443_v19, %s7717_s15  ;;  %v7172_v48 = vunpack.i.h.bf16 %v7170_v29  ;;  %v7171_v59 = vunpack.i.l.bf16 %v7170_v29 }
 0x339   : > { %7459 = vrot.lane.b32.xlu0 %v7458_v22, %s7717_s15 }
 0x33a   : > { %v4009_v40 = vsel %vm2765_vm2, %v10266_v15, %v7171_v59  ;;  %v3911_v44 = vsel %vm2765_vm2, %v2854_v46, %v7172_v48  ;;  %v10575_v46 = vld [vmem:[#allocation3 + $0xe0] sm:$0xff] }
 0x33b   : > { %v7180_v45 = vpop.permute.xlu0 %7179 }
 0x33c   : > { %v7182_v31 = vunpack.i.h.bf16 %v7180_v45  ;;  %v7181_v11 = vunpack.i.l.bf16 %v7180_v45  ;;  %7454 = vrot.lane.b32.xlu1 %v7453_v20, %s7716_s14  ;;  %v7508_v45 = vpack.i.bf16 %v3059_v24, %v10553_v47  ;;  %v7083_v20 = vpack.c.bf16 %v4140_v4, %v4139_v23  ;;  %v10587_v24 = vld [vmem:[#allocation3 + $0xca] sm:$0xff] }
 0x33d   : > { %7469 = vrot.lane.b32.xlu0 %v7468_v12, %s7716_s14 }
 0x33e   : > { %v7175_v0 = vpop.permute.xlu1 %7174  ;;  %v4041_v61 = vsel %vm3943_vm4, %v4009_v40, %v7181_v11  ;;  %v3944_v10 = vsel %vm3943_vm4, %v3911_v44, %v7182_v31  ;;  %v3061_v11 = vld [vmem:[#allocation3 + $0xd8] sm:$0xff]  ;;  %v7518_v44 = vpack.i.bf16 %v10537_v5, %v10575_v46 }
 0x33f   : > { %v7190_v1 = vpop.permute.xlu0 %7189  ;;  %v7177_v27 = vunpack.i.h.bf16 %v7175_v0  ;;  %v7176_v21 = vunpack.i.l.bf16 %v7175_v0  ;;  %v7503_v40 = vpack.i.bf16 %v10511_v16, %v3061_v11 }
 0x340   : > { %v7192_v60 = vunpack.i.h.bf16 %v7190_v1  ;;  %v7191_v34 = vunpack.i.l.bf16 %v7190_v1  ;;  %7464 = vrot.lane.b32.xlu1 %v7463_v14, %s7718_s16 }
 0x341   : > { %7479 = vrot.lane.b32.xlu0 %v7478_v6, %s7718_s16  ;;  %v4033_v8 = vsel %vm2765_vm2, %v10317_v28, %v7176_v21  ;;  %v3935_v7 = vsel %vm2765_vm2, %v10543_v50, %v7177_v27  ;;  %v7513_v27 = vpack.i.bf16 %v10516_v32, %v10587_v24 }
 0x342   : > { %v4073_v57 = vsel %vm3976_vm5, %v4041_v61, %v7191_v34  ;;  %v3977_v9 = vsel %vm3976_vm5, %v3944_v10, %v7192_v60  ;;  %v7185_v36 = vpop.permute.xlu1 %7184  ;;  %v10589_v61 = vld [vmem:[#allocation3 + $0xda] sm:$0xff] }
 0x343   : > { %v7200_v15 = vpop.permute.xlu0 %7199  ;;  %4308 = vmatprep.mubr.f32.mxu0 %v4073_v57  ;;  %v7187_v42 = vunpack.i.h.bf16 %v7185_v36  ;;  %v7186_v53 = vunpack.i.l.bf16 %v7185_v36  ;;  %v7528_v21 = vpack.i.bf16 %v10518_v17, %v10589_v61 }
 0x344   : > { %4309 = vmatmul.mubr.f32.vlgmr.msra.gmra.mrb[0].mxu0 %v3977_v9  ;;  %7474 = vrot.lane.b32.xlu1 %v7473_v30, %s7717_s15  ;;  %v7202_v37 = vunpack.i.h.bf16 %v7200_v15  ;;  %v7201_v63 = vunpack.i.l.bf16 %v7200_v15 }
 0x345   : > { %7489 = vrot.lane.b32.xlu0 %v7488_v56, %s7717_s15  ;;  %v4065_v51 = vsel %vm3943_vm4, %v4033_v8, %v7186_v53  ;;  %v3968_v54 = vsel %vm3943_vm4, %v3935_v7, %v7187_v42  ;;  %v10603_v53 = vld [vmem:[#allocation3 + $0xe1] sm:$0xff] }
 0x346   : > { %v7195_v62 = vpop.permute.xlu1 %7194  ;;  %v4010_v59 = vsel %vm2765_vm2, %v10342_v2, %v7201_v63  ;;  %v3912_v31 = vsel %vm2765_vm2, %v2855_v55, %v7202_v37  ;;  %v7523_v37 = vpack.i.bf16 %v10527_v26, %v10603_v53 }
 0x347   : > { %v7210_v18 = vpop.permute.xlu0 %7209  ;;  %v7197_v38 = vunpack.i.h.bf16 %v7195_v62  ;;  %v7196_v35 = vunpack.i.l.bf16 %v7195_v62 }
 0x348   : > { %v7212_v28 = vunpack.i.h.bf16 %v7210_v18  ;;  %v7211_v3 = vunpack.i.l.bf16 %v7210_v18  ;;  %7484 = vrot.lane.b32.xlu1 %v7483_v52, %s7716_s14  ;;  %v10605_v18 = vld [vmem:[#allocation3 + $0xf1] sm:$0xff] }
 0x349   : > { %7499 = vrot.lane.b32.xlu0 %v7498_v58, %s7716_s14  ;;  %v4097_v39 = vsel %vm3976_vm5, %v4065_v51, %v7196_v35  ;;  %v4001_v29 = vsel %vm3976_vm5, %v3968_v54, %v7197_v38  ;;  %v7538_v63 = vpack.i.bf16 %v3061_v11, %v10605_v18  ;;  %v2984_v38 = vld [vmem:[#allocation3 + $0x31] sm:$0xff] }
 0x34a   : > { %v7205_v22 = vpop.permute.xlu1 %7204  ;;  %4428 = vmatprep.mubr.f32.mxu1 %v4097_v39  ;;  %v4042_v25 = vsel %vm3943_vm4, %v4010_v59, %v7211_v3  ;;  %v3945_v1 = vsel %vm3943_vm4, %v3912_v31, %v7212_v28  ;;  %v2856_v35 = vld [vmem:[#allocation3 + $0x18] sm:$0xff]  ;;  %v3063_v51 = vld [vmem:[#allocation3 + $0xf0] sm:$0xff] }
 0x34b   : > { %v7220_v19 = vpop.permute.xlu0 %7219  ;;  %4429 = vmatmul.mubr.f32.vlgmr.msra.gmra.mrb[0].mxu1 %v4001_v29  ;;  %v7207_v2 = vunpack.i.h.bf16 %v7205_v22  ;;  %v7206_v6 = vunpack.i.l.bf16 %v7205_v22  ;;  %v10618_v54 = vld [vmem:[#allocation3 + $0xf8] sm:$0xff] }
 0x34c   : > { %v7222_v12 = vunpack.i.h.bf16 %v7220_v19  ;;  %v7221_v48 = vunpack.i.l.bf16 %v7220_v19  ;;  %7494 = vrot.lane.b32.xlu1 %v7493_v13, %s7718_s16  ;;  %7082 = vmatpush3.bf16.msra.mxu1 %v10481_v49  ;;  %v10593_v49 = vld [vmem:[#allocation3 + $0x128] sm:$0xff]  ;;  %v10631_v59 = vld [vmem:[#allocation3 + $0xf2] sm:$0xff] }
 0x34d   : > { %7509 = vrot.lane.b32.xlu0 %v7508_v45, %s7718_s16  ;;  %7084 = vmatprep.subr.bf16.mxu1 %v7083_v20  ;;  %v4034_v15 = vsel %vm2765_vm2, %v10391_v43, %v7206_v6  ;;  %v3936_v36 = vsel %vm2765_vm2, %v10593_v49, %v7207_v2  ;;  %v7558_v2 = vpack.i.bf16 %v10553_v47, %v10631_v59 }
 0x34e   : > { %v4074_v0 = vsel %vm3976_vm5, %v4042_v25, %v7221_v48  ;;  %v3978_v14 = vsel %vm3976_vm5, %v3945_v1, %v7222_v12  ;;  %v7215_v34 = vpop.permute.xlu1 %7214  ;;  %v7548_v12 = vpack.i.bf16 %v10587_v24, %v10618_v54  ;;  %v10629_v48 = vld [vmem:[#allocation3 + $0xe2] sm:$0xff]  ;;  %v3008_v25 = vld [vmem:[#allocation3 + $0x151] sm:$0xff] }
 0x34f   : > { %v7230_v60 = vpop.permute.xlu0 %7229  ;;  %4313 = vmatprep.mubr.f32.mxu0 %v4074_v0  ;;  %v7217_v10 = vunpack.i.h.bf16 %v7215_v34  ;;  %v7216_v57 = vunpack.i.l.bf16 %v7215_v34  ;;  %v10635_v1 = vld [vmem:[#allocation3 + $0x138] sm:$0xff] }
 0x350   : > { %4314 = vmatmul.mubr.f32.gmra.mrb[2].mxu0 %v3978_v14  ;;  %7504 = vrot.lane.b32.xlu1 %v7503_v40, %s7717_s15  ;;  %v7232_v30 = vunpack.i.h.bf16 %v7230_v60  ;;  %v7231_v56 = vunpack.i.l.bf16 %v7230_v60 }
 0x351   : > { %7519 = vrot.lane.b32.xlu0 %v7518_v44, %s7717_s15  ;;  %7086 = vmatpush3.bf16.msra.mxu1 %v7083_v20  ;;  %v4066_v32 = vsel %vm3943_vm4, %v4034_v15, %v7216_v57  ;;  %v3969_v43 = vsel %vm3943_vm4, %v3936_v36, %v7217_v10  ;;  %v7533_v20 = vpack.i.bf16 %v10539_v33, %v3063_v51  ;;  %v10644_v57 = vld [vmem:[#allocation3 + $0xf9] sm:$0xff] }
 0x352   : > { %v7225_v16 = vpop.permute.xlu1 %7224  ;;  %v4011_v28 = vsel %vm2765_vm2, %v2984_v38, %v7231_v56  ;;  %v3913_v3 = vsel %vm2765_vm2, %v2856_v35, %v7232_v30  ;;  %v7543_v33 = vpack.i.bf16 %v10555_v41, %v10629_v48  ;;  %v7553_v56 = vpack.i.bf16 %v10575_v46, %v10644_v57 }
 0x353   : > { %v7240_v9 = vpop.permute.xlu0 %7239  ;;  %v7227_v5 = vunpack.i.h.bf16 %v7225_v16  ;;  %v7226_v42 = vunpack.i.l.bf16 %v7225_v16 }
 0x354   : > { %v7242_v62 = vunpack.i.h.bf16 %v7240_v9  ;;  %v7241_v52 = vunpack.i.l.bf16 %v7240_v9  ;;  %7514 = vrot.lane.b32.xlu1 %v7513_v27, %s7716_s14  ;;  %v10646_v9 = vld [vmem:[#allocation3 + $0x109] sm:$0xff] }
 0x355   : > { %7529 = vrot.lane.b32.xlu0 %v7528_v21, %s7716_s14  ;;  %v4098_v17 = vsel %vm3976_vm5, %v4066_v32, %v7226_v42  ;;  %v4002_v58 = vsel %vm3976_vm5, %v3969_v43, %v7227_v5  ;;  %v7568_v5 = vpack.i.bf16 %v3063_v51, %v10646_v9  ;;  %v2985_v42 = vld [vmem:[#allocation3 + $0x39] sm:$0xff] }
 0x356   : > { %v7235_v7 = vpop.permute.xlu1 %7234  ;;  %4433 = vmatprep.mubr.f32.mxu1 %v4098_v17  ;;  %v4043_v26 = vsel %vm3943_vm4, %v4011_v28, %v7241_v52  ;;  %v3946_v55 = vsel %vm3943_vm4, %v3913_v3, %v7242_v62  ;;  %v2857_v62 = vld [vmem:[#allocation3 + $0x20] sm:$0xff] }
 0x357   : > { %v7250_v8 = vpop.permute.xlu0 %7249  ;;  %4434 = vmatmul.mubr.f32.gmra.mrb[2].mxu1 %v4002_v58  ;;  %v7237_v19 = vunpack.i.h.bf16 %v7235_v7  ;;  %v7236_v22 = vunpack.i.l.bf16 %v7235_v7  ;;  %v3065_v58 = vld [vmem:[#allocation3 + $0x108] sm:$0xff]  ;;  %v10670_v51 = vld [vmem:[#allocation3 + $0xfa] sm:$0xff] }
 0x358   : > { %v7252_v23 = vunpack.i.h.bf16 %v7250_v8  ;;  %v7251_v4 = vunpack.i.l.bf16 %v7250_v8  ;;  %7524 = vrot.lane.b32.xlu1 %v7523_v37, %s7718_s16  ;;  %v10659_v8 = vld [vmem:[#allocation3 + $0x110] sm:$0xff]  ;;  %v7563_v28 = vpack.i.bf16 %v10589_v61, %v3065_v58 }
 0x359   : > { %7539 = vrot.lane.b32.xlu0 %v7538_v63, %s7718_s16  ;;  %v4035_v6 = vsel %vm2765_vm2, %v3008_v25, %v7236_v22  ;;  %v3937_v60 = vsel %vm2765_vm2, %v10635_v1, %v7237_v19  ;;  %v7578_v3 = vpack.i.bf16 %v10629_v48, %v10659_v8  ;;  %v10676_v19 = vld [vmem:[#allocation3 + $0x140] sm:$0xff] }
 0x35a   : > { %v4075_v39 = vsel %vm3976_vm5, %v4043_v26, %v7251_v4  ;;  %v3979_v29 = vsel %vm3976_vm5, %v3946_v55, %v7252_v23  ;;  %v7245_v45 = vpop.permute.xlu1 %7244  ;;  %v10672_v26 = vld [vmem:[#allocation3 + $0x10a] sm:$0xff] }
 0x35b   : > { %v7260_v13 = vpop.permute.xlu0 %7259  ;;  %4318 = vmatprep.mubr.f32.mxu0 %v4075_v39  ;;  %v7247_v31 = vunpack.i.h.bf16 %v7245_v45  ;;  %v7246_v11 = vunpack.i.l.bf16 %v7245_v45  ;;  %v7573_v45 = vpack.i.bf16 %v10603_v53, %v10670_v51 }
 0x35c   : > { %4319 = vmatmul.mubr.f32.gmra.mrb[4].mxu0 %v3979_v29  ;;  %7534 = vrot.lane.b32.xlu1 %v7533_v20, %s7717_s15  ;;  %v7262_v34 = vunpack.i.h.bf16 %v7260_v13  ;;  %v7261_v40 = vunpack.i.l.bf16 %v7260_v13  ;;  %v3009_v29 = vld [vmem:[#allocation3 + $0x159] sm:$0xff]  ;;  %v7588_v20 = vpack.i.bf16 %v10605_v18, %v10672_v26 }
 0x35d   : > { %7549 = vrot.lane.b32.xlu0 %v7548_v12, %s7717_s15  ;;  %v4067_v47 = vsel %vm3943_vm4, %v4035_v6, %v7246_v11  ;;  %v3970_v41 = vsel %vm3943_vm4, %v3937_v60, %v7247_v31 }
 0x35e   : > { %v7255_v14 = vpop.permute.xlu1 %7254  ;;  %v4012_v43 = vsel %vm2765_vm2, %v2985_v42, %v7261_v40  ;;  %v3914_v17 = vsel %vm2765_vm2, %v2857_v62, %v7262_v34  ;;  %v3099_v40 = vld [vmem:[#allocation3 + $0x121] sm:$0xff] }
 0x35f   : > { %v7270_v0 = vpop.permute.xlu0 %7269  ;;  %v7257_v44 = vunpack.i.h.bf16 %v7255_v14  ;;  %v7256_v10 = vunpack.i.l.bf16 %v7255_v14 }
 0x360   : > { %v7272_v16 = vunpack.i.h.bf16 %v7270_v0  ;;  %v7271_v27 = vunpack.i.l.bf16 %v7270_v0  ;;  %7544 = vrot.lane.b32.xlu1 %v7543_v33, %s7716_s14  ;;  %v10685_v33 = vld [vmem:[#allocation3 + $0x111] sm:$0xff] }
 0x361   : > { %7559 = vrot.lane.b32.xlu0 %v7558_v2, %s7716_s14  ;;  %v4099_v21 = vsel %vm3976_vm5, %v4067_v47, %v7256_v10  ;;  %v4003_v15 = vsel %vm3976_vm5, %v3970_v41, %v7257_v44  ;;  %v2986_v47 = vld [vmem:[#allocation3 + $0x49] sm:$0xff] }
 0x362   : > { %v7265_v30 = vpop.permute.xlu1 %7264  ;;  %4438 = vmatprep.mubr.f32.mxu1 %v4099_v21  ;;  %v4044_v46 = vsel %vm3943_vm4, %v4012_v43, %v7271_v27  ;;  %v3947_v7 = vsel %vm3943_vm4, %v3914_v17, %v7272_v16  ;;  %v7583_v16 = vpack.i.bf16 %v10618_v54, %v10685_v33  ;;  %v7598_v27 = vpack.i.bf16 %v3065_v58, %v3099_v40  ;;  %v2858_v41 = vld [vmem:[#allocation3 + $0x30] sm:$0xff] }
 0x363   : > { %v7280_v36 = vpop.permute.xlu0 %7279  ;;  %4439 = vmatmul.mubr.f32.gmra.mrb[4].mxu1 %v4003_v15  ;;  %v7267_v38 = vunpack.i.h.bf16 %v7265_v30  ;;  %v7266_v35 = vunpack.i.l.bf16 %v7265_v30  ;;  %v7593_v17 = vpack.i.bf16 %v10631_v59, %v10543_v50  ;;  %v7608_v58 = vpack.i.bf16 %v10670_v51, %v10593_v49 }
 0x364   : > { %v7282_v52 = vunpack.i.h.bf16 %v7280_v36  ;;  %v7281_v32 = vunpack.i.l.bf16 %v7280_v36  ;;  %7554 = vrot.lane.b32.xlu1 %v7553_v56, %s7718_s16 }
 0x365   : > { %7569 = vrot.lane.b32.xlu0 %v7568_v5, %s7718_s16  ;;  %v4036_v12 = vsel %vm2765_vm2, %v3009_v29, %v7266_v35  ;;  %v3938_v31 = vsel %vm2765_vm2, %v10676_v19, %v7267_v38  ;;  %v3010_v38 = vld [vmem:[#allocation3 + $0x169] sm:$0xff] }
 0x366   : > { %v4076_v37 = vsel %vm3976_vm5, %v4044_v46, %v7281_v32  ;;  %v3980_v63 = vsel %vm3976_vm5, %v3947_v7, %v7282_v52  ;;  %v7275_v4 = vpop.permute.xlu1 %7274  ;;  %v10707_v46 = vld [vmem:[#allocation3 + $0x112] sm:$0xff] }
 0x367   : > { %4323 = vmatprep.mubr.f32.mxu0 %v4076_v37  ;;  %v7290_v23 = vpop.permute.xlu0 %7289  ;;  %v7277_v55 = vunpack.i.h.bf16 %v7275_v4  ;;  %v7276_v39 = vunpack.i.l.bf16 %v7275_v4  ;;  %v2882_v35 = vld [vmem:[#allocation3 + $0x150] sm:$0xff] }
 0x368   : > { %4324 = vmatmul.mubr.f32.gmra.mrb[6].mxu0 %v3980_v63  ;;  %7564 = vrot.lane.b32.xlu1 %v7563_v28, %s7717_s15  ;;  %v7292_v11 = vunpack.i.h.bf16 %v7290_v23  ;;  %v7291_v25 = vunpack.i.l.bf16 %v7290_v23  ;;  %v10711_v63 = vld [vmem:[#allocation3 + $0x122] sm:$0xff]  ;;  %v7603_v28 = vpack.i.bf16 %v10644_v57, %v10707_v46 }
 0x369   : > { %7579 = vrot.lane.b32.xlu0 %v7578_v3, %s7717_s15  ;;  %v4068_v53 = vsel %vm3943_vm4, %v4036_v12, %v7276_v39  ;;  %v3971_v18 = vsel %vm3943_vm4, %v3938_v31, %v7277_v55  ;;  %v7618_v3 = vpack.i.bf16 %v10646_v9, %v10711_v63 }
 0x36a   : > { %v7285_v13 = vpop.permute.xlu1 %7284  ;;  %v4013_v36 = vsel %vm2765_vm2, %v2986_v47, %v7291_v25  ;;  %v3915_v30 = vsel %vm2765_vm2, %v2858_v41, %v7292_v11  ;;  %v3101_v25 = vld [vmem:[#allocation3 + $0x139] sm:$0xff] }
 0x36b   : > { %v7300_v22 = vpop.permute.xlu0 %7299  ;;  %v7287_v0 = vunpack.i.h.bf16 %v7285_v13  ;;  %v7286_v14 = vunpack.i.l.bf16 %v7285_v13 }
 0x36c   : > { %v7302_v2 = vunpack.i.h.bf16 %v7300_v22  ;;  %v7301_v6 = vunpack.i.l.bf16 %v7300_v22  ;;  %7574 = vrot.lane.b32.xlu1 %v7573_v45, %s7716_s14 }
 0x36d   : > { %7589 = vrot.lane.b32.xlu0 %v7588_v20, %s7716_s14  ;;  %v4100_v60 = vsel %vm3976_vm5, %v4068_v53, %v7286_v14  ;;  %v4004_v34 = vsel %vm3976_vm5, %v3971_v18, %v7287_v0  ;;  %v10725_v0 = vld [vmem:[#allocation3 + $0x129] sm:$0xff]  ;;  %v2987_v18 = vld [vmem:[#allocation3 + $0x51] sm:$0xff] }
 0x36e   : > { %v7295_v10 = vpop.permute.xlu1 %7294  ;;  %4443 = vmatprep.mubr.f32.mxu1 %v4100_v60  ;;  %v4045_v56 = vsel %vm3943_vm4, %v4013_v36, %v7301_v6  ;;  %v3948_v5 = vsel %vm3943_vm4, %v3915_v30, %v7302_v2  ;;  %v7628_v6 = vpack.i.bf16 %v10543_v50, %v3101_v25  ;;  %v7613_v53 = vpack.i.bf16 %v10659_v8, %v10725_v0  ;;  %v2859_v60 = vld [vmem:[#allocation3 + $0x38] sm:$0xff] }
 0x36f   : > { %v7310_v44 = vpop.permute.xlu0 %7309  ;;  %4444 = vmatmul.mubr.f32.gmra.mrb[6].mxu1 %v4004_v34  ;;  %v7297_v62 = vunpack.i.h.bf16 %v7295_v10  ;;  %v7296_v52 = vunpack.i.l.bf16 %v7295_v10  ;;  %v7638_v36 = vpack.i.bf16 %v10707_v46, %v10676_v19  ;;  %v7623_v30 = vpack.i.bf16 %v10672_v26, %v10635_v1 }
 0x370   : > { %v7312_v21 = vunpack.i.h.bf16 %v7310_v44  ;;  %v7311_v15 = vunpack.i.l.bf16 %v7310_v44  ;;  %7584 = vrot.lane.b32.xlu1 %v7583_v16, %s7718_s16 }
 0x371   : > { %7599 = vrot.lane.b32.xlu0 %v7598_v27, %s7718_s16  ;;  %v4037_v55 = vsel %vm2765_vm2, %v3010_v38, %v7296_v52  ;;  %v3939_v39 = vsel %vm2765_vm2, %v2882_v35, %v7297_v62  ;;  %v2883_v62 = vld [vmem:[#allocation3 + $0x158] sm:$0xff] }
 0x372   : > { %v4077_v54 = vsel %vm3976_vm5, %v4045_v56, %v7311_v15  ;;  %v3981_v42 = vsel %vm3976_vm5, %v3948_v5, %v7312_v21  ;;  %v7305_v43 = vpop.permute.xlu1 %7304 }
 0x373   : > { %v7320_v32 = vpop.permute.xlu0 %7319  ;;  %4328 = vmatprep.mubr.f32.mxu0 %v4077_v54  ;;  %v7307_v7 = vunpack.i.h.bf16 %v7305_v43  ;;  %v7306_v37 = vunpack.i.l.bf16 %v7305_v43  ;;  %v10744_v54 = vld [vmem:[#allocation3 + $0x12a] sm:$0xff] }
 0x374   : > { %4329 = vmatmul.mubr.f32.gmra.mrb[8].mxu0 %v3981_v42  ;;  %7594 = vrot.lane.b32.xlu1 %v7593_v17, %s7717_s15  ;;  %v7322_v29 = vunpack.i.h.bf16 %v7320_v32  ;;  %v7321_v22 = vunpack.i.l.bf16 %v7320_v32  ;;  %v3011_v42 = vld [vmem:[#allocation3 + $0x171] sm:$0xff]  ;;  %v7633_v43 = vpack.i.bf16 %v10685_v33, %v10744_v54 }
 0x375   : > { %7609 = vrot.lane.b32.xlu0 %v7608_v58, %s7717_s15  ;;  %v4069_v31 = vsel %vm3943_vm4, %v4037_v55, %v7306_v37  ;;  %v3972_v57 = vsel %vm3943_vm4, %v3939_v39, %v7307_v7 }
 0x376   : > { %v7315_v4 = vpop.permute.xlu1 %7314  ;;  %v4014_v44 = vsel %vm2765_vm2, %v2987_v18, %v7321_v22  ;;  %v3916_v10 = vsel %vm2765_vm2, %v2859_v60, %v7322_v29  ;;  %v2988_v22 = vld [vmem:[#allocation3 + $0x61] sm:$0xff] }
 0x377   : > { %v7330_v23 = vpop.permute.xlu0 %7329  ;;  %v7317_v13 = vunpack.i.h.bf16 %v7315_v4  ;;  %v7316_v45 = vunpack.i.l.bf16 %v7315_v4  ;;  %v3012_v60 = vld [vmem:[#allocation3 + $0x181] sm:$0xff] }
 0x378   : > { %v7332_v20 = vunpack.i.h.bf16 %v7330_v23  ;;  %v7331_v12 = vunpack.i.l.bf16 %v7330_v23  ;;  %7604 = vrot.lane.b32.xlu1 %v7603_v28, %s7716_s14 }
 0x379   : > { %7619 = vrot.lane.b32.xlu0 %v7618_v3, %s7716_s14  ;;  %v4101_v9 = vsel %vm3976_vm5, %v4069_v31, %v7316_v45  ;;  %v4005_v11 = vsel %vm3976_vm5, %v3972_v57, %v7317_v13  ;;  %v3102_v3 = vld [vmem:[#allocation3 + $0x141] sm:$0xff] }
 0x37a   : > { %v7325_v2 = vpop.permute.xlu1 %7324  ;;  %4448 = vmatprep.mubr.f32.mxu1 %v4101_v9  ;;  %v4046_v16 = vsel %vm3943_vm4, %v4014_v44, %v7331_v12  ;;  %v3949_v50 = vsel %vm3943_vm4, %v3916_v10, %v7332_v20  ;;  %v7643_v29 = vpack.i.bf16 %v10593_v49, %v3102_v3  ;;  %v2860_v13 = vld [vmem:[#allocation3 + $0x48] sm:$0xff] }
 0x37b   : > { %v7340_v14 = vpop.permute.xlu0 %7339  ;;  %4449 = vmatmul.mubr.f32.gmra.mrb[8].mxu1 %v4005_v11  ;;  %v7327_v47 = vunpack.i.h.bf16 %v7325_v2  ;;  %v7326_v41 = vunpack.i.l.bf16 %v7325_v2 }
 0x37c   : > { %v7342_v34 = vunpack.i.h.bf16 %v7340_v14  ;;  %v7341_v40 = vunpack.i.l.bf16 %v7340_v14  ;;  %7614 = vrot.lane.b32.xlu1 %v7613_v53, %s7718_s16 }
 0x37d   : > { %7629 = vrot.lane.b32.xlu0 %v7628_v6, %s7718_s16  ;;  %v4038_v19 = vsel %vm2765_vm2, %v3011_v42, %v7326_v41  ;;  %v3940_v1 = vsel %vm2765_vm2, %v2883_v62, %v7327_v47  ;;  %v2989_v62 = vld [vmem:[#allocation3 + $0x69] sm:$0xff] }
 0x37e   : > { %v4078_v27 = vsel %vm3976_vm5, %v4046_v16, %v7341_v40  ;;  %v3982_v8 = vsel %vm3976_vm5, %v3949_v50, %v7342_v34  ;;  %v7335_v15 = vpop.permute.xlu1 %7334  ;;  %v2884_v34 = vld [vmem:[#allocation3 + $0x168] sm:$0xff] }
 0x37f   : > { %4333 = vmatprep.mubr.f32.mxu0 %v4078_v27  ;;  %v7350_v21 = vpop.permute.xlu0 %7349  ;;  %v7337_v56 = vunpack.i.h.bf16 %v7335_v15  ;;  %v7336_v5 = vunpack.i.l.bf16 %v7335_v15 }
 0x380   : > { %4334 = vmatmul.mubr.f32.gmra.mrb[10].mxu0 %v3982_v8  ;;  %7624 = vrot.lane.b32.xlu1 %v7623_v30, %s7717_s15  ;;  %v7352_v17 = vunpack.i.h.bf16 %v7350_v21  ;;  %v7351_v58 = vunpack.i.l.bf16 %v7350_v21 }
 0x381   : > { %7639 = vrot.lane.b32.xlu0 %v7638_v36, %s7717_s15  ;;  %v4070_v23 = vsel %vm3943_vm4, %v4038_v19, %v7336_v5  ;;  %v3973_v4 = vsel %vm3943_vm4, %v3940_v1, %v7337_v56 }
 0x382   : > { %v7345_v32 = vpop.permute.xlu1 %7344  ;;  %v4015_v12 = vsel %vm2765_vm2, %v2988_v22, %v7351_v58  ;;  %v3917_v31 = vsel %vm2765_vm2, %v2860_v13, %v7352_v17 }
 0x383   : > { %v7360_v52 = vpop.permute.xlu0 %7359  ;;  %v7347_v7 = vunpack.i.h.bf16 %v7345_v32  ;;  %v7346_v37 = vunpack.i.l.bf16 %v7345_v32 }
 0x384   : > { %v7362_v38 = vunpack.i.h.bf16 %v7360_v52  ;;  %v7361_v35 = vunpack.i.l.bf16 %v7360_v52  ;;  %7634 = vrot.lane.b32.xlu1 %v7633_v43, %s7716_s14  ;;  %v2861_v52 = vld [vmem:[#allocation3 + $0x50] sm:$0xff] }
 0x385   : > { %v4102_v28 = vsel %vm3976_vm5, %v4070_v23, %v7346_v37  ;;  %v4006_v33 = vsel %vm3976_vm5, %v3973_v4, %v7347_v7 }
 0x386   : > { %v7355_v39 = vpop.permute.xlu1 %7354  ;;  %4453 = vmatprep.mubr.f32.mxu1 %v4102_v28  ;;  %v4047_v57 = vsel %vm3943_vm4, %v4015_v12, %v7361_v35  ;;  %v3950_v9 = vsel %vm3943_vm4, %v3917_v31, %v7362_v38 }
 0x387   : > { %v7370_v55 = vpop.permute.xlu0 %7369  ;;  %4454 = vmatmul.mubr.f32.gmra.mrb[10].mxu1 %v4006_v33  ;;  %v7357_v49 = vunpack.i.h.bf16 %v7355_v39  ;;  %v7356_v14 = vunpack.i.l.bf16 %v7355_v39  ;;  %v3013_v39 = vld [vmem:[#allocation3 + $0x189] sm:$0xff] }
 0x388   : > { %v7372_v45 = vunpack.i.h.bf16 %v7370_v55  ;;  %v7371_v20 = vunpack.i.l.bf16 %v7370_v55  ;;  %7644 = vrot.lane.b32.xlu1 %v7643_v29, %s7718_s16  ;;  %v2885_v29 = vld [vmem:[#allocation3 + $0x170] sm:$0xff] }
 0x389   : > { %v4039_v10 = vsel %vm2765_vm2, %v3012_v60, %v7356_v14  ;;  %v3941_v16 = vsel %vm2765_vm2, %v2884_v34, %v7357_v49  ;;  %v2862_v60 = vld [vmem:[#allocation3 + $0x60] sm:$0xff] }
 0x38a   : > { %v4079_v11 = vsel %vm3976_vm5, %v4047_v57, %v7371_v20  ;;  %v3983_v25 = vsel %vm3976_vm5, %v3950_v9, %v7372_v45  ;;  %v7365_v6 = vpop.permute.xlu1 %7364 }
 0x38b   : > { %v7380_v2 = vpop.permute.xlu0 %7379  ;;  %4338 = vmatprep.mubr.f32.mxu0 %v4079_v11  ;;  %v7367_v53 = vunpack.i.h.bf16 %v7365_v6  ;;  %v7366_v18 = vunpack.i.l.bf16 %v7365_v6 }
 0x38c   : > { %4339 = vmatmul.mubr.f32.gmra.mrb[12].mxu0 %v3983_v25  ;;  %v7382_v50 = vunpack.i.h.bf16 %v7380_v2  ;;  %v7381_v27 = vunpack.i.l.bf16 %v7380_v2 }
 0x38d   : > { %v4071_v15 = vsel %vm3943_vm4, %v4039_v10, %v7366_v18  ;;  %v3974_v36 = vsel %vm3943_vm4, %v3941_v16, %v7367_v53  ;;  %v3111_v53 = vld [vmem:[#allocation3 + $0x32] sm:$0xff] }
 0x38e   : > { %v7375_v44 = vpop.permute.xlu1 %7374  ;;  %v4016_v19 = vsel %vm2765_vm2, %v2989_v62, %v7381_v27  ;;  %v3918_v1 = vsel %vm2765_vm2, %v2861_v52, %v7382_v50  ;;  %v2990_v18 = vld [vmem:[#allocation3 + $0x79] sm:$0xff] }
 0x38f   : > { %v7390_v40 = vpop.permute.xlu0 %7389  ;;  %v7377_v8 = vunpack.i.h.bf16 %v7375_v44  ;;  %v7376_v47 = vunpack.i.l.bf16 %v7375_v44 }
 0x390   : > { %v7392_v41 = vunpack.i.h.bf16 %v7390_v40  ;;  %v7391_v21 = vunpack.i.l.bf16 %v7390_v40 }
 0x391   : > { %v4103_v30 = vsel %vm3976_vm5, %v4071_v15, %v7376_v47  ;;  %v4007_v56 = vsel %vm3976_vm5, %v3974_v36, %v7377_v8 }
 0x392   : > { %v7385_v42 = vpop.permute.xlu1 %7384  ;;  %4458 = vmatprep.mubr.f32.mxu1 %v4103_v30  ;;  %v4048_v17 = vsel %vm3943_vm4, %v4016_v19, %v7391_v21  ;;  %v3951_v58 = vsel %vm3943_vm4, %v3918_v1, %v7392_v41  ;;  %v3112_v41 = vld [vmem:[#allocation3 + $0x3a] sm:$0xff]  ;;  %v3113_v30 = vld [vmem:[#allocation3 + $0x4a] sm:$0xff]  ;;  %v3114_v1 = vld [vmem:[#allocation3 + $0x52] sm:$0xff] }
 0x393   : > { %v7400_v5 = vpop.permute.xlu0 %7399  ;;  %4459 = vmatmul.mubr.f32.gmra.mrb[12].mxu1 %v4007_v56  ;;  %v7387_v23 = vunpack.i.h.bf16 %v7385_v42  ;;  %v7386_v4 = vunpack.i.l.bf16 %v7385_v42  ;;  %v2991_v56 = vld [vmem:[#allocation3 + $0x81] sm:$0xff] }
 0x394   : > { %v7402_v32 = vunpack.i.h.bf16 %v7400_v5  ;;  %v7401_v43 = vunpack.i.l.bf16 %v7400_v5  ;;  %v2863_v5 = vld [vmem:[#allocation3 + $0x68] sm:$0xff] }
 0x395   : > { %v4040_v45 = vsel %vm2765_vm2, %v3013_v39, %v7386_v4  ;;  %v3942_v20 = vsel %vm2765_vm2, %v2885_v29, %v7387_v23 }
 0x396   : > { %v4080_v7 = vsel %vm3976_vm5, %v4048_v17, %v7401_v43  ;;  %v3984_v37 = vsel %vm3976_vm5, %v3951_v58, %v7402_v32  ;;  %v7395_v35 = vpop.permute.xlu1 %7394 }
 0x397   : > { %4343 = vmatprep.mubr.f32.mxu0 %v4080_v7  ;;  %v7410_v38 = vpop.permute.xlu0 %7409  ;;  %v7397_v28 = vunpack.i.h.bf16 %v7395_v35  ;;  %v7396_v33 = vunpack.i.l.bf16 %v7395_v35  ;;  %v3115_v7 = vld [vmem:[#allocation3 + $0x62] sm:$0xff] }
 0x398   : > { %4344 = vmatmul.mubr.f32.gmra.mrb[14].mxu0 %v3984_v37  ;;  %v7412_v12 = vunpack.i.h.bf16 %v7410_v38  ;;  %v7411_v31 = vunpack.i.l.bf16 %v7410_v38 }
 0x399   : > { %v4072_v57 = vsel %vm3943_vm4, %v4040_v45, %v7396_v33  ;;  %v3975_v9 = vsel %vm3943_vm4, %v3942_v20, %v7397_v28  ;;  %v2864_v45 = vld [vmem:[#allocation3 + $0x78] sm:$0xff] }
 0x39a   : > { %v7405_v55 = vpop.permute.xlu1 %7404  ;;  %v4017_v44 = vsel %vm2765_vm2, %v2990_v18, %v7411_v31  ;;  %v3919_v10 = vsel %vm2765_vm2, %v2862_v60, %v7412_v12  ;;  %v3119_v60 = vld [vmem:[#allocation3 + $0x92] sm:$0xff] }
 0x39b   : > { %v7420_v3 = vpop.permute.xlu0 %7419  ;;  %v7407_v22 = vunpack.i.h.bf16 %v7405_v55  ;;  %v7406_v13 = vunpack.i.l.bf16 %v7405_v55  ;;  %v3116_v55 = vld [vmem:[#allocation3 + $0x6a] sm:$0xff] }
 0x39c   : > { %v7422_v34 = vunpack.i.h.bf16 %v7420_v3  ;;  %v7421_v40 = vunpack.i.l.bf16 %v7420_v3 }
 0x39d   : > { %v4104_v11 = vsel %vm3976_vm5, %v4072_v57, %v7406_v13  ;;  %v4008_v25 = vsel %vm3976_vm5, %v3975_v9, %v7407_v22  ;;  %v3117_v22 = vld [vmem:[#allocation3 + $0x7a] sm:$0xff]  ;;  %v2992_v13 = vld [vmem:[#allocation3 + $0x91] sm:$0xff] }
 0x39e   : > { %v7415_v14 = vpop.permute.xlu1 %7414  ;;  %4463 = vmatprep.mubr.f32.mxu1 %v4104_v11 }
 0x39f   : > { %v7430_v49 = vpop.permute.xlu0 %7429  ;;  %v7417_v2 = vunpack.i.h.bf16 %v7415_v14  ;;  %v7416_v6 = vunpack.i.l.bf16 %v7415_v14  ;;  %4464 = vmatmul.mubr.f32.gmra.mrb[14].mxu1 %v4008_v25 }
 0x3a0   : > { %6983 = vmatprep.mubr.msk.f32.mxu1 %vm2765_vm2, %v3111_v53  ;;  %v7432_v52 = vunpack.i.h.bf16 %v7430_v49  ;;  %v7431_v32 = vunpack.i.l.bf16 %v7430_v49 }
 0x3a1   : > { %v4049_v16 = vsel %vm3943_vm4, %v4017_v44, %v7416_v6  ;;  %v3952_v50 = vsel %vm3943_vm4, %v3919_v10, %v7417_v2  ;;  %v3118_v2 = vld [vmem:[#allocation3 + $0x82] sm:$0xff] }
 0x3a2   : > { %v7425_v8 = vpop.permute.xlu1 %7424  ;;  %v4081_v47 = vsel %vm3976_vm5, %v4049_v16, %v7421_v40  ;;  %v3985_v21 = vsel %vm3976_vm5, %v3952_v50, %v7422_v34  ;;  %v2993_v34 = vld [vmem:[#allocation3 + $0x99] sm:$0xff] }
 0x3a3   : > { %v7440_v27 = vpop.permute.xlu0 %7439  ;;  %v7427_v15 = vunpack.i.h.bf16 %v7425_v8  ;;  %v7426_v36 = vunpack.i.l.bf16 %v7425_v8  ;;  %4348 = vmatprep.mubr.f32.mxu0 %v4081_v47  ;;  %6984 = vmatmul.mubr.msk.f32.vlgmr.msra.gmra.mrb[16].mxu1 %vm2765_vm2, %v3112_v41  ;;  %v2865_v40 = vld [vmem:[#allocation3 + $0x80] sm:$0xff] }
 0x3a4   : > { %4349 = vmatmul.mubr.f32.gmra.mrb[16].mxu0 %v3985_v21  ;;  %6986 = vmatprep.mubr.msk.f32.mxu1 %vm2765_vm2, %v3113_v30  ;;  %v7442_v37 = vunpack.i.h.bf16 %v7440_v27  ;;  %v7441_v38 = vunpack.i.l.bf16 %v7440_v27  ;;  %v3120_v47 = vld [vmem:[#allocation3 + $0x9a] sm:$0xff] }
 0x3a5   : > { %v4018_v42 = vsel %vm2765_vm2, %v2991_v56, %v7426_v36  ;;  %v3920_v62 = vsel %vm2765_vm2, %v2863_v5, %v7427_v15  ;;  %v3121_v15 = vld [vmem:[#allocation3 + $0xaa] sm:$0xff] }
 0x3a6   : > { %v7435_v19 = vpop.permute.xlu1 %7434  ;;  %v4050_v35 = vsel %vm3943_vm4, %v4018_v42, %v7431_v32  ;;  %v3953_v23 = vsel %vm3943_vm4, %v3920_v62, %v7432_v52  ;;  %v4019_v31 = vsel %vm2765_vm2, %v2992_v13, %v7441_v38  ;;  %v3921_v57 = vsel %vm2765_vm2, %v2864_v45, %v7442_v37  ;;  %v2995_v13 = vld [vmem:[#allocation3 + $0xb1] sm:$0xff] }
 0x3a7   : > { %v7450_v43 = vpop.permute.xlu0 %7449  ;;  %v7437_v17 = vunpack.i.h.bf16 %v7435_v19  ;;  %v7436_v58 = vunpack.i.l.bf16 %v7435_v19  ;;  %6987 = vmatmul.mubr.msk.f32.gmra.mrb[18].mxu1 %vm2765_vm2, %v3114_v1  ;;  %v2867_v45 = vld [vmem:[#allocation3 + $0x98] sm:$0xff] }
 0x3a8   : > { %6989 = vmatprep.mubr.msk.f32.mxu1 %vm2765_vm2, %v3115_v7  ;;  %v7452_v20 = vunpack.i.h.bf16 %v7450_v43  ;;  %v7451_v12 = vunpack.i.l.bf16 %v7450_v43  ;;  %v3122_v43 = vld [vmem:[#allocation3 + $0xb2] sm:$0xff] }
 0x3a9   : > { %v4082_v4 = vsel %vm3976_vm5, %v4050_v35, %v7436_v58  ;;  %v3986_v28 = vsel %vm3976_vm5, %v3953_v23, %v7437_v17  ;;  %v3123_v17 = vld [vmem:[#allocation3 + $0xc2] sm:$0xff]  ;;  %v2866_v7 = vld [vmem:[#allocation3 + $0x90] sm:$0xff] }
 0x3aa   : > { %v7445_v3 = vpop.permute.xlu1 %7444  ;;  %4353 = vmatprep.mubr.f32.mxu0 %v4082_v4  ;;  %v2994_v58 = vld [vmem:[#allocation3 + $0xa9] sm:$0xff] }
 0x3ab   : > { %v7460_v33 = vpop.permute.xlu0 %7459  ;;  %v7447_v39 = vunpack.i.h.bf16 %v7445_v3  ;;  %v7446_v29 = vunpack.i.l.bf16 %v7445_v3  ;;  %4354 = vmatmul.mubr.f32.gmra.mrb[18].mxu0 %v3986_v28  ;;  %6990 = vmatmul.mubr.msk.f32.gmra.mrb[20].mxu1 %vm2765_vm2, %v3116_v55 }
 0x3ac   : > { %6992 = vmatprep.mubr.msk.f32.mxu1 %vm2765_vm2, %v3117_v22  ;;  %v7462_v16 = vunpack.i.h.bf16 %v7460_v33  ;;  %v7461_v50 = vunpack.i.l.bf16 %v7460_v33 }
 0x3ad   : > { %v4051_v9 = vsel %vm3943_vm4, %v4019_v31, %v7446_v29  ;;  %v3954_v11 = vsel %vm3943_vm4, %v3921_v57, %v7447_v39 }
 0x3ae   : > { %v7455_v49 = vpop.permute.xlu1 %7454  ;;  %v4083_v14 = vsel %vm3976_vm5, %v4051_v9, %v7451_v12  ;;  %v3987_v6 = vsel %vm3976_vm5, %v3954_v11, %v7452_v20 }
 0x3af   : > { %v7470_v25 = vpop.permute.xlu0 %7469  ;;  %v7457_v53 = vunpack.i.h.bf16 %v7455_v49  ;;  %v7456_v18 = vunpack.i.l.bf16 %v7455_v49  ;;  %4358 = vmatprep.mubr.f32.mxu0 %v4083_v14  ;;  %6993 = vmatmul.mubr.msk.f32.gmra.mrb[22].mxu1 %vm2765_vm2, %v3118_v2 }
 0x3b0   : > { %4359 = vmatmul.mubr.f32.gmra.mrb[20].mxu0 %v3987_v6  ;;  %6995 = vmatprep.mubr.msk.f32.mxu1 %vm2765_vm2, %v3119_v60  ;;  %v7472_v36 = vunpack.i.h.bf16 %v7470_v25  ;;  %v7471_v30 = vunpack.i.l.bf16 %v7470_v25 }
 0x3b1   : > { %v4020_v44 = vsel %vm2765_vm2, %v2993_v34, %v7456_v18  ;;  %v3922_v10 = vsel %vm2765_vm2, %v2865_v40, %v7457_v53 }
 0x3b2   : > { %v7465_v8 = vpop.permute.xlu1 %7464  ;;  %v4052_v56 = vsel %vm3943_vm4, %v4020_v44, %v7461_v50  ;;  %v3955_v5 = vsel %vm3943_vm4, %v3922_v10, %v7462_v16  ;;  %v4021_v35 = vsel %vm2765_vm2, %v2994_v58, %v7471_v30  ;;  %v3923_v23 = vsel %vm2765_vm2, %v2866_v7, %v7472_v36  ;;  %v2868_v44 = vld [vmem:[#allocation3 + $0xa8] sm:$0xff]  ;;  %v2869_v30 = vld [vmem:[#allocation3 + $0xb0] sm:$0xff] }
 0x3b3   : > { %v7480_v27 = vpop.permute.xlu0 %7479  ;;  %v7467_v41 = vunpack.i.h.bf16 %v7465_v8  ;;  %v7466_v21 = vunpack.i.l.bf16 %v7465_v8  ;;  %6996 = vmatmul.mubr.msk.f32.gmra.mrb[24].mxu1 %vm2765_vm2, %v3120_v47 }
 0x3b4   : > { %6998 = vmatprep.mubr.msk.f32.mxu1 %vm2765_vm2, %v3121_v15  ;;  %v7482_v37 = vunpack.i.h.bf16 %v7480_v27  ;;  %v7481_v38 = vunpack.i.l.bf16 %v7480_v27 }
 0x3b5   : > { %v4084_v42 = vsel %vm3976_vm5, %v4052_v56, %v7466_v21  ;;  %v3988_v62 = vsel %vm3976_vm5, %v3955_v5, %v7467_v41 }
 0x3b6   : > { %v7475_v32 = vpop.permute.xlu1 %7474  ;;  %4363 = vmatprep.mubr.f32.mxu0 %v4084_v42 }
 0x3b7   : > { %v7490_v52 = vpop.permute.xlu0 %7489  ;;  %v7477_v19 = vunpack.i.h.bf16 %v7475_v32  ;;  %v7476_v1 = vunpack.i.l.bf16 %v7475_v32  ;;  %4364 = vmatmul.mubr.f32.gmra.mrb[22].mxu0 %v3988_v62  ;;  %6999 = vmatmul.mubr.msk.f32.gmra.mrb[26].mxu1 %vm2765_vm2, %v3122_v43 }
 0x3b8   : > { %7001 = vmatprep.mubr.msk.f32.mxu1 %vm2765_vm2, %v3123_v17  ;;  %v7492_v31 = vunpack.i.h.bf16 %v7490_v52  ;;  %v7491_v57 = vunpack.i.l.bf16 %v7490_v52 }
 0x3b9   : > { %v4053_v4 = vsel %vm3943_vm4, %v4021_v35, %v7476_v1  ;;  %v3956_v28 = vsel %vm3943_vm4, %v3923_v23, %v7477_v19  ;;  %v3134_v23 = vld [vmem:[#allocation3 + $0x142] sm:$0xff] }
 0x3ba   : > { %v7485_v3 = vpop.permute.xlu1 %7484  ;;  %v4085_v55 = vsel %vm3976_vm5, %v4053_v4, %v7481_v38  ;;  %v3989_v39 = vsel %vm3976_vm5, %v3956_v28, %v7482_v37 }
 0x3bb   : > { %v7500_v33 = vpop.permute.xlu0 %7499  ;;  %v7487_v29 = vunpack.i.h.bf16 %v7485_v3  ;;  %v7486_v22 = vunpack.i.l.bf16 %v7485_v3  ;;  %4368 = vmatprep.mubr.f32.mxu0 %v4085_v55  ;;  %7002 = vmatmul.mubr.msk.f32.gmra.mrb[28].mxu1 %vm2765_vm2, %v10587_v24  ;;  %v2870_v3 = vld [vmem:[#allocation3 + $0xc0] sm:$0xff] }
 0x3bc   : > { %4369 = vmatmul.mubr.f32.gmra.mrb[24].mxu0 %v3989_v39  ;;  %7004 = vmatprep.mubr.msk.f32.mxu1 %vm2765_vm2, %v10589_v61  ;;  %v7502_v24 = vunpack.i.h.bf16 %v7500_v33  ;;  %v7501_v14 = vunpack.i.l.bf16 %v7500_v33  ;;  %v2998_v33 = vld [vmem:[#allocation3 + $0xd9] sm:$0xff] }
 0x3bd   : > { %v4022_v20 = vsel %vm2765_vm2, %v2995_v13, %v7486_v22  ;;  %v3924_v12 = vsel %vm2765_vm2, %v2867_v45, %v7487_v29 }
 0x3be   : > { %v7495_v11 = vpop.permute.xlu1 %7494  ;;  %v4054_v61 = vsel %vm3943_vm4, %v4022_v20, %v7491_v57  ;;  %v3957_v2 = vsel %vm3943_vm4, %v3924_v12, %v7492_v31  ;;  %v3925_v50 = vsel %vm2765_vm2, %v2868_v44, %v7502_v24  ;;  %v3136_v57 = vld [vmem:[#allocation3 + $0x15a] sm:$0xff]  ;;  %v3139_v44 = vld [vmem:[#allocation3 + $0x182] sm:$0xff] }
 0x3bf   : > { %v7510_v9 = vpop.permute.xlu0 %7509  ;;  %v7497_v25 = vunpack.i.h.bf16 %v7495_v11  ;;  %v7496_v49 = vunpack.i.l.bf16 %v7495_v11  ;;  %7005 = vmatmul.mubr.msk.f32.gmra.mrb[30].mxu1 %vm2765_vm2, %v10629_v48  ;;  %v2996_v48 = vld [vmem:[#allocation3 + $0xc1] sm:$0xff] }
 0x3c0   : > { %7007 = vmatprep.mubr.msk.f32.mxu1 %vm2765_vm2, %v10631_v59  ;;  %v7512_v59 = vunpack.i.h.bf16 %v7510_v9  ;;  %v7511_v10 = vunpack.i.l.bf16 %v7510_v9  ;;  %v4023_v16 = vsel %vm2765_vm2, %v2996_v48, %v7501_v14  ;;  %v2999_v24 = vld [vmem:[#allocation3 + $0xe1] sm:$0xff] }
 0x3c1   : > { %v4086_v6 = vsel %vm3976_vm5, %v4054_v61, %v7496_v49  ;;  %v3990_v53 = vsel %vm3976_vm5, %v3957_v2, %v7497_v25  ;;  %v3137_v49 = vld [vmem:[#allocation3 + $0x16a] sm:$0xff] }
 0x3c2   : > { %v7505_v60 = vpop.permute.xlu1 %7504  ;;  %4373 = vmatprep.mubr.f32.mxu0 %v4086_v6  ;;  %v2871_v14 = vld [vmem:[#allocation3 + $0xc8] sm:$0xff] }
 0x3c3   : > { %v7520_v18 = vpop.permute.xlu0 %7519  ;;  %v7507_v34 = vunpack.i.h.bf16 %v7505_v60  ;;  %v7506_v40 = vunpack.i.l.bf16 %v7505_v60  ;;  %4374 = vmatmul.mubr.f32.gmra.mrb[26].mxu0 %v3990_v53  ;;  %7008 = vmatmul.mubr.msk.f32.gmra.mrb[32].mxu1 %vm2765_vm2, %v10670_v51 }
 0x3c4   : > { %7010 = vmatprep.mubr.msk.f32.mxu1 %vm2765_vm2, %v10672_v26  ;;  %v2997_v26 = vld [vmem:[#allocation3 + $0xc9] sm:$0xff]  ;;  %v7522_v42 = vunpack.i.h.bf16 %v7520_v18  ;;  %v7521_v62 = vunpack.i.l.bf16 %v7520_v18 }
 0x3c5   : > { %v4055_v27 = vsel %vm3943_vm4, %v4023_v16, %v7506_v40  ;;  %v3958_v8 = vsel %vm3943_vm4, %v3925_v50, %v7507_v34  ;;  %v3138_v34 = vld [vmem:[#allocation3 + $0x172] sm:$0xff] }
 0x3c6   : > { %v7515_v41 = vpop.permute.xlu1 %7514  ;;  %v4087_v21 = vsel %vm3976_vm5, %v4055_v27, %v7511_v10  ;;  %v3991_v51 = vsel %vm3976_vm5, %v3958_v8, %v7512_v59 }
 0x3c7   : > { %v7530_v47 = vpop.permute.xlu0 %7529  ;;  %v7517_v15 = vunpack.i.h.bf16 %v7515_v41  ;;  %v7516_v36 = vunpack.i.l.bf16 %v7515_v41  ;;  %4378 = vmatprep.mubr.f32.mxu0 %v4087_v21  ;;  %7011 = vmatmul.mubr.msk.f32.gmra.mrb[34].mxu1 %vm2765_vm2, %v10707_v46  ;;  %v3133_v46 = vld [vmem:[#allocation3 + $0x13a] sm:$0xff] }
 0x3c8   : > { %4379 = vmatmul.mubr.f32.gmra.mrb[28].mxu0 %v3991_v51  ;;  %7013 = vmatprep.mubr.msk.f32.mxu1 %vm2765_vm2, %v10711_v63  ;;  %v7532_v1 = vunpack.i.h.bf16 %v7530_v47  ;;  %v7531_v17 = vunpack.i.l.bf16 %v7530_v47  ;;  %v3141_v47 = vld [vmem:[#allocation3 + $0x19a] sm:$0xff]  ;;  %v3140_v51 = vld [vmem:[#allocation3 + $0x18a] sm:$0xff] }
 0x3c9   : > { %v4024_v56 = vsel %vm2765_vm2, %v2997_v26, %v7516_v36  ;;  %v3926_v5 = vsel %vm2765_vm2, %v2869_v30, %v7517_v15  ;;  %v3000_v26 = vld [vmem:[#allocation3 + $0xf1] sm:$0xff] }
 0x3ca   : > { %v7525_v32 = vpop.permute.xlu1 %7524  ;;  %v4056_v63 = vsel %vm3943_vm4, %v4024_v56, %v7521_v62  ;;  %v3959_v58 = vsel %vm3943_vm4, %v3926_v5, %v7522_v42  ;;  %v4025_v29 = vsel %vm2765_vm2, %v2998_v33, %v7531_v17  ;;  %v3927_v22 = vsel %vm2765_vm2, %v2870_v3, %v7532_v1  ;;  %v2872_v30 = vld [vmem:[#allocation3 + $0xd8] sm:$0xff]  ;;  %v3142_v62 = vld [vmem:[#allocation3 + $0x1a2] sm:$0xff] }
 0x3cb   : > { %v7540_v52 = vpop.permute.xlu0 %7539  ;;  %v7527_v43 = vunpack.i.h.bf16 %v7525_v32  ;;  %v7526_v19 = vunpack.i.l.bf16 %v7525_v32  ;;  %7014 = vmatmul.mubr.msk.f32.gmra.mrb[36].mxu1 %vm2765_vm2, %v10744_v54  ;;  %v3135_v54 = vld [vmem:[#allocation3 + $0x152] sm:$0xff] }
 0x3cc   : > { %7016 = vmatprep.mubr.msk.f32.mxu1 %vm2765_vm2, %v3133_v46  ;;  %v7542_v55 = vunpack.i.h.bf16 %v7540_v52  ;;  %v7541_v39 = vunpack.i.l.bf16 %v7540_v52 }
 0x3cd   : > { %v4088_v7 = vsel %vm3976_vm5, %v4056_v63, %v7526_v19  ;;  %v3992_v37 = vsel %vm3976_vm5, %v3959_v58, %v7527_v43 }
 0x3ce   : > { %v7535_v35 = vpop.permute.xlu1 %7534  ;;  %4383 = vmatprep.mubr.f32.mxu0 %v4088_v7  ;;  %v3001_v7 = vld [vmem:[#allocation3 + $0xf9] sm:$0xff] }
 0x3cf   : > { %v7550_v38 = vpop.permute.xlu0 %7549  ;;  %v7537_v4 = vunpack.i.h.bf16 %v7535_v35  ;;  %v7536_v28 = vunpack.i.l.bf16 %v7535_v35  ;;  %4384 = vmatmul.mubr.f32.gmra.mrb[30].mxu0 %v3992_v37  ;;  %7017 = vmatmul.mubr.msk.f32.gmra.mrb[38].mxu1 %vm2765_vm2, %v3134_v23  ;;  %v2873_v37 = vld [vmem:[#allocation3 + $0xe0] sm:$0xff] }
 0x3d0   : > { %7019 = vmatprep.mubr.msk.f32.mxu1 %vm2765_vm2, %v3135_v54  ;;  %v7552_v6 = vunpack.i.h.bf16 %v7550_v38  ;;  %v7551_v53 = vunpack.i.l.bf16 %v7550_v38 }
 0x3d1   : > { %v4057_v13 = vsel %vm3943_vm4, %v4025_v29, %v7536_v28  ;;  %v3960_v45 = vsel %vm3943_vm4, %v3927_v22, %v7537_v4 }
 0x3d2   : > { %v7545_v12 = vpop.permute.xlu1 %7544  ;;  %v4089_v31 = vsel %vm3976_vm5, %v4057_v13, %v7541_v39  ;;  %v3993_v9 = vsel %vm3976_vm5, %v3960_v45, %v7542_v55 }
 0x3d3   : > { %v7560_v20 = vpop.permute.xlu0 %7559  ;;  %v7547_v11 = vunpack.i.h.bf16 %v7545_v12  ;;  %v7546_v25 = vunpack.i.l.bf16 %v7545_v12  ;;  %4388 = vmatprep.mubr.f32.mxu0 %v4089_v31  ;;  %7020 = vmatmul.mubr.msk.f32.gmra.mrb[40].mxu1 %vm2765_vm2, %v3136_v57 }
 0x3d4   : > { %4389 = vmatmul.mubr.f32.gmra.mrb[32].mxu0 %v3993_v9  ;;  %7022 = vmatprep.mubr.msk.f32.mxu1 %vm2765_vm2, %v3137_v49  ;;  %v7562_v59 = vunpack.i.h.bf16 %v7560_v20  ;;  %v7561_v10 = vunpack.i.l.bf16 %v7560_v20  ;;  %v3002_v9 = vld [vmem:[#allocation3 + $0x109] sm:$0xff] }
 0x3d5   : > { %v4026_v61 = vsel %vm2765_vm2, %v2999_v24, %v7546_v25  ;;  %v3928_v2 = vsel %vm2765_vm2, %v2871_v14, %v7547_v11  ;;  %v2874_v11 = vld [vmem:[#allocation3 + $0xf0] sm:$0xff] }
 0x3d6   : > { %v7555_v60 = vpop.permute.xlu1 %7554  ;;  %v4058_v16 = vsel %vm3943_vm4, %v4026_v61, %v7551_v53  ;;  %v3961_v50 = vsel %vm3943_vm4, %v3928_v2, %v7552_v6  ;;  %v4027_v42 = vsel %vm2765_vm2, %v3000_v26, %v7561_v10  ;;  %v3929_v52 = vsel %vm2765_vm2, %v2872_v30, %v7562_v59 }
 0x3d7   : > { %v7570_v18 = vpop.permute.xlu0 %7569  ;;  %v7557_v40 = vunpack.i.h.bf16 %v7555_v60  ;;  %v7556_v48 = vunpack.i.l.bf16 %v7555_v60  ;;  %7023 = vmatmul.mubr.msk.f32.gmra.mrb[42].mxu1 %vm2765_vm2, %v3138_v34 }
 0x3d8   : > { %7025 = vmatprep.mubr.msk.f32.mxu1 %vm2765_vm2, %v3139_v44  ;;  %v7572_v56 = vunpack.i.h.bf16 %v7570_v18  ;;  %v7571_v5 = vunpack.i.l.bf16 %v7570_v18  ;;  %v2875_v44 = vld [vmem:[#allocation3 + $0xf8] sm:$0xff] }
 0x3d9   : > { %v4090_v27 = vsel %vm3976_vm5, %v4058_v16, %v7556_v48  ;;  %v3994_v8 = vsel %vm3976_vm5, %v3961_v50, %v7557_v40  ;;  %v3003_v48 = vld [vmem:[#allocation3 + $0x111] sm:$0xff] }
 0x3da   : > { %v7565_v21 = vpop.permute.xlu1 %7564  ;;  %4393 = vmatprep.mubr.f32.mxu0 %v4090_v27 }
 0x3db   : > { %v7580_v41 = vpop.permute.xlu0 %7579  ;;  %v7567_v15 = vunpack.i.h.bf16 %v7565_v21  ;;  %v7566_v36 = vunpack.i.l.bf16 %v7565_v21  ;;  %4394 = vmatmul.mubr.f32.gmra.mrb[34].mxu0 %v3994_v8  ;;  %7026 = vmatmul.mubr.msk.f32.gmra.mrb[44].mxu1 %vm2765_vm2, %v3140_v51 }
 0x3dc   : > { %7028 = vmatprep.mubr.msk.f32.mxu1 %vm2765_vm2, %v3141_v47  ;;  %v7582_v23 = vunpack.i.h.bf16 %v7580_v41  ;;  %v7581_v4 = vunpack.i.l.bf16 %v7580_v41 }
 0x3dd   : > { %v4059_v32 = vsel %vm3943_vm4, %v4027_v42, %v7566_v36  ;;  %v3962_v43 = vsel %vm3943_vm4, %v3929_v52, %v7567_v15  ;;  %v2876_v52 = vld [vmem:[#allocation3 + $0x108] sm:$0xff] }
 0x3de   : > { %v7575_v46 = vpop.permute.xlu1 %7574  ;;  %v4091_v1 = vsel %vm3976_vm5, %v4059_v32, %v7571_v5  ;;  %v3995_v17 = vsel %vm3976_vm5, %v3962_v43, %v7572_v56 }
 0x3df   : > { %v7590_v19 = vpop.permute.xlu0 %7589  ;;  %v7577_v63 = vunpack.i.h.bf16 %v7575_v46  ;;  %v7576_v58 = vunpack.i.l.bf16 %v7575_v46  ;;  %4398 = vmatprep.mubr.f32.mxu0 %v4091_v1  ;;  %7029 = vmatmul.mubr.msk.f32.gmra.mrb[46].mxu1 %vm2765_vm2, %v3142_v62  ;;  %v3004_v62 = vld [vmem:[#allocation3 + $0x121] sm:$0xff] }
 0x3e0   : > { %4399 = vmatmul.mubr.f32.gmra.mrb[36].mxu0 %v3995_v17  ;;  %v7592_v55 = vunpack.i.h.bf16 %v7590_v19  ;;  %v7591_v39 = vunpack.i.l.bf16 %v7590_v19 }
 0x3e1   : > { %v4028_v38 = vsel %vm2765_vm2, %v3001_v7, %v7576_v58  ;;  %v3930_v35 = vsel %vm2765_vm2, %v2873_v37, %v7577_v63 }
 0x3e2   : > { %v7585_v54 = vpop.permute.xlu1 %7584  ;;  %v4060_v29 = vsel %vm3943_vm4, %v4028_v38, %v7581_v4  ;;  %v3963_v22 = vsel %vm3943_vm4, %v3930_v35, %v7582_v23  ;;  %v4029_v24 = vsel %vm2765_vm2, %v3002_v9, %v7591_v39  ;;  %v3931_v14 = vsel %vm2765_vm2, %v2874_v11, %v7592_v55  ;;  %v2877_v23 = vld [vmem:[#allocation3 + $0x110] sm:$0xff] }
 0x3e3   : > { %v7600_v28 = vpop.permute.xlu0 %7599  ;;  %v7587_v33 = vunpack.i.h.bf16 %v7585_v54  ;;  %v7586_v3 = vunpack.i.l.bf16 %v7585_v54 }
 0x3e4   : > { %v7602_v25 = vunpack.i.h.bf16 %v7600_v28  ;;  %v7601_v49 = vunpack.i.l.bf16 %v7600_v28 }
 0x3e5   : > { %v4092_v13 = vsel %vm3976_vm5, %v4060_v29, %v7586_v3  ;;  %v3996_v45 = vsel %vm3976_vm5, %v3963_v22, %v7587_v33 }
 0x3e6   : > { %v7595_v12 = vpop.permute.xlu1 %7594  ;;  %4403 = vmatprep.mubr.f32.mxu0 %v4092_v13 }
 0x3e7   : > { %v7610_v20 = vpop.permute.xlu0 %7609  ;;  %v7597_v31 = vunpack.i.h.bf16 %v7595_v12  ;;  %v7596_v57 = vunpack.i.l.bf16 %v7595_v12  ;;  %4404 = vmatmul.mubr.f32.gmra.mrb[38].mxu0 %v3996_v45 }
 0x3e8   : > { %v7612_v16 = vunpack.i.h.bf16 %v7610_v20  ;;  %v7611_v50 = vunpack.i.l.bf16 %v7610_v20 }
 0x3e9   : > { %v4061_v61 = vsel %vm3943_vm4, %v4029_v24, %v7596_v57  ;;  %v3964_v2 = vsel %vm3943_vm4, %v3931_v14, %v7597_v31 }
 0x3ea   : > { %v7605_v6 = vpop.permute.xlu1 %7604  ;;  %v4093_v53 = vsel %vm3976_vm5, %v4061_v61, %v7601_v49  ;;  %v3997_v18 = vsel %vm3976_vm5, %v3964_v2, %v7602_v25 }
 0x3eb   : > { %v7620_v60 = vpop.permute.xlu0 %7619  ;;  %v7607_v34 = vunpack.i.h.bf16 %v7605_v6  ;;  %v7606_v40 = vunpack.i.l.bf16 %v7605_v6  ;;  %4408 = vmatprep.mubr.f32.mxu0 %v4093_v53 }
 0x3ec   : > { %4409 = vmatmul.mubr.f32.gmra.mrb[40].mxu0 %v3997_v18  ;;  %v7622_v41 = vunpack.i.h.bf16 %v7620_v60  ;;  %v7621_v21 = vunpack.i.l.bf16 %v7620_v60 }
 0x3ed   : > { %v4030_v59 = vsel %vm2765_vm2, %v3003_v48, %v7606_v40  ;;  %v3932_v10 = vsel %vm2765_vm2, %v2875_v44, %v7607_v34 }
 0x3ee   : > { %v7615_v27 = vpop.permute.xlu1 %7614  ;;  %v4062_v51 = vsel %vm3943_vm4, %v4030_v59, %v7611_v50  ;;  %v3965_v15 = vsel %vm3943_vm4, %v3932_v10, %v7612_v16  ;;  %v4031_v19 = vsel %vm2765_vm2, %v3004_v62, %v7621_v21  ;;  %v3933_v46 = vsel %vm2765_vm2, %v2876_v52, %v7622_v41 }
 0x3ef   : > { %v7617_v8 = vunpack.i.h.bf16 %v7615_v27  ;;  %v7616_v47 = vunpack.i.l.bf16 %v7615_v27  ;;  %v7630_v36 = vpop.permute.xlu0 %7629 }
 0x3f0   : > { %v7632_v32 = vunpack.i.h.bf16 %v7630_v36  ;;  %v7631_v43 = vunpack.i.l.bf16 %v7630_v36  ;;  %v4762_v36 = vlaneseq }
 0x3f1   : > { %v4094_v26 = vsel %vm3976_vm5, %v4062_v51, %v7616_v47  ;;  %v3998_v30 = vsel %vm3976_vm5, %v3965_v15, %v7617_v8  ;;  %v7719_v51 = vmov 1983009808  }
 0x3f2   : > { %v7625_v56 = vpop.permute.xlu1 %7624  ;;  %4413 = vmatprep.mubr.f32.mxu0 %v4094_v26  ;;  %v4760_v15 = vunpack.c.l.s4 %v7719_v51 }
 0x3f3   : > { %v7627_v5 = vunpack.i.h.bf16 %v7625_v56  ;;  %v7626_v42 = vunpack.i.l.bf16 %v7625_v56  ;;  %4414 = vmatmul.mubr.f32.gmra.mrb[42].mxu0 %v3998_v30  ;;  %v7640_v37 = vpop.permute.xlu0 %7639  ;;  %v10919_v56 = vshrl.u32 %v4762_v36, 7 }
 0x3f4   : > { %v7642_v54 = vunpack.i.h.bf16 %v7640_v37  ;;  %v7641_v33 = vunpack.i.l.bf16 %v7640_v37  ;;  %v4761_v30 = vunpack.c.0.s8 %v4760_v15 }
 0x3f5   : > { %v4063_v1 = vsel %vm3943_vm4, %v4031_v19, %v7626_v42  ;;  %v3966_v17 = vsel %vm3943_vm4, %v3933_v46, %v7627_v5  ;;  %12420 = vst [vmem:[#allocation78_spill] sm:$0xff] %v10919_v56  ;;  %v10924_v5 = vld [vmem:[%s11849_s4] ss:$0 sm:$0xff] }
 0x3f6   : > { %v7635_v63 = vpop.permute.xlu1 %7634  ;;  %v4095_v58 = vsel %vm3976_vm5, %v4063_v1, %v7631_v43  ;;  %v3999_v7 = vsel %vm3976_vm5, %v3966_v17, %v7632_v32  ;;  %v10932_v19 = vsub.s32 %v4761_v30, %v10919_v56 }
 0x3f7   : > { %v7637_v38 = vunpack.i.h.bf16 %v7635_v63  ;;  %v7636_v35 = vunpack.i.l.bf16 %v7635_v63  ;;  %4418 = vmatprep.mubr.f32.mxu0 %v4095_v58 }
 0x3f8   : > { %4419 = vmatmul.mubr.f32.gmra.mrb[44].mxu0 %v3999_v7 }
 0x3f9   : > { %v4032_v4 = vsel %vm2765_vm2, %v10725_v0, %v7636_v35  ;;  %v3934_v28 = vsel %vm2765_vm2, %v2877_v23, %v7637_v38 }
 0x3fa   : > { %v7645_v3 = vpop.permute.xlu1 %7644  ;;  %v4064_v29 = vsel %vm3943_vm4, %v4032_v4, %v7641_v33  ;;  %v3967_v22 = vsel %vm3943_vm4, %v3934_v28, %v7642_v54 }
 0x3fb   : > { %v7647_v55 = vunpack.i.h.bf16 %v7645_v3  ;;  %v7646_v39 = vunpack.i.l.bf16 %v7645_v3 }
 0x3fd   : > { %v4096_v13 = vsel %vm3976_vm5, %v4064_v29, %v7646_v39  ;;  %v4000_v45 = vsel %vm3976_vm5, %v3967_v22, %v7647_v55 }
 0x3fe   : > { %4423 = vmatprep.mubr.f32.mxu0 %v4096_v13 }
 0x3ff   : > { %4424 = vmatmul.mubr.f32.gmra.mrb[46].mxu0 %v4000_v45 }
 0x417   : > { %v4310_v20 = vpop.f32.mrb[0].mxu0 }
 0x418   : > { %v4312_v12 = vpop.f32.mrb[1].mxu0  ;;  %v4311_v52 = vadd.f32 %v10924_v5, %v4310_v20 }
 0x41e   : > { %v4430_v0 = vpop.f32.mrb[0].mxu1 }
 0x41f   : > { %v4432_v31 = vpop.f32.mrb[1].mxu1  ;;  %v10929_v32 = vadd.f32 %v10924_v5, %v4430_v0 }
 0x423   : > { %v4315_v57 = vpop.f32.mrb[2].mxu0 }
 0x424   : > { %v4317_v9 = vpop.f32.mrb[3].mxu0  ;;  %v4316_v62 = vadd.f32 %v10924_v5, %v4315_v57 }
 0x42a   : > { %v4435_v11 = vpop.f32.mrb[2].mxu1 }
 0x42b   : > { %v4437_v25 = vpop.f32.mrb[3].mxu1  ;;  %v10935_v46 = vadd.f32 %v10924_v5, %v4435_v11 }
 0x42f   : > { %v4320_v49 = vpop.f32.mrb[4].mxu0 }
 0x430   : > { %v4322_v24 = vpop.f32.mrb[5].mxu0  ;;  %v4321_v1 = vadd.f32 %v10924_v5, %v4320_v49 }
 0x436   : > { %v4440_v14 = vpop.f32.mrb[4].mxu1 }
 0x437   : > { %v4442_v61 = vpop.f32.mrb[5].mxu1  ;;  %v10939_v17 = vadd.f32 %v10924_v5, %v4440_v14 }
 0x43b   : > { %v4325_v2 = vpop.f32.mrb[6].mxu0 }
 0x43c   : > { %v4327_v6 = vpop.f32.mrb[7].mxu0  ;;  %v4326_v37 = vadd.f32 %v10924_v5, %v4325_v2 }
 0x442   : > { %v4445_v53 = vpop.f32.mrb[6].mxu1 }
 0x443   : > { %v4447_v18 = vpop.f32.mrb[7].mxu1  ;;  %v10943_v38 = vadd.f32 %v10924_v5, %v4445_v53 }
 0x447   : > { %v4330_v60 = vpop.f32.mrb[8].mxu0 }
 0x448   : > { %v4332_v34 = vpop.f32.mrb[9].mxu0  ;;  %v10946_v35 = vadd.f32 %v10924_v5, %v4330_v60 }
 0x44e   : > { %v4450_v40 = vpop.f32.mrb[8].mxu1 }
 0x44f   : > { %v4452_v48 = vpop.f32.mrb[9].mxu1  ;;  %v10949_v28 = vadd.f32 %v10924_v5, %v4450_v40 }
 0x453   : > { %v4335_v44 = vpop.f32.mrb[10].mxu0 }
 0x454   : > { %v4337_v59 = vpop.f32.mrb[11].mxu0  ;;  %v10952_v54 = vadd.f32 %v10924_v5, %v4335_v44 }
 0x45a   : > { %v4455_v10 = vpop.f32.mrb[10].mxu1 }
 0x45b   : > { %v4457_v16 = vpop.f32.mrb[11].mxu1  ;;  %v10955_v33 = vadd.f32 %v10924_v5, %v4455_v10 }
 0x45f   : > { %v4340_v50 = vpop.f32.mrb[12].mxu0 }
 0x460   : > { %v4342_v27 = vpop.f32.mrb[13].mxu0  ;;  %v10958_v55 = vadd.f32 %v10924_v5, %v4340_v50 }
 0x466   : > { %v4460_v8 = vpop.f32.mrb[12].mxu1 }
 0x467   : > { %v4462_v47 = vpop.f32.mrb[13].mxu1  ;;  %v10961_v39 = vadd.f32 %v10924_v5, %v4460_v8 }
 0x46b   : > { %v4345_v41 = vpop.f32.mrb[14].mxu0 }
 0x46c   : > { %v4347_v21 = vpop.f32.mrb[15].mxu0  ;;  %v10964_v29 = vadd.f32 %v10924_v5, %v4345_v41 }
 0x472   : > { %v4465_v26 = vpop.f32.mrb[14].mxu1 }
 0x473   : > { %v4467_v42 = vpop.f32.mrb[15].mxu1  ;;  %v10967_v45 = vadd.f32 %v10924_v5, %v4465_v26 }
 0x476   : > { %v6985_v43 = vpop.f32.mrb[16].mxu1 }
 0x477   : > { %v4541_v63 = vadd.f32 %v6985_v43, %v4316_v62  ;;  %v4350_v58 = vpop.f32.mrb[16].mxu0  ;;  %v4535_v7 = vpop.f32.mrb[17].mxu1 }
 0x478   : > { %v4536_v23 = vadd.f32 %v4535_v7, %v4311_v52  ;;  %v4352_v4 = vpop.f32.mrb[17].mxu0  ;;  %v10971_v57 = vadd.f32 %v10924_v5, %v4350_v58 }
 0x479   : > { %v4695_v3 = vmax.f32 %v4541_v63, 0.0 }
 0x47a   : > { %v4694_v22 = vmax.f32 %v4536_v23, 0.0  ;;  %v6988_v13 = vpop.f32.mrb[18].mxu1 }
 0x47b   : > { %v4775_v20 = vcombine.high %v4695_v3, %v4695_v3  ;;  %v4782_v12 = vrot.slane %v4695_v3, %v10932_v19  ;;  %v4551_v0 = vadd.f32 %v6988_v13, %v4326_v37  ;;  %v4545_v31 = vpop.f32.mrb[19].mxu1 }
 0x47c   : > { %v4758_v9 = vcombine.high %v4694_v22, %v4694_v22  ;;  %v4765_v11 = vrot.slane %v4694_v22, %v10932_v19  ;;  %v4546_v25 = vadd.f32 %v4545_v31, %v4321_v1 }
 0x47d   : > { %v4789_v49 = vrot.slane %v4775_v20, %v10932_v19  ;;  %v4790_v24 = vcombine.high %v4782_v12, %v4782_v12  ;;  %v6800_v14 = vrot.slane %v4782_v12, 9  ;;  %v4697_v61 = vmax.f32 %v4551_v0, 0.0 }
 0x47e   : > { %v4772_v2 = vrot.slane %v4758_v9, %v10932_v19  ;;  %v4773_v6 = vcombine.high %v4765_v11, %v4765_v11  ;;  %v6796_v53 = vrot.slane %v4765_v11, 9  ;;  %v4696_v18 = vmax.f32 %v4546_v25, 0.0  ;;  %v4355_v60 = vpop.f32.mrb[18].mxu0  ;;  %v6991_v34 = vpop.f32.mrb[20].mxu1 }
 0x47f   : > { %v4791_v40 = vcombine.high %v4789_v49, %v4789_v49  ;;  %v6801_v48 = vrot.slane %v4790_v24, 9  ;;  %v6802_v44 = vrot.slane %v4789_v49, 9  ;;  %v10976_v59 = vmax.f32 %v4782_v12, %v6800_v14  ;;  %v4357_v10 = vpop.f32.mrb[19].mxu0  ;;  %v4555_v16 = vpop.f32.mrb[21].mxu1 }
 0x480   : > { %v4774_v50 = vcombine.high %v4772_v2, %v4772_v2  ;;  %v6797_v27 = vrot.slane %v4773_v6, 9  ;;  %v6798_v8 = vrot.slane %v4772_v2, 9  ;;  %v10978_v47 = vmax.f32 %v4765_v11, %v6796_v53 }
 0x481   : > { %v6803_v41 = vrot.slane %v4791_v40, 9  ;;  %v5627_v21 = vmax.f32 %v4790_v24, %v6801_v48  ;;  %v10980_v51 = vmax.f32 %v4789_v49, %v6802_v44  ;;  %v4809_v15 = vcombine.high %v4697_v61, %v4697_v61 }
 0x482   : > { %v6799_v36 = vrot.slane %v4774_v50, 9  ;;  %v5623_v26 = vmax.f32 %v4773_v6, %v6797_v27  ;;  %v10982_v30 = vmax.f32 %v4772_v2, %v6798_v8  ;;  %v4816_v42 = vrot.slane %v4697_v61, %v10932_v19  ;;  %v10985_v62 = vpop.f32.mrb[22].mxu1 }
 0x483   : > { %v5629_v52 = vmax.f32 %v4791_v40, %v6803_v41  ;;  %v4823_v43 = vrot.slane %v4809_v15, %v10932_v19  ;;  %v4792_v1 = vcombine.high %v4696_v18, %v4696_v18  ;;  %v4799_v63 = vrot.slane %v4696_v18, %v10932_v19  ;;  %v10989_v58 = vpop.f32.mrb[20].mxu0  ;;  %v10991_v7 = vpop.f32.mrb[23].mxu1 }
 0x484   : > { %v5625_v37 = vmax.f32 %v4774_v50, %v6799_v36  ;;  %v4824_v23 = vcombine.high %v4816_v42, %v4816_v42  ;;  %v6864_v4 = vrot.slane %v4816_v42, 9  ;;  %v10994_v3 = vadd.f32 %v10924_v5, %v4355_v60  ;;  %v4362_v22 = vpop.f32.mrb[21].mxu0 }
 0x485   : > { %v4825_v13 = vcombine.high %v4823_v43, %v4823_v43  ;;  %v6866_v20 = vrot.slane %v4823_v43, 9  ;;  %v4806_v12 = vrot.slane %v4792_v1, %v10932_v19  ;;  %v4807_v0 = vcombine.high %v4799_v63, %v4799_v63 }
 0x486   : > { %v6865_v31 = vrot.slane %v4824_v23, 9  ;;  %v5882_v9 = vmax.f32 %v4816_v42, %v6864_v4  ;;  %v6860_v11 = vrot.slane %v4799_v63, 9  ;;  %v4561_v25 = vadd.f32 %v6991_v34, %v10952_v54  ;;  %v10998_v49 = vpop.f32.mrb[24].mxu1 }
 0x487   : > { %v6867_v24 = vrot.slane %v4825_v13, 9  ;;  %v5884_v14 = vmax.f32 %v4823_v43, %v6866_v20  ;;  %v4808_v61 = vcombine.high %v4806_v12, %v4806_v12  ;;  %v6861_v2 = vrot.slane %v4807_v0, 9  ;;  %v11000_v6 = vpop.f32.mrb[25].mxu1 }
 0x488   : > { %v5883_v53 = vmax.f32 %v4824_v23, %v6865_v31  ;;  %v5946_v18 = vmax.f32 %v10976_v59, %v5882_v9  ;;  %v6862_v60 = vrot.slane %v4806_v12, 9  ;;  %v5878_v40 = vmax.f32 %v4799_v63, %v6860_v11 }
 0x489   : > { %v5885_v48 = vmax.f32 %v4825_v13, %v6867_v24  ;;  %v5948_v44 = vmax.f32 %v10980_v51, %v5884_v14  ;;  %v6863_v10 = vrot.slane %v4808_v61, 9  ;;  %v5879_v50 = vmax.f32 %v4807_v0, %v6861_v2 }
 0x48a   : > { %v5947_v27 = vmax.f32 %v5627_v21, %v5883_v53  ;;  %v5880_v54 = vmax.f32 %v4806_v12, %v6862_v60  ;;  %v5942_v34 = vmax.f32 %v10978_v47, %v5878_v40  ;;  %v4699_v8 = vmax.f32 %v4561_v25, 0.0  ;;  %v11005_v41 = vpop.f32.mrb[22].mxu0  ;;  %v11007_v15 = vpop.f32.mrb[26].mxu1 }
 0x48b   : > { %v5949_v36 = vmax.f32 %v5629_v52, %v5885_v48  ;;  %v5881_v42 = vmax.f32 %v4808_v61, %v6863_v10  ;;  %v5943_v43 = vmax.f32 %v5623_v26, %v5879_v50  ;;  %v4556_v59 = vadd.f32 %v4555_v16, %v10946_v35  ;;  %v4367_v1 = vpop.f32.mrb[23].mxu0  ;;  %v11010_v63 = vpop.f32.mrb[27].mxu1 }
 0x48c   : > { %v11012_v51 = vrot.slane %v5947_v27, 7  ;;  %v5944_v21 = vmax.f32 %v10982_v30, %v5880_v54  ;;  %v4843_v23 = vcombine.high %v4699_v8, %v4699_v8  ;;  %v4850_v47 = vrot.slane %v4699_v8, %v10932_v19 }
 0x48d   : > { %v11016_v4 = vrot.slane %v5949_v36, 7  ;;  %v5945_v22 = vmax.f32 %v5625_v37, %v5881_v42  ;;  %v11018_v13 = vrot.slane %v5943_v43, 7  ;;  %v4698_v52 = vmax.f32 %v4556_v59, 0.0 }
 0x48e   : > { %12421 = vst [vmem:[#allocation31_spill] sm:$0xff] %v11012_v51  ;;  %v6093_v26 = vsel %vm6075_vm6, %v11012_v51, %v5946_v18  ;;  %v4857_v35 = vrot.slane %v4843_v23, %v10932_v19  ;;  %v4858_v16 = vcombine.high %v4850_v47, %v4850_v47  ;;  %v6808_v20 = vrot.slane %v4850_v47, 9  ;;  %v11023_v12 = vpop.f32.mrb[28].mxu1 }
 0x48f   : > { %12422 = vst [vmem:[#allocation79_spill] sm:$0xff] %v11016_v4  ;;  %12423 = vst [vmem:[#allocation80_spill] sm:$0xff] %v11018_v13  ;;  %v6094_v30 = vsel %vm6077_vm7, %v11012_v51, %v6093_v26  ;;  %v6100_v0 = vsel %vm6075_vm6, %v11016_v4, %v5948_v44  ;;  %v6076_v37 = vsel %vm6075_vm6, %v11018_v13, %v5942_v34  ;;  %v11031_v31 = vrot.slane %v5945_v22, 7  ;;  %v11033_v9 = vpop.f32.mrb[24].mxu0  ;;  %v11035_v11 = vpop.f32.mrb[29].mxu1 }
 0x490   : > { %v11039_v25 = vsel %vm6079_vm8, %v11012_v51, %v6094_v30  ;;  %v11043_v24 = vsel %vm6077_vm7, %v11016_v4, %v6100_v0  ;;  %v6078_v14 = vsel %vm6077_vm7, %v11018_v13, %v6076_v37  ;;  %v4859_v61 = vcombine.high %v4857_v35, %v4857_v35  ;;  %v4372_v2 = vpop.f32.mrb[25].mxu0 }
 0x491   : > { %12424 = vst [vmem:[#allocation81_spill] sm:$0xff] %v11031_v31  ;;  %12425 = vst [vmem:[#allocation82_spill] sm:$0xff] %v11039_v25  ;;  %v11049_v53 = vsel %vm6079_vm8, %v11018_v13, %v6078_v14  ;;  %v6086_v18 = vsel %vm6075_vm6, %v11031_v31, %v5944_v21  ;;  %v6809_v60 = vrot.slane %v4858_v16, 9  ;;  %v6810_v40 = vrot.slane %v4857_v35, 9 }
 0x492   : > { %12426 = vst [vmem:[#allocation83_spill] sm:$0xff] %v11043_v24  ;;  %12427 = vst [vmem:[#allocation84_spill] sm:$0xff] %v11049_v53  ;;  %v11055_v48 = vsel %vm6077_vm7, %v11031_v31, %v6086_v18  ;;  %v6811_v44 = vrot.slane %v4859_v61, 9  ;;  %v11057_v10 = vmax.f32 %v4850_v47, %v6808_v20  ;;  %v4826_v50 = vcombine.high %v4698_v52, %v4698_v52  ;;  %v11059_v27 = vpop.f32.mrb[30].mxu1 }
 0x493   : > { %12428 = vst [vmem:[#allocation85_spill] sm:$0xff] %v11055_v48  ;;  %v11061_v54 = vmax.f32 %v4858_v16, %v6809_v60  ;;  %v11063_v34 = vmax.f32 %v4857_v35, %v6810_v40  ;;  %v4833_v8 = vrot.slane %v4698_v52, %v10932_v19  ;;  %v4571_v36 = vadd.f32 %v10985_v62, %v10964_v29  ;;  %v11068_v42 = vpop.f32.mrb[31].mxu1 }
 0x494   : > { %v11070_v43 = vmax.f32 %v4859_v61, %v6811_v44  ;;  %v4840_v59 = vrot.slane %v4826_v50, %v10932_v19  ;;  %v11075_v1 = vadd.f32 %v10924_v5, %v10989_v58  ;;  %v4566_v21 = vadd.f32 %v10991_v7, %v10958_v55 }
 0x495   : > { %v4841_v23 = vcombine.high %v4833_v8, %v4833_v8  ;;  %v6804_v47 = vrot.slane %v4833_v8, 9  ;;  %v4701_v22 = vmax.f32 %v4571_v36, 0.0  ;;  %v4581_v52 = vadd.f32 %v10998_v49, %v10994_v3 }
 0x496   : > { %v4842_v29 = vcombine.high %v4840_v59, %v4840_v59  ;;  %v6806_v62 = vrot.slane %v4840_v59, 9  ;;  %v4700_v26 = vmax.f32 %v4566_v21, 0.0  ;;  %v4576_v35 = vadd.f32 %v11000_v6, %v10971_v57  ;;  %v11083_v16 = vpop.f32.mrb[26].mxu0  ;;  %v11085_v20 = vpop.f32.mrb[32].mxu1 }
 0x497   : > { %v6805_v58 = vrot.slane %v4841_v23, 9  ;;  %v11087_v30 = vmax.f32 %v4833_v8, %v6804_v47  ;;  %v4877_v55 = vcombine.high %v4701_v22, %v4701_v22  ;;  %v4884_v7 = vrot.slane %v4701_v22, %v10932_v19  ;;  %v4377_v0 = vpop.f32.mrb[27].mxu0  ;;  %v11090_v37 = vpop.f32.mrb[33].mxu1 }
 0x498   : > { %v6807_v3 = vrot.slane %v4842_v29, 9  ;;  %v11092_v49 = vmax.f32 %v4840_v59, %v6806_v62  ;;  %v4860_v14 = vcombine.high %v4700_v26, %v4700_v26  ;;  %v4867_v61 = vrot.slane %v4700_v26, %v10932_v19 }
 0x499   : > { %v5631_v57 = vmax.f32 %v4841_v23, %v6805_v58  ;;  %v4891_v6 = vrot.slane %v4877_v55, %v10932_v19  ;;  %v4892_v2 = vcombine.high %v4884_v7, %v4884_v7  ;;  %v6872_v18 = vrot.slane %v4884_v7, 9 }
 0x49a   : > { %v5633_v60 = vmax.f32 %v4842_v29, %v6807_v3  ;;  %v4874_v40 = vrot.slane %v4860_v14, %v10932_v19  ;;  %v4875_v44 = vcombine.high %v4867_v61, %v4867_v61  ;;  %v6868_v50 = vrot.slane %v4867_v61, 9  ;;  %v11097_v8 = vpop.f32.mrb[34].mxu1 }
 0x49b   : > { %12429 = vst [vmem:[#allocation86_spill] sm:$0xff] %v11097_v8  ;;  %v4893_v36 = vcombine.high %v4891_v6, %v4891_v6  ;;  %v6873_v21 = vrot.slane %v4892_v2, 9  ;;  %v6874_v47 = vrot.slane %v4891_v6, 9  ;;  %v5890_v59 = vmax.f32 %v4884_v7, %v6872_v18  ;;  %v11099_v22 = vpop.f32.mrb[28].mxu0  ;;  %v11101_v62 = vpop.f32.mrb[35].mxu1 }
 0x49c   : > { %12430 = vst [vmem:[#allocation87_spill] sm:$0xff] %v11101_v62  ;;  %v4876_v23 = vcombine.high %v4874_v40, %v4874_v40  ;;  %v6869_v26 = vrot.slane %v4875_v44, 9  ;;  %v6870_v58 = vrot.slane %v4874_v40, 9  ;;  %v5886_v55 = vmax.f32 %v4867_v61, %v6868_v50  ;;  %v4382_v0 = vpop.f32.mrb[29].mxu0 }
 0x49d   : > { %v6875_v29 = vrot.slane %v4893_v36, 9  ;;  %v5891_v3 = vmax.f32 %v4892_v2, %v6873_v21  ;;  %v5892_v14 = vmax.f32 %v4891_v6, %v6874_v47  ;;  %v5954_v4 = vmax.f32 %v11057_v10, %v5890_v59 }
 0x49e   : > { %v6871_v24 = vrot.slane %v4876_v23, 9  ;;  %v5887_v51 = vmax.f32 %v4875_v44, %v6869_v26  ;;  %v5888_v25 = vmax.f32 %v4874_v40, %v6870_v58  ;;  %v5950_v56 = vmax.f32 %v11087_v30, %v5886_v55  ;;  %v11105_v7 = vpop.f32.mrb[36].mxu1 }
 0x49f   : > { %12431 = vst [vmem:[#allocation88_spill] sm:$0xff] %v11105_v7  ;;  %v5893_v18 = vmax.f32 %v4893_v36, %v6875_v29  ;;  %v5955_v31 = vmax.f32 %v11061_v54, %v5891_v3  ;;  %v5956_v48 = vmax.f32 %v11063_v34, %v5892_v14  ;;  %v4703_v13 = vmax.f32 %v4581_v52, 0.0  ;;  %v11109_v61 = vpop.f32.mrb[37].mxu1 }
 0x4a0   : > { %12432 = vst [vmem:[#allocation89_spill] sm:$0xff] %v11109_v61  ;;  %v5889_v50 = vmax.f32 %v4876_v23, %v6871_v24  ;;  %v5951_v2 = vmax.f32 %v5631_v57, %v5887_v51  ;;  %v5952_v6 = vmax.f32 %v11092_v49, %v5888_v25  ;;  %v4702_v10 = vmax.f32 %v4576_v35, 0.0 }
 0x4a1   : > { %v5957_v44 = vmax.f32 %v11070_v43, %v5893_v18  ;;  %v11113_v40 = vrot.slane %v5955_v31, 7  ;;  %v4911_v30 = vcombine.high %v4703_v13, %v4703_v13  ;;  %v4918_v21 = vrot.slane %v4703_v13, %v10932_v19 }
 0x4a2   : > { %v5953_v36 = vmax.f32 %v5633_v60, %v5889_v50  ;;  %v11116_v47 = vrot.slane %v5951_v2, 7  ;;  %v4894_v54 = vcombine.high %v4702_v10, %v4702_v10  ;;  %v4901_v34 = vrot.slane %v4702_v10, %v10932_v19  ;;  %v4385_v52 = vpop.f32.mrb[30].mxu0  ;;  %v11119_v59 = vpop.f32.mrb[38].mxu1 }
 0x4a3   : > { %12433 = vst [vmem:[#allocation90_spill] sm:$0xff] %v11113_v40  ;;  %12435 = vst [vmem:[#allocation92_spill] sm:$0xff] %v11119_v59  ;;  %v6121_v51 = vsel %vm6075_vm6, %v11113_v40, %v5954_v4  ;;  %v11123_v25 = vrot.slane %v5957_v44, 7  ;;  %v4925_v31 = vrot.slane %v4911_v30, %v10932_v19  ;;  %v4926_v24 = vcombine.high %v4918_v21, %v4918_v21  ;;  %v4387_v43 = vpop.f32.mrb[31].mxu0  ;;  %v11126_v35 = vpop.f32.mrb[39].mxu1 }
 0x4a4   : > { %12434 = vst [vmem:[#allocation91_spill] sm:$0xff] %v11116_v47  ;;  %12437 = vst [vmem:[#allocation94_spill] sm:$0xff] %v11126_v35  ;;  %v6122_v13 = vsel %vm6077_vm7, %v11113_v40, %v6121_v51  ;;  %v6107_v49 = vsel %vm6075_vm6, %v11116_v47, %v5950_v56  ;;  %v11132_v57 = vrot.slane %v5953_v36, 7  ;;  %v6816_v60 = vrot.slane %v4918_v21, 9 }
 0x4a5   : > { %12436 = vst [vmem:[#allocation93_spill] sm:$0xff] %v11123_v25  ;;  %v11136_v4 = vsel %vm6079_vm8, %v11113_v40, %v6122_v13  ;;  %v6128_v23 = vsel %vm6075_vm6, %v11123_v25, %v5956_v48  ;;  %v6108_v26 = vsel %vm6077_vm7, %v11116_v47, %v6107_v49  ;;  %v4927_v58 = vcombine.high %v4925_v31, %v4925_v31 }
 0x4a6   : > { %12438 = vst [vmem:[#allocation95_spill] sm:$0xff] %v11132_v57  ;;  %12439 = vst [vmem:[#allocation96_spill] sm:$0xff] %v11136_v4  ;;  %v11144_v55 = vsel %vm6077_vm7, %v11123_v25, %v6128_v23  ;;  %v11148_v56 = vsel %vm6079_vm8, %v11116_v47, %v6108_v26  ;;  %v6114_v0 = vsel %vm6075_vm6, %v11132_v57, %v5952_v6  ;;  %v6817_v29 = vrot.slane %v4926_v24, 9  ;;  %v11152_v3 = vpop.f32.mrb[40].mxu1 }
 0x4a7   : > { %12440 = vst [vmem:[#allocation97_spill] sm:$0xff] %v11144_v55  ;;  %12441 = vst [vmem:[#allocation98_spill] sm:$0xff] %v11148_v56  ;;  %v11156_v48 = vsel %vm6077_vm7, %v11132_v57, %v6114_v0  ;;  %v6818_v14 = vrot.slane %v4925_v31, 9  ;;  %v6819_v18 = vrot.slane %v4927_v58, 9  ;;  %v11158_v50 = vmax.f32 %v4918_v21, %v6816_v60  ;;  %v11160_v2 = vpop.f32.mrb[32].mxu0  ;;  %v11162_v10 = vpop.f32.mrb[41].mxu1 }
 0x4a8   : > { %12442 = vst [vmem:[#allocation99_spill] sm:$0xff] %v11156_v48  ;;  %v11164_v44 = vmax.f32 %v4926_v24, %v6817_v29  ;;  %v4908_v30 = vrot.slane %v4894_v54, %v10932_v19  ;;  %v4909_v6 = vcombine.high %v4901_v34, %v4901_v34  ;;  %v6812_v36 = vrot.slane %v4901_v34, 9  ;;  %v4392_v51 = vpop.f32.mrb[33].mxu0 }
 0x4a9   : > { %v11167_v43 = vmax.f32 %v4925_v31, %v6818_v14  ;;  %v11169_v13 = vmax.f32 %v4927_v58, %v6819_v18  ;;  %v4366_v49 = vadd.f32 %v10924_v5, %v11005_v41  ;;  %v4586_v21 = vadd.f32 %v11010_v63, %v11075_v1 }
 0x4aa   : > { %v4910_v60 = vcombine.high %v4908_v30, %v4908_v30  ;;  %v6813_v23 = vrot.slane %v4909_v6, 9  ;;  %v6814_v26 = vrot.slane %v4908_v30, 9  ;;  %v11175_v24 = vmax.f32 %v4901_v34, %v6812_v36  ;;  %v11177_v0 = vpop.f32.mrb[42].mxu1 }
 0x4ab   : > { %v4591_v54 = vadd.f32 %v11007_v15, %v4366_v49  ;;  %v4704_v29 = vmax.f32 %v4586_v21, 0.0  ;;  %v4371_v31 = vadd.f32 %v10924_v5, %v11033_v9  ;;  %v4376_v58 = vadd.f32 %v10924_v5, %v11083_v16  ;;  %v11184_v41 = vpop.f32.mrb[43].mxu1 }
 0x4ac   : > { %v6815_v14 = vrot.slane %v4910_v60, 9  ;;  %v5639_v63 = vmax.f32 %v4909_v6, %v6813_v23  ;;  %v11186_v1 = vmax.f32 %v4908_v30, %v6814_v26  ;;  %v4381_v34 = vadd.f32 %v10924_v5, %v11099_v22 }
 0x4ad   : > { %v4705_v18 = vmax.f32 %v4591_v54, 0.0  ;;  %v4928_v36 = vcombine.high %v4704_v29, %v4704_v29  ;;  %v4935_v15 = vrot.slane %v4704_v29, %v10932_v19  ;;  %v4596_v51 = vadd.f32 %v11035_v11, %v4371_v31 }
 0x4ae   : > { %v5641_v49 = vmax.f32 %v4910_v60, %v6815_v14  ;;  %v4601_v9 = vadd.f32 %v11023_v12, %v4376_v58  ;;  %v4606_v16 = vadd.f32 %v11068_v42, %v4381_v34  ;;  %v11195_v21 = vadd.f32 %v10924_v5, %v4385_v52  ;;  %v11197_v6 = vpop.f32.mrb[34].mxu0  ;;  %v11199_v30 = vpop.f32.mrb[44].mxu1 }
 0x4af   : > { %v4945_v23 = vcombine.high %v4705_v18, %v4705_v18  ;;  %v4952_v22 = vrot.slane %v4705_v18, %v10932_v19  ;;  %v4942_v26 = vrot.slane %v4928_v36, %v10932_v19  ;;  %v4943_v54 = vcombine.high %v4935_v15, %v4935_v15  ;;  %v4397_v29 = vpop.f32.mrb[35].mxu0  ;;  %v11203_v11 = vpop.f32.mrb[45].mxu1 }
 0x4b0   : > { %v6876_v60 = vrot.slane %v4935_v15, 9  ;;  %v4706_v12 = vmax.f32 %v4596_v51, 0.0  ;;  %v11205_v31 = vmax.f32 %v4601_v9, 0.0  ;;  %v11207_v42 = vmax.f32 %v4606_v16, 0.0 }
 0x4b1   : > { %v4959_v52 = vrot.slane %v4945_v23, %v10932_v19  ;;  %v4960_v58 = vcombine.high %v4952_v22, %v4952_v22  ;;  %v6880_v14 = vrot.slane %v4952_v22, 9  ;;  %v4944_v34 = vcombine.high %v4942_v26, %v4942_v26 }
 0x4b2   : > { %v6877_v25 = vrot.slane %v4943_v54, 9  ;;  %v6878_v55 = vrot.slane %v4942_v26, 9  ;;  %v5894_v18 = vmax.f32 %v4935_v15, %v6876_v60  ;;  %v4962_v40 = vcombine.high %v4706_v12, %v4706_v12  ;;  %v11210_v36 = vpop.f32.mrb[46].mxu1 }
 0x4b3   : > { %v4961_v29 = vcombine.high %v4959_v52, %v4959_v52  ;;  %v6881_v4 = vrot.slane %v4960_v58, 9  ;;  %v6882_v57 = vrot.slane %v4959_v52, 9  ;;  %v5898_v48 = vmax.f32 %v4952_v22, %v6880_v14  ;;  %v11212_v51 = vpop.f32.mrb[36].mxu0  ;;  %v11214_v9 = vpop.f32.mrb[47].mxu1 }
 0x4b4   : > { %v6879_v16 = vrot.slane %v4944_v34, 9  ;;  %v5895_v47 = vmax.f32 %v4943_v54, %v6877_v25  ;;  %v5896_v23 = vmax.f32 %v4942_v26, %v6878_v55  ;;  %v5958_v56 = vmax.f32 %v11175_v24, %v5894_v18  ;;  %v4402_v53 = vpop.f32.mrb[37].mxu0 }
 0x4b5   : > { %v6883_v59 = vrot.slane %v4961_v29, 9  ;;  %v5899_v35 = vmax.f32 %v4960_v58, %v6881_v4  ;;  %v5900_v15 = vmax.f32 %v4959_v52, %v6882_v57  ;;  %v5962_v60 = vmax.f32 %v11158_v50, %v5898_v48 }
 0x4b6   : > { %v5897_v7 = vmax.f32 %v4944_v34, %v6879_v16  ;;  %v5959_v61 = vmax.f32 %v5639_v63, %v5895_v47  ;;  %v5960_v8 = vmax.f32 %v11186_v1, %v5896_v23  ;;  %v4969_v22 = vrot.slane %v4706_v12, %v10932_v19 }
 0x4b7   : > { %v5901_v14 = vmax.f32 %v4961_v29, %v6883_v59  ;;  %v5963_v62 = vmax.f32 %v11164_v44, %v5899_v35  ;;  %v5964_v25 = vmax.f32 %v11167_v43, %v5900_v15  ;;  %v4976_v55 = vrot.slane %v4962_v40, %v10932_v19 }
 0x4b8   : > { %v5961_v24 = vmax.f32 %v5641_v49, %v5897_v7  ;;  %v11223_v53 = vrot.slane %v5959_v61, 7  ;;  %v4977_v4 = vcombine.high %v4969_v22, %v4969_v22  ;;  %v6820_v57 = vrot.slane %v4969_v22, 9 }
 0x4b9   : > { %v5965_v48 = vmax.f32 %v11169_v13, %v5901_v14  ;;  %v11226_v50 = vrot.slane %v5963_v62, 7  ;;  %v4978_v47 = vcombine.high %v4976_v55, %v4976_v55  ;;  %v6822_v63 = vrot.slane %v4976_v55, 9 }
 0x4ba   : > { %v6135_v59 = vsel %vm6075_vm6, %v11223_v53, %v5958_v56  ;;  %v11230_v1 = vrot.slane %v5961_v24, 7  ;;  %v6821_v35 = vrot.slane %v4977_v4, 9  ;;  %v11232_v44 = vmax.f32 %v4969_v22, %v6820_v57  ;;  %v11234_v40 = vpop.f32.mrb[38].mxu0 }
 0x4bb   : > { %v6149_v7 = vsel %vm6075_vm6, %v11226_v50, %v5962_v60  ;;  %v11238_v61 = vrot.slane %v5965_v48, 7  ;;  %v6136_v62 = vsel %vm6077_vm7, %v11223_v53, %v6135_v59  ;;  %v6823_v43 = vrot.slane %v4978_v47, 9  ;;  %v4407_v13 = vpop.f32.mrb[39].mxu0 }
 0x4bc   : > { %v6150_v56 = vsel %vm6077_vm7, %v11226_v50, %v6149_v7  ;;  %v11246_v49 = vsel %vm6079_vm8, %v11223_v53, %v6136_v62  ;;  %v6142_v26 = vsel %vm6075_vm6, %v11230_v1, %v5960_v8  ;;  %v5647_v54 = vmax.f32 %v4977_v4, %v6821_v35 }
 0x4bd   : > { %12443 = vst [vmem:[#allocation100_spill] sm:$0xff] %v11238_v61  ;;  %v11252_v12 = vsel %vm6079_vm8, %v11226_v50, %v6150_v56  ;;  %v6156_v52 = vsel %vm6075_vm6, %v11238_v61, %v5964_v25  ;;  %v11258_v58 = vsel %vm6077_vm7, %v11230_v1, %v6142_v26  ;;  %v11260_v34 = vmax.f32 %v4976_v55, %v6822_v63 }
 0x4be   : > { %v11264_v18 = vsel %vm6077_vm7, %v11238_v61, %v6156_v52  ;;  %v5649_v29 = vmax.f32 %v4978_v47, %v6823_v43  ;;  %v4979_v8 = vcombine.high %v11205_v31, %v11205_v31  ;;  %v4986_v16 = vrot.slane %v11205_v31, %v10932_v19 }
 0x4bf   : > { %12444 = vst [vmem:[#allocation7_spill] sm:$0xff] %v11264_v18  ;;  %v4996_v23 = vcombine.high %v11207_v42, %v11207_v42  ;;  %v5003_v15 = vrot.slane %v11207_v42, %v10932_v19  ;;  %v4611_v60 = vadd.f32 %v11059_v27, %v11195_v21  ;;  %v4661_v22 = vadd.f32 %v11152_v3, %v10935_v46  ;;  %v11278_v14 = vpop.f32.mrb[40].mxu0 }
 0x4c0   : > { %v4993_v25 = vrot.slane %v4979_v8, %v10932_v19  ;;  %v4994_v55 = vcombine.high %v4986_v16, %v4986_v16  ;;  %v6824_v24 = vrot.slane %v4986_v16, 9  ;;  %v4391_v31 = vadd.f32 %v10924_v5, %v11160_v2  ;;  %v4412_v4 = vpop.f32.mrb[41].mxu0 }
 0x4c1   : > { %v5010_v57 = vrot.slane %v4996_v23, %v10932_v19  ;;  %v5011_v48 = vcombine.high %v5003_v15, %v5003_v15  ;;  %v6884_v42 = vrot.slane %v5003_v15, 9  ;;  %v4709_v47 = vmax.f32 %v4611_v60, 0.0 }
 0x4c2   : > { %v4995_v63 = vcombine.high %v4993_v25, %v4993_v25  ;;  %v6825_v27 = vrot.slane %v4994_v55, 9  ;;  %v6826_v21 = vrot.slane %v4993_v25, 9  ;;  %v11284_v59 = vmax.f32 %v4986_v16, %v6824_v24 }
 0x4c3   : > { %v5012_v46 = vcombine.high %v5010_v57, %v5010_v57  ;;  %v6885_v3 = vrot.slane %v5011_v48, 9  ;;  %v6886_v35 = vrot.slane %v5010_v57, 9  ;;  %v5902_v7 = vmax.f32 %v5003_v15, %v6884_v42 }
 0x4c4   : > { %v6827_v62 = vrot.slane %v4995_v63, 9  ;;  %v5651_v43 = vmax.f32 %v4994_v55, %v6825_v27  ;;  %v5652_v13 = vmax.f32 %v4993_v25, %v6826_v21  ;;  %v5013_v56 = vcombine.high %v4709_v47, %v4709_v47 }
 0x4c5   : > { %v6887_v2 = vrot.slane %v5012_v46, 9  ;;  %v5903_v26 = vmax.f32 %v5011_v48, %v6885_v3  ;;  %v5904_v52 = vmax.f32 %v5010_v57, %v6886_v35  ;;  %v5966_v8 = vmax.f32 %v11232_v44, %v5902_v7 }
 0x4c6   : > { %v5653_v23 = vmax.f32 %v4995_v63, %v6827_v62  ;;  %v5020_v60 = vrot.slane %v4709_v47, %v10932_v19  ;;  %v5027_v4 = vrot.slane %v5013_v56, %v10932_v19  ;;  %v4719_v16 = vmax.f32 %v4661_v22, 0.0  ;;  %v11289_v24 = vpop.f32.mrb[42].mxu0 }
 0x4c7   : > { %v5905_v61 = vmax.f32 %v5012_v46, %v6887_v2  ;;  %v5967_v18 = vmax.f32 %v5647_v54, %v5903_v26  ;;  %v5968_v15 = vmax.f32 %v11260_v34, %v5904_v52  ;;  %v4616_v25 = vadd.f32 %v11090_v37, %v4391_v31  ;;  %v4417_v55 = vpop.f32.mrb[43].mxu0 }
 0x4c8   : > { %v5028_v42 = vcombine.high %v5020_v60, %v5020_v60  ;;  %v5029_v48 = vcombine.high %v5027_v4, %v5027_v4  ;;  %v6888_v57 = vrot.slane %v5020_v60, 9  ;;  %v6890_v27 = vrot.slane %v5027_v4, 9 }
 0x4c9   : > { %v5969_v44 = vmax.f32 %v5649_v29, %v5905_v61  ;;  %v11293_v63 = vrot.slane %v5967_v18, 7  ;;  %v5183_v47 = vcombine.high %v4719_v16, %v4719_v16  ;;  %v5190_v21 = vrot.slane %v4719_v16, %v10932_v19 }
 0x4ca   : > { %v6889_v22 = vrot.slane %v5028_v42, 9  ;;  %v6891_v3 = vrot.slane %v5029_v48, 9  ;;  %v5906_v35 = vmax.f32 %v5020_v60, %v6888_v57  ;;  %v5908_v46 = vmax.f32 %v5027_v4, %v6890_v27 }
 0x4cb   : > { %v6163_v54 = vsel %vm6075_vm6, %v11293_v63, %v5966_v8  ;;  %v11298_v34 = vrot.slane %v5969_v44, 7  ;;  %v5197_v37 = vrot.slane %v5183_v47, %v10932_v19  ;;  %v5198_v31 = vcombine.high %v5190_v21, %v5190_v21  ;;  %v11301_v7 = vpop.f32.mrb[44].mxu0 }
 0x4cc   : > { %v11305_v61 = vsel %vm6077_vm7, %v11293_v63, %v6163_v54  ;;  %v5907_v18 = vmax.f32 %v5028_v42, %v6889_v22  ;;  %v5909_v29 = vmax.f32 %v5029_v48, %v6891_v3  ;;  %v5970_v62 = vmax.f32 %v11284_v59, %v5906_v35  ;;  %v4422_v56 = vpop.f32.mrb[45].mxu0 }
 0x4cd   : > { %v6170_v2 = vsel %vm6075_vm6, %v11298_v34, %v5968_v15  ;;  %v5972_v26 = vmax.f32 %v5652_v13, %v5908_v46  ;;  %v5199_v52 = vcombine.high %v5197_v37, %v5197_v37  ;;  %v6848_v8 = vrot.slane %v5190_v21, 9 }
 0x4ce   : > { %v11312_v60 = vsel %vm6077_vm7, %v11298_v34, %v6170_v2  ;;  %v5971_v4 = vmax.f32 %v5651_v43, %v5907_v18  ;;  %v5973_v16 = vmax.f32 %v5653_v23, %v5909_v29  ;;  %v6849_v55 = vrot.slane %v5198_v31, 9 }
 0x4cf   : > { %v6850_v57 = vrot.slane %v5197_v37, 9  ;;  %v6851_v27 = vrot.slane %v5199_v52, 9  ;;  %v11314_v42 = vmax.f32 %v5190_v21, %v6848_v8  ;;  %v4710_v48 = vmax.f32 %v4616_v25, 0.0 }
 0x4d0   : > { %v11316_v59 = vrot.slane %v5971_v4, 7  ;;  %v11318_v44 = vrot.slane %v5973_v16, 7  ;;  %v11320_v15 = vmax.f32 %v5198_v31, %v6849_v55  ;;  %v4656_v13 = vadd.f32 %v11162_v10, %v10929_v32 }
 0x4d1   : > { %v11324_v47 = vmax.f32 %v5197_v37, %v6850_v57  ;;  %v11326_v22 = vmax.f32 %v5199_v52, %v6851_v27  ;;  %v5030_v43 = vcombine.high %v4710_v48, %v4710_v48  ;;  %v5037_v23 = vrot.slane %v4710_v48, %v10932_v19 }
 0x4d2   : > { %12445 = vst [vmem:[#allocation8_spill] sm:$0xff] %v11316_v59  ;;  %12446 = vst [vmem:[#allocation9_spill] sm:$0xff] %v11318_v44  ;;  %v6177_v21 = vsel %vm6075_vm6, %v11316_v59, %v5970_v62  ;;  %v6184_v25 = vsel %vm6075_vm6, %v11318_v44, %v5972_v26  ;;  %v4718_v3 = vmax.f32 %v4656_v13, 0.0  ;;  %v4671_v35 = vadd.f32 %v11177_v0, %v10943_v38  ;;  %v11335_v46 = vpop.f32.mrb[46].mxu0 }
 0x4d3   : > { %v11339_v32 = vsel %vm6077_vm7, %v11316_v59, %v6177_v21  ;;  %v11343_v10 = vsel %vm6077_vm7, %v11318_v44, %v6184_v25  ;;  %v5044_v54 = vrot.slane %v5030_v43, %v10932_v19  ;;  %v5045_v37 = vcombine.high %v5037_v23, %v5037_v23  ;;  %v4427_v31 = vpop.f32.mrb[47].mxu0 }
 0x4d4   : > { %12447 = vst [vmem:[#allocation10_spill] sm:$0xff] %v11339_v32  ;;  %12448 = vst [vmem:[#allocation11_spill] sm:$0xff] %v11343_v10  ;;  %v6828_v18 = vrot.slane %v5037_v23, 9  ;;  %v5166_v29 = vcombine.high %v4718_v3, %v4718_v3  ;;  %v5173_v62 = vrot.slane %v4718_v3, %v10932_v19  ;;  %v4721_v56 = vmax.f32 %v4671_v35, 0.0 }
 0x4d5   : > { %v5046_v38 = vcombine.high %v5044_v54, %v5044_v54  ;;  %v6829_v0 = vrot.slane %v5045_v37, 9  ;;  %v6830_v2 = vrot.slane %v5044_v54, 9  ;;  %v4666_v26 = vadd.f32 %v11184_v41, %v10939_v17 }
 0x4d6   : > { %v11349_v52 = vmax.f32 %v5037_v23, %v6828_v18  ;;  %v5180_v8 = vrot.slane %v5166_v29, %v10932_v19  ;;  %v5181_v4 = vcombine.high %v5173_v62, %v5173_v62  ;;  %v6844_v16 = vrot.slane %v5173_v62, 9 }
 0x4d7   : > { %v6831_v55 = vrot.slane %v5046_v38, 9  ;;  %v11352_v57 = vmax.f32 %v5045_v37, %v6829_v0  ;;  %v11354_v27 = vmax.f32 %v5044_v54, %v6830_v2  ;;  %v5217_v48 = vcombine.high %v4721_v56, %v4721_v56 }
 0x4d8   : > { %v5182_v13 = vcombine.high %v5180_v8, %v5180_v8  ;;  %v6845_v43 = vrot.slane %v5181_v4, 9  ;;  %v6846_v21 = vrot.slane %v5180_v8, 9  ;;  %v11356_v25 = vmax.f32 %v5173_v62, %v6844_v16 }
 0x4d9   : > { %v11358_v3 = vmax.f32 %v5046_v38, %v6831_v55  ;;  %v5224_v17 = vrot.slane %v4721_v56, %v10932_v19  ;;  %v5231_v41 = vrot.slane %v5217_v48, %v10932_v19  ;;  %v4720_v23 = vmax.f32 %v4666_v26, 0.0 }
 0x4da   : > { %v6847_v35 = vrot.slane %v5182_v13, 9  ;;  %v5671_v31 = vmax.f32 %v5181_v4, %v6845_v43  ;;  %v11362_v18 = vmax.f32 %v5180_v8, %v6846_v21  ;;  %v4396_v54 = vadd.f32 %v10924_v5, %v11197_v6 }
 0x4db   : > { %v5232_v37 = vcombine.high %v5224_v17, %v5224_v17  ;;  %v5233_v29 = vcombine.high %v5231_v41, %v5231_v41  ;;  %v6912_v0 = vrot.slane %v5224_v17, 9  ;;  %v6914_v2 = vrot.slane %v5231_v41, 9 }
 0x4dc   : > { %v5673_v62 = vmax.f32 %v5182_v13, %v6847_v35  ;;  %v5200_v16 = vcombine.high %v4720_v23, %v4720_v23  ;;  %v5207_v38 = vrot.slane %v4720_v23, %v10932_v19  ;;  %v4621_v56 = vadd.f32 %v11085_v20, %v4396_v54 }
 0x4dd   : > { %v6913_v55 = vrot.slane %v5232_v37, 9  ;;  %v6915_v48 = vrot.slane %v5233_v29, 9  ;;  %v5930_v26 = vmax.f32 %v5224_v17, %v6912_v0  ;;  %v5932_v44 = vmax.f32 %v5231_v41, %v6914_v2 }
 0x4de   : > { %v5214_v8 = vrot.slane %v5200_v16, %v10932_v19  ;;  %v5215_v4 = vcombine.high %v5207_v38, %v5207_v38  ;;  %v6908_v43 = vrot.slane %v5207_v38, 9  ;;  %v4711_v21 = vmax.f32 %v4621_v56, 0.0 }
 0x4df   : > { %v5931_v5 = vmax.f32 %v5232_v37, %v6913_v55  ;;  %v5933_v6 = vmax.f32 %v5233_v29, %v6915_v48  ;;  %v5994_v10 = vmax.f32 %v11314_v42, %v5930_v26  ;;  %v5996_v13 = vmax.f32 %v11324_v47, %v5932_v44 }
 0x4e0   : > { %v5216_v35 = vcombine.high %v5214_v8, %v5214_v8  ;;  %v6909_v59 = vrot.slane %v5215_v4, 9  ;;  %v6910_v23 = vrot.slane %v5214_v8, 9  ;;  %v5926_v32 = vmax.f32 %v5207_v38, %v6908_v43 }
 0x4e1   : > { %v5995_v20 = vmax.f32 %v11320_v15, %v5931_v5  ;;  %v5997_v17 = vmax.f32 %v11326_v22, %v5933_v6  ;;  %v5047_v41 = vcombine.high %v4711_v21, %v4711_v21  ;;  %v5054_v54 = vrot.slane %v4711_v21, %v10932_v19 }
 0x4e2   : > { %v6911_v0 = vrot.slane %v5216_v35, 9  ;;  %v5927_v2 = vmax.f32 %v5215_v4, %v6909_v59  ;;  %v5928_v16 = vmax.f32 %v5214_v8, %v6910_v23  ;;  %v5990_v37 = vmax.f32 %v11356_v25, %v5926_v32 }
 0x4e3   : > { %v11375_v29 = vrot.slane %v5995_v20, 7  ;;  %v11377_v42 = vrot.slane %v5997_v17, 7  ;;  %v5061_v44 = vrot.slane %v5047_v41, %v10932_v19  ;;  %v5062_v47 = vcombine.high %v5054_v54, %v5054_v54 }
 0x4e4   : > { %v5929_v38 = vmax.f32 %v5216_v35, %v6911_v0  ;;  %v5991_v56 = vmax.f32 %v5671_v31, %v5927_v2  ;;  %v5992_v15 = vmax.f32 %v11362_v18, %v5928_v16  ;;  %v6832_v22 = vrot.slane %v5054_v54, 9 }
 0x4e5   : > { %12449 = vst [vmem:[#allocation101_spill] sm:$0xff] %v11375_v29  ;;  %12450 = vst [vmem:[#allocation102_spill] sm:$0xff] %v11377_v42  ;;  %v6261_v55 = vsel %vm6075_vm6, %v11375_v29, %v5994_v10  ;;  %v6268_v59 = vsel %vm6075_vm6, %v11377_v42, %v5996_v13  ;;  %v5063_v48 = vcombine.high %v5061_v44, %v5061_v44  ;;  %v6833_v32 = vrot.slane %v5062_v47, 9 }
 0x4e6   : > { %v6262_v25 = vsel %vm6077_vm7, %v11375_v29, %v6261_v55  ;;  %v11389_v26 = vsel %vm6077_vm7, %v11377_v42, %v6268_v59  ;;  %v5993_v8 = vmax.f32 %v5673_v62, %v5929_v38  ;;  %v11391_v31 = vrot.slane %v5991_v56, 7  ;;  %v12453_v38 = vld [vmem:[#allocation87_spill] sm:$0xff] }
 0x4e7   : > { %12451 = vst [vmem:[#allocation13_spill] sm:$0xff] %v11389_v26  ;;  %v11395_v18 = vsel %vm6079_vm8, %v11375_v29, %v6262_v25  ;;  %v6834_v10 = vrot.slane %v5061_v44, 9  ;;  %v6835_v4 = vrot.slane %v5063_v48, 9  ;;  %v11397_v43 = vmax.f32 %v5054_v54, %v6832_v22 }
 0x4e8   : > { %12452 = vst [vmem:[#allocation103_spill] sm:$0xff] %v11395_v18  ;;  %v6247_v21 = vsel %vm6075_vm6, %v11391_v31, %v5990_v37  ;;  %v11401_v5 = vrot.slane %v5993_v8, 7  ;;  %v11403_v6 = vmax.f32 %v5062_v47, %v6833_v32  ;;  %v4681_v62 = vadd.f32 %v11199_v30, %v10955_v33 }
 0x4e9   : > { %v6248_v13 = vsel %vm6077_vm7, %v11391_v31, %v6247_v21  ;;  %v11409_v35 = vmax.f32 %v5061_v44, %v6834_v10  ;;  %v11411_v23 = vmax.f32 %v5063_v48, %v6835_v4  ;;  %v4676_v20 = vadd.f32 %v11203_v11, %v10949_v28  ;;  %v11430_v28 = vld [vmem:[%s11849_s4] ss:$0 sm:$0xff] }
 0x4ea   : > { %v11417_v17 = vsel %vm6079_vm8, %v11391_v31, %v6248_v13  ;;  %v6254_v41 = vsel %vm6075_vm6, %v11401_v5, %v5992_v15  ;;  %v4723_v54 = vmax.f32 %v4681_v62, 0.0  ;;  %v4691_v33 = vadd.f32 %v11210_v36, %v10967_v45 }
 0x4eb   : > { %v11425_v30 = vsel %vm6077_vm7, %v11401_v5, %v6254_v41  ;;  %v4722_v0 = vmax.f32 %v4676_v20, 0.0  ;;  %v4401_v11 = vadd.f32 %v11430_v28, %v11212_v51  ;;  %v4686_v2 = vadd.f32 %v11214_v9, %v10961_v39 }
 0x4ec   : > { %v5251_v16 = vcombine.high %v4723_v54, %v4723_v54  ;;  %v5258_v37 = vrot.slane %v4723_v54, %v10932_v19  ;;  %v4725_v45 = vmax.f32 %v4691_v33, 0.0  ;;  %v11439_v36 = vadd.f32 %v11430_v28, %v11234_v40 }
 0x4ed   : > { %v5234_v44 = vcombine.high %v4722_v0, %v4722_v0  ;;  %v5241_v47 = vrot.slane %v4722_v0, %v10932_v19  ;;  %v4626_v56 = vadd.f32 %v12453_v38, %v4401_v11  ;;  %v4724_v15 = vmax.f32 %v4686_v2, 0.0 }
 0x4ee   : > { %v5265_v22 = vrot.slane %v5251_v16, %v10932_v19  ;;  %v5266_v51 = vcombine.high %v5258_v37, %v5258_v37  ;;  %v6856_v55 = vrot.slane %v5258_v37, 9  ;;  %v5285_v59 = vcombine.high %v4725_v45, %v4725_v45 }
 0x4ef   : > { %v5248_v39 = vrot.slane %v5234_v44, %v10932_v19  ;;  %v5249_v9 = vcombine.high %v5241_v47, %v5241_v47  ;;  %v6852_v48 = vrot.slane %v5241_v47, 9  ;;  %v5292_v32 = vrot.slane %v4725_v45, %v10932_v19 }
 0x4f0   : > { %v5267_v25 = vcombine.high %v5265_v22, %v5265_v22  ;;  %v6857_v40 = vrot.slane %v5266_v51, 9  ;;  %v6858_v8 = vrot.slane %v5265_v22, 9  ;;  %v5682_v10 = vmax.f32 %v5258_v37, %v6856_v55 }
 0x4f1   : > { %v5250_v4 = vcombine.high %v5248_v39, %v5248_v39  ;;  %v6853_v21 = vrot.slane %v5249_v9, 9  ;;  %v6854_v62 = vrot.slane %v5248_v39, 9  ;;  %v11446_v13 = vmax.f32 %v5241_v47, %v6852_v48 }
 0x4f2   : > { %v6859_v20 = vrot.slane %v5267_v25, 9  ;;  %v5683_v41 = vmax.f32 %v5266_v51, %v6857_v40  ;;  %v5684_v54 = vmax.f32 %v5265_v22, %v6858_v8  ;;  %v5299_v33 = vrot.slane %v5285_v59, %v10932_v19 }
 0x4f3   : > { %v6855_v0 = vrot.slane %v5250_v4, 9  ;;  %v11449_v11 = vmax.f32 %v5249_v9, %v6853_v21  ;;  %v11451_v2 = vmax.f32 %v5248_v39, %v6854_v62  ;;  %v5300_v16 = vcombine.high %v5292_v32, %v5292_v32 }
 0x4f4   : > { %v5685_v45 = vmax.f32 %v5267_v25, %v6859_v20  ;;  %v5301_v44 = vcombine.high %v5299_v33, %v5299_v33  ;;  %v6920_v38 = vrot.slane %v5292_v32, 9  ;;  %v6922_v37 = vrot.slane %v5299_v33, 9 }
 0x4f5   : > { %v5681_v55 = vmax.f32 %v5250_v4, %v6855_v0  ;;  %v6921_v42 = vrot.slane %v5300_v16, 9  ;;  %v4712_v26 = vmax.f32 %v4626_v56, 0.0  ;;  %v5268_v47 = vcombine.high %v4724_v15, %v4724_v15 }
 0x4f6   : > { %v6923_v48 = vrot.slane %v5301_v44, 9  ;;  %v5938_v29 = vmax.f32 %v5292_v32, %v6920_v38  ;;  %v5940_v51 = vmax.f32 %v5299_v33, %v6922_v37  ;;  %v5275_v22 = vrot.slane %v4724_v15, %v10932_v19 }
 0x4f7   : > { %v5939_v59 = vmax.f32 %v5300_v16, %v6921_v42  ;;  %v5064_v40 = vcombine.high %v4712_v26, %v4712_v26  ;;  %v5071_v9 = vrot.slane %v4712_v26, %v10932_v19  ;;  %v5282_v39 = vrot.slane %v5268_v47, %v10932_v19 }
 0x4f8   : > { %v5941_v8 = vmax.f32 %v5301_v44, %v6923_v48  ;;  %v6002_v25 = vmax.f32 %v5682_v10, %v5938_v29  ;;  %v6004_v21 = vmax.f32 %v5684_v54, %v5940_v51  ;;  %v5283_v62 = vcombine.high %v5275_v22, %v5275_v22 }
 0x4f9   : > { %v6003_v20 = vmax.f32 %v5683_v41, %v5939_v59  ;;  %v5078_v4 = vrot.slane %v5064_v40, %v10932_v19  ;;  %v5079_v56 = vcombine.high %v5071_v9, %v5071_v9  ;;  %v6892_v0 = vrot.slane %v5071_v9, 9 }
 0x4fa   : > { %v6005_v18 = vmax.f32 %v5685_v45, %v5941_v8  ;;  %v5284_v32 = vcombine.high %v5282_v39, %v5282_v39  ;;  %v6916_v33 = vrot.slane %v5275_v22, 9  ;;  %v6917_v38 = vrot.slane %v5283_v62, 9 }
 0x4fb   : > { %v11457_v15 = vrot.slane %v6003_v20, 7  ;;  %v5080_v42 = vcombine.high %v5078_v4, %v5078_v4  ;;  %v6893_v16 = vrot.slane %v5079_v56, 9  ;;  %v6894_v26 = vrot.slane %v5078_v4, 9 }
 0x4fc   : > { %v11459_v37 = vrot.slane %v6005_v18, 7  ;;  %v5910_v44 = vmax.f32 %v5071_v9, %v6892_v0  ;;  %v6918_v29 = vrot.slane %v5282_v39, 9  ;;  %v6919_v10 = vrot.slane %v5284_v32, 9 }
 0x4fd   : > { %v6289_v41 = vsel %vm6075_vm6, %v11457_v15, %v6002_v25  ;;  %v6895_v54 = vrot.slane %v5080_v42, 9  ;;  %v5911_v47 = vmax.f32 %v5079_v56, %v6893_v16  ;;  %v5912_v48 = vmax.f32 %v5078_v4, %v6894_v26 }
 0x4fe   : > { %v6290_v45 = vsel %vm6077_vm7, %v11457_v15, %v6289_v41  ;;  %v6296_v51 = vsel %vm6075_vm6, %v11459_v37, %v6004_v21  ;;  %v5974_v59 = vmax.f32 %v11349_v52, %v5910_v44  ;;  %v5934_v40 = vmax.f32 %v5275_v22, %v6916_v33  ;;  %v12454_v33 = vld [vmem:[#allocation86_spill] sm:$0xff] }
 0x4ff   : > { %v11470_v18 = vsel %vm6079_vm8, %v11457_v15, %v6290_v45  ;;  %v11474_v9 = vsel %vm6077_vm7, %v11459_v37, %v6296_v51  ;;  %v5913_v8 = vmax.f32 %v5080_v42, %v6895_v54  ;;  %v5975_v25 = vmax.f32 %v11352_v57, %v5911_v47 }
 0x500   : > { %v5976_v20 = vmax.f32 %v11354_v27, %v5912_v48  ;;  %v5935_v4 = vmax.f32 %v5283_v62, %v6917_v38  ;;  %v5936_v56 = vmax.f32 %v5282_v39, %v6918_v29  ;;  %v5937_v0 = vmax.f32 %v5284_v32, %v6919_v10  ;;  %v12456_v29 = vld [vmem:[#allocation88_spill] sm:$0xff] }
 0x501   : > { %v5977_v21 = vmax.f32 %v11358_v3, %v5913_v8  ;;  %v11479_v52 = vrot.slane %v5975_v25, 7  ;;  %v5998_v22 = vmax.f32 %v11446_v13, %v5934_v40  ;;  %v4631_v16 = vadd.f32 %v12454_v33, %v11439_v36 }
 0x502   : > { %v5999_v26 = vmax.f32 %v11449_v11, %v5935_v4  ;;  %v6000_v42 = vmax.f32 %v11451_v2, %v5936_v56  ;;  %v6001_v44 = vmax.f32 %v5681_v55, %v5937_v0  ;;  %v4411_v57 = vadd.f32 %v11430_v28, %v11278_v14  ;;  %v12455_v55 = vld [vmem:[#allocation89_spill] sm:$0xff] }
 0x503   : > { %v6191_v27 = vsel %vm6075_vm6, %v11479_v52, %v5974_v59  ;;  %v11490_v39 = vrot.slane %v5977_v21, 7  ;;  %v4713_v3 = vmax.f32 %v4631_v16, 0.0  ;;  %v4416_v13 = vadd.f32 %v11430_v28, %v11289_v24 }
 0x504   : > { %v11496_v36 = vsel %vm6077_vm7, %v11479_v52, %v6191_v27  ;;  %v11498_v11 = vrot.slane %v5999_v26, 7  ;;  %v11500_v2 = vrot.slane %v6001_v44, 7  ;;  %v4636_v62 = vadd.f32 %v12455_v55, %v4411_v57 }
 0x505   : > { %v6198_v14 = vsel %vm6075_vm6, %v11490_v39, %v5976_v20  ;;  %v5081_v32 = vcombine.high %v4713_v3, %v4713_v3  ;;  %v5088_v38 = vrot.slane %v4713_v3, %v10932_v19  ;;  %v4641_v10 = vadd.f32 %v12456_v29, %v4416_v13 }
 0x506   : > { %v11509_v24 = vsel %vm6077_vm7, %v11490_v39, %v6198_v14  ;;  %v6275_v41 = vsel %vm6075_vm6, %v11498_v11, %v5998_v22  ;;  %v6282_v54 = vsel %vm6075_vm6, %v11500_v2, %v6000_v42  ;;  %v4714_v47 = vmax.f32 %v4636_v62, 0.0 }
 0x507   : > { %v6276_v48 = vsel %vm6077_vm7, %v11498_v11, %v6275_v41  ;;  %v11519_v45 = vsel %vm6077_vm7, %v11500_v2, %v6282_v54  ;;  %v5095_v51 = vrot.slane %v5081_v32, %v10932_v19  ;;  %v5096_v59 = vcombine.high %v5088_v38, %v5088_v38 }
 0x508   : > { %v11524_v40 = vsel %vm6079_vm8, %v11498_v11, %v6276_v48  ;;  %v6896_v8 = vrot.slane %v5088_v38, 9  ;;  %v5098_v25 = vcombine.high %v4714_v47, %v4714_v47  ;;  %v5105_v20 = vrot.slane %v4714_v47, %v10932_v19 }
 0x509   : > { %v5097_v4 = vcombine.high %v5095_v51, %v5095_v51  ;;  %v6897_v56 = vrot.slane %v5096_v59, 9  ;;  %v6898_v0 = vrot.slane %v5095_v51, 9  ;;  %v4715_v21 = vmax.f32 %v4641_v10, 0.0 }
 0x50a   : > { %v5914_v22 = vmax.f32 %v5088_v38, %v6896_v8  ;;  %v5112_v33 = vrot.slane %v5098_v25, %v10932_v19  ;;  %v5113_v16 = vcombine.high %v5105_v20, %v5105_v20  ;;  %v6836_v26 = vrot.slane %v5105_v20, 9 }
 0x50b   : > { %v6899_v42 = vrot.slane %v5097_v4, 9  ;;  %v5915_v44 = vmax.f32 %v5096_v59, %v6897_v56  ;;  %v5916_v57 = vmax.f32 %v5095_v51, %v6898_v0  ;;  %v5115_v27 = vcombine.high %v4715_v21, %v4715_v21 }
 0x50c   : > { %v5978_v3 = vmax.f32 %v11397_v43, %v5914_v22  ;;  %v5114_v13 = vcombine.high %v5112_v33, %v5112_v33  ;;  %v6837_v55 = vrot.slane %v5113_v16, 9  ;;  %v6838_v62 = vrot.slane %v5112_v33, 9  ;;  %v12457_v22 = vld [vmem:[#allocation94_spill] sm:$0xff] }
 0x50d   : > { %v5917_v14 = vmax.f32 %v5097_v4, %v6899_v42  ;;  %v5979_v32 = vmax.f32 %v11403_v6, %v5915_v44  ;;  %v5980_v29 = vmax.f32 %v11409_v35, %v5916_v57  ;;  %v11531_v10 = vmax.f32 %v5105_v20, %v6836_v26  ;;  %v12458_v26 = vld [vmem:[#allocation92_spill] sm:$0xff] }
 0x50e   : > { %v6839_v38 = vrot.slane %v5114_v13, 9  ;;  %v11533_v41 = vmax.f32 %v5113_v16, %v6837_v55  ;;  %v11535_v54 = vmax.f32 %v5112_v33, %v6838_v62  ;;  %v5122_v47 = vrot.slane %v4715_v21, %v10932_v19 }
 0x50f   : > { %v5981_v48 = vmax.f32 %v11411_v23, %v5917_v14  ;;  %v11539_v43 = vrot.slane %v5979_v32, 7  ;;  %v5129_v51 = vrot.slane %v5115_v27, %v10932_v19  ;;  %v4421_v6 = vadd.f32 %v11430_v28, %v11301_v7  ;;  %v12461_v32 = vld [vmem:[#allocation98_spill] sm:$0xff] }
 0x510   : > { %v11544_v59 = vmax.f32 %v5114_v13, %v6839_v38  ;;  %v5130_v35 = vcombine.high %v5122_v47, %v5122_v47  ;;  %v6840_v8 = vrot.slane %v5122_v47, 9  ;;  %v4426_v25 = vadd.f32 %v11430_v28, %v11335_v46  ;;  %v12460_v13 = vld [vmem:[#allocation80_spill] sm:$0xff] }
 0x511   : > { %v6205_v20 = vsel %vm6075_vm6, %v11539_v43, %v5978_v3  ;;  %v11550_v4 = vrot.slane %v5981_v48, 7  ;;  %v5131_v23 = vcombine.high %v5129_v51, %v5129_v51  ;;  %v6842_v56 = vrot.slane %v5129_v51, 9  ;;  %v12459_v3 = vld [vmem:[#allocation84_spill] sm:$0xff] }
 0x512   : > { %v11554_v0 = vsel %vm6077_vm7, %v11539_v43, %v6205_v20  ;;  %v6841_v21 = vrot.slane %v5130_v35, 9  ;;  %v11556_v7 = vmax.f32 %v5122_v47, %v6840_v8  ;;  %v4646_v33 = vadd.f32 %v12457_v22, %v4421_v6 }
 0x513   : > { %v6212_v16 = vsel %vm6075_vm6, %v11550_v4, %v5980_v29  ;;  %v6843_v46 = vrot.slane %v5131_v23, 9  ;;  %v11561_v28 = vmax.f32 %v5129_v51, %v6842_v56  ;;  %v4651_v42 = vadd.f32 %v12458_v26, %v4426_v25  ;;  %v12462_v29 = vld [vmem:[#allocation91_spill] sm:$0xff] }
 0x514   : > { %v11566_v44 = vsel %vm6077_vm7, %v11550_v4, %v6212_v16  ;;  %v5667_v57 = vmax.f32 %v5130_v35, %v6841_v21  ;;  %v4716_v27 = vmax.f32 %v4646_v33, 0.0  ;;  %v11571_v55 = vsel %vm6081_vm9, %v12460_v13, %v12459_v3 }
 0x515   : > { %v5669_v62 = vmax.f32 %v5131_v23, %v6843_v46  ;;  %v4717_v14 = vmax.f32 %v4651_v42, 0.0  ;;  %v11576_v38 = vsel %vm6081_vm9, %v12462_v29, %v12461_v32  ;;  %v11581_v47 = vsel %vm6081_vm9, %v11223_v53, %v11246_v49 }
 0x516   : > { %v5132_v48 = vcombine.high %v4716_v27, %v4716_v27  ;;  %v5139_v51 = vrot.slane %v4716_v27, %v10932_v19  ;;  %v6165_v6 = vsel %vm6079_vm8, %v11293_v63, %v11305_v61  ;;  %v6193_v35 = vsel %vm6079_vm8, %v11479_v52, %v11496_v36 }
 0x517   : > { %v5149_v8 = vcombine.high %v4717_v14, %v4717_v14  ;;  %v5156_v25 = vrot.slane %v4717_v14, %v10932_v19  ;;  %v6166_v20 = vsel %vm6081_vm9, %v11293_v63, %v6165_v6  ;;  %v11595_v53 = vsel %vm6081_vm9, %v11479_v52, %v6193_v35 }
 0x518   : > { %v5146_v49 = vrot.slane %v5132_v48, %v10932_v19  ;;  %v5147_v23 = vcombine.high %v5139_v51, %v5139_v51  ;;  %v6900_v56 = vrot.slane %v5139_v51, 9  ;;  %v6250_v61 = vsel %vm6081_vm9, %v11391_v31, %v11417_v17 }
 0x519   : > { %v5163_v36 = vrot.slane %v5149_v8, %v10932_v19  ;;  %v5164_v21 = vcombine.high %v5156_v25, %v5156_v25  ;;  %v6904_v22 = vrot.slane %v5156_v25, 9  ;;  %v6278_v63 = vsel %vm6081_vm9, %v11498_v11, %v11524_v40 }
 0x51a   : > { %v5148_v33 = vcombine.high %v5146_v49, %v5146_v49  ;;  %v6901_v16 = vrot.slane %v5147_v23, 9  ;;  %v6902_v52 = vrot.slane %v5146_v49, 9  ;;  %v5918_v46 = vmax.f32 %v5139_v51, %v6900_v56 }
 0x51b   : > { %v5165_v26 = vcombine.high %v5163_v36, %v5163_v36  ;;  %v6905_v42 = vrot.slane %v5164_v21, 9  ;;  %v6906_v27 = vrot.slane %v5163_v36, 9  ;;  %v5922_v3 = vmax.f32 %v5156_v25, %v6904_v22 }
 0x51c   : > { %v6903_v13 = vrot.slane %v5148_v33, 9  ;;  %v5919_v14 = vmax.f32 %v5147_v23, %v6901_v16  ;;  %v5920_v32 = vmax.f32 %v5146_v49, %v6902_v52  ;;  %v5982_v31 = vmax.f32 %v11531_v10, %v5918_v46  ;;  %v12464_v16 = vld [vmem:[#allocation81_spill] sm:$0xff] }
 0x51d   : > { %v6907_v17 = vrot.slane %v5165_v26, 9  ;;  %v5923_v29 = vmax.f32 %v5164_v21, %v6905_v42  ;;  %v5924_v48 = vmax.f32 %v5163_v36, %v6906_v27  ;;  %v5986_v6 = vmax.f32 %v11556_v7, %v5922_v3  ;;  %v12467_v42 = vld [vmem:[#allocation78_spill] sm:$0xff] }
 0x51e   : > { %v5921_v35 = vmax.f32 %v5148_v33, %v6903_v13  ;;  %v5983_v11 = vmax.f32 %v11533_v41, %v5919_v14  ;;  %v5984_v40 = vmax.f32 %v11535_v54, %v5920_v32  ;;  %v6332_v51 = vcombine.low %v11571_v55, %v11576_v38  ;;  %v12463_v41 = vld [vmem:[#allocation85_spill] sm:$0xff] }
 0x51f   : > { %v5925_v8 = vmax.f32 %v5165_v26, %v6907_v17  ;;  %v5987_v25 = vmax.f32 %v5667_v57, %v5923_v29  ;;  %v5988_v23 = vmax.f32 %v11561_v28, %v5924_v48  ;;  %v7720_v56 = vmov 1934713408  }
 0x520   : > { %v5985_v49 = vmax.f32 %v11544_v59, %v5921_v35  ;;  %v6218_v10 = vrot.slane %v5983_v11, 7  ;;  %v6334_v21 = vunpack.c.l.s4 %v7720_v56  ;;  %v6341_v36 = vcombine.low %v11581_v47, %v6166_v20  ;;  %v12466_v47 = vld [vmem:[#allocation95_spill] sm:$0xff] }
 0x521   : > { %v5989_v7 = vmax.f32 %v5669_v62, %v5925_v8  ;;  %v6232_v22 = vrot.slane %v5987_v25, 7  ;;  %v6359_v33 = vcombine.low %v6250_v61, %v6278_v63  ;;  %v6088_v54 = vsel %vm6079_vm8, %v12464_v16, %v12463_v41  ;;  %v12465_v62 = vld [vmem:[#allocation99_spill] sm:$0xff] }
 0x522   : > { %v6219_v55 = vsel %vm6075_vm6, %v6218_v10, %v5982_v31  ;;  %v6225_v38 = vrot.slane %v5985_v49, 7  ;;  %v6335_v57 = vunpack.c.0.s8 %v6334_v21  ;;  %v6089_v28 = vsel %vm6081_vm9, %v12464_v16, %v6088_v54  ;;  %v12470_v16 = vld [vmem:[#allocation96_spill] sm:$0xff]  ;;  %v12471_v54 = vld [vmem:[#allocation90_spill] sm:$0xff] }
 0x523   : > { %v6220_v59 = vsel %vm6077_vm7, %v6218_v10, %v6219_v55  ;;  %v6233_v52 = vsel %vm6075_vm6, %v6232_v22, %v5986_v6  ;;  %v11622_v46 = vrot.slane %v5989_v7, 7  ;;  %v6116_v20 = vsel %vm6079_vm8, %v12466_v47, %v12465_v62  ;;  %v12473_v62 = vld [vmem:[#allocation8_spill] sm:$0xff] }
 0x524   : > { %v6226_v61 = vsel %vm6075_vm6, %v6225_v38, %v5984_v40  ;;  %v6234_v63 = vsel %vm6077_vm7, %v6232_v22, %v6233_v52  ;;  %v6221_v26 = vsel %vm6079_vm8, %v6218_v10, %v6220_v59  ;;  %v11631_v27 = vsub.s32 %v6335_v57, %v12467_v42  ;;  %v12472_v52 = vld [vmem:[#allocation10_spill] sm:$0xff] }
 0x525   : > { %v6227_v3 = vsel %vm6077_vm7, %v6225_v38, %v6226_v61  ;;  %v6240_v13 = vsel %vm6075_vm6, %v11622_v46, %v5988_v23  ;;  %v6222_v14 = vsel %vm6081_vm9, %v6218_v10, %v6221_v26  ;;  %v6117_v32 = vsel %vm6081_vm9, %v12466_v47, %v6116_v20 }
 0x526   : > { %v11641_v31 = vsel %vm6077_vm7, %v11622_v46, %v6240_v13  ;;  %v11644_v17 = vrot.slane %v6332_v51, %v11631_v27  ;;  %v11647_v29 = vrot.slane %v6341_v36, %v11631_v27  ;;  %v6350_v48 = vcombine.low %v11595_v53, %v6222_v14  ;;  %v12474_v13 = vld [vmem:[#allocation103_spill] sm:$0xff]  ;;  %v12475_v14 = vld [vmem:[#allocation101_spill] sm:$0xff] }
 0x527   : > { %v11651_v6 = vrot.slane %v6359_v33, %v11631_v27  ;;  %v6144_v35 = vsel %vm6079_vm8, %v11230_v1, %v11258_v58  ;;  %v6172_v11 = vsel %vm6079_vm8, %v11298_v34, %v11312_v60  ;;  %v6200_v40 = vsel %vm6079_vm8, %v11490_v39, %v11509_v24  ;;  %v12469_v33 = vld [vmem:[#allocation31_spill] sm:$0xff] }
 0x528   : > { %v11663_v51 = vrot.slane %v6350_v48, %v11631_v27  ;;  %v6924_v53 = vcombine.high %v11644_v17, %v11647_v29  ;;  %v6145_v8 = vsel %vm6081_vm9, %v11230_v1, %v6144_v35  ;;  %v6173_v58 = vsel %vm6081_vm9, %v11298_v34, %v6172_v11 }
 0x529   : > { %v6201_v25 = vsel %vm6081_vm9, %v11490_v39, %v6200_v40  ;;  %v6228_v60 = vsel %vm6079_vm8, %v6225_v38, %v6227_v3  ;;  %v6256_v24 = vsel %vm6079_vm8, %v11401_v5, %v11425_v30  ;;  %v6284_v23 = vsel %vm6079_vm8, %v11500_v2, %v11519_v45  ;;  %v12468_v45 = vld [vmem:[#allocation82_spill] sm:$0xff] }
 0x52a   : > { %v6925_v49 = vcombine.high %v11663_v51, %v11651_v6  ;;  %v6510_v1 = vrot.slane %v6924_v53, %v10932_v19  ;;  %v6229_v34 = vsel %vm6081_vm9, %v6225_v38, %v6228_v60  ;;  %v6257_v39 = vsel %vm6081_vm9, %v11401_v5, %v6256_v24  ;;  %v12476_v60 = vld [vmem:[#allocation83_spill] sm:$0xff] }
 0x52b   : > { %v6285_v10 = vsel %vm6081_vm9, %v11500_v2, %v6284_v23  ;;  %v6368_v56 = vcombine.low %v6089_v28, %v6117_v32  ;;  %v6377_v21 = vcombine.low %v6145_v8, %v6173_v58  ;;  %v6386_v30 = vcombine.low %v6201_v25, %v6229_v34  ;;  %v12477_v24 = vld [vmem:[#allocation79_spill] sm:$0xff] }
 0x52c   : > { %v6517_v36 = vrot.slane %v6925_v49, %v10932_v19  ;;  %v6395_v7 = vcombine.low %v6257_v39, %v6285_v10  ;;  %v6096_v41 = vsel %vm6081_vm9, %v12469_v33, %v12468_v45  ;;  %v6124_v55 = vsel %vm6081_vm9, %v12471_v54, %v12470_v16  ;;  %v12478_v10 = vld [vmem:[#allocation97_spill] sm:$0xff] }
 0x52d   : > { %v6375_v38 = vrot.slane %v6368_v56, %v11631_v27  ;;  %v6384_v5 = vrot.slane %v6377_v21, %v11631_v27  ;;  %v6393_v2 = vrot.slane %v6386_v30, %v11631_v27  ;;  %v6152_v57 = vsel %vm6081_vm9, %v11226_v50, %v11252_v12  ;;  %v12479_v56 = vld [vmem:[#allocation93_spill] sm:$0xff]  ;;  %v12480_v30 = vld [vmem:[#allocation7_spill] sm:$0xff] }
 0x52e   : > { %v6518_v28 = vcombine.low %v6510_v1, %v6517_v36  ;;  %v6402_v59 = vrot.slane %v6395_v7, %v11631_v27  ;;  %v6179_v47 = vsel %vm6079_vm8, %v12473_v62, %v12472_v52  ;;  %v6207_v20 = vsel %vm6079_vm8, %v11539_v43, %v11554_v0  ;;  %v12481_v36 = vld [vmem:[#allocation100_spill] sm:$0xff] }
 0x52f   : > { %v6526_v61 = vcombine.low %v6375_v38, %v6384_v5  ;;  %v6180_v26 = vsel %vm6081_vm9, %v12473_v62, %v6179_v47  ;;  %v6208_v42 = vsel %vm6081_vm9, %v11539_v43, %v6207_v20  ;;  %v6235_v50 = vsel %vm6079_vm8, %v6232_v22, %v6234_v63  ;;  %v12484_v47 = vld [vmem:[#allocation13_spill] sm:$0xff]  ;;  %v12485_v20 = vld [vmem:[#allocation102_spill] sm:$0xff] }
 0x530   : > { %6519 = vrot.lane.b32.xlu0 %v6518_v28, %s7716_s14  ;;  %v6527_v12 = vcombine.low %v6393_v2, %v6402_v59  ;;  %v6236_v3 = vsel %vm6081_vm9, %v6232_v22, %v6235_v50  ;;  %v6264_v32 = vsel %vm6081_vm9, %v12475_v14, %v12474_v13  ;;  %v6292_v0 = vsel %vm6081_vm9, %v11457_v15, %v11470_v18 }
 0x531   : > { %v6534_v48 = vrot.slane %v6526_v61, %v10932_v19  ;;  %v6404_v35 = vcombine.low %v6096_v41, %v6124_v55  ;;  %v6413_v11 = vcombine.low %v6152_v57, %v6180_v26  ;;  %v6422_v43 = vcombine.low %v6208_v42, %v6236_v3  ;;  %v12482_v55 = vld [vmem:[#allocation11_spill] sm:$0xff] }
 0x532   : > { %v6541_v63 = vrot.slane %v6527_v12, %v10932_v19  ;;  %v6431_v40 = vcombine.low %v6264_v32, %v6292_v0  ;;  %v6926_v53 = vcombine.high %v6375_v38, %v6384_v5  ;;  %v6927_v8 = vcombine.high %v6393_v2, %v6402_v59  ;;  %v12483_v38 = vld [vmem:[#allocation9_spill] sm:$0xff] }
 0x533   : > { %v6411_v22 = vrot.slane %v6404_v35, %v11631_v27  ;;  %v6420_v58 = vrot.slane %v6413_v11, %v11631_v27  ;;  %v6429_v25 = vrot.slane %v6422_v43, %v11631_v27  ;;  %v6102_v15 = vsel %vm6079_vm8, %v12477_v24, %v12476_v60 }
 0x534   : > { %v6542_v18 = vcombine.low %v6534_v48, %v6541_v63  ;;  %v6438_v23 = vrot.slane %v6431_v40, %v11631_v27  ;;  %v6558_v49 = vrot.slane %v6926_v53, %v10932_v19  ;;  %v6565_v1 = vrot.slane %v6927_v8, %v10932_v19 }
 0x535   : > { %v6928_v34 = vcombine.high %v6411_v22, %v6420_v58  ;;  %v6103_v39 = vsel %vm6081_vm9, %v12477_v24, %v6102_v15  ;;  %v6130_v21 = vsel %vm6079_vm8, %v12479_v56, %v12478_v10  ;;  %v6158_v7 = vsel %vm6079_vm8, %v12481_v36, %v12480_v30 }
 0x536   : > { %6543 = vrot.lane.b32.xlu0 %v6542_v18, %s7717_s15  ;;  %v6929_v45 = vcombine.high %v6429_v25, %v6438_v23  ;;  %v6566_v33 = vcombine.low %v6558_v49, %v6565_v1  ;;  %v6131_v41 = vsel %vm6081_vm9, %v12479_v56, %v6130_v21  ;;  %v6159_v16 = vsel %vm6081_vm9, %v12481_v36, %v6158_v7 }
 0x537   : > { %v6604_v54 = vrot.slane %v6928_v34, %v10932_v19  ;;  %v6186_v5 = vsel %vm6079_vm8, %v12483_v38, %v12482_v55  ;;  %v6214_v2 = vsel %vm6079_vm8, %v11550_v4, %v11566_v44  ;;  %v6242_v57 = vsel %vm6079_vm8, %v11622_v46, %v11641_v31 }
 0x538   : > { %v6611_v28 = vrot.slane %v6929_v45, %v10932_v19  ;;  %v6187_v59 = vsel %vm6081_vm9, %v12483_v38, %v6186_v5  ;;  %v6215_v52 = vsel %vm6081_vm9, %v11550_v4, %v6214_v2  ;;  %v6243_v62 = vsel %vm6081_vm9, %v11622_v46, %v6242_v57 }
 0x539   : > { %v6270_v61 = vsel %vm6079_vm8, %v12485_v20, %v12484_v47  ;;  %v6298_v44 = vsel %vm6079_vm8, %v11459_v37, %v11474_v9  ;;  %v6440_v31 = vcombine.low %v6103_v39, %v6131_v41  ;;  %v6449_v26 = vcombine.low %v6159_v16, %v6187_v59 }
 0x53a   : > { %v6612_v42 = vcombine.low %v6604_v54, %v6611_v28  ;;  %6567 = vrot.lane.b32.xlu0 %v6566_v33, %s7718_s16  ;;  %v6271_v50 = vsel %vm6081_vm9, %v12485_v20, %v6270_v61  ;;  %v6299_v4 = vsel %vm6081_vm9, %v11459_v37, %v6298_v44  ;;  %v6458_v46 = vcombine.low %v6215_v52, %v6243_v62 }
 0x53b   : > { %v6447_v12 = vrot.slane %v6440_v31, %v11631_v27  ;;  %v6456_v3 = vrot.slane %v6449_v26, %v11631_v27  ;;  %v6467_v13 = vcombine.low %v6271_v50, %v6299_v4  ;;  %v6480_v9 = vcombine.low %v11644_v17, %v11647_v29 }
 0x53c   : > { %6613 = vrot.lane.b32.xlu1 %v6612_v42, %s7716_s14  ;;  %v6465_v14 = vrot.slane %v6458_v46, %v11631_v27  ;;  %v6481_v32 = vcombine.low %v11663_v51, %v11651_v6  ;;  %v6574_v0 = vcombine.low %v6411_v22, %v6420_v58  ;;  %v6575_v48 = vcombine.low %v6429_v25, %v6438_v23  ;;  %s6750_s14 = sshll.u32 %s215_s13, 4 }
 0x53d   : > { %v6474_v37 = vrot.slane %v6467_v13, %v11631_v27  ;;  %v6620_v35 = vcombine.low %v6447_v12, %v6456_v3  ;;  %v6930_v11 = vcombine.high %v6447_v12, %v6456_v3  ;;  %v6488_v43 = vrot.slane %v6480_v9, %v10932_v19  ;;  %s217_s17 = scalar_lea.vmem [#allocation4], %s6750_s14 }
 0x53e   : > { %v6495_v63 = vrot.slane %v6481_v32, %v10932_v19  ;;  %v6582_v17 = vrot.slane %v6574_v0, %v10932_v19  ;;  %v6589_v29 = vrot.slane %v6575_v48, %v10932_v19 }
 0x53f   : > { %v6621_v40 = vcombine.low %v6465_v14, %v6474_v37  ;;  %v6931_v53 = vcombine.high %v6465_v14, %v6474_v37  ;;  %v6628_v6 = vrot.slane %v6620_v35, %v10932_v19  ;;  %v6652_v27 = vrot.slane %v6930_v11, %v10932_v19 }
 0x540   : > { %v6496_v8 = vcombine.low %v6488_v43, %v6495_v63  ;;  %v6590_v60 = vcombine.low %v6582_v17, %v6589_v29 }
 0x541   : > { %v6635_v51 = vrot.slane %v6621_v40, %v10932_v19  ;;  %v6659_v22 = vrot.slane %v6931_v53, %v10932_v19 }
 0x543   : > { %v6636_v58 = vcombine.low %v6628_v6, %v6635_v51  ;;  %v6660_v25 = vcombine.low %v6652_v27, %v6659_v22 }
 0x545   : > { %6637 = vrot.lane.b32.xlu1 %v6636_v58, %s7717_s15  ;;  %s6687_s15 = sshll.u32 %s217_s17, 4  ;;  %s11804_s15 = int_to_ptr.vmem [resolvable:$true] %s6687_s15 }
 0x546   : > { %s7649_s30 = scalar_lea.vmem %s11804_s15, 256  ;;  %p7656_p0 = scmp.lt.s32.totalorder %s11804_s15, %s7654_s7 }
 0x547   : > { %p7650_p11 = scmp.ne.s32.totalorder %s11804_s15, %s7649_s30  ;;  %p7657_p1 = scmp.lt.s32.totalorder %s7655_s8, %s7649_s30 }
 0x549   : > { %6661 = vrot.lane.b32.xlu1 %v6660_v25, %s7718_s16  ;;  %p7651_p12 = pnand %p7650_p11, %p7790_p5  ;;  %p7658_p2 = por %p7657_p1, %p7656_p0 }
 0x54b   : > { %p7652_p13 = pneg %p7651_p12 }
 0x54d   : > { %p7659_p3 = pnand %p7658_p2, %p7652_p13 }
 0x5a2   : > { %v6520_v24 = vpop.permute.xlu0 %6519 }
 0x5a3   : > { %v6664_v18 = vsel %vm2765_vm2, %v6496_v8, %v6520_v24 }
 0x5a8   : > { %v6544_v15 = vpop.permute.xlu0 %6543 }
 0x5a9   : > { %v6665_v23 = vsel %vm3943_vm4, %v6664_v18, %v6544_v15 }
 0x5ac   : > { %v6568_v49 = vpop.permute.xlu0 %6567 }
 0x5ad   : > { %v6666_v1 = vsel %vm3976_vm5, %v6665_v23, %v6568_v49 }
 0x5ae   : > { %6670 = vst [vmem:[%s217_s17] sm:$0xff] %v6666_v1  ;;  %v6614_v19 = vpop.permute.xlu1 %6613 }
 0x5af   : > { %v6667_v39 = vsel %vm2765_vm2, %v6590_v60, %v6614_v19 }
 0x5b7   : > { %v6638_v34 = vpop.permute.xlu1 %6637 }
 0x5b8   : > { %v6668_v10 = vsel %vm3943_vm4, %v6667_v39, %v6638_v34 }
 0x5bb   : > { %v6662_v56 = vpop.permute.xlu1 %6661 }
 0x5bc   : > { %v6669_v21 = vsel %vm3976_vm5, %v6668_v10, %v6662_v56 }
 0x5bd   : > { %6671 = vst [vmem:[%s217_s17 + $0x8] sm:$0xff] %v6669_v21 }
 0x5be   : > { %7662 = shalt.err (!%p7659_p3)
}
 0x5bf   : > { %s7663_s9 = scalar_lea.hbm %s11802_s26, 256  ;;  %s7667_s12 = scalar_lea.hbm %s11850_s5, 512 }
 0x5c0   : > { %p7664_p4 = scmp.ne.s32.totalorder %s11802_s26, %s7663_s9  ;;  %p7668_p9 = scmp.lt.u32.totalorder %s11802_s26, %s11850_s5 }
 0x5c1   : > { %p7669_p10 = scmp.lt.u32.totalorder %s7667_s12, %s7663_s9  ;;  %p7671_p12 = scmp.lt.u32.totalorder %s7663_s9, %s11802_s26 }
 0x5c2   : > { %p7665_p7 = pnand %p7664_p4, %p7790_p5 }
 0x5c3   : > { %p7670_p11 = por %p7669_p10, %p7668_p9 }
 0x5c4   : > { %p7666_p8 = pneg %p7665_p7 }
 0x5c5   : > { %p7672_p13 = por %p7671_p12, %p7670_p11 }
 0x5c7   : > { %p7673_p0 = pnand %p7672_p13, %p7666_p8 }
 0x5c9   : > { %7676 = shalt.err (!%p7673_p0)
}
 0x5ca   : > { %7119 = dma.vmem_to_hbm [thread:$0]  (%p7790_p5), %s11804_s15, 256, %s11802_s26, %s6673_s22  }
 0x5cb PF: > { %p7125_p1 = scmp.ge.s32.totalorder %s7711_s21, 2  ;;  %s6699_s17 = sand.u32 1, %s7699_s18  }
 0x5cc   : > { %s6700_s23 = scalar_lea.sflag [#allocation5], %s6699_s17 }
 0x5cd   : > { %p7122_p2 = pnand %p7125_p1, %p7794_p6 }
 0x5cf   : > { %7694 = dma.done.wait (!%p7122_p2), %s6700_s23, 256  }
 0x5d0   : > { %7696 = vsyncadd (!%p7122_p2), %s6700_s23, 4294967040  ;;  %p15_p3 = scmp.ge.s32.totalorder %s7777_s24, 4   ;;  %s12486_s18 = smov %s7703_s19 }
 0x5d1   : > { %s12487_s19 = smov %s7707_s20  ;;  %s12488_s20 = smov %s7788_s27 }
 0x5d2   : > { %s12489_s21 = smov %s7777_s24  ;;  %17 = sbr.rel (!%p15_p3) target bundleno = 3 (0x3), region = 79 }
 0x5d9   :  { %6705 = vsyncpa [#allocation5], 1 }
 0x5da   :  { %6707 = vsyncpa [#allocation5 + $0x1], 1 }

</bundles_post_ra>
